<compile_context>
chip_gen: v7x
topology: tpu7x:2x2x1
jax: 0.10.0
libtpu: 0.0.40
codegen_flags: <defaults>
</compile_context>

<pallas_src>
import functools
import math

import jax
import jax.numpy as jnp
from jax.experimental import pallas as pl
from jax.experimental.pallas import tpu as pltpu


# Fixed ordering of the stacked per-layer weight slabs passed to the kernel.
ENC_NAMES = ("wqkv", "bqkv", "wo", "bo", "ln1g", "ln1b",
             "w1", "b1", "w2", "b2", "ln2g", "ln2b")
DEC_NAMES = ("sa_wqkv", "sa_bqkv", "sa_wo", "sa_bo", "ln1g", "ln1b",
             "ca_wq", "ca_bq", "ca_wkv", "ca_bkv", "ca_wo", "ca_bo",
             "ln2g", "ln2b",
             "w1", "b1", "w2", "b2", "ln3g", "ln3b")


# -----------------------------------------------------------------------------
# Fully-fused transformer kernel (one grid step == one batch element)
# -----------------------------------------------------------------------------
def _make_transformer_kernel(num_layers, num_heads, d_model, eps=1e-5):
    H, D = num_heads, d_model
    Dh = D // H
    scale = 1.0 / math.sqrt(Dh)
    NE, ND = len(ENC_NAMES), len(DEC_NAMES)

    def kernel(x_ref, mask_ref, *rest):
        o_ref = rest[-1]
        wrefs = rest[:-1]
        enc = dict(zip(ENC_NAMES, wrefs[:NE]))
        dec = dict(zip(DEC_NAMES, wrefs[NE:NE + ND]))
        enc_ng, enc_nb, dec_ng, dec_nb = wrefs[NE + ND:NE + ND + 4]

        x = x_ref[0]                    # (S, D) f32 — residual stream
        mask_add = mask_ref[...]        # (S, S) f32 — hoisted once per step

        def _ln(y, g, b):
            mu = jnp.mean(y, axis=-1, keepdims=True)
            var = jnp.mean(jnp.square(y - mu), axis=-1, keepdims=True)
            return (y - mu) * jax.lax.rsqrt(var + eps) * g + b

        def _attn(q_all, k_all, v_all, wo, bo, m):
            # q_all/k_all/v_all: (S, D) f32; heads are contiguous lane slices.
            qb = q_all.astype(jnp.bfloat16)
            kb = k_all.astype(jnp.bfloat16)
            vb = v_all.astype(jnp.bfloat16)
            outs = []
            for h in range(H):          # static unroll: tiny per-head temps
                sl = slice(h * Dh, (h + 1) * Dh)
                s = jax.lax.dot_general(
                    qb[:, sl], kb[:, sl], (((1,), (1,)), ((), ())),
                    preferred_element_type=jnp.float32) * scale
                if m is not None:
                    s = s + m
                s = s - jnp.max(s, axis=-1, keepdims=True)
                p = jnp.exp(s)
                p = p * pl.reciprocal(jnp.sum(p, axis=-1, keepdims=True),
                                      approx=True)
                outs.append(jnp.dot(p.astype(jnp.bfloat16), vb[:, sl],
                                    preferred_element_type=jnp.float32))
            o = jnp.concatenate(outs, axis=-1)        # (S, D)
            # Single fused output projection.
            return jnp.dot(o.astype(jnp.bfloat16), wo,
                           preferred_element_type=jnp.float32) + bo

        def _ffn(y, w1, b1, w2, b2):
            hid = jnp.dot(y.astype(jnp.bfloat16), w1,
                          preferred_element_type=jnp.float32) + b1
            hid = jnp.maximum(hid, 0.0)               # (S, 4D) stays in vregs
            return jnp.dot(hid.astype(jnp.bfloat16), w2,
                           preferred_element_type=jnp.float32) + b2

        # ------------------------- encoder -------------------------
        mem = x
        for l in range(num_layers):
            qkv = jnp.dot(mem.astype(jnp.bfloat16), enc["wqkv"][l],
                          preferred_element_type=jnp.float32) + enc["bqkv"][l]
            a = _attn(qkv[:, :D], qkv[:, D:2 * D], qkv[:, 2 * D:],
                      enc["wo"][l], enc["bo"][l], None)
            mem = _ln(mem + a, enc["ln1g"][l], enc["ln1b"][l])
            f = _ffn(mem, enc["w1"][l], enc["b1"][l], enc["w2"][l], enc["b2"][l])
            mem = _ln(mem + f, enc["ln2g"][l], enc["ln2b"][l])
        mem = _ln(mem, enc_ng[...], enc_nb[...])      # final encoder norm
        mem_b = mem.astype(jnp.bfloat16)

        # ------------------------- decoder -------------------------
        y = x
        for l in range(num_layers):
            # masked self-attention
            qkv = jnp.dot(y.astype(jnp.bfloat16), dec["sa_wqkv"][l],
                          preferred_element_type=jnp.float32) + dec["sa_bqkv"][l]
            a = _attn(qkv[:, :D], qkv[:, D:2 * D], qkv[:, 2 * D:],
                      dec["sa_wo"][l], dec["sa_bo"][l], mask_add)
            y = _ln(y + a, dec["ln1g"][l], dec["ln1b"][l])

            # cross-attention on encoder memory
            q_all = jnp.dot(y.astype(jnp.bfloat16), dec["ca_wq"][l],
                            preferred_element_type=jnp.float32) + dec["ca_bq"][l]
            kv = jnp.dot(mem_b, dec["ca_wkv"][l],
                         preferred_element_type=jnp.float32) + dec["ca_bkv"][l]
            a = _attn(q_all, kv[:, :D], kv[:, D:],
                      dec["ca_wo"][l], dec["ca_bo"][l], None)
            y = _ln(y + a, dec["ln2g"][l], dec["ln2b"][l])

            # feed-forward
            f = _ffn(y, dec["w1"][l], dec["b1"][l], dec["w2"][l], dec["b2"][l])
            y = _ln(y + f, dec["ln3g"][l], dec["ln3b"][l])
        y = _ln(y, dec_ng[...], dec_nb[...])          # final decoder norm

        o_ref[0] = y

    return kernel


# -----------------------------------------------------------------------------
# Wrapper: one pallas_call for the whole forward
# -----------------------------------------------------------------------------
def transformer_layer_forward(inp, mask, params, *, num_heads=8):
    """Equivalent of TransformerLayer.forward (eval mode). inp: (B, S, D)."""
    x = inp.astype(jnp.float32)
    mask = mask.astype(jnp.float32)
    B, S, D = x.shape
    L = int(params["enc"]["wqkv"].shape[0])
    FF = int(params["enc"]["w1"].shape[-1])

    weights = ([params["enc"][n] for n in ENC_NAMES]
               + [params["dec"][n] for n in DEC_NAMES]
               + [params["enc_ng"], params["enc_nb"],
                  params["dec_ng"], params["dec_nb"]])

    in_specs = [pl.BlockSpec((1, S, D), lambda b: (b, 0, 0)),
                pl.BlockSpec((S, S), lambda b: (0, 0))]
    for w in weights:
        # Full-array, grid-invariant blocks: DMA'd once, VMEM-resident.
        in_specs.append(pl.BlockSpec(w.shape, lambda b, _nd=w.ndim: (0,) * _nd))

    # Rough advisory cost estimate for the XLA scheduler.
    attn_flops = 8 * S * D * D + 4 * S * S * D
    ffn_flops = 4 * S * D * FF
    flops = B * L * ((attn_flops + ffn_flops) + (2 * attn_flops + ffn_flops))
    transcendentals = 3 * B * L * num_heads * S * S
    bytes_accessed = (2 * B * S * D * 4 + S * S * 4
                      + sum(int(w.size) * w.dtype.itemsize for w in weights))

    return pl.pallas_call(
        _make_transformer_kernel(L, num_heads, D),
        grid=(B,),
        in_specs=in_specs,
        out_specs=pl.BlockSpec((1, S, D), lambda b: (b, 0, 0)),
        out_shape=jax.ShapeDtypeStruct((B, S, D), jnp.float32),
        compiler_params=pltpu.CompilerParams(
            dimension_semantics=("parallel",)),
        cost_estimate=pl.CostEstimate(flops=int(flops),
                                      transcendentals=int(transcendentals),
                                      bytes_accessed=int(bytes_accessed)),
    )(x, mask, *weights)


# -----------------------------------------------------------------------------
# Deterministic parameter construction (lane-dense packing, bf16 matmul weights)
# -----------------------------------------------------------------------------
def _xavier(key, shape):
    fan_in, fan_out = shape
    a = math.sqrt(6.0 / (fan_in + fan_out))
    return jax.random.uniform(key, shape, jnp.float32, -a, a)


def init_encoder_layer(key, d, ff):
    ks = jax.random.split(key, 6)
    wq, wk, wv, wo = (_xavier(k, (d, d)) for k in ks[:4])
    return dict(
        wqkv=jnp.concatenate([wq, wk, wv], axis=1).astype(jnp.bfloat16),
        bqkv=jnp.zeros((1, 3 * d), jnp.float32),
        wo=wo.astype(jnp.bfloat16),
        bo=jnp.zeros((1, d), jnp.float32),
        ln1g=jnp.ones((1, d), jnp.float32),
        ln1b=jnp.zeros((1, d), jnp.float32),
        w1=_xavier(ks[4], (d, ff)).astype(jnp.bfloat16),
        b1=jnp.zeros((1, ff), jnp.float32),
        w2=_xavier(ks[5], (ff, d)).astype(jnp.bfloat16),
        b2=jnp.zeros((1, d), jnp.float32),
        ln2g=jnp.ones((1, d), jnp.float32),
        ln2b=jnp.zeros((1, d), jnp.float32),
    )


def init_decoder_layer(key, d, ff):
    ks = jax.random.split(key, 10)
    wq, wk, wv, wo = (_xavier(k, (d, d)) for k in ks[:4])
    cq, ck, cv, cwo = (_xavier(k, (d, d)) for k in ks[4:8])
    return dict(
        sa_wqkv=jnp.concatenate([wq, wk, wv], axis=1).astype(jnp.bfloat16),
        sa_bqkv=jnp.zeros((1, 3 * d), jnp.float32),
        sa_wo=wo.astype(jnp.bfloat16),
        sa_bo=jnp.zeros((1, d), jnp.float32),
        ln1g=jnp.ones((1, d), jnp.float32),
        ln1b=jnp.zeros((1, d), jnp.float32),
        ca_wq=cq.astype(jnp.bfloat16),
        ca_bq=jnp.zeros((1, d), jnp.float32),
        ca_wkv=jnp.concatenate([ck, cv], axis=1).astype(jnp.bfloat16),
        ca_bkv=jnp.zeros((1, 2 * d), jnp.float32),
        ca_wo=cwo.astype(jnp.bfloat16),
        ca_bo=jnp.zeros((1, d), jnp.float32),
        ln2g=jnp.ones((1, d), jnp.float32),
        ln2b=jnp.zeros((1, d), jnp.float32),
        w1=_xavier(ks[8], (d, ff)).astype(jnp.bfloat16),
        b1=jnp.zeros((1, ff), jnp.float32),
        w2=_xavier(ks[9], (ff, d)).astype(jnp.bfloat16),
        b2=jnp.zeros((1, d), jnp.float32),
        ln3g=jnp.ones((1, d), jnp.float32),
        ln3b=jnp.zeros((1, d), jnp.float32),
    )


def init_params(key, *, d, heads, layers):
    del heads  # head split is implicit in the contiguous column packing
    ff = 4 * d
    k_enc, k_dec = jax.random.split(key)
    enc_layers = [init_encoder_layer(k, d, ff)
                  for k in jax.random.split(k_enc, layers)]
    dec_layers = [init_decoder_layer(k, d, ff)
                  for k in jax.random.split(k_dec, layers)]
    return dict(
        enc={n: jnp.stack([lp[n] for lp in enc_layers]) for n in ENC_NAMES},
        dec={n: jnp.stack([lp[n] for lp in dec_layers]) for n in DEC_NAMES},
        enc_ng=jnp.ones((1, d), jnp.float32),
        enc_nb=jnp.zeros((1, d), jnp.float32),
        dec_ng=jnp.ones((1, d), jnp.float32),
        dec_nb=jnp.zeros((1, d), jnp.float32),
    )


# -----------------------------------------------------------------------------
if __name__ == "__main__":
    # TransformerLayer(in_dim=64, layers=2, heads=8), batch-first input (B, S, D)
    # and an additive causal tgt_mask (S, S) as nn.Transformer expects.
    B, S, D, heads, layers = 2, 16, 64, 8, 2

    key = jax.random.PRNGKey(0)
    k_in, k_par = jax.random.split(key)
    inp = jax.random.normal(k_in, (B, S, D), jnp.float32)
    # additive causal mask (finite large-negative instead of -inf for TPU safety)
    causal = jnp.arange(S)[None, :] > jnp.arange(S)[:, None]
    mask = jnp.where(causal, -1e9, 0.0).astype(jnp.float32)

    params = init_params(k_par, d=D, heads=heads, layers=layers)

    fwd = jax.jit(functools.partial(transformer_layer_forward, num_heads=heads))
    out = fwd(inp, mask, params)
    out = jax.block_until_ready(out)

    assert out.shape == (B, S, D), out.shape
    assert bool(jnp.all(jnp.isfinite(out)))
    print("KERNEL_OK")
</pallas_src>

<mosaic_0001>
module attributes {stable_mosaic.version = 11 : i64} {
  func.func @kernel(%arg0: i32, %arg1: memref<1x16x64xf32, #tpu.memory_space<vmem>>, %arg2: memref<16x16xf32, #tpu.memory_space<vmem>>, %arg3: memref<2x64x192xbf16, #tpu.memory_space<vmem>>, %arg4: memref<2x1x192xf32, #tpu.memory_space<vmem>>, %arg5: memref<2x64x64xbf16, #tpu.memory_space<vmem>>, %arg6: memref<2x1x64xf32, #tpu.memory_space<vmem>>, %arg7: memref<2x1x64xf32, #tpu.memory_space<vmem>>, %arg8: memref<2x1x64xf32, #tpu.memory_space<vmem>>, %arg9: memref<2x64x256xbf16, #tpu.memory_space<vmem>>, %arg10: memref<2x1x256xf32, #tpu.memory_space<vmem>>, %arg11: memref<2x256x64xbf16, #tpu.memory_space<vmem>>, %arg12: memref<2x1x64xf32, #tpu.memory_space<vmem>>, %arg13: memref<2x1x64xf32, #tpu.memory_space<vmem>>, %arg14: memref<2x1x64xf32, #tpu.memory_space<vmem>>, %arg15: memref<2x64x192xbf16, #tpu.memory_space<vmem>>, %arg16: memref<2x1x192xf32, #tpu.memory_space<vmem>>, %arg17: memref<2x64x64xbf16, #tpu.memory_space<vmem>>, %arg18: memref<2x1x64xf32, #tpu.memory_space<vmem>>, %arg19: memref<2x1x64xf32, #tpu.memory_space<vmem>>, %arg20: memref<2x1x64xf32, #tpu.memory_space<vmem>>, %arg21: memref<2x64x64xbf16, #tpu.memory_space<vmem>>, %arg22: memref<2x1x64xf32, #tpu.memory_space<vmem>>, %arg23: memref<2x64x128xbf16, #tpu.memory_space<vmem>>, %arg24: memref<2x1x128xf32, #tpu.memory_space<vmem>>, %arg25: memref<2x64x64xbf16, #tpu.memory_space<vmem>>, %arg26: memref<2x1x64xf32, #tpu.memory_space<vmem>>, %arg27: memref<2x1x64xf32, #tpu.memory_space<vmem>>, %arg28: memref<2x1x64xf32, #tpu.memory_space<vmem>>, %arg29: memref<2x64x256xbf16, #tpu.memory_space<vmem>>, %arg30: memref<2x1x256xf32, #tpu.memory_space<vmem>>, %arg31: memref<2x256x64xbf16, #tpu.memory_space<vmem>>, %arg32: memref<2x1x64xf32, #tpu.memory_space<vmem>>, %arg33: memref<2x1x64xf32, #tpu.memory_space<vmem>>, %arg34: memref<2x1x64xf32, #tpu.memory_space<vmem>>, %arg35: memref<1x64xf32, #tpu.memory_space<vmem>>, %arg36: memref<1x64xf32, #tpu.memory_space<vmem>>, %arg37: memref<1x64xf32, #tpu.memory_space<vmem>>, %arg38: memref<1x64xf32, #tpu.memory_space<vmem>>, %arg39: memref<1x16x64xf32, #tpu.memory_space<vmem>>) attributes {dimension_semantics = [#tpu.dimension_semantics<parallel>], iteration_bounds = array<i64: 2>, scalar_prefetch = 0 : i64, scratch_operands = 0 : i64, tpu.core_type = #tpu.core_type<tc>, window_params = [{transform_indices = @transform_0, window_bounds = array<i64: 1, 16, 64>}, {pipeline_mode = #tpu.pipeline_mode<synchronous>, transform_indices = @transform_1, window_bounds = array<i64: 16, 16>}, {pipeline_mode = #tpu.pipeline_mode<synchronous>, transform_indices = @transform_2, window_bounds = array<i64: 2, 64, 192>}, {pipeline_mode = #tpu.pipeline_mode<synchronous>, transform_indices = @transform_3, window_bounds = array<i64: 2, 1, 192>}, {pipeline_mode = #tpu.pipeline_mode<synchronous>, transform_indices = @transform_4, window_bounds = array<i64: 2, 64, 64>}, {pipeline_mode = #tpu.pipeline_mode<synchronous>, transform_indices = @transform_5, window_bounds = array<i64: 2, 1, 64>}, {pipeline_mode = #tpu.pipeline_mode<synchronous>, transform_indices = @transform_6, window_bounds = array<i64: 2, 1, 64>}, {pipeline_mode = #tpu.pipeline_mode<synchronous>, transform_indices = @transform_7, window_bounds = array<i64: 2, 1, 64>}, {pipeline_mode = #tpu.pipeline_mode<synchronous>, transform_indices = @transform_8, window_bounds = array<i64: 2, 64, 256>}, {pipeline_mode = #tpu.pipeline_mode<synchronous>, transform_indices = @transform_9, window_bounds = array<i64: 2, 1, 256>}, {pipeline_mode = #tpu.pipeline_mode<synchronous>, transform_indices = @transform_10, window_bounds = array<i64: 2, 256, 64>}, {pipeline_mode = #tpu.pipeline_mode<synchronous>, transform_indices = @transform_11, window_bounds = array<i64: 2, 1, 64>}, {pipeline_mode = #tpu.pipeline_mode<synchronous>, transform_indices = @transform_12, window_bounds = array<i64: 2, 1, 64>}, {pipeline_mode = #tpu.pipeline_mode<synchronous>, transform_indices = @transform_13, window_bounds = array<i64: 2, 1, 64>}, {pipeline_mode = #tpu.pipeline_mode<synchronous>, transform_indices = @transform_14, window_bounds = array<i64: 2, 64, 192>}, {pipeline_mode = #tpu.pipeline_mode<synchronous>, transform_indices = @transform_15, window_bounds = array<i64: 2, 1, 192>}, {pipeline_mode = #tpu.pipeline_mode<synchronous>, transform_indices = @transform_16, window_bounds = array<i64: 2, 64, 64>}, {pipeline_mode = #tpu.pipeline_mode<synchronous>, transform_indices = @transform_17, window_bounds = array<i64: 2, 1, 64>}, {pipeline_mode = #tpu.pipeline_mode<synchronous>, transform_indices = @transform_18, window_bounds = array<i64: 2, 1, 64>}, {pipeline_mode = #tpu.pipeline_mode<synchronous>, transform_indices = @transform_19, window_bounds = array<i64: 2, 1, 64>}, {pipeline_mode = #tpu.pipeline_mode<synchronous>, transform_indices = @transform_20, window_bounds = array<i64: 2, 64, 64>}, {pipeline_mode = #tpu.pipeline_mode<synchronous>, transform_indices = @transform_21, window_bounds = array<i64: 2, 1, 64>}, {pipeline_mode = #tpu.pipeline_mode<synchronous>, transform_indices = @transform_22, window_bounds = array<i64: 2, 64, 128>}, {pipeline_mode = #tpu.pipeline_mode<synchronous>, transform_indices = @transform_23, window_bounds = array<i64: 2, 1, 128>}, {pipeline_mode = #tpu.pipeline_mode<synchronous>, transform_indices = @transform_24, window_bounds = array<i64: 2, 64, 64>}, {pipeline_mode = #tpu.pipeline_mode<synchronous>, transform_indices = @transform_25, window_bounds = array<i64: 2, 1, 64>}, {pipeline_mode = #tpu.pipeline_mode<synchronous>, transform_indices = @transform_26, window_bounds = array<i64: 2, 1, 64>}, {pipeline_mode = #tpu.pipeline_mode<synchronous>, transform_indices = @transform_27, window_bounds = array<i64: 2, 1, 64>}, {pipeline_mode = #tpu.pipeline_mode<synchronous>, transform_indices = @transform_28, window_bounds = array<i64: 2, 64, 256>}, {pipeline_mode = #tpu.pipeline_mode<synchronous>, transform_indices = @transform_29, window_bounds = array<i64: 2, 1, 256>}, {pipeline_mode = #tpu.pipeline_mode<synchronous>, transform_indices = @transform_30, window_bounds = array<i64: 2, 256, 64>}, {pipeline_mode = #tpu.pipeline_mode<synchronous>, transform_indices = @transform_31, window_bounds = array<i64: 2, 1, 64>}, {pipeline_mode = #tpu.pipeline_mode<synchronous>, transform_indices = @transform_32, window_bounds = array<i64: 2, 1, 64>}, {pipeline_mode = #tpu.pipeline_mode<synchronous>, transform_indices = @transform_33, window_bounds = array<i64: 2, 1, 64>}, {pipeline_mode = #tpu.pipeline_mode<synchronous>, transform_indices = @transform_34, window_bounds = array<i64: 1, 64>}, {pipeline_mode = #tpu.pipeline_mode<synchronous>, transform_indices = @transform_35, window_bounds = array<i64: 1, 64>}, {pipeline_mode = #tpu.pipeline_mode<synchronous>, transform_indices = @transform_36, window_bounds = array<i64: 1, 64>}, {pipeline_mode = #tpu.pipeline_mode<synchronous>, transform_indices = @transform_37, window_bounds = array<i64: 1, 64>}, {transform_indices = @transform_38, window_bounds = array<i64: 1, 16, 64>}]} {
    %c0 = arith.constant 0 : index
    %c0_0 = arith.constant 0 : index
    %c0_1 = arith.constant 0 : index
    %0 = vector.load %arg1[%c0, %c0_0, %c0_1] : memref<1x16x64xf32, #tpu.memory_space<vmem>>, vector<1x16x64xf32>
    %1 = vector.shape_cast %0 : vector<1x16x64xf32> to vector<16x64xf32>
    %c0_2 = arith.constant 0 : index
    %c0_3 = arith.constant 0 : index
    %2 = vector.load %arg2[%c0_2, %c0_3] : memref<16x16xf32, #tpu.memory_space<vmem>>, vector<16x16xf32>
    %3 = arith.truncf %1 : vector<16x64xf32> to vector<16x64xbf16>
    %c0_4 = arith.constant 0 : index
    %c0_5 = arith.constant 0 : index
    %c0_6 = arith.constant 0 : index
    %4 = vector.load %arg3[%c0_4, %c0_5, %c0_6] : memref<2x64x192xbf16, #tpu.memory_space<vmem>>, vector<1x64x192xbf16>
    %5 = vector.shape_cast %4 : vector<1x64x192xbf16> to vector<64x192xbf16>
    %cst = arith.constant dense<0.000000e+00> : vector<16x192xf32>
    %6 = tpu.matmul %3, %5, %cst {dimension_numbers = #tpu.dot_dimension_numbers<[1], [0], [0], [1], [0, 0, 1, 1], [], []>} : vector<16x64xbf16>, vector<64x192xbf16>, vector<16x192xf32> -> vector<16x192xf32>
    %c0_7 = arith.constant 0 : index
    %c0_8 = arith.constant 0 : index
    %c0_9 = arith.constant 0 : index
    %7 = vector.load %arg4[%c0_7, %c0_8, %c0_9] : memref<2x1x192xf32, #tpu.memory_space<vmem>>, vector<1x1x192xf32>
    %8 = vector.shape_cast %7 : vector<1x1x192xf32> to vector<1x192xf32>
    %9 = vector.broadcast %8 : vector<1x192xf32> to vector<16x192xf32>
    %10 = arith.addf %6, %9 : vector<16x192xf32>
    %11 = vector.extract_strided_slice %10 {offsets = [0, 0], sizes = [16, 64], strides = [1, 1]} : vector<16x192xf32> to vector<16x64xf32>
    %12 = vector.extract_strided_slice %10 {offsets = [0, 64], sizes = [16, 64], strides = [1, 1]} : vector<16x192xf32> to vector<16x64xf32>
    %13 = vector.extract_strided_slice %10 {offsets = [0, 128], sizes = [16, 64], strides = [1, 1]} : vector<16x192xf32> to vector<16x64xf32>
    %c0_10 = arith.constant 0 : index
    %c0_11 = arith.constant 0 : index
    %c0_12 = arith.constant 0 : index
    %14 = vector.load %arg5[%c0_10, %c0_11, %c0_12] : memref<2x64x64xbf16, #tpu.memory_space<vmem>>, vector<1x64x64xbf16>
    %15 = vector.shape_cast %14 : vector<1x64x64xbf16> to vector<64x64xbf16>
    %c0_13 = arith.constant 0 : index
    %c0_14 = arith.constant 0 : index
    %c0_15 = arith.constant 0 : index
    %16 = vector.load %arg6[%c0_13, %c0_14, %c0_15] : memref<2x1x64xf32, #tpu.memory_space<vmem>>, vector<1x1x64xf32>
    %17 = vector.shape_cast %16 : vector<1x1x64xf32> to vector<1x64xf32>
    %18 = arith.truncf %11 : vector<16x64xf32> to vector<16x64xbf16>
    %19 = arith.truncf %12 : vector<16x64xf32> to vector<16x64xbf16>
    %20 = arith.truncf %13 : vector<16x64xf32> to vector<16x64xbf16>
    %21 = vector.extract_strided_slice %18 {offsets = [0, 0], sizes = [16, 8], strides = [1, 1]} : vector<16x64xbf16> to vector<16x8xbf16>
    %22 = vector.extract_strided_slice %19 {offsets = [0, 0], sizes = [16, 8], strides = [1, 1]} : vector<16x64xbf16> to vector<16x8xbf16>
    %cst_16 = arith.constant dense<0.000000e+00> : vector<16x16xf32>
    %23 = tpu.matmul %21, %22, %cst_16 {dimension_numbers = #tpu.dot_dimension_numbers<[1], [1], [0], [0], [0, 0, 1, 0], [], []>} : vector<16x8xbf16>, vector<16x8xbf16>, vector<16x16xf32> -> vector<16x16xf32>
    %cst_17 = arith.constant 0.353553385 : f32
    %24 = vector.broadcast %cst_17 : f32 to vector<16x16xf32>
    %25 = arith.mulf %23, %24 : vector<16x16xf32>
    %cst_18 = arith.constant dense<0xFF800000> : vector<16xf32>
    %26 = vector.multi_reduction <maximumf>, %25, %cst_18 [1] : vector<16x16xf32> to vector<16xf32>
    %27 = vector.shape_cast %26 : vector<16xf32> to vector<16x1xf32>
    %28 = vector.broadcast %27 : vector<16x1xf32> to vector<16x16xf32>
    %29 = arith.subf %25, %28 : vector<16x16xf32>
    %30 = math.exp %29 : vector<16x16xf32>
    %cst_19 = arith.constant dense<0.000000e+00> : vector<16xf32>
    %31 = vector.multi_reduction <add>, %30, %cst_19 [1] : vector<16x16xf32> to vector<16xf32>
    %32 = vector.shape_cast %31 : vector<16xf32> to vector<16x1xf32>
    %33 = tpu.reciprocal %32 {approx = true} : vector<16x1xf32> -> vector<16x1xf32>
    %34 = vector.broadcast %33 : vector<16x1xf32> to vector<16x16xf32>
    %35 = arith.mulf %30, %34 : vector<16x16xf32>
    %36 = arith.truncf %35 : vector<16x16xf32> to vector<16x16xbf16>
    %37 = vector.extract_strided_slice %20 {offsets = [0, 0], sizes = [16, 8], strides = [1, 1]} : vector<16x64xbf16> to vector<16x8xbf16>
    %cst_20 = arith.constant dense<0.000000e+00> : vector<16x8xf32>
    %38 = tpu.matmul %36, %37, %cst_20 {dimension_numbers = #tpu.dot_dimension_numbers<[1], [0], [0], [1], [0, 0, 1, 1], [], []>} : vector<16x16xbf16>, vector<16x8xbf16>, vector<16x8xf32> -> vector<16x8xf32>
    %39 = vector.extract_strided_slice %18 {offsets = [0, 8], sizes = [16, 8], strides = [1, 1]} : vector<16x64xbf16> to vector<16x8xbf16>
    %40 = vector.extract_strided_slice %19 {offsets = [0, 8], sizes = [16, 8], strides = [1, 1]} : vector<16x64xbf16> to vector<16x8xbf16>
    %cst_21 = arith.constant dense<0.000000e+00> : vector<16x16xf32>
    %41 = tpu.matmul %39, %40, %cst_21 {dimension_numbers = #tpu.dot_dimension_numbers<[1], [1], [0], [0], [0, 0, 1, 0], [], []>} : vector<16x8xbf16>, vector<16x8xbf16>, vector<16x16xf32> -> vector<16x16xf32>
    %cst_22 = arith.constant 0.353553385 : f32
    %42 = vector.broadcast %cst_22 : f32 to vector<16x16xf32>
    %43 = arith.mulf %41, %42 : vector<16x16xf32>
    %cst_23 = arith.constant dense<0xFF800000> : vector<16xf32>
    %44 = vector.multi_reduction <maximumf>, %43, %cst_23 [1] : vector<16x16xf32> to vector<16xf32>
    %45 = vector.shape_cast %44 : vector<16xf32> to vector<16x1xf32>
    %46 = vector.broadcast %45 : vector<16x1xf32> to vector<16x16xf32>
    %47 = arith.subf %43, %46 : vector<16x16xf32>
    %48 = math.exp %47 : vector<16x16xf32>
    %cst_24 = arith.constant dense<0.000000e+00> : vector<16xf32>
    %49 = vector.multi_reduction <add>, %48, %cst_24 [1] : vector<16x16xf32> to vector<16xf32>
    %50 = vector.shape_cast %49 : vector<16xf32> to vector<16x1xf32>
    %51 = tpu.reciprocal %50 {approx = true} : vector<16x1xf32> -> vector<16x1xf32>
    %52 = vector.broadcast %51 : vector<16x1xf32> to vector<16x16xf32>
    %53 = arith.mulf %48, %52 : vector<16x16xf32>
    %54 = arith.truncf %53 : vector<16x16xf32> to vector<16x16xbf16>
    %55 = vector.extract_strided_slice %20 {offsets = [0, 8], sizes = [16, 8], strides = [1, 1]} : vector<16x64xbf16> to vector<16x8xbf16>
    %cst_25 = arith.constant dense<0.000000e+00> : vector<16x8xf32>
    %56 = tpu.matmul %54, %55, %cst_25 {dimension_numbers = #tpu.dot_dimension_numbers<[1], [0], [0], [1], [0, 0, 1, 1], [], []>} : vector<16x16xbf16>, vector<16x8xbf16>, vector<16x8xf32> -> vector<16x8xf32>
    %57 = vector.extract_strided_slice %18 {offsets = [0, 16], sizes = [16, 8], strides = [1, 1]} : vector<16x64xbf16> to vector<16x8xbf16>
    %58 = vector.extract_strided_slice %19 {offsets = [0, 16], sizes = [16, 8], strides = [1, 1]} : vector<16x64xbf16> to vector<16x8xbf16>
    %cst_26 = arith.constant dense<0.000000e+00> : vector<16x16xf32>
    %59 = tpu.matmul %57, %58, %cst_26 {dimension_numbers = #tpu.dot_dimension_numbers<[1], [1], [0], [0], [0, 0, 1, 0], [], []>} : vector<16x8xbf16>, vector<16x8xbf16>, vector<16x16xf32> -> vector<16x16xf32>
    %cst_27 = arith.constant 0.353553385 : f32
    %60 = vector.broadcast %cst_27 : f32 to vector<16x16xf32>
    %61 = arith.mulf %59, %60 : vector<16x16xf32>
    %cst_28 = arith.constant dense<0xFF800000> : vector<16xf32>
    %62 = vector.multi_reduction <maximumf>, %61, %cst_28 [1] : vector<16x16xf32> to vector<16xf32>
    %63 = vector.shape_cast %62 : vector<16xf32> to vector<16x1xf32>
    %64 = vector.broadcast %63 : vector<16x1xf32> to vector<16x16xf32>
    %65 = arith.subf %61, %64 : vector<16x16xf32>
    %66 = math.exp %65 : vector<16x16xf32>
    %cst_29 = arith.constant dense<0.000000e+00> : vector<16xf32>
    %67 = vector.multi_reduction <add>, %66, %cst_29 [1] : vector<16x16xf32> to vector<16xf32>
    %68 = vector.shape_cast %67 : vector<16xf32> to vector<16x1xf32>
    %69 = tpu.reciprocal %68 {approx = true} : vector<16x1xf32> -> vector<16x1xf32>
    %70 = vector.broadcast %69 : vector<16x1xf32> to vector<16x16xf32>
    %71 = arith.mulf %66, %70 : vector<16x16xf32>
    %72 = arith.truncf %71 : vector<16x16xf32> to vector<16x16xbf16>
    %73 = vector.extract_strided_slice %20 {offsets = [0, 16], sizes = [16, 8], strides = [1, 1]} : vector<16x64xbf16> to vector<16x8xbf16>
    %cst_30 = arith.constant dense<0.000000e+00> : vector<16x8xf32>
    %74 = tpu.matmul %72, %73, %cst_30 {dimension_numbers = #tpu.dot_dimension_numbers<[1], [0], [0], [1], [0, 0, 1, 1], [], []>} : vector<16x16xbf16>, vector<16x8xbf16>, vector<16x8xf32> -> vector<16x8xf32>
    %75 = vector.extract_strided_slice %18 {offsets = [0, 24], sizes = [16, 8], strides = [1, 1]} : vector<16x64xbf16> to vector<16x8xbf16>
    %76 = vector.extract_strided_slice %19 {offsets = [0, 24], sizes = [16, 8], strides = [1, 1]} : vector<16x64xbf16> to vector<16x8xbf16>
    %cst_31 = arith.constant dense<0.000000e+00> : vector<16x16xf32>
    %77 = tpu.matmul %75, %76, %cst_31 {dimension_numbers = #tpu.dot_dimension_numbers<[1], [1], [0], [0], [0, 0, 1, 0], [], []>} : vector<16x8xbf16>, vector<16x8xbf16>, vector<16x16xf32> -> vector<16x16xf32>
    %cst_32 = arith.constant 0.353553385 : f32
    %78 = vector.broadcast %cst_32 : f32 to vector<16x16xf32>
    %79 = arith.mulf %77, %78 : vector<16x16xf32>
    %cst_33 = arith.constant dense<0xFF800000> : vector<16xf32>
    %80 = vector.multi_reduction <maximumf>, %79, %cst_33 [1] : vector<16x16xf32> to vector<16xf32>
    %81 = vector.shape_cast %80 : vector<16xf32> to vector<16x1xf32>
    %82 = vector.broadcast %81 : vector<16x1xf32> to vector<16x16xf32>
    %83 = arith.subf %79, %82 : vector<16x16xf32>
    %84 = math.exp %83 : vector<16x16xf32>
    %cst_34 = arith.constant dense<0.000000e+00> : vector<16xf32>
    %85 = vector.multi_reduction <add>, %84, %cst_34 [1] : vector<16x16xf32> to vector<16xf32>
    %86 = vector.shape_cast %85 : vector<16xf32> to vector<16x1xf32>
    %87 = tpu.reciprocal %86 {approx = true} : vector<16x1xf32> -> vector<16x1xf32>
    %88 = vector.broadcast %87 : vector<16x1xf32> to vector<16x16xf32>
    %89 = arith.mulf %84, %88 : vector<16x16xf32>
    %90 = arith.truncf %89 : vector<16x16xf32> to vector<16x16xbf16>
    %91 = vector.extract_strided_slice %20 {offsets = [0, 24], sizes = [16, 8], strides = [1, 1]} : vector<16x64xbf16> to vector<16x8xbf16>
    %cst_35 = arith.constant dense<0.000000e+00> : vector<16x8xf32>
    %92 = tpu.matmul %90, %91, %cst_35 {dimension_numbers = #tpu.dot_dimension_numbers<[1], [0], [0], [1], [0, 0, 1, 1], [], []>} : vector<16x16xbf16>, vector<16x8xbf16>, vector<16x8xf32> -> vector<16x8xf32>
    %93 = vector.extract_strided_slice %18 {offsets = [0, 32], sizes = [16, 8], strides = [1, 1]} : vector<16x64xbf16> to vector<16x8xbf16>
    %94 = vector.extract_strided_slice %19 {offsets = [0, 32], sizes = [16, 8], strides = [1, 1]} : vector<16x64xbf16> to vector<16x8xbf16>
    %cst_36 = arith.constant dense<0.000000e+00> : vector<16x16xf32>
    %95 = tpu.matmul %93, %94, %cst_36 {dimension_numbers = #tpu.dot_dimension_numbers<[1], [1], [0], [0], [0, 0, 1, 0], [], []>} : vector<16x8xbf16>, vector<16x8xbf16>, vector<16x16xf32> -> vector<16x16xf32>
    %cst_37 = arith.constant 0.353553385 : f32
    %96 = vector.broadcast %cst_37 : f32 to vector<16x16xf32>
    %97 = arith.mulf %95, %96 : vector<16x16xf32>
    %cst_38 = arith.constant dense<0xFF800000> : vector<16xf32>
    %98 = vector.multi_reduction <maximumf>, %97, %cst_38 [1] : vector<16x16xf32> to vector<16xf32>
    %99 = vector.shape_cast %98 : vector<16xf32> to vector<16x1xf32>
    %100 = vector.broadcast %99 : vector<16x1xf32> to vector<16x16xf32>
    %101 = arith.subf %97, %100 : vector<16x16xf32>
    %102 = math.exp %101 : vector<16x16xf32>
    %cst_39 = arith.constant dense<0.000000e+00> : vector<16xf32>
    %103 = vector.multi_reduction <add>, %102, %cst_39 [1] : vector<16x16xf32> to vector<16xf32>
    %104 = vector.shape_cast %103 : vector<16xf32> to vector<16x1xf32>
    %105 = tpu.reciprocal %104 {approx = true} : vector<16x1xf32> -> vector<16x1xf32>
    %106 = vector.broadcast %105 : vector<16x1xf32> to vector<16x16xf32>
    %107 = arith.mulf %102, %106 : vector<16x16xf32>
    %108 = arith.truncf %107 : vector<16x16xf32> to vector<16x16xbf16>
    %109 = vector.extract_strided_slice %20 {offsets = [0, 32], sizes = [16, 8], strides = [1, 1]} : vector<16x64xbf16> to vector<16x8xbf16>
    %cst_40 = arith.constant dense<0.000000e+00> : vector<16x8xf32>
    %110 = tpu.matmul %108, %109, %cst_40 {dimension_numbers = #tpu.dot_dimension_numbers<[1], [0], [0], [1], [0, 0, 1, 1], [], []>} : vector<16x16xbf16>, vector<16x8xbf16>, vector<16x8xf32> -> vector<16x8xf32>
    %111 = vector.extract_strided_slice %18 {offsets = [0, 40], sizes = [16, 8], strides = [1, 1]} : vector<16x64xbf16> to vector<16x8xbf16>
    %112 = vector.extract_strided_slice %19 {offsets = [0, 40], sizes = [16, 8], strides = [1, 1]} : vector<16x64xbf16> to vector<16x8xbf16>
    %cst_41 = arith.constant dense<0.000000e+00> : vector<16x16xf32>
    %113 = tpu.matmul %111, %112, %cst_41 {dimension_numbers = #tpu.dot_dimension_numbers<[1], [1], [0], [0], [0, 0, 1, 0], [], []>} : vector<16x8xbf16>, vector<16x8xbf16>, vector<16x16xf32> -> vector<16x16xf32>
    %cst_42 = arith.constant 0.353553385 : f32
    %114 = vector.broadcast %cst_42 : f32 to vector<16x16xf32>
    %115 = arith.mulf %113, %114 : vector<16x16xf32>
    %cst_43 = arith.constant dense<0xFF800000> : vector<16xf32>
    %116 = vector.multi_reduction <maximumf>, %115, %cst_43 [1] : vector<16x16xf32> to vector<16xf32>
    %117 = vector.shape_cast %116 : vector<16xf32> to vector<16x1xf32>
    %118 = vector.broadcast %117 : vector<16x1xf32> to vector<16x16xf32>
    %119 = arith.subf %115, %118 : vector<16x16xf32>
    %120 = math.exp %119 : vector<16x16xf32>
    %cst_44 = arith.constant dense<0.000000e+00> : vector<16xf32>
    %121 = vector.multi_reduction <add>, %120, %cst_44 [1] : vector<16x16xf32> to vector<16xf32>
    %122 = vector.shape_cast %121 : vector<16xf32> to vector<16x1xf32>
    %123 = tpu.reciprocal %122 {approx = true} : vector<16x1xf32> -> vector<16x1xf32>
    %124 = vector.broadcast %123 : vector<16x1xf32> to vector<16x16xf32>
    %125 = arith.mulf %120, %124 : vector<16x16xf32>
    %126 = arith.truncf %125 : vector<16x16xf32> to vector<16x16xbf16>
    %127 = vector.extract_strided_slice %20 {offsets = [0, 40], sizes = [16, 8], strides = [1, 1]} : vector<16x64xbf16> to vector<16x8xbf16>
    %cst_45 = arith.constant dense<0.000000e+00> : vector<16x8xf32>
    %128 = tpu.matmul %126, %127, %cst_45 {dimension_numbers = #tpu.dot_dimension_numbers<[1], [0], [0], [1], [0, 0, 1, 1], [], []>} : vector<16x16xbf16>, vector<16x8xbf16>, vector<16x8xf32> -> vector<16x8xf32>
    %129 = vector.extract_strided_slice %18 {offsets = [0, 48], sizes = [16, 8], strides = [1, 1]} : vector<16x64xbf16> to vector<16x8xbf16>
    %130 = vector.extract_strided_slice %19 {offsets = [0, 48], sizes = [16, 8], strides = [1, 1]} : vector<16x64xbf16> to vector<16x8xbf16>
    %cst_46 = arith.constant dense<0.000000e+00> : vector<16x16xf32>
    %131 = tpu.matmul %129, %130, %cst_46 {dimension_numbers = #tpu.dot_dimension_numbers<[1], [1], [0], [0], [0, 0, 1, 0], [], []>} : vector<16x8xbf16>, vector<16x8xbf16>, vector<16x16xf32> -> vector<16x16xf32>
    %cst_47 = arith.constant 0.353553385 : f32
    %132 = vector.broadcast %cst_47 : f32 to vector<16x16xf32>
    %133 = arith.mulf %131, %132 : vector<16x16xf32>
    %cst_48 = arith.constant dense<0xFF800000> : vector<16xf32>
    %134 = vector.multi_reduction <maximumf>, %133, %cst_48 [1] : vector<16x16xf32> to vector<16xf32>
    %135 = vector.shape_cast %134 : vector<16xf32> to vector<16x1xf32>
    %136 = vector.broadcast %135 : vector<16x1xf32> to vector<16x16xf32>
    %137 = arith.subf %133, %136 : vector<16x16xf32>
    %138 = math.exp %137 : vector<16x16xf32>
    %cst_49 = arith.constant dense<0.000000e+00> : vector<16xf32>
    %139 = vector.multi_reduction <add>, %138, %cst_49 [1] : vector<16x16xf32> to vector<16xf32>
    %140 = vector.shape_cast %139 : vector<16xf32> to vector<16x1xf32>
    %141 = tpu.reciprocal %140 {approx = true} : vector<16x1xf32> -> vector<16x1xf32>
    %142 = vector.broadcast %141 : vector<16x1xf32> to vector<16x16xf32>
    %143 = arith.mulf %138, %142 : vector<16x16xf32>
    %144 = arith.truncf %143 : vector<16x16xf32> to vector<16x16xbf16>
    %145 = vector.extract_strided_slice %20 {offsets = [0, 48], sizes = [16, 8], strides = [1, 1]} : vector<16x64xbf16> to vector<16x8xbf16>
    %cst_50 = arith.constant dense<0.000000e+00> : vector<16x8xf32>
    %146 = tpu.matmul %144, %145, %cst_50 {dimension_numbers = #tpu.dot_dimension_numbers<[1], [0], [0], [1], [0, 0, 1, 1], [], []>} : vector<16x16xbf16>, vector<16x8xbf16>, vector<16x8xf32> -> vector<16x8xf32>
    %147 = vector.extract_strided_slice %18 {offsets = [0, 56], sizes = [16, 8], strides = [1, 1]} : vector<16x64xbf16> to vector<16x8xbf16>
    %148 = vector.extract_strided_slice %19 {offsets = [0, 56], sizes = [16, 8], strides = [1, 1]} : vector<16x64xbf16> to vector<16x8xbf16>
    %cst_51 = arith.constant dense<0.000000e+00> : vector<16x16xf32>
    %149 = tpu.matmul %147, %148, %cst_51 {dimension_numbers = #tpu.dot_dimension_numbers<[1], [1], [0], [0], [0, 0, 1, 0], [], []>} : vector<16x8xbf16>, vector<16x8xbf16>, vector<16x16xf32> -> vector<16x16xf32>
    %cst_52 = arith.constant 0.353553385 : f32
    %150 = vector.broadcast %cst_52 : f32 to vector<16x16xf32>
    %151 = arith.mulf %149, %150 : vector<16x16xf32>
    %cst_53 = arith.constant dense<0xFF800000> : vector<16xf32>
    %152 = vector.multi_reduction <maximumf>, %151, %cst_53 [1] : vector<16x16xf32> to vector<16xf32>
    %153 = vector.shape_cast %152 : vector<16xf32> to vector<16x1xf32>
    %154 = vector.broadcast %153 : vector<16x1xf32> to vector<16x16xf32>
    %155 = arith.subf %151, %154 : vector<16x16xf32>
    %156 = math.exp %155 : vector<16x16xf32>
    %cst_54 = arith.constant dense<0.000000e+00> : vector<16xf32>
    %157 = vector.multi_reduction <add>, %156, %cst_54 [1] : vector<16x16xf32> to vector<16xf32>
    %158 = vector.shape_cast %157 : vector<16xf32> to vector<16x1xf32>
    %159 = tpu.reciprocal %158 {approx = true} : vector<16x1xf32> -> vector<16x1xf32>
    %160 = vector.broadcast %159 : vector<16x1xf32> to vector<16x16xf32>
    %161 = arith.mulf %156, %160 : vector<16x16xf32>
    %162 = arith.truncf %161 : vector<16x16xf32> to vector<16x16xbf16>
    %163 = vector.extract_strided_slice %20 {offsets = [0, 56], sizes = [16, 8], strides = [1, 1]} : vector<16x64xbf16> to vector<16x8xbf16>
    %cst_55 = arith.constant dense<0.000000e+00> : vector<16x8xf32>
    %164 = tpu.matmul %162, %163, %cst_55 {dimension_numbers = #tpu.dot_dimension_numbers<[1], [0], [0], [1], [0, 0, 1, 1], [], []>} : vector<16x16xbf16>, vector<16x8xbf16>, vector<16x8xf32> -> vector<16x8xf32>
    %165 = tpu.concatenate %38, %56, %74, %92, %110, %128, %146, %164 in 1 : vector<16x8xf32>, vector<16x8xf32>, vector<16x8xf32>, vector<16x8xf32>, vector<16x8xf32>, vector<16x8xf32>, vector<16x8xf32>, vector<16x8xf32> -> vector<16x64xf32>
    %166 = arith.truncf %165 : vector<16x64xf32> to vector<16x64xbf16>
    %cst_56 = arith.constant dense<0.000000e+00> : vector<16x64xf32>
    %167 = tpu.matmul %166, %15, %cst_56 {dimension_numbers = #tpu.dot_dimension_numbers<[1], [0], [0], [1], [0, 0, 1, 1], [], []>} : vector<16x64xbf16>, vector<64x64xbf16>, vector<16x64xf32> -> vector<16x64xf32>
    %168 = vector.broadcast %17 : vector<1x64xf32> to vector<16x64xf32>
    %169 = arith.addf %167, %168 : vector<16x64xf32>
    %170 = arith.addf %1, %169 : vector<16x64xf32>
    %c0_57 = arith.constant 0 : index
    %c0_58 = arith.constant 0 : index
    %c0_59 = arith.constant 0 : index
    %171 = vector.load %arg7[%c0_57, %c0_58, %c0_59] : memref<2x1x64xf32, #tpu.memory_space<vmem>>, vector<1x1x64xf32>
    %172 = vector.shape_cast %171 : vector<1x1x64xf32> to vector<1x64xf32>
    %c0_60 = arith.constant 0 : index
    %c0_61 = arith.constant 0 : index
    %c0_62 = arith.constant 0 : index
    %173 = vector.load %arg8[%c0_60, %c0_61, %c0_62] : memref<2x1x64xf32, #tpu.memory_space<vmem>>, vector<1x1x64xf32>
    %174 = vector.shape_cast %173 : vector<1x1x64xf32> to vector<1x64xf32>
    %cst_63 = arith.constant dense<0.000000e+00> : vector<16xf32>
    %175 = vector.multi_reduction <add>, %170, %cst_63 [1] : vector<16x64xf32> to vector<16xf32>
    %176 = vector.shape_cast %175 : vector<16xf32> to vector<16x1xf32>
    %cst_64 = arith.constant 6.400000e+01 : f32
    %177 = vector.broadcast %cst_64 : f32 to vector<16x1xf32>
    %178 = arith.divf %176, %177 : vector<16x1xf32>
    %179 = vector.broadcast %178 : vector<16x1xf32> to vector<16x64xf32>
    %180 = arith.subf %170, %179 : vector<16x64xf32>
    %181 = arith.mulf %180, %180 : vector<16x64xf32>
    %cst_65 = arith.constant dense<0.000000e+00> : vector<16xf32>
    %182 = vector.multi_reduction <add>, %181, %cst_65 [1] : vector<16x64xf32> to vector<16xf32>
    %183 = vector.shape_cast %182 : vector<16xf32> to vector<16x1xf32>
    %cst_66 = arith.constant 6.400000e+01 : f32
    %184 = vector.broadcast %cst_66 : f32 to vector<16x1xf32>
    %185 = arith.divf %183, %184 : vector<16x1xf32>
    %186 = vector.broadcast %178 : vector<16x1xf32> to vector<16x64xf32>
    %187 = arith.subf %170, %186 : vector<16x64xf32>
    %cst_67 = arith.constant 9.99999974E-6 : f32
    %188 = vector.broadcast %cst_67 : f32 to vector<16x1xf32>
    %189 = arith.addf %185, %188 : vector<16x1xf32>
    %190 = math.rsqrt %189 : vector<16x1xf32>
    %191 = vector.broadcast %190 : vector<16x1xf32> to vector<16x64xf32>
    %192 = arith.mulf %187, %191 : vector<16x64xf32>
    %193 = vector.broadcast %172 : vector<1x64xf32> to vector<16x64xf32>
    %194 = arith.mulf %192, %193 : vector<16x64xf32>
    %195 = vector.broadcast %174 : vector<1x64xf32> to vector<16x64xf32>
    %196 = arith.addf %194, %195 : vector<16x64xf32>
    %c0_68 = arith.constant 0 : index
    %c0_69 = arith.constant 0 : index
    %c0_70 = arith.constant 0 : index
    %197 = vector.load %arg9[%c0_68, %c0_69, %c0_70] : memref<2x64x256xbf16, #tpu.memory_space<vmem>>, vector<1x64x256xbf16>
    %198 = vector.shape_cast %197 : vector<1x64x256xbf16> to vector<64x256xbf16>
    %c0_71 = arith.constant 0 : index
    %c0_72 = arith.constant 0 : index
    %c0_73 = arith.constant 0 : index
    %199 = vector.load %arg10[%c0_71, %c0_72, %c0_73] : memref<2x1x256xf32, #tpu.memory_space<vmem>>, vector<1x1x256xf32>
    %200 = vector.shape_cast %199 : vector<1x1x256xf32> to vector<1x256xf32>
    %c0_74 = arith.constant 0 : index
    %c0_75 = arith.constant 0 : index
    %c0_76 = arith.constant 0 : index
    %201 = vector.load %arg11[%c0_74, %c0_75, %c0_76] : memref<2x256x64xbf16, #tpu.memory_space<vmem>>, vector<1x256x64xbf16>
    %202 = vector.shape_cast %201 : vector<1x256x64xbf16> to vector<256x64xbf16>
    %c0_77 = arith.constant 0 : index
    %c0_78 = arith.constant 0 : index
    %c0_79 = arith.constant 0 : index
    %203 = vector.load %arg12[%c0_77, %c0_78, %c0_79] : memref<2x1x64xf32, #tpu.memory_space<vmem>>, vector<1x1x64xf32>
    %204 = vector.shape_cast %203 : vector<1x1x64xf32> to vector<1x64xf32>
    %205 = arith.truncf %196 : vector<16x64xf32> to vector<16x64xbf16>
    %cst_80 = arith.constant dense<0.000000e+00> : vector<16x256xf32>
    %206 = tpu.matmul %205, %198, %cst_80 {dimension_numbers = #tpu.dot_dimension_numbers<[1], [0], [0], [1], [0, 0, 1, 1], [], []>} : vector<16x64xbf16>, vector<64x256xbf16>, vector<16x256xf32> -> vector<16x256xf32>
    %207 = vector.broadcast %200 : vector<1x256xf32> to vector<16x256xf32>
    %208 = arith.addf %206, %207 : vector<16x256xf32>
    %cst_81 = arith.constant 0.000000e+00 : f32
    %209 = vector.broadcast %cst_81 : f32 to vector<16x256xf32>
    %210 = arith.maximumf %208, %209 : vector<16x256xf32>
    %211 = arith.truncf %210 : vector<16x256xf32> to vector<16x256xbf16>
    %cst_82 = arith.constant dense<0.000000e+00> : vector<16x64xf32>
    %212 = tpu.matmul %211, %202, %cst_82 {dimension_numbers = #tpu.dot_dimension_numbers<[1], [0], [0], [1], [0, 0, 1, 1], [], []>} : vector<16x256xbf16>, vector<256x64xbf16>, vector<16x64xf32> -> vector<16x64xf32>
    %213 = vector.broadcast %204 : vector<1x64xf32> to vector<16x64xf32>
    %214 = arith.addf %212, %213 : vector<16x64xf32>
    %215 = arith.addf %196, %214 : vector<16x64xf32>
    %c0_83 = arith.constant 0 : index
    %c0_84 = arith.constant 0 : index
    %c0_85 = arith.constant 0 : index
    %216 = vector.load %arg13[%c0_83, %c0_84, %c0_85] : memref<2x1x64xf32, #tpu.memory_space<vmem>>, vector<1x1x64xf32>
    %217 = vector.shape_cast %216 : vector<1x1x64xf32> to vector<1x64xf32>
    %c0_86 = arith.constant 0 : index
    %c0_87 = arith.constant 0 : index
    %c0_88 = arith.constant 0 : index
    %218 = vector.load %arg14[%c0_86, %c0_87, %c0_88] : memref<2x1x64xf32, #tpu.memory_space<vmem>>, vector<1x1x64xf32>
    %219 = vector.shape_cast %218 : vector<1x1x64xf32> to vector<1x64xf32>
    %cst_89 = arith.constant dense<0.000000e+00> : vector<16xf32>
    %220 = vector.multi_reduction <add>, %215, %cst_89 [1] : vector<16x64xf32> to vector<16xf32>
    %221 = vector.shape_cast %220 : vector<16xf32> to vector<16x1xf32>
    %cst_90 = arith.constant 6.400000e+01 : f32
    %222 = vector.broadcast %cst_90 : f32 to vector<16x1xf32>
    %223 = arith.divf %221, %222 : vector<16x1xf32>
    %224 = vector.broadcast %223 : vector<16x1xf32> to vector<16x64xf32>
    %225 = arith.subf %215, %224 : vector<16x64xf32>
    %226 = arith.mulf %225, %225 : vector<16x64xf32>
    %cst_91 = arith.constant dense<0.000000e+00> : vector<16xf32>
    %227 = vector.multi_reduction <add>, %226, %cst_91 [1] : vector<16x64xf32> to vector<16xf32>
    %228 = vector.shape_cast %227 : vector<16xf32> to vector<16x1xf32>
    %cst_92 = arith.constant 6.400000e+01 : f32
    %229 = vector.broadcast %cst_92 : f32 to vector<16x1xf32>
    %230 = arith.divf %228, %229 : vector<16x1xf32>
    %231 = vector.broadcast %223 : vector<16x1xf32> to vector<16x64xf32>
    %232 = arith.subf %215, %231 : vector<16x64xf32>
    %cst_93 = arith.constant 9.99999974E-6 : f32
    %233 = vector.broadcast %cst_93 : f32 to vector<16x1xf32>
    %234 = arith.addf %230, %233 : vector<16x1xf32>
    %235 = math.rsqrt %234 : vector<16x1xf32>
    %236 = vector.broadcast %235 : vector<16x1xf32> to vector<16x64xf32>
    %237 = arith.mulf %232, %236 : vector<16x64xf32>
    %238 = vector.broadcast %217 : vector<1x64xf32> to vector<16x64xf32>
    %239 = arith.mulf %237, %238 : vector<16x64xf32>
    %240 = vector.broadcast %219 : vector<1x64xf32> to vector<16x64xf32>
    %241 = arith.addf %239, %240 : vector<16x64xf32>
    %242 = arith.truncf %241 : vector<16x64xf32> to vector<16x64xbf16>
    %c1 = arith.constant 1 : index
    %c0_94 = arith.constant 0 : index
    %c0_95 = arith.constant 0 : index
    %243 = vector.load %arg3[%c1, %c0_94, %c0_95] : memref<2x64x192xbf16, #tpu.memory_space<vmem>>, vector<1x64x192xbf16>
    %244 = vector.shape_cast %243 : vector<1x64x192xbf16> to vector<64x192xbf16>
    %cst_96 = arith.constant dense<0.000000e+00> : vector<16x192xf32>
    %245 = tpu.matmul %242, %244, %cst_96 {dimension_numbers = #tpu.dot_dimension_numbers<[1], [0], [0], [1], [0, 0, 1, 1], [], []>} : vector<16x64xbf16>, vector<64x192xbf16>, vector<16x192xf32> -> vector<16x192xf32>
    %c1_97 = arith.constant 1 : index
    %c0_98 = arith.constant 0 : index
    %c0_99 = arith.constant 0 : index
    %246 = vector.load %arg4[%c1_97, %c0_98, %c0_99] : memref<2x1x192xf32, #tpu.memory_space<vmem>>, vector<1x1x192xf32>
    %247 = vector.shape_cast %246 : vector<1x1x192xf32> to vector<1x192xf32>
    %248 = vector.broadcast %247 : vector<1x192xf32> to vector<16x192xf32>
    %249 = arith.addf %245, %248 : vector<16x192xf32>
    %250 = vector.extract_strided_slice %249 {offsets = [0, 0], sizes = [16, 64], strides = [1, 1]} : vector<16x192xf32> to vector<16x64xf32>
    %251 = vector.extract_strided_slice %249 {offsets = [0, 64], sizes = [16, 64], strides = [1, 1]} : vector<16x192xf32> to vector<16x64xf32>
    %252 = vector.extract_strided_slice %249 {offsets = [0, 128], sizes = [16, 64], strides = [1, 1]} : vector<16x192xf32> to vector<16x64xf32>
    %c1_100 = arith.constant 1 : index
    %c0_101 = arith.constant 0 : index
    %c0_102 = arith.constant 0 : index
    %253 = vector.load %arg5[%c1_100, %c0_101, %c0_102] : memref<2x64x64xbf16, #tpu.memory_space<vmem>>, vector<1x64x64xbf16>
    %254 = vector.shape_cast %253 : vector<1x64x64xbf16> to vector<64x64xbf16>
    %c1_103 = arith.constant 1 : index
    %c0_104 = arith.constant 0 : index
    %c0_105 = arith.constant 0 : index
    %255 = vector.load %arg6[%c1_103, %c0_104, %c0_105] : memref<2x1x64xf32, #tpu.memory_space<vmem>>, vector<1x1x64xf32>
    %256 = vector.shape_cast %255 : vector<1x1x64xf32> to vector<1x64xf32>
    %257 = arith.truncf %250 : vector<16x64xf32> to vector<16x64xbf16>
    %258 = arith.truncf %251 : vector<16x64xf32> to vector<16x64xbf16>
    %259 = arith.truncf %252 : vector<16x64xf32> to vector<16x64xbf16>
    %260 = vector.extract_strided_slice %257 {offsets = [0, 0], sizes = [16, 8], strides = [1, 1]} : vector<16x64xbf16> to vector<16x8xbf16>
    %261 = vector.extract_strided_slice %258 {offsets = [0, 0], sizes = [16, 8], strides = [1, 1]} : vector<16x64xbf16> to vector<16x8xbf16>
    %cst_106 = arith.constant dense<0.000000e+00> : vector<16x16xf32>
    %262 = tpu.matmul %260, %261, %cst_106 {dimension_numbers = #tpu.dot_dimension_numbers<[1], [1], [0], [0], [0, 0, 1, 0], [], []>} : vector<16x8xbf16>, vector<16x8xbf16>, vector<16x16xf32> -> vector<16x16xf32>
    %cst_107 = arith.constant 0.353553385 : f32
    %263 = vector.broadcast %cst_107 : f32 to vector<16x16xf32>
    %264 = arith.mulf %262, %263 : vector<16x16xf32>
    %cst_108 = arith.constant dense<0xFF800000> : vector<16xf32>
    %265 = vector.multi_reduction <maximumf>, %264, %cst_108 [1] : vector<16x16xf32> to vector<16xf32>
    %266 = vector.shape_cast %265 : vector<16xf32> to vector<16x1xf32>
    %267 = vector.broadcast %266 : vector<16x1xf32> to vector<16x16xf32>
    %268 = arith.subf %264, %267 : vector<16x16xf32>
    %269 = math.exp %268 : vector<16x16xf32>
    %cst_109 = arith.constant dense<0.000000e+00> : vector<16xf32>
    %270 = vector.multi_reduction <add>, %269, %cst_109 [1] : vector<16x16xf32> to vector<16xf32>
    %271 = vector.shape_cast %270 : vector<16xf32> to vector<16x1xf32>
    %272 = tpu.reciprocal %271 {approx = true} : vector<16x1xf32> -> vector<16x1xf32>
    %273 = vector.broadcast %272 : vector<16x1xf32> to vector<16x16xf32>
    %274 = arith.mulf %269, %273 : vector<16x16xf32>
    %275 = arith.truncf %274 : vector<16x16xf32> to vector<16x16xbf16>
    %276 = vector.extract_strided_slice %259 {offsets = [0, 0], sizes = [16, 8], strides = [1, 1]} : vector<16x64xbf16> to vector<16x8xbf16>
    %cst_110 = arith.constant dense<0.000000e+00> : vector<16x8xf32>
    %277 = tpu.matmul %275, %276, %cst_110 {dimension_numbers = #tpu.dot_dimension_numbers<[1], [0], [0], [1], [0, 0, 1, 1], [], []>} : vector<16x16xbf16>, vector<16x8xbf16>, vector<16x8xf32> -> vector<16x8xf32>
    %278 = vector.extract_strided_slice %257 {offsets = [0, 8], sizes = [16, 8], strides = [1, 1]} : vector<16x64xbf16> to vector<16x8xbf16>
    %279 = vector.extract_strided_slice %258 {offsets = [0, 8], sizes = [16, 8], strides = [1, 1]} : vector<16x64xbf16> to vector<16x8xbf16>
    %cst_111 = arith.constant dense<0.000000e+00> : vector<16x16xf32>
    %280 = tpu.matmul %278, %279, %cst_111 {dimension_numbers = #tpu.dot_dimension_numbers<[1], [1], [0], [0], [0, 0, 1, 0], [], []>} : vector<16x8xbf16>, vector<16x8xbf16>, vector<16x16xf32> -> vector<16x16xf32>
    %cst_112 = arith.constant 0.353553385 : f32
    %281 = vector.broadcast %cst_112 : f32 to vector<16x16xf32>
    %282 = arith.mulf %280, %281 : vector<16x16xf32>
    %cst_113 = arith.constant dense<0xFF800000> : vector<16xf32>
    %283 = vector.multi_reduction <maximumf>, %282, %cst_113 [1] : vector<16x16xf32> to vector<16xf32>
    %284 = vector.shape_cast %283 : vector<16xf32> to vector<16x1xf32>
    %285 = vector.broadcast %284 : vector<16x1xf32> to vector<16x16xf32>
    %286 = arith.subf %282, %285 : vector<16x16xf32>
    %287 = math.exp %286 : vector<16x16xf32>
    %cst_114 = arith.constant dense<0.000000e+00> : vector<16xf32>
    %288 = vector.multi_reduction <add>, %287, %cst_114 [1] : vector<16x16xf32> to vector<16xf32>
    %289 = vector.shape_cast %288 : vector<16xf32> to vector<16x1xf32>
    %290 = tpu.reciprocal %289 {approx = true} : vector<16x1xf32> -> vector<16x1xf32>
    %291 = vector.broadcast %290 : vector<16x1xf32> to vector<16x16xf32>
    %292 = arith.mulf %287, %291 : vector<16x16xf32>
    %293 = arith.truncf %292 : vector<16x16xf32> to vector<16x16xbf16>
    %294 = vector.extract_strided_slice %259 {offsets = [0, 8], sizes = [16, 8], strides = [1, 1]} : vector<16x64xbf16> to vector<16x8xbf16>
    %cst_115 = arith.constant dense<0.000000e+00> : vector<16x8xf32>
    %295 = tpu.matmul %293, %294, %cst_115 {dimension_numbers = #tpu.dot_dimension_numbers<[1], [0], [0], [1], [0, 0, 1, 1], [], []>} : vector<16x16xbf16>, vector<16x8xbf16>, vector<16x8xf32> -> vector<16x8xf32>
    %296 = vector.extract_strided_slice %257 {offsets = [0, 16], sizes = [16, 8], strides = [1, 1]} : vector<16x64xbf16> to vector<16x8xbf16>
    %297 = vector.extract_strided_slice %258 {offsets = [0, 16], sizes = [16, 8], strides = [1, 1]} : vector<16x64xbf16> to vector<16x8xbf16>
    %cst_116 = arith.constant dense<0.000000e+00> : vector<16x16xf32>
    %298 = tpu.matmul %296, %297, %cst_116 {dimension_numbers = #tpu.dot_dimension_numbers<[1], [1], [0], [0], [0, 0, 1, 0], [], []>} : vector<16x8xbf16>, vector<16x8xbf16>, vector<16x16xf32> -> vector<16x16xf32>
    %cst_117 = arith.constant 0.353553385 : f32
    %299 = vector.broadcast %cst_117 : f32 to vector<16x16xf32>
    %300 = arith.mulf %298, %299 : vector<16x16xf32>
    %cst_118 = arith.constant dense<0xFF800000> : vector<16xf32>
    %301 = vector.multi_reduction <maximumf>, %300, %cst_118 [1] : vector<16x16xf32> to vector<16xf32>
    %302 = vector.shape_cast %301 : vector<16xf32> to vector<16x1xf32>
    %303 = vector.broadcast %302 : vector<16x1xf32> to vector<16x16xf32>
    %304 = arith.subf %300, %303 : vector<16x16xf32>
    %305 = math.exp %304 : vector<16x16xf32>
    %cst_119 = arith.constant dense<0.000000e+00> : vector<16xf32>
    %306 = vector.multi_reduction <add>, %305, %cst_119 [1] : vector<16x16xf32> to vector<16xf32>
    %307 = vector.shape_cast %306 : vector<16xf32> to vector<16x1xf32>
    %308 = tpu.reciprocal %307 {approx = true} : vector<16x1xf32> -> vector<16x1xf32>
    %309 = vector.broadcast %308 : vector<16x1xf32> to vector<16x16xf32>
    %310 = arith.mulf %305, %309 : vector<16x16xf32>
    %311 = arith.truncf %310 : vector<16x16xf32> to vector<16x16xbf16>
    %312 = vector.extract_strided_slice %259 {offsets = [0, 16], sizes = [16, 8], strides = [1, 1]} : vector<16x64xbf16> to vector<16x8xbf16>
    %cst_120 = arith.constant dense<0.000000e+00> : vector<16x8xf32>
    %313 = tpu.matmul %311, %312, %cst_120 {dimension_numbers = #tpu.dot_dimension_numbers<[1], [0], [0], [1], [0, 0, 1, 1], [], []>} : vector<16x16xbf16>, vector<16x8xbf16>, vector<16x8xf32> -> vector<16x8xf32>
    %314 = vector.extract_strided_slice %257 {offsets = [0, 24], sizes = [16, 8], strides = [1, 1]} : vector<16x64xbf16> to vector<16x8xbf16>
    %315 = vector.extract_strided_slice %258 {offsets = [0, 24], sizes = [16, 8], strides = [1, 1]} : vector<16x64xbf16> to vector<16x8xbf16>
    %cst_121 = arith.constant dense<0.000000e+00> : vector<16x16xf32>
    %316 = tpu.matmul %314, %315, %cst_121 {dimension_numbers = #tpu.dot_dimension_numbers<[1], [1], [0], [0], [0, 0, 1, 0], [], []>} : vector<16x8xbf16>, vector<16x8xbf16>, vector<16x16xf32> -> vector<16x16xf32>
    %cst_122 = arith.constant 0.353553385 : f32
    %317 = vector.broadcast %cst_122 : f32 to vector<16x16xf32>
    %318 = arith.mulf %316, %317 : vector<16x16xf32>
    %cst_123 = arith.constant dense<0xFF800000> : vector<16xf32>
    %319 = vector.multi_reduction <maximumf>, %318, %cst_123 [1] : vector<16x16xf32> to vector<16xf32>
    %320 = vector.shape_cast %319 : vector<16xf32> to vector<16x1xf32>
    %321 = vector.broadcast %320 : vector<16x1xf32> to vector<16x16xf32>
    %322 = arith.subf %318, %321 : vector<16x16xf32>
    %323 = math.exp %322 : vector<16x16xf32>
    %cst_124 = arith.constant dense<0.000000e+00> : vector<16xf32>
    %324 = vector.multi_reduction <add>, %323, %cst_124 [1] : vector<16x16xf32> to vector<16xf32>
    %325 = vector.shape_cast %324 : vector<16xf32> to vector<16x1xf32>
    %326 = tpu.reciprocal %325 {approx = true} : vector<16x1xf32> -> vector<16x1xf32>
    %327 = vector.broadcast %326 : vector<16x1xf32> to vector<16x16xf32>
    %328 = arith.mulf %323, %327 : vector<16x16xf32>
    %329 = arith.truncf %328 : vector<16x16xf32> to vector<16x16xbf16>
    %330 = vector.extract_strided_slice %259 {offsets = [0, 24], sizes = [16, 8], strides = [1, 1]} : vector<16x64xbf16> to vector<16x8xbf16>
    %cst_125 = arith.constant dense<0.000000e+00> : vector<16x8xf32>
    %331 = tpu.matmul %329, %330, %cst_125 {dimension_numbers = #tpu.dot_dimension_numbers<[1], [0], [0], [1], [0, 0, 1, 1], [], []>} : vector<16x16xbf16>, vector<16x8xbf16>, vector<16x8xf32> -> vector<16x8xf32>
    %332 = vector.extract_strided_slice %257 {offsets = [0, 32], sizes = [16, 8], strides = [1, 1]} : vector<16x64xbf16> to vector<16x8xbf16>
    %333 = vector.extract_strided_slice %258 {offsets = [0, 32], sizes = [16, 8], strides = [1, 1]} : vector<16x64xbf16> to vector<16x8xbf16>
    %cst_126 = arith.constant dense<0.000000e+00> : vector<16x16xf32>
    %334 = tpu.matmul %332, %333, %cst_126 {dimension_numbers = #tpu.dot_dimension_numbers<[1], [1], [0], [0], [0, 0, 1, 0], [], []>} : vector<16x8xbf16>, vector<16x8xbf16>, vector<16x16xf32> -> vector<16x16xf32>
    %cst_127 = arith.constant 0.353553385 : f32
    %335 = vector.broadcast %cst_127 : f32 to vector<16x16xf32>
    %336 = arith.mulf %334, %335 : vector<16x16xf32>
    %cst_128 = arith.constant dense<0xFF800000> : vector<16xf32>
    %337 = vector.multi_reduction <maximumf>, %336, %cst_128 [1] : vector<16x16xf32> to vector<16xf32>
    %338 = vector.shape_cast %337 : vector<16xf32> to vector<16x1xf32>
    %339 = vector.broadcast %338 : vector<16x1xf32> to vector<16x16xf32>
    %340 = arith.subf %336, %339 : vector<16x16xf32>
    %341 = math.exp %340 : vector<16x16xf32>
    %cst_129 = arith.constant dense<0.000000e+00> : vector<16xf32>
    %342 = vector.multi_reduction <add>, %341, %cst_129 [1] : vector<16x16xf32> to vector<16xf32>
    %343 = vector.shape_cast %342 : vector<16xf32> to vector<16x1xf32>
    %344 = tpu.reciprocal %343 {approx = true} : vector<16x1xf32> -> vector<16x1xf32>
    %345 = vector.broadcast %344 : vector<16x1xf32> to vector<16x16xf32>
    %346 = arith.mulf %341, %345 : vector<16x16xf32>
    %347 = arith.truncf %346 : vector<16x16xf32> to vector<16x16xbf16>
    %348 = vector.extract_strided_slice %259 {offsets = [0, 32], sizes = [16, 8], strides = [1, 1]} : vector<16x64xbf16> to vector<16x8xbf16>
    %cst_130 = arith.constant dense<0.000000e+00> : vector<16x8xf32>
    %349 = tpu.matmul %347, %348, %cst_130 {dimension_numbers = #tpu.dot_dimension_numbers<[1], [0], [0], [1], [0, 0, 1, 1], [], []>} : vector<16x16xbf16>, vector<16x8xbf16>, vector<16x8xf32> -> vector<16x8xf32>
    %350 = vector.extract_strided_slice %257 {offsets = [0, 40], sizes = [16, 8], strides = [1, 1]} : vector<16x64xbf16> to vector<16x8xbf16>
    %351 = vector.extract_strided_slice %258 {offsets = [0, 40], sizes = [16, 8], strides = [1, 1]} : vector<16x64xbf16> to vector<16x8xbf16>
    %cst_131 = arith.constant dense<0.000000e+00> : vector<16x16xf32>
    %352 = tpu.matmul %350, %351, %cst_131 {dimension_numbers = #tpu.dot_dimension_numbers<[1], [1], [0], [0], [0, 0, 1, 0], [], []>} : vector<16x8xbf16>, vector<16x8xbf16>, vector<16x16xf32> -> vector<16x16xf32>
    %cst_132 = arith.constant 0.353553385 : f32
    %353 = vector.broadcast %cst_132 : f32 to vector<16x16xf32>
    %354 = arith.mulf %352, %353 : vector<16x16xf32>
    %cst_133 = arith.constant dense<0xFF800000> : vector<16xf32>
    %355 = vector.multi_reduction <maximumf>, %354, %cst_133 [1] : vector<16x16xf32> to vector<16xf32>
    %356 = vector.shape_cast %355 : vector<16xf32> to vector<16x1xf32>
    %357 = vector.broadcast %356 : vector<16x1xf32> to vector<16x16xf32>
    %358 = arith.subf %354, %357 : vector<16x16xf32>
    %359 = math.exp %358 : vector<16x16xf32>
    %cst_134 = arith.constant dense<0.000000e+00> : vector<16xf32>
    %360 = vector.multi_reduction <add>, %359, %cst_134 [1] : vector<16x16xf32> to vector<16xf32>
    %361 = vector.shape_cast %360 : vector<16xf32> to vector<16x1xf32>
    %362 = tpu.reciprocal %361 {approx = true} : vector<16x1xf32> -> vector<16x1xf32>
    %363 = vector.broadcast %362 : vector<16x1xf32> to vector<16x16xf32>
    %364 = arith.mulf %359, %363 : vector<16x16xf32>
    %365 = arith.truncf %364 : vector<16x16xf32> to vector<16x16xbf16>
    %366 = vector.extract_strided_slice %259 {offsets = [0, 40], sizes = [16, 8], strides = [1, 1]} : vector<16x64xbf16> to vector<16x8xbf16>
    %cst_135 = arith.constant dense<0.000000e+00> : vector<16x8xf32>
    %367 = tpu.matmul %365, %366, %cst_135 {dimension_numbers = #tpu.dot_dimension_numbers<[1], [0], [0], [1], [0, 0, 1, 1], [], []>} : vector<16x16xbf16>, vector<16x8xbf16>, vector<16x8xf32> -> vector<16x8xf32>
    %368 = vector.extract_strided_slice %257 {offsets = [0, 48], sizes = [16, 8], strides = [1, 1]} : vector<16x64xbf16> to vector<16x8xbf16>
    %369 = vector.extract_strided_slice %258 {offsets = [0, 48], sizes = [16, 8], strides = [1, 1]} : vector<16x64xbf16> to vector<16x8xbf16>
    %cst_136 = arith.constant dense<0.000000e+00> : vector<16x16xf32>
    %370 = tpu.matmul %368, %369, %cst_136 {dimension_numbers = #tpu.dot_dimension_numbers<[1], [1], [0], [0], [0, 0, 1, 0], [], []>} : vector<16x8xbf16>, vector<16x8xbf16>, vector<16x16xf32> -> vector<16x16xf32>
    %cst_137 = arith.constant 0.353553385 : f32
    %371 = vector.broadcast %cst_137 : f32 to vector<16x16xf32>
    %372 = arith.mulf %370, %371 : vector<16x16xf32>
    %cst_138 = arith.constant dense<0xFF800000> : vector<16xf32>
    %373 = vector.multi_reduction <maximumf>, %372, %cst_138 [1] : vector<16x16xf32> to vector<16xf32>
    %374 = vector.shape_cast %373 : vector<16xf32> to vector<16x1xf32>
    %375 = vector.broadcast %374 : vector<16x1xf32> to vector<16x16xf32>
    %376 = arith.subf %372, %375 : vector<16x16xf32>
    %377 = math.exp %376 : vector<16x16xf32>
    %cst_139 = arith.constant dense<0.000000e+00> : vector<16xf32>
    %378 = vector.multi_reduction <add>, %377, %cst_139 [1] : vector<16x16xf32> to vector<16xf32>
    %379 = vector.shape_cast %378 : vector<16xf32> to vector<16x1xf32>
    %380 = tpu.reciprocal %379 {approx = true} : vector<16x1xf32> -> vector<16x1xf32>
    %381 = vector.broadcast %380 : vector<16x1xf32> to vector<16x16xf32>
    %382 = arith.mulf %377, %381 : vector<16x16xf32>
    %383 = arith.truncf %382 : vector<16x16xf32> to vector<16x16xbf16>
    %384 = vector.extract_strided_slice %259 {offsets = [0, 48], sizes = [16, 8], strides = [1, 1]} : vector<16x64xbf16> to vector<16x8xbf16>
    %cst_140 = arith.constant dense<0.000000e+00> : vector<16x8xf32>
    %385 = tpu.matmul %383, %384, %cst_140 {dimension_numbers = #tpu.dot_dimension_numbers<[1], [0], [0], [1], [0, 0, 1, 1], [], []>} : vector<16x16xbf16>, vector<16x8xbf16>, vector<16x8xf32> -> vector<16x8xf32>
    %386 = vector.extract_strided_slice %257 {offsets = [0, 56], sizes = [16, 8], strides = [1, 1]} : vector<16x64xbf16> to vector<16x8xbf16>
    %387 = vector.extract_strided_slice %258 {offsets = [0, 56], sizes = [16, 8], strides = [1, 1]} : vector<16x64xbf16> to vector<16x8xbf16>
    %cst_141 = arith.constant dense<0.000000e+00> : vector<16x16xf32>
    %388 = tpu.matmul %386, %387, %cst_141 {dimension_numbers = #tpu.dot_dimension_numbers<[1], [1], [0], [0], [0, 0, 1, 0], [], []>} : vector<16x8xbf16>, vector<16x8xbf16>, vector<16x16xf32> -> vector<16x16xf32>
    %cst_142 = arith.constant 0.353553385 : f32
    %389 = vector.broadcast %cst_142 : f32 to vector<16x16xf32>
    %390 = arith.mulf %388, %389 : vector<16x16xf32>
    %cst_143 = arith.constant dense<0xFF800000> : vector<16xf32>
    %391 = vector.multi_reduction <maximumf>, %390, %cst_143 [1] : vector<16x16xf32> to vector<16xf32>
    %392 = vector.shape_cast %391 : vector<16xf32> to vector<16x1xf32>
    %393 = vector.broadcast %392 : vector<16x1xf32> to vector<16x16xf32>
    %394 = arith.subf %390, %393 : vector<16x16xf32>
    %395 = math.exp %394 : vector<16x16xf32>
    %cst_144 = arith.constant dense<0.000000e+00> : vector<16xf32>
    %396 = vector.multi_reduction <add>, %395, %cst_144 [1] : vector<16x16xf32> to vector<16xf32>
    %397 = vector.shape_cast %396 : vector<16xf32> to vector<16x1xf32>
    %398 = tpu.reciprocal %397 {approx = true} : vector<16x1xf32> -> vector<16x1xf32>
    %399 = vector.broadcast %398 : vector<16x1xf32> to vector<16x16xf32>
    %400 = arith.mulf %395, %399 : vector<16x16xf32>
    %401 = arith.truncf %400 : vector<16x16xf32> to vector<16x16xbf16>
    %402 = vector.extract_strided_slice %259 {offsets = [0, 56], sizes = [16, 8], strides = [1, 1]} : vector<16x64xbf16> to vector<16x8xbf16>
    %cst_145 = arith.constant dense<0.000000e+00> : vector<16x8xf32>
    %403 = tpu.matmul %401, %402, %cst_145 {dimension_numbers = #tpu.dot_dimension_numbers<[1], [0], [0], [1], [0, 0, 1, 1], [], []>} : vector<16x16xbf16>, vector<16x8xbf16>, vector<16x8xf32> -> vector<16x8xf32>
    %404 = tpu.concatenate %277, %295, %313, %331, %349, %367, %385, %403 in 1 : vector<16x8xf32>, vector<16x8xf32>, vector<16x8xf32>, vector<16x8xf32>, vector<16x8xf32>, vector<16x8xf32>, vector<16x8xf32>, vector<16x8xf32> -> vector<16x64xf32>
    %405 = arith.truncf %404 : vector<16x64xf32> to vector<16x64xbf16>
    %cst_146 = arith.constant dense<0.000000e+00> : vector<16x64xf32>
    %406 = tpu.matmul %405, %254, %cst_146 {dimension_numbers = #tpu.dot_dimension_numbers<[1], [0], [0], [1], [0, 0, 1, 1], [], []>} : vector<16x64xbf16>, vector<64x64xbf16>, vector<16x64xf32> -> vector<16x64xf32>
    %407 = vector.broadcast %256 : vector<1x64xf32> to vector<16x64xf32>
    %408 = arith.addf %406, %407 : vector<16x64xf32>
    %409 = arith.addf %241, %408 : vector<16x64xf32>
    %c1_147 = arith.constant 1 : index
    %c0_148 = arith.constant 0 : index
    %c0_149 = arith.constant 0 : index
    %410 = vector.load %arg7[%c1_147, %c0_148, %c0_149] : memref<2x1x64xf32, #tpu.memory_space<vmem>>, vector<1x1x64xf32>
    %411 = vector.shape_cast %410 : vector<1x1x64xf32> to vector<1x64xf32>
    %c1_150 = arith.constant 1 : index
    %c0_151 = arith.constant 0 : index
    %c0_152 = arith.constant 0 : index
    %412 = vector.load %arg8[%c1_150, %c0_151, %c0_152] : memref<2x1x64xf32, #tpu.memory_space<vmem>>, vector<1x1x64xf32>
    %413 = vector.shape_cast %412 : vector<1x1x64xf32> to vector<1x64xf32>
    %cst_153 = arith.constant dense<0.000000e+00> : vector<16xf32>
    %414 = vector.multi_reduction <add>, %409, %cst_153 [1] : vector<16x64xf32> to vector<16xf32>
    %415 = vector.shape_cast %414 : vector<16xf32> to vector<16x1xf32>
    %cst_154 = arith.constant 6.400000e+01 : f32
    %416 = vector.broadcast %cst_154 : f32 to vector<16x1xf32>
    %417 = arith.divf %415, %416 : vector<16x1xf32>
    %418 = vector.broadcast %417 : vector<16x1xf32> to vector<16x64xf32>
    %419 = arith.subf %409, %418 : vector<16x64xf32>
    %420 = arith.mulf %419, %419 : vector<16x64xf32>
    %cst_155 = arith.constant dense<0.000000e+00> : vector<16xf32>
    %421 = vector.multi_reduction <add>, %420, %cst_155 [1] : vector<16x64xf32> to vector<16xf32>
    %422 = vector.shape_cast %421 : vector<16xf32> to vector<16x1xf32>
    %cst_156 = arith.constant 6.400000e+01 : f32
    %423 = vector.broadcast %cst_156 : f32 to vector<16x1xf32>
    %424 = arith.divf %422, %423 : vector<16x1xf32>
    %425 = vector.broadcast %417 : vector<16x1xf32> to vector<16x64xf32>
    %426 = arith.subf %409, %425 : vector<16x64xf32>
    %cst_157 = arith.constant 9.99999974E-6 : f32
    %427 = vector.broadcast %cst_157 : f32 to vector<16x1xf32>
    %428 = arith.addf %424, %427 : vector<16x1xf32>
    %429 = math.rsqrt %428 : vector<16x1xf32>
    %430 = vector.broadcast %429 : vector<16x1xf32> to vector<16x64xf32>
    %431 = arith.mulf %426, %430 : vector<16x64xf32>
    %432 = vector.broadcast %411 : vector<1x64xf32> to vector<16x64xf32>
    %433 = arith.mulf %431, %432 : vector<16x64xf32>
    %434 = vector.broadcast %413 : vector<1x64xf32> to vector<16x64xf32>
    %435 = arith.addf %433, %434 : vector<16x64xf32>
    %c1_158 = arith.constant 1 : index
    %c0_159 = arith.constant 0 : index
    %c0_160 = arith.constant 0 : index
    %436 = vector.load %arg9[%c1_158, %c0_159, %c0_160] : memref<2x64x256xbf16, #tpu.memory_space<vmem>>, vector<1x64x256xbf16>
    %437 = vector.shape_cast %436 : vector<1x64x256xbf16> to vector<64x256xbf16>
    %c1_161 = arith.constant 1 : index
    %c0_162 = arith.constant 0 : index
    %c0_163 = arith.constant 0 : index
    %438 = vector.load %arg10[%c1_161, %c0_162, %c0_163] : memref<2x1x256xf32, #tpu.memory_space<vmem>>, vector<1x1x256xf32>
    %439 = vector.shape_cast %438 : vector<1x1x256xf32> to vector<1x256xf32>
    %c1_164 = arith.constant 1 : index
    %c0_165 = arith.constant 0 : index
    %c0_166 = arith.constant 0 : index
    %440 = vector.load %arg11[%c1_164, %c0_165, %c0_166] : memref<2x256x64xbf16, #tpu.memory_space<vmem>>, vector<1x256x64xbf16>
    %441 = vector.shape_cast %440 : vector<1x256x64xbf16> to vector<256x64xbf16>
    %c1_167 = arith.constant 1 : index
    %c0_168 = arith.constant 0 : index
    %c0_169 = arith.constant 0 : index
    %442 = vector.load %arg12[%c1_167, %c0_168, %c0_169] : memref<2x1x64xf32, #tpu.memory_space<vmem>>, vector<1x1x64xf32>
    %443 = vector.shape_cast %442 : vector<1x1x64xf32> to vector<1x64xf32>
    %444 = arith.truncf %435 : vector<16x64xf32> to vector<16x64xbf16>
    %cst_170 = arith.constant dense<0.000000e+00> : vector<16x256xf32>
    %445 = tpu.matmul %444, %437, %cst_170 {dimension_numbers = #tpu.dot_dimension_numbers<[1], [0], [0], [1], [0, 0, 1, 1], [], []>} : vector<16x64xbf16>, vector<64x256xbf16>, vector<16x256xf32> -> vector<16x256xf32>
    %446 = vector.broadcast %439 : vector<1x256xf32> to vector<16x256xf32>
    %447 = arith.addf %445, %446 : vector<16x256xf32>
    %cst_171 = arith.constant 0.000000e+00 : f32
    %448 = vector.broadcast %cst_171 : f32 to vector<16x256xf32>
    %449 = arith.maximumf %447, %448 : vector<16x256xf32>
    %450 = arith.truncf %449 : vector<16x256xf32> to vector<16x256xbf16>
    %cst_172 = arith.constant dense<0.000000e+00> : vector<16x64xf32>
    %451 = tpu.matmul %450, %441, %cst_172 {dimension_numbers = #tpu.dot_dimension_numbers<[1], [0], [0], [1], [0, 0, 1, 1], [], []>} : vector<16x256xbf16>, vector<256x64xbf16>, vector<16x64xf32> -> vector<16x64xf32>
    %452 = vector.broadcast %443 : vector<1x64xf32> to vector<16x64xf32>
    %453 = arith.addf %451, %452 : vector<16x64xf32>
    %454 = arith.addf %435, %453 : vector<16x64xf32>
    %c1_173 = arith.constant 1 : index
    %c0_174 = arith.constant 0 : index
    %c0_175 = arith.constant 0 : index
    %455 = vector.load %arg13[%c1_173, %c0_174, %c0_175] : memref<2x1x64xf32, #tpu.memory_space<vmem>>, vector<1x1x64xf32>
    %456 = vector.shape_cast %455 : vector<1x1x64xf32> to vector<1x64xf32>
    %c1_176 = arith.constant 1 : index
    %c0_177 = arith.constant 0 : index
    %c0_178 = arith.constant 0 : index
    %457 = vector.load %arg14[%c1_176, %c0_177, %c0_178] : memref<2x1x64xf32, #tpu.memory_space<vmem>>, vector<1x1x64xf32>
    %458 = vector.shape_cast %457 : vector<1x1x64xf32> to vector<1x64xf32>
    %cst_179 = arith.constant dense<0.000000e+00> : vector<16xf32>
    %459 = vector.multi_reduction <add>, %454, %cst_179 [1] : vector<16x64xf32> to vector<16xf32>
    %460 = vector.shape_cast %459 : vector<16xf32> to vector<16x1xf32>
    %cst_180 = arith.constant 6.400000e+01 : f32
    %461 = vector.broadcast %cst_180 : f32 to vector<16x1xf32>
    %462 = arith.divf %460, %461 : vector<16x1xf32>
    %463 = vector.broadcast %462 : vector<16x1xf32> to vector<16x64xf32>
    %464 = arith.subf %454, %463 : vector<16x64xf32>
    %465 = arith.mulf %464, %464 : vector<16x64xf32>
    %cst_181 = arith.constant dense<0.000000e+00> : vector<16xf32>
    %466 = vector.multi_reduction <add>, %465, %cst_181 [1] : vector<16x64xf32> to vector<16xf32>
    %467 = vector.shape_cast %466 : vector<16xf32> to vector<16x1xf32>
    %cst_182 = arith.constant 6.400000e+01 : f32
    %468 = vector.broadcast %cst_182 : f32 to vector<16x1xf32>
    %469 = arith.divf %467, %468 : vector<16x1xf32>
    %470 = vector.broadcast %462 : vector<16x1xf32> to vector<16x64xf32>
    %471 = arith.subf %454, %470 : vector<16x64xf32>
    %cst_183 = arith.constant 9.99999974E-6 : f32
    %472 = vector.broadcast %cst_183 : f32 to vector<16x1xf32>
    %473 = arith.addf %469, %472 : vector<16x1xf32>
    %474 = math.rsqrt %473 : vector<16x1xf32>
    %475 = vector.broadcast %474 : vector<16x1xf32> to vector<16x64xf32>
    %476 = arith.mulf %471, %475 : vector<16x64xf32>
    %477 = vector.broadcast %456 : vector<1x64xf32> to vector<16x64xf32>
    %478 = arith.mulf %476, %477 : vector<16x64xf32>
    %479 = vector.broadcast %458 : vector<1x64xf32> to vector<16x64xf32>
    %480 = arith.addf %478, %479 : vector<16x64xf32>
    %c0_184 = arith.constant 0 : index
    %c0_185 = arith.constant 0 : index
    %481 = vector.load %arg35[%c0_184, %c0_185] : memref<1x64xf32, #tpu.memory_space<vmem>>, vector<1x64xf32>
    %c0_186 = arith.constant 0 : index
    %c0_187 = arith.constant 0 : index
    %482 = vector.load %arg36[%c0_186, %c0_187] : memref<1x64xf32, #tpu.memory_space<vmem>>, vector<1x64xf32>
    %cst_188 = arith.constant dense<0.000000e+00> : vector<16xf32>
    %483 = vector.multi_reduction <add>, %480, %cst_188 [1] : vector<16x64xf32> to vector<16xf32>
    %484 = vector.shape_cast %483 : vector<16xf32> to vector<16x1xf32>
    %cst_189 = arith.constant 6.400000e+01 : f32
    %485 = vector.broadcast %cst_189 : f32 to vector<16x1xf32>
    %486 = arith.divf %484, %485 : vector<16x1xf32>
    %487 = vector.broadcast %486 : vector<16x1xf32> to vector<16x64xf32>
    %488 = arith.subf %480, %487 : vector<16x64xf32>
    %489 = arith.mulf %488, %488 : vector<16x64xf32>
    %cst_190 = arith.constant dense<0.000000e+00> : vector<16xf32>
    %490 = vector.multi_reduction <add>, %489, %cst_190 [1] : vector<16x64xf32> to vector<16xf32>
    %491 = vector.shape_cast %490 : vector<16xf32> to vector<16x1xf32>
    %cst_191 = arith.constant 6.400000e+01 : f32
    %492 = vector.broadcast %cst_191 : f32 to vector<16x1xf32>
    %493 = arith.divf %491, %492 : vector<16x1xf32>
    %494 = vector.broadcast %486 : vector<16x1xf32> to vector<16x64xf32>
    %495 = arith.subf %480, %494 : vector<16x64xf32>
    %cst_192 = arith.constant 9.99999974E-6 : f32
    %496 = vector.broadcast %cst_192 : f32 to vector<16x1xf32>
    %497 = arith.addf %493, %496 : vector<16x1xf32>
    %498 = math.rsqrt %497 : vector<16x1xf32>
    %499 = vector.broadcast %498 : vector<16x1xf32> to vector<16x64xf32>
    %500 = arith.mulf %495, %499 : vector<16x64xf32>
    %501 = vector.broadcast %481 : vector<1x64xf32> to vector<16x64xf32>
    %502 = arith.mulf %500, %501 : vector<16x64xf32>
    %503 = vector.broadcast %482 : vector<1x64xf32> to vector<16x64xf32>
    %504 = arith.addf %502, %503 : vector<16x64xf32>
    %505 = arith.truncf %504 : vector<16x64xf32> to vector<16x64xbf16>
    %506 = arith.truncf %1 : vector<16x64xf32> to vector<16x64xbf16>
    %c0_193 = arith.constant 0 : index
    %c0_194 = arith.constant 0 : index
    %c0_195 = arith.constant 0 : index
    %507 = vector.load %arg15[%c0_193, %c0_194, %c0_195] : memref<2x64x192xbf16, #tpu.memory_space<vmem>>, vector<1x64x192xbf16>
    %508 = vector.shape_cast %507 : vector<1x64x192xbf16> to vector<64x192xbf16>
    %cst_196 = arith.constant dense<0.000000e+00> : vector<16x192xf32>
    %509 = tpu.matmul %506, %508, %cst_196 {dimension_numbers = #tpu.dot_dimension_numbers<[1], [0], [0], [1], [0, 0, 1, 1], [], []>} : vector<16x64xbf16>, vector<64x192xbf16>, vector<16x192xf32> -> vector<16x192xf32>
    %c0_197 = arith.constant 0 : index
    %c0_198 = arith.constant 0 : index
    %c0_199 = arith.constant 0 : index
    %510 = vector.load %arg16[%c0_197, %c0_198, %c0_199] : memref<2x1x192xf32, #tpu.memory_space<vmem>>, vector<1x1x192xf32>
    %511 = vector.shape_cast %510 : vector<1x1x192xf32> to vector<1x192xf32>
    %512 = vector.broadcast %511 : vector<1x192xf32> to vector<16x192xf32>
    %513 = arith.addf %509, %512 : vector<16x192xf32>
    %514 = vector.extract_strided_slice %513 {offsets = [0, 0], sizes = [16, 64], strides = [1, 1]} : vector<16x192xf32> to vector<16x64xf32>
    %515 = vector.extract_strided_slice %513 {offsets = [0, 64], sizes = [16, 64], strides = [1, 1]} : vector<16x192xf32> to vector<16x64xf32>
    %516 = vector.extract_strided_slice %513 {offsets = [0, 128], sizes = [16, 64], strides = [1, 1]} : vector<16x192xf32> to vector<16x64xf32>
    %c0_200 = arith.constant 0 : index
    %c0_201 = arith.constant 0 : index
    %c0_202 = arith.constant 0 : index
    %517 = vector.load %arg17[%c0_200, %c0_201, %c0_202] : memref<2x64x64xbf16, #tpu.memory_space<vmem>>, vector<1x64x64xbf16>
    %518 = vector.shape_cast %517 : vector<1x64x64xbf16> to vector<64x64xbf16>
    %c0_203 = arith.constant 0 : index
    %c0_204 = arith.constant 0 : index
    %c0_205 = arith.constant 0 : index
    %519 = vector.load %arg18[%c0_203, %c0_204, %c0_205] : memref<2x1x64xf32, #tpu.memory_space<vmem>>, vector<1x1x64xf32>
    %520 = vector.shape_cast %519 : vector<1x1x64xf32> to vector<1x64xf32>
    %521 = arith.truncf %514 : vector<16x64xf32> to vector<16x64xbf16>
    %522 = arith.truncf %515 : vector<16x64xf32> to vector<16x64xbf16>
    %523 = arith.truncf %516 : vector<16x64xf32> to vector<16x64xbf16>
    %524 = vector.extract_strided_slice %521 {offsets = [0, 0], sizes = [16, 8], strides = [1, 1]} : vector<16x64xbf16> to vector<16x8xbf16>
    %525 = vector.extract_strided_slice %522 {offsets = [0, 0], sizes = [16, 8], strides = [1, 1]} : vector<16x64xbf16> to vector<16x8xbf16>
    %cst_206 = arith.constant dense<0.000000e+00> : vector<16x16xf32>
    %526 = tpu.matmul %524, %525, %cst_206 {dimension_numbers = #tpu.dot_dimension_numbers<[1], [1], [0], [0], [0, 0, 1, 0], [], []>} : vector<16x8xbf16>, vector<16x8xbf16>, vector<16x16xf32> -> vector<16x16xf32>
    %cst_207 = arith.constant 0.353553385 : f32
    %527 = vector.broadcast %cst_207 : f32 to vector<16x16xf32>
    %528 = arith.mulf %526, %527 : vector<16x16xf32>
    %529 = arith.addf %528, %2 : vector<16x16xf32>
    %cst_208 = arith.constant dense<0xFF800000> : vector<16xf32>
    %530 = vector.multi_reduction <maximumf>, %529, %cst_208 [1] : vector<16x16xf32> to vector<16xf32>
    %531 = vector.shape_cast %530 : vector<16xf32> to vector<16x1xf32>
    %532 = vector.broadcast %531 : vector<16x1xf32> to vector<16x16xf32>
    %533 = arith.subf %529, %532 : vector<16x16xf32>
    %534 = math.exp %533 : vector<16x16xf32>
    %cst_209 = arith.constant dense<0.000000e+00> : vector<16xf32>
    %535 = vector.multi_reduction <add>, %534, %cst_209 [1] : vector<16x16xf32> to vector<16xf32>
    %536 = vector.shape_cast %535 : vector<16xf32> to vector<16x1xf32>
    %537 = tpu.reciprocal %536 {approx = true} : vector<16x1xf32> -> vector<16x1xf32>
    %538 = vector.broadcast %537 : vector<16x1xf32> to vector<16x16xf32>
    %539 = arith.mulf %534, %538 : vector<16x16xf32>
    %540 = arith.truncf %539 : vector<16x16xf32> to vector<16x16xbf16>
    %541 = vector.extract_strided_slice %523 {offsets = [0, 0], sizes = [16, 8], strides = [1, 1]} : vector<16x64xbf16> to vector<16x8xbf16>
    %cst_210 = arith.constant dense<0.000000e+00> : vector<16x8xf32>
    %542 = tpu.matmul %540, %541, %cst_210 {dimension_numbers = #tpu.dot_dimension_numbers<[1], [0], [0], [1], [0, 0, 1, 1], [], []>} : vector<16x16xbf16>, vector<16x8xbf16>, vector<16x8xf32> -> vector<16x8xf32>
    %543 = vector.extract_strided_slice %521 {offsets = [0, 8], sizes = [16, 8], strides = [1, 1]} : vector<16x64xbf16> to vector<16x8xbf16>
    %544 = vector.extract_strided_slice %522 {offsets = [0, 8], sizes = [16, 8], strides = [1, 1]} : vector<16x64xbf16> to vector<16x8xbf16>
    %cst_211 = arith.constant dense<0.000000e+00> : vector<16x16xf32>
    %545 = tpu.matmul %543, %544, %cst_211 {dimension_numbers = #tpu.dot_dimension_numbers<[1], [1], [0], [0], [0, 0, 1, 0], [], []>} : vector<16x8xbf16>, vector<16x8xbf16>, vector<16x16xf32> -> vector<16x16xf32>
    %cst_212 = arith.constant 0.353553385 : f32
    %546 = vector.broadcast %cst_212 : f32 to vector<16x16xf32>
    %547 = arith.mulf %545, %546 : vector<16x16xf32>
    %548 = arith.addf %547, %2 : vector<16x16xf32>
    %cst_213 = arith.constant dense<0xFF800000> : vector<16xf32>
    %549 = vector.multi_reduction <maximumf>, %548, %cst_213 [1] : vector<16x16xf32> to vector<16xf32>
    %550 = vector.shape_cast %549 : vector<16xf32> to vector<16x1xf32>
    %551 = vector.broadcast %550 : vector<16x1xf32> to vector<16x16xf32>
    %552 = arith.subf %548, %551 : vector<16x16xf32>
    %553 = math.exp %552 : vector<16x16xf32>
    %cst_214 = arith.constant dense<0.000000e+00> : vector<16xf32>
    %554 = vector.multi_reduction <add>, %553, %cst_214 [1] : vector<16x16xf32> to vector<16xf32>
    %555 = vector.shape_cast %554 : vector<16xf32> to vector<16x1xf32>
    %556 = tpu.reciprocal %555 {approx = true} : vector<16x1xf32> -> vector<16x1xf32>
    %557 = vector.broadcast %556 : vector<16x1xf32> to vector<16x16xf32>
    %558 = arith.mulf %553, %557 : vector<16x16xf32>
    %559 = arith.truncf %558 : vector<16x16xf32> to vector<16x16xbf16>
    %560 = vector.extract_strided_slice %523 {offsets = [0, 8], sizes = [16, 8], strides = [1, 1]} : vector<16x64xbf16> to vector<16x8xbf16>
    %cst_215 = arith.constant dense<0.000000e+00> : vector<16x8xf32>
    %561 = tpu.matmul %559, %560, %cst_215 {dimension_numbers = #tpu.dot_dimension_numbers<[1], [0], [0], [1], [0, 0, 1, 1], [], []>} : vector<16x16xbf16>, vector<16x8xbf16>, vector<16x8xf32> -> vector<16x8xf32>
    %562 = vector.extract_strided_slice %521 {offsets = [0, 16], sizes = [16, 8], strides = [1, 1]} : vector<16x64xbf16> to vector<16x8xbf16>
    %563 = vector.extract_strided_slice %522 {offsets = [0, 16], sizes = [16, 8], strides = [1, 1]} : vector<16x64xbf16> to vector<16x8xbf16>
    %cst_216 = arith.constant dense<0.000000e+00> : vector<16x16xf32>
    %564 = tpu.matmul %562, %563, %cst_216 {dimension_numbers = #tpu.dot_dimension_numbers<[1], [1], [0], [0], [0, 0, 1, 0], [], []>} : vector<16x8xbf16>, vector<16x8xbf16>, vector<16x16xf32> -> vector<16x16xf32>
    %cst_217 = arith.constant 0.353553385 : f32
    %565 = vector.broadcast %cst_217 : f32 to vector<16x16xf32>
    %566 = arith.mulf %564, %565 : vector<16x16xf32>
    %567 = arith.addf %566, %2 : vector<16x16xf32>
    %cst_218 = arith.constant dense<0xFF800000> : vector<16xf32>
    %568 = vector.multi_reduction <maximumf>, %567, %cst_218 [1] : vector<16x16xf32> to vector<16xf32>
    %569 = vector.shape_cast %568 : vector<16xf32> to vector<16x1xf32>
    %570 = vector.broadcast %569 : vector<16x1xf32> to vector<16x16xf32>
    %571 = arith.subf %567, %570 : vector<16x16xf32>
    %572 = math.exp %571 : vector<16x16xf32>
    %cst_219 = arith.constant dense<0.000000e+00> : vector<16xf32>
    %573 = vector.multi_reduction <add>, %572, %cst_219 [1] : vector<16x16xf32> to vector<16xf32>
    %574 = vector.shape_cast %573 : vector<16xf32> to vector<16x1xf32>
    %575 = tpu.reciprocal %574 {approx = true} : vector<16x1xf32> -> vector<16x1xf32>
    %576 = vector.broadcast %575 : vector<16x1xf32> to vector<16x16xf32>
    %577 = arith.mulf %572, %576 : vector<16x16xf32>
    %578 = arith.truncf %577 : vector<16x16xf32> to vector<16x16xbf16>
    %579 = vector.extract_strided_slice %523 {offsets = [0, 16], sizes = [16, 8], strides = [1, 1]} : vector<16x64xbf16> to vector<16x8xbf16>
    %cst_220 = arith.constant dense<0.000000e+00> : vector<16x8xf32>
    %580 = tpu.matmul %578, %579, %cst_220 {dimension_numbers = #tpu.dot_dimension_numbers<[1], [0], [0], [1], [0, 0, 1, 1], [], []>} : vector<16x16xbf16>, vector<16x8xbf16>, vector<16x8xf32> -> vector<16x8xf32>
    %581 = vector.extract_strided_slice %521 {offsets = [0, 24], sizes = [16, 8], strides = [1, 1]} : vector<16x64xbf16> to vector<16x8xbf16>
    %582 = vector.extract_strided_slice %522 {offsets = [0, 24], sizes = [16, 8], strides = [1, 1]} : vector<16x64xbf16> to vector<16x8xbf16>
    %cst_221 = arith.constant dense<0.000000e+00> : vector<16x16xf32>
    %583 = tpu.matmul %581, %582, %cst_221 {dimension_numbers = #tpu.dot_dimension_numbers<[1], [1], [0], [0], [0, 0, 1, 0], [], []>} : vector<16x8xbf16>, vector<16x8xbf16>, vector<16x16xf32> -> vector<16x16xf32>
    %cst_222 = arith.constant 0.353553385 : f32
    %584 = vector.broadcast %cst_222 : f32 to vector<16x16xf32>
    %585 = arith.mulf %583, %584 : vector<16x16xf32>
    %586 = arith.addf %585, %2 : vector<16x16xf32>
    %cst_223 = arith.constant dense<0xFF800000> : vector<16xf32>
    %587 = vector.multi_reduction <maximumf>, %586, %cst_223 [1] : vector<16x16xf32> to vector<16xf32>
    %588 = vector.shape_cast %587 : vector<16xf32> to vector<16x1xf32>
    %589 = vector.broadcast %588 : vector<16x1xf32> to vector<16x16xf32>
    %590 = arith.subf %586, %589 : vector<16x16xf32>
    %591 = math.exp %590 : vector<16x16xf32>
    %cst_224 = arith.constant dense<0.000000e+00> : vector<16xf32>
    %592 = vector.multi_reduction <add>, %591, %cst_224 [1] : vector<16x16xf32> to vector<16xf32>
    %593 = vector.shape_cast %592 : vector<16xf32> to vector<16x1xf32>
    %594 = tpu.reciprocal %593 {approx = true} : vector<16x1xf32> -> vector<16x1xf32>
    %595 = vector.broadcast %594 : vector<16x1xf32> to vector<16x16xf32>
    %596 = arith.mulf %591, %595 : vector<16x16xf32>
    %597 = arith.truncf %596 : vector<16x16xf32> to vector<16x16xbf16>
    %598 = vector.extract_strided_slice %523 {offsets = [0, 24], sizes = [16, 8], strides = [1, 1]} : vector<16x64xbf16> to vector<16x8xbf16>
    %cst_225 = arith.constant dense<0.000000e+00> : vector<16x8xf32>
    %599 = tpu.matmul %597, %598, %cst_225 {dimension_numbers = #tpu.dot_dimension_numbers<[1], [0], [0], [1], [0, 0, 1, 1], [], []>} : vector<16x16xbf16>, vector<16x8xbf16>, vector<16x8xf32> -> vector<16x8xf32>
    %600 = vector.extract_strided_slice %521 {offsets = [0, 32], sizes = [16, 8], strides = [1, 1]} : vector<16x64xbf16> to vector<16x8xbf16>
    %601 = vector.extract_strided_slice %522 {offsets = [0, 32], sizes = [16, 8], strides = [1, 1]} : vector<16x64xbf16> to vector<16x8xbf16>
    %cst_226 = arith.constant dense<0.000000e+00> : vector<16x16xf32>
    %602 = tpu.matmul %600, %601, %cst_226 {dimension_numbers = #tpu.dot_dimension_numbers<[1], [1], [0], [0], [0, 0, 1, 0], [], []>} : vector<16x8xbf16>, vector<16x8xbf16>, vector<16x16xf32> -> vector<16x16xf32>
    %cst_227 = arith.constant 0.353553385 : f32
    %603 = vector.broadcast %cst_227 : f32 to vector<16x16xf32>
    %604 = arith.mulf %602, %603 : vector<16x16xf32>
    %605 = arith.addf %604, %2 : vector<16x16xf32>
    %cst_228 = arith.constant dense<0xFF800000> : vector<16xf32>
    %606 = vector.multi_reduction <maximumf>, %605, %cst_228 [1] : vector<16x16xf32> to vector<16xf32>
    %607 = vector.shape_cast %606 : vector<16xf32> to vector<16x1xf32>
    %608 = vector.broadcast %607 : vector<16x1xf32> to vector<16x16xf32>
    %609 = arith.subf %605, %608 : vector<16x16xf32>
    %610 = math.exp %609 : vector<16x16xf32>
    %cst_229 = arith.constant dense<0.000000e+00> : vector<16xf32>
    %611 = vector.multi_reduction <add>, %610, %cst_229 [1] : vector<16x16xf32> to vector<16xf32>
    %612 = vector.shape_cast %611 : vector<16xf32> to vector<16x1xf32>
    %613 = tpu.reciprocal %612 {approx = true} : vector<16x1xf32> -> vector<16x1xf32>
    %614 = vector.broadcast %613 : vector<16x1xf32> to vector<16x16xf32>
    %615 = arith.mulf %610, %614 : vector<16x16xf32>
    %616 = arith.truncf %615 : vector<16x16xf32> to vector<16x16xbf16>
    %617 = vector.extract_strided_slice %523 {offsets = [0, 32], sizes = [16, 8], strides = [1, 1]} : vector<16x64xbf16> to vector<16x8xbf16>
    %cst_230 = arith.constant dense<0.000000e+00> : vector<16x8xf32>
    %618 = tpu.matmul %616, %617, %cst_230 {dimension_numbers = #tpu.dot_dimension_numbers<[1], [0], [0], [1], [0, 0, 1, 1], [], []>} : vector<16x16xbf16>, vector<16x8xbf16>, vector<16x8xf32> -> vector<16x8xf32>
    %619 = vector.extract_strided_slice %521 {offsets = [0, 40], sizes = [16, 8], strides = [1, 1]} : vector<16x64xbf16> to vector<16x8xbf16>
    %620 = vector.extract_strided_slice %522 {offsets = [0, 40], sizes = [16, 8], strides = [1, 1]} : vector<16x64xbf16> to vector<16x8xbf16>
    %cst_231 = arith.constant dense<0.000000e+00> : vector<16x16xf32>
    %621 = tpu.matmul %619, %620, %cst_231 {dimension_numbers = #tpu.dot_dimension_numbers<[1], [1], [0], [0], [0, 0, 1, 0], [], []>} : vector<16x8xbf16>, vector<16x8xbf16>, vector<16x16xf32> -> vector<16x16xf32>
    %cst_232 = arith.constant 0.353553385 : f32
    %622 = vector.broadcast %cst_232 : f32 to vector<16x16xf32>
    %623 = arith.mulf %621, %622 : vector<16x16xf32>
    %624 = arith.addf %623, %2 : vector<16x16xf32>
    %cst_233 = arith.constant dense<0xFF800000> : vector<16xf32>
    %625 = vector.multi_reduction <maximumf>, %624, %cst_233 [1] : vector<16x16xf32> to vector<16xf32>
    %626 = vector.shape_cast %625 : vector<16xf32> to vector<16x1xf32>
    %627 = vector.broadcast %626 : vector<16x1xf32> to vector<16x16xf32>
    %628 = arith.subf %624, %627 : vector<16x16xf32>
    %629 = math.exp %628 : vector<16x16xf32>
    %cst_234 = arith.constant dense<0.000000e+00> : vector<16xf32>
    %630 = vector.multi_reduction <add>, %629, %cst_234 [1] : vector<16x16xf32> to vector<16xf32>
    %631 = vector.shape_cast %630 : vector<16xf32> to vector<16x1xf32>
    %632 = tpu.reciprocal %631 {approx = true} : vector<16x1xf32> -> vector<16x1xf32>
    %633 = vector.broadcast %632 : vector<16x1xf32> to vector<16x16xf32>
    %634 = arith.mulf %629, %633 : vector<16x16xf32>
    %635 = arith.truncf %634 : vector<16x16xf32> to vector<16x16xbf16>
    %636 = vector.extract_strided_slice %523 {offsets = [0, 40], sizes = [16, 8], strides = [1, 1]} : vector<16x64xbf16> to vector<16x8xbf16>
    %cst_235 = arith.constant dense<0.000000e+00> : vector<16x8xf32>
    %637 = tpu.matmul %635, %636, %cst_235 {dimension_numbers = #tpu.dot_dimension_numbers<[1], [0], [0], [1], [0, 0, 1, 1], [], []>} : vector<16x16xbf16>, vector<16x8xbf16>, vector<16x8xf32> -> vector<16x8xf32>
    %638 = vector.extract_strided_slice %521 {offsets = [0, 48], sizes = [16, 8], strides = [1, 1]} : vector<16x64xbf16> to vector<16x8xbf16>
    %639 = vector.extract_strided_slice %522 {offsets = [0, 48], sizes = [16, 8], strides = [1, 1]} : vector<16x64xbf16> to vector<16x8xbf16>
    %cst_236 = arith.constant dense<0.000000e+00> : vector<16x16xf32>
    %640 = tpu.matmul %638, %639, %cst_236 {dimension_numbers = #tpu.dot_dimension_numbers<[1], [1], [0], [0], [0, 0, 1, 0], [], []>} : vector<16x8xbf16>, vector<16x8xbf16>, vector<16x16xf32> -> vector<16x16xf32>
    %cst_237 = arith.constant 0.353553385 : f32
    %641 = vector.broadcast %cst_237 : f32 to vector<16x16xf32>
    %642 = arith.mulf %640, %641 : vector<16x16xf32>
    %643 = arith.addf %642, %2 : vector<16x16xf32>
    %cst_238 = arith.constant dense<0xFF800000> : vector<16xf32>
    %644 = vector.multi_reduction <maximumf>, %643, %cst_238 [1] : vector<16x16xf32> to vector<16xf32>
    %645 = vector.shape_cast %644 : vector<16xf32> to vector<16x1xf32>
    %646 = vector.broadcast %645 : vector<16x1xf32> to vector<16x16xf32>
    %647 = arith.subf %643, %646 : vector<16x16xf32>
    %648 = math.exp %647 : vector<16x16xf32>
    %cst_239 = arith.constant dense<0.000000e+00> : vector<16xf32>
    %649 = vector.multi_reduction <add>, %648, %cst_239 [1] : vector<16x16xf32> to vector<16xf32>
    %650 = vector.shape_cast %649 : vector<16xf32> to vector<16x1xf32>
    %651 = tpu.reciprocal %650 {approx = true} : vector<16x1xf32> -> vector<16x1xf32>
    %652 = vector.broadcast %651 : vector<16x1xf32> to vector<16x16xf32>
    %653 = arith.mulf %648, %652 : vector<16x16xf32>
    %654 = arith.truncf %653 : vector<16x16xf32> to vector<16x16xbf16>
    %655 = vector.extract_strided_slice %523 {offsets = [0, 48], sizes = [16, 8], strides = [1, 1]} : vector<16x64xbf16> to vector<16x8xbf16>
    %cst_240 = arith.constant dense<0.000000e+00> : vector<16x8xf32>
    %656 = tpu.matmul %654, %655, %cst_240 {dimension_numbers = #tpu.dot_dimension_numbers<[1], [0], [0], [1], [0, 0, 1, 1], [], []>} : vector<16x16xbf16>, vector<16x8xbf16>, vector<16x8xf32> -> vector<16x8xf32>
    %657 = vector.extract_strided_slice %521 {offsets = [0, 56], sizes = [16, 8], strides = [1, 1]} : vector<16x64xbf16> to vector<16x8xbf16>
    %658 = vector.extract_strided_slice %522 {offsets = [0, 56], sizes = [16, 8], strides = [1, 1]} : vector<16x64xbf16> to vector<16x8xbf16>
    %cst_241 = arith.constant dense<0.000000e+00> : vector<16x16xf32>
    %659 = tpu.matmul %657, %658, %cst_241 {dimension_numbers = #tpu.dot_dimension_numbers<[1], [1], [0], [0], [0, 0, 1, 0], [], []>} : vector<16x8xbf16>, vector<16x8xbf16>, vector<16x16xf32> -> vector<16x16xf32>
    %cst_242 = arith.constant 0.353553385 : f32
    %660 = vector.broadcast %cst_242 : f32 to vector<16x16xf32>
    %661 = arith.mulf %659, %660 : vector<16x16xf32>
    %662 = arith.addf %661, %2 : vector<16x16xf32>
    %cst_243 = arith.constant dense<0xFF800000> : vector<16xf32>
    %663 = vector.multi_reduction <maximumf>, %662, %cst_243 [1] : vector<16x16xf32> to vector<16xf32>
    %664 = vector.shape_cast %663 : vector<16xf32> to vector<16x1xf32>
    %665 = vector.broadcast %664 : vector<16x1xf32> to vector<16x16xf32>
    %666 = arith.subf %662, %665 : vector<16x16xf32>
    %667 = math.exp %666 : vector<16x16xf32>
    %cst_244 = arith.constant dense<0.000000e+00> : vector<16xf32>
    %668 = vector.multi_reduction <add>, %667, %cst_244 [1] : vector<16x16xf32> to vector<16xf32>
    %669 = vector.shape_cast %668 : vector<16xf32> to vector<16x1xf32>
    %670 = tpu.reciprocal %669 {approx = true} : vector<16x1xf32> -> vector<16x1xf32>
    %671 = vector.broadcast %670 : vector<16x1xf32> to vector<16x16xf32>
    %672 = arith.mulf %667, %671 : vector<16x16xf32>
    %673 = arith.truncf %672 : vector<16x16xf32> to vector<16x16xbf16>
    %674 = vector.extract_strided_slice %523 {offsets = [0, 56], sizes = [16, 8], strides = [1, 1]} : vector<16x64xbf16> to vector<16x8xbf16>
    %cst_245 = arith.constant dense<0.000000e+00> : vector<16x8xf32>
    %675 = tpu.matmul %673, %674, %cst_245 {dimension_numbers = #tpu.dot_dimension_numbers<[1], [0], [0], [1], [0, 0, 1, 1], [], []>} : vector<16x16xbf16>, vector<16x8xbf16>, vector<16x8xf32> -> vector<16x8xf32>
    %676 = tpu.concatenate %542, %561, %580, %599, %618, %637, %656, %675 in 1 : vector<16x8xf32>, vector<16x8xf32>, vector<16x8xf32>, vector<16x8xf32>, vector<16x8xf32>, vector<16x8xf32>, vector<16x8xf32>, vector<16x8xf32> -> vector<16x64xf32>
    %677 = arith.truncf %676 : vector<16x64xf32> to vector<16x64xbf16>
    %cst_246 = arith.constant dense<0.000000e+00> : vector<16x64xf32>
    %678 = tpu.matmul %677, %518, %cst_246 {dimension_numbers = #tpu.dot_dimension_numbers<[1], [0], [0], [1], [0, 0, 1, 1], [], []>} : vector<16x64xbf16>, vector<64x64xbf16>, vector<16x64xf32> -> vector<16x64xf32>
    %679 = vector.broadcast %520 : vector<1x64xf32> to vector<16x64xf32>
    %680 = arith.addf %678, %679 : vector<16x64xf32>
    %681 = arith.addf %1, %680 : vector<16x64xf32>
    %c0_247 = arith.constant 0 : index
    %c0_248 = arith.constant 0 : index
    %c0_249 = arith.constant 0 : index
    %682 = vector.load %arg19[%c0_247, %c0_248, %c0_249] : memref<2x1x64xf32, #tpu.memory_space<vmem>>, vector<1x1x64xf32>
    %683 = vector.shape_cast %682 : vector<1x1x64xf32> to vector<1x64xf32>
    %c0_250 = arith.constant 0 : index
    %c0_251 = arith.constant 0 : index
    %c0_252 = arith.constant 0 : index
    %684 = vector.load %arg20[%c0_250, %c0_251, %c0_252] : memref<2x1x64xf32, #tpu.memory_space<vmem>>, vector<1x1x64xf32>
    %685 = vector.shape_cast %684 : vector<1x1x64xf32> to vector<1x64xf32>
    %cst_253 = arith.constant dense<0.000000e+00> : vector<16xf32>
    %686 = vector.multi_reduction <add>, %681, %cst_253 [1] : vector<16x64xf32> to vector<16xf32>
    %687 = vector.shape_cast %686 : vector<16xf32> to vector<16x1xf32>
    %cst_254 = arith.constant 6.400000e+01 : f32
    %688 = vector.broadcast %cst_254 : f32 to vector<16x1xf32>
    %689 = arith.divf %687, %688 : vector<16x1xf32>
    %690 = vector.broadcast %689 : vector<16x1xf32> to vector<16x64xf32>
    %691 = arith.subf %681, %690 : vector<16x64xf32>
    %692 = arith.mulf %691, %691 : vector<16x64xf32>
    %cst_255 = arith.constant dense<0.000000e+00> : vector<16xf32>
    %693 = vector.multi_reduction <add>, %692, %cst_255 [1] : vector<16x64xf32> to vector<16xf32>
    %694 = vector.shape_cast %693 : vector<16xf32> to vector<16x1xf32>
    %cst_256 = arith.constant 6.400000e+01 : f32
    %695 = vector.broadcast %cst_256 : f32 to vector<16x1xf32>
    %696 = arith.divf %694, %695 : vector<16x1xf32>
    %697 = vector.broadcast %689 : vector<16x1xf32> to vector<16x64xf32>
    %698 = arith.subf %681, %697 : vector<16x64xf32>
    %cst_257 = arith.constant 9.99999974E-6 : f32
    %699 = vector.broadcast %cst_257 : f32 to vector<16x1xf32>
    %700 = arith.addf %696, %699 : vector<16x1xf32>
    %701 = math.rsqrt %700 : vector<16x1xf32>
    %702 = vector.broadcast %701 : vector<16x1xf32> to vector<16x64xf32>
    %703 = arith.mulf %698, %702 : vector<16x64xf32>
    %704 = vector.broadcast %683 : vector<1x64xf32> to vector<16x64xf32>
    %705 = arith.mulf %703, %704 : vector<16x64xf32>
    %706 = vector.broadcast %685 : vector<1x64xf32> to vector<16x64xf32>
    %707 = arith.addf %705, %706 : vector<16x64xf32>
    %708 = arith.truncf %707 : vector<16x64xf32> to vector<16x64xbf16>
    %c0_258 = arith.constant 0 : index
    %c0_259 = arith.constant 0 : index
    %c0_260 = arith.constant 0 : index
    %709 = vector.load %arg21[%c0_258, %c0_259, %c0_260] : memref<2x64x64xbf16, #tpu.memory_space<vmem>>, vector<1x64x64xbf16>
    %710 = vector.shape_cast %709 : vector<1x64x64xbf16> to vector<64x64xbf16>
    %cst_261 = arith.constant dense<0.000000e+00> : vector<16x64xf32>
    %711 = tpu.matmul %708, %710, %cst_261 {dimension_numbers = #tpu.dot_dimension_numbers<[1], [0], [0], [1], [0, 0, 1, 1], [], []>} : vector<16x64xbf16>, vector<64x64xbf16>, vector<16x64xf32> -> vector<16x64xf32>
    %c0_262 = arith.constant 0 : index
    %c0_263 = arith.constant 0 : index
    %c0_264 = arith.constant 0 : index
    %712 = vector.load %arg22[%c0_262, %c0_263, %c0_264] : memref<2x1x64xf32, #tpu.memory_space<vmem>>, vector<1x1x64xf32>
    %713 = vector.shape_cast %712 : vector<1x1x64xf32> to vector<1x64xf32>
    %714 = vector.broadcast %713 : vector<1x64xf32> to vector<16x64xf32>
    %715 = arith.addf %711, %714 : vector<16x64xf32>
    %c0_265 = arith.constant 0 : index
    %c0_266 = arith.constant 0 : index
    %c0_267 = arith.constant 0 : index
    %716 = vector.load %arg23[%c0_265, %c0_266, %c0_267] : memref<2x64x128xbf16, #tpu.memory_space<vmem>>, vector<1x64x128xbf16>
    %717 = vector.shape_cast %716 : vector<1x64x128xbf16> to vector<64x128xbf16>
    %cst_268 = arith.constant dense<0.000000e+00> : vector<16x128xf32>
    %718 = tpu.matmul %505, %717, %cst_268 {dimension_numbers = #tpu.dot_dimension_numbers<[1], [0], [0], [1], [0, 0, 1, 1], [], []>} : vector<16x64xbf16>, vector<64x128xbf16>, vector<16x128xf32> -> vector<16x128xf32>
    %c0_269 = arith.constant 0 : index
    %c0_270 = arith.constant 0 : index
    %c0_271 = arith.constant 0 : index
    %719 = vector.load %arg24[%c0_269, %c0_270, %c0_271] : memref<2x1x128xf32, #tpu.memory_space<vmem>>, vector<1x1x128xf32>
    %720 = vector.shape_cast %719 : vector<1x1x128xf32> to vector<1x128xf32>
    %721 = vector.broadcast %720 : vector<1x128xf32> to vector<16x128xf32>
    %722 = arith.addf %718, %721 : vector<16x128xf32>
    %723 = vector.extract_strided_slice %722 {offsets = [0, 0], sizes = [16, 64], strides = [1, 1]} : vector<16x128xf32> to vector<16x64xf32>
    %724 = vector.extract_strided_slice %722 {offsets = [0, 64], sizes = [16, 64], strides = [1, 1]} : vector<16x128xf32> to vector<16x64xf32>
    %c0_272 = arith.constant 0 : index
    %c0_273 = arith.constant 0 : index
    %c0_274 = arith.constant 0 : index
    %725 = vector.load %arg25[%c0_272, %c0_273, %c0_274] : memref<2x64x64xbf16, #tpu.memory_space<vmem>>, vector<1x64x64xbf16>
    %726 = vector.shape_cast %725 : vector<1x64x64xbf16> to vector<64x64xbf16>
    %c0_275 = arith.constant 0 : index
    %c0_276 = arith.constant 0 : index
    %c0_277 = arith.constant 0 : index
    %727 = vector.load %arg26[%c0_275, %c0_276, %c0_277] : memref<2x1x64xf32, #tpu.memory_space<vmem>>, vector<1x1x64xf32>
    %728 = vector.shape_cast %727 : vector<1x1x64xf32> to vector<1x64xf32>
    %729 = arith.truncf %715 : vector<16x64xf32> to vector<16x64xbf16>
    %730 = arith.truncf %723 : vector<16x64xf32> to vector<16x64xbf16>
    %731 = arith.truncf %724 : vector<16x64xf32> to vector<16x64xbf16>
    %732 = vector.extract_strided_slice %729 {offsets = [0, 0], sizes = [16, 8], strides = [1, 1]} : vector<16x64xbf16> to vector<16x8xbf16>
    %733 = vector.extract_strided_slice %730 {offsets = [0, 0], sizes = [16, 8], strides = [1, 1]} : vector<16x64xbf16> to vector<16x8xbf16>
    %cst_278 = arith.constant dense<0.000000e+00> : vector<16x16xf32>
    %734 = tpu.matmul %732, %733, %cst_278 {dimension_numbers = #tpu.dot_dimension_numbers<[1], [1], [0], [0], [0, 0, 1, 0], [], []>} : vector<16x8xbf16>, vector<16x8xbf16>, vector<16x16xf32> -> vector<16x16xf32>
    %cst_279 = arith.constant 0.353553385 : f32
    %735 = vector.broadcast %cst_279 : f32 to vector<16x16xf32>
    %736 = arith.mulf %734, %735 : vector<16x16xf32>
    %cst_280 = arith.constant dense<0xFF800000> : vector<16xf32>
    %737 = vector.multi_reduction <maximumf>, %736, %cst_280 [1] : vector<16x16xf32> to vector<16xf32>
    %738 = vector.shape_cast %737 : vector<16xf32> to vector<16x1xf32>
    %739 = vector.broadcast %738 : vector<16x1xf32> to vector<16x16xf32>
    %740 = arith.subf %736, %739 : vector<16x16xf32>
    %741 = math.exp %740 : vector<16x16xf32>
    %cst_281 = arith.constant dense<0.000000e+00> : vector<16xf32>
    %742 = vector.multi_reduction <add>, %741, %cst_281 [1] : vector<16x16xf32> to vector<16xf32>
    %743 = vector.shape_cast %742 : vector<16xf32> to vector<16x1xf32>
    %744 = tpu.reciprocal %743 {approx = true} : vector<16x1xf32> -> vector<16x1xf32>
    %745 = vector.broadcast %744 : vector<16x1xf32> to vector<16x16xf32>
    %746 = arith.mulf %741, %745 : vector<16x16xf32>
    %747 = arith.truncf %746 : vector<16x16xf32> to vector<16x16xbf16>
    %748 = vector.extract_strided_slice %731 {offsets = [0, 0], sizes = [16, 8], strides = [1, 1]} : vector<16x64xbf16> to vector<16x8xbf16>
    %cst_282 = arith.constant dense<0.000000e+00> : vector<16x8xf32>
    %749 = tpu.matmul %747, %748, %cst_282 {dimension_numbers = #tpu.dot_dimension_numbers<[1], [0], [0], [1], [0, 0, 1, 1], [], []>} : vector<16x16xbf16>, vector<16x8xbf16>, vector<16x8xf32> -> vector<16x8xf32>
    %750 = vector.extract_strided_slice %729 {offsets = [0, 8], sizes = [16, 8], strides = [1, 1]} : vector<16x64xbf16> to vector<16x8xbf16>
    %751 = vector.extract_strided_slice %730 {offsets = [0, 8], sizes = [16, 8], strides = [1, 1]} : vector<16x64xbf16> to vector<16x8xbf16>
    %cst_283 = arith.constant dense<0.000000e+00> : vector<16x16xf32>
    %752 = tpu.matmul %750, %751, %cst_283 {dimension_numbers = #tpu.dot_dimension_numbers<[1], [1], [0], [0], [0, 0, 1, 0], [], []>} : vector<16x8xbf16>, vector<16x8xbf16>, vector<16x16xf32> -> vector<16x16xf32>
    %cst_284 = arith.constant 0.353553385 : f32
    %753 = vector.broadcast %cst_284 : f32 to vector<16x16xf32>
    %754 = arith.mulf %752, %753 : vector<16x16xf32>
    %cst_285 = arith.constant dense<0xFF800000> : vector<16xf32>
    %755 = vector.multi_reduction <maximumf>, %754, %cst_285 [1] : vector<16x16xf32> to vector<16xf32>
    %756 = vector.shape_cast %755 : vector<16xf32> to vector<16x1xf32>
    %757 = vector.broadcast %756 : vector<16x1xf32> to vector<16x16xf32>
    %758 = arith.subf %754, %757 : vector<16x16xf32>
    %759 = math.exp %758 : vector<16x16xf32>
    %cst_286 = arith.constant dense<0.000000e+00> : vector<16xf32>
    %760 = vector.multi_reduction <add>, %759, %cst_286 [1] : vector<16x16xf32> to vector<16xf32>
    %761 = vector.shape_cast %760 : vector<16xf32> to vector<16x1xf32>
    %762 = tpu.reciprocal %761 {approx = true} : vector<16x1xf32> -> vector<16x1xf32>
    %763 = vector.broadcast %762 : vector<16x1xf32> to vector<16x16xf32>
    %764 = arith.mulf %759, %763 : vector<16x16xf32>
    %765 = arith.truncf %764 : vector<16x16xf32> to vector<16x16xbf16>
    %766 = vector.extract_strided_slice %731 {offsets = [0, 8], sizes = [16, 8], strides = [1, 1]} : vector<16x64xbf16> to vector<16x8xbf16>
    %cst_287 = arith.constant dense<0.000000e+00> : vector<16x8xf32>
    %767 = tpu.matmul %765, %766, %cst_287 {dimension_numbers = #tpu.dot_dimension_numbers<[1], [0], [0], [1], [0, 0, 1, 1], [], []>} : vector<16x16xbf16>, vector<16x8xbf16>, vector<16x8xf32> -> vector<16x8xf32>
    %768 = vector.extract_strided_slice %729 {offsets = [0, 16], sizes = [16, 8], strides = [1, 1]} : vector<16x64xbf16> to vector<16x8xbf16>
    %769 = vector.extract_strided_slice %730 {offsets = [0, 16], sizes = [16, 8], strides = [1, 1]} : vector<16x64xbf16> to vector<16x8xbf16>
    %cst_288 = arith.constant dense<0.000000e+00> : vector<16x16xf32>
    %770 = tpu.matmul %768, %769, %cst_288 {dimension_numbers = #tpu.dot_dimension_numbers<[1], [1], [0], [0], [0, 0, 1, 0], [], []>} : vector<16x8xbf16>, vector<16x8xbf16>, vector<16x16xf32> -> vector<16x16xf32>
    %cst_289 = arith.constant 0.353553385 : f32
    %771 = vector.broadcast %cst_289 : f32 to vector<16x16xf32>
    %772 = arith.mulf %770, %771 : vector<16x16xf32>
    %cst_290 = arith.constant dense<0xFF800000> : vector<16xf32>
    %773 = vector.multi_reduction <maximumf>, %772, %cst_290 [1] : vector<16x16xf32> to vector<16xf32>
    %774 = vector.shape_cast %773 : vector<16xf32> to vector<16x1xf32>
    %775 = vector.broadcast %774 : vector<16x1xf32> to vector<16x16xf32>
    %776 = arith.subf %772, %775 : vector<16x16xf32>
    %777 = math.exp %776 : vector<16x16xf32>
    %cst_291 = arith.constant dense<0.000000e+00> : vector<16xf32>
    %778 = vector.multi_reduction <add>, %777, %cst_291 [1] : vector<16x16xf32> to vector<16xf32>
    %779 = vector.shape_cast %778 : vector<16xf32> to vector<16x1xf32>
    %780 = tpu.reciprocal %779 {approx = true} : vector<16x1xf32> -> vector<16x1xf32>
    %781 = vector.broadcast %780 : vector<16x1xf32> to vector<16x16xf32>
    %782 = arith.mulf %777, %781 : vector<16x16xf32>
    %783 = arith.truncf %782 : vector<16x16xf32> to vector<16x16xbf16>
    %784 = vector.extract_strided_slice %731 {offsets = [0, 16], sizes = [16, 8], strides = [1, 1]} : vector<16x64xbf16> to vector<16x8xbf16>
    %cst_292 = arith.constant dense<0.000000e+00> : vector<16x8xf32>
    %785 = tpu.matmul %783, %784, %cst_292 {dimension_numbers = #tpu.dot_dimension_numbers<[1], [0], [0], [1], [0, 0, 1, 1], [], []>} : vector<16x16xbf16>, vector<16x8xbf16>, vector<16x8xf32> -> vector<16x8xf32>
    %786 = vector.extract_strided_slice %729 {offsets = [0, 24], sizes = [16, 8], strides = [1, 1]} : vector<16x64xbf16> to vector<16x8xbf16>
    %787 = vector.extract_strided_slice %730 {offsets = [0, 24], sizes = [16, 8], strides = [1, 1]} : vector<16x64xbf16> to vector<16x8xbf16>
    %cst_293 = arith.constant dense<0.000000e+00> : vector<16x16xf32>
    %788 = tpu.matmul %786, %787, %cst_293 {dimension_numbers = #tpu.dot_dimension_numbers<[1], [1], [0], [0], [0, 0, 1, 0], [], []>} : vector<16x8xbf16>, vector<16x8xbf16>, vector<16x16xf32> -> vector<16x16xf32>
    %cst_294 = arith.constant 0.353553385 : f32
    %789 = vector.broadcast %cst_294 : f32 to vector<16x16xf32>
    %790 = arith.mulf %788, %789 : vector<16x16xf32>
    %cst_295 = arith.constant dense<0xFF800000> : vector<16xf32>
    %791 = vector.multi_reduction <maximumf>, %790, %cst_295 [1] : vector<16x16xf32> to vector<16xf32>
    %792 = vector.shape_cast %791 : vector<16xf32> to vector<16x1xf32>
    %793 = vector.broadcast %792 : vector<16x1xf32> to vector<16x16xf32>
    %794 = arith.subf %790, %793 : vector<16x16xf32>
    %795 = math.exp %794 : vector<16x16xf32>
    %cst_296 = arith.constant dense<0.000000e+00> : vector<16xf32>
    %796 = vector.multi_reduction <add>, %795, %cst_296 [1] : vector<16x16xf32> to vector<16xf32>
    %797 = vector.shape_cast %796 : vector<16xf32> to vector<16x1xf32>
    %798 = tpu.reciprocal %797 {approx = true} : vector<16x1xf32> -> vector<16x1xf32>
    %799 = vector.broadcast %798 : vector<16x1xf32> to vector<16x16xf32>
    %800 = arith.mulf %795, %799 : vector<16x16xf32>
    %801 = arith.truncf %800 : vector<16x16xf32> to vector<16x16xbf16>
    %802 = vector.extract_strided_slice %731 {offsets = [0, 24], sizes = [16, 8], strides = [1, 1]} : vector<16x64xbf16> to vector<16x8xbf16>
    %cst_297 = arith.constant dense<0.000000e+00> : vector<16x8xf32>
    %803 = tpu.matmul %801, %802, %cst_297 {dimension_numbers = #tpu.dot_dimension_numbers<[1], [0], [0], [1], [0, 0, 1, 1], [], []>} : vector<16x16xbf16>, vector<16x8xbf16>, vector<16x8xf32> -> vector<16x8xf32>
    %804 = vector.extract_strided_slice %729 {offsets = [0, 32], sizes = [16, 8], strides = [1, 1]} : vector<16x64xbf16> to vector<16x8xbf16>
    %805 = vector.extract_strided_slice %730 {offsets = [0, 32], sizes = [16, 8], strides = [1, 1]} : vector<16x64xbf16> to vector<16x8xbf16>
    %cst_298 = arith.constant dense<0.000000e+00> : vector<16x16xf32>
    %806 = tpu.matmul %804, %805, %cst_298 {dimension_numbers = #tpu.dot_dimension_numbers<[1], [1], [0], [0], [0, 0, 1, 0], [], []>} : vector<16x8xbf16>, vector<16x8xbf16>, vector<16x16xf32> -> vector<16x16xf32>
    %cst_299 = arith.constant 0.353553385 : f32
    %807 = vector.broadcast %cst_299 : f32 to vector<16x16xf32>
    %808 = arith.mulf %806, %807 : vector<16x16xf32>
    %cst_300 = arith.constant dense<0xFF800000> : vector<16xf32>
    %809 = vector.multi_reduction <maximumf>, %808, %cst_300 [1] : vector<16x16xf32> to vector<16xf32>
    %810 = vector.shape_cast %809 : vector<16xf32> to vector<16x1xf32>
    %811 = vector.broadcast %810 : vector<16x1xf32> to vector<16x16xf32>
    %812 = arith.subf %808, %811 : vector<16x16xf32>
    %813 = math.exp %812 : vector<16x16xf32>
    %cst_301 = arith.constant dense<0.000000e+00> : vector<16xf32>
    %814 = vector.multi_reduction <add>, %813, %cst_301 [1] : vector<16x16xf32> to vector<16xf32>
    %815 = vector.shape_cast %814 : vector<16xf32> to vector<16x1xf32>
    %816 = tpu.reciprocal %815 {approx = true} : vector<16x1xf32> -> vector<16x1xf32>
    %817 = vector.broadcast %816 : vector<16x1xf32> to vector<16x16xf32>
    %818 = arith.mulf %813, %817 : vector<16x16xf32>
    %819 = arith.truncf %818 : vector<16x16xf32> to vector<16x16xbf16>
    %820 = vector.extract_strided_slice %731 {offsets = [0, 32], sizes = [16, 8], strides = [1, 1]} : vector<16x64xbf16> to vector<16x8xbf16>
    %cst_302 = arith.constant dense<0.000000e+00> : vector<16x8xf32>
    %821 = tpu.matmul %819, %820, %cst_302 {dimension_numbers = #tpu.dot_dimension_numbers<[1], [0], [0], [1], [0, 0, 1, 1], [], []>} : vector<16x16xbf16>, vector<16x8xbf16>, vector<16x8xf32> -> vector<16x8xf32>
    %822 = vector.extract_strided_slice %729 {offsets = [0, 40], sizes = [16, 8], strides = [1, 1]} : vector<16x64xbf16> to vector<16x8xbf16>
    %823 = vector.extract_strided_slice %730 {offsets = [0, 40], sizes = [16, 8], strides = [1, 1]} : vector<16x64xbf16> to vector<16x8xbf16>
    %cst_303 = arith.constant dense<0.000000e+00> : vector<16x16xf32>
    %824 = tpu.matmul %822, %823, %cst_303 {dimension_numbers = #tpu.dot_dimension_numbers<[1], [1], [0], [0], [0, 0, 1, 0], [], []>} : vector<16x8xbf16>, vector<16x8xbf16>, vector<16x16xf32> -> vector<16x16xf32>
    %cst_304 = arith.constant 0.353553385 : f32
    %825 = vector.broadcast %cst_304 : f32 to vector<16x16xf32>
    %826 = arith.mulf %824, %825 : vector<16x16xf32>
    %cst_305 = arith.constant dense<0xFF800000> : vector<16xf32>
    %827 = vector.multi_reduction <maximumf>, %826, %cst_305 [1] : vector<16x16xf32> to vector<16xf32>
    %828 = vector.shape_cast %827 : vector<16xf32> to vector<16x1xf32>
    %829 = vector.broadcast %828 : vector<16x1xf32> to vector<16x16xf32>
    %830 = arith.subf %826, %829 : vector<16x16xf32>
    %831 = math.exp %830 : vector<16x16xf32>
    %cst_306 = arith.constant dense<0.000000e+00> : vector<16xf32>
    %832 = vector.multi_reduction <add>, %831, %cst_306 [1] : vector<16x16xf32> to vector<16xf32>
    %833 = vector.shape_cast %832 : vector<16xf32> to vector<16x1xf32>
    %834 = tpu.reciprocal %833 {approx = true} : vector<16x1xf32> -> vector<16x1xf32>
    %835 = vector.broadcast %834 : vector<16x1xf32> to vector<16x16xf32>
    %836 = arith.mulf %831, %835 : vector<16x16xf32>
    %837 = arith.truncf %836 : vector<16x16xf32> to vector<16x16xbf16>
    %838 = vector.extract_strided_slice %731 {offsets = [0, 40], sizes = [16, 8], strides = [1, 1]} : vector<16x64xbf16> to vector<16x8xbf16>
    %cst_307 = arith.constant dense<0.000000e+00> : vector<16x8xf32>
    %839 = tpu.matmul %837, %838, %cst_307 {dimension_numbers = #tpu.dot_dimension_numbers<[1], [0], [0], [1], [0, 0, 1, 1], [], []>} : vector<16x16xbf16>, vector<16x8xbf16>, vector<16x8xf32> -> vector<16x8xf32>
    %840 = vector.extract_strided_slice %729 {offsets = [0, 48], sizes = [16, 8], strides = [1, 1]} : vector<16x64xbf16> to vector<16x8xbf16>
    %841 = vector.extract_strided_slice %730 {offsets = [0, 48], sizes = [16, 8], strides = [1, 1]} : vector<16x64xbf16> to vector<16x8xbf16>
    %cst_308 = arith.constant dense<0.000000e+00> : vector<16x16xf32>
    %842 = tpu.matmul %840, %841, %cst_308 {dimension_numbers = #tpu.dot_dimension_numbers<[1], [1], [0], [0], [0, 0, 1, 0], [], []>} : vector<16x8xbf16>, vector<16x8xbf16>, vector<16x16xf32> -> vector<16x16xf32>
    %cst_309 = arith.constant 0.353553385 : f32
    %843 = vector.broadcast %cst_309 : f32 to vector<16x16xf32>
    %844 = arith.mulf %842, %843 : vector<16x16xf32>
    %cst_310 = arith.constant dense<0xFF800000> : vector<16xf32>
    %845 = vector.multi_reduction <maximumf>, %844, %cst_310 [1] : vector<16x16xf32> to vector<16xf32>
    %846 = vector.shape_cast %845 : vector<16xf32> to vector<16x1xf32>
    %847 = vector.broadcast %846 : vector<16x1xf32> to vector<16x16xf32>
    %848 = arith.subf %844, %847 : vector<16x16xf32>
    %849 = math.exp %848 : vector<16x16xf32>
    %cst_311 = arith.constant dense<0.000000e+00> : vector<16xf32>
    %850 = vector.multi_reduction <add>, %849, %cst_311 [1] : vector<16x16xf32> to vector<16xf32>
    %851 = vector.shape_cast %850 : vector<16xf32> to vector<16x1xf32>
    %852 = tpu.reciprocal %851 {approx = true} : vector<16x1xf32> -> vector<16x1xf32>
    %853 = vector.broadcast %852 : vector<16x1xf32> to vector<16x16xf32>
    %854 = arith.mulf %849, %853 : vector<16x16xf32>
    %855 = arith.truncf %854 : vector<16x16xf32> to vector<16x16xbf16>
    %856 = vector.extract_strided_slice %731 {offsets = [0, 48], sizes = [16, 8], strides = [1, 1]} : vector<16x64xbf16> to vector<16x8xbf16>
    %cst_312 = arith.constant dense<0.000000e+00> : vector<16x8xf32>
    %857 = tpu.matmul %855, %856, %cst_312 {dimension_numbers = #tpu.dot_dimension_numbers<[1], [0], [0], [1], [0, 0, 1, 1], [], []>} : vector<16x16xbf16>, vector<16x8xbf16>, vector<16x8xf32> -> vector<16x8xf32>
    %858 = vector.extract_strided_slice %729 {offsets = [0, 56], sizes = [16, 8], strides = [1, 1]} : vector<16x64xbf16> to vector<16x8xbf16>
    %859 = vector.extract_strided_slice %730 {offsets = [0, 56], sizes = [16, 8], strides = [1, 1]} : vector<16x64xbf16> to vector<16x8xbf16>
    %cst_313 = arith.constant dense<0.000000e+00> : vector<16x16xf32>
    %860 = tpu.matmul %858, %859, %cst_313 {dimension_numbers = #tpu.dot_dimension_numbers<[1], [1], [0], [0], [0, 0, 1, 0], [], []>} : vector<16x8xbf16>, vector<16x8xbf16>, vector<16x16xf32> -> vector<16x16xf32>
    %cst_314 = arith.constant 0.353553385 : f32
    %861 = vector.broadcast %cst_314 : f32 to vector<16x16xf32>
    %862 = arith.mulf %860, %861 : vector<16x16xf32>
    %cst_315 = arith.constant dense<0xFF800000> : vector<16xf32>
    %863 = vector.multi_reduction <maximumf>, %862, %cst_315 [1] : vector<16x16xf32> to vector<16xf32>
    %864 = vector.shape_cast %863 : vector<16xf32> to vector<16x1xf32>
    %865 = vector.broadcast %864 : vector<16x1xf32> to vector<16x16xf32>
    %866 = arith.subf %862, %865 : vector<16x16xf32>
    %867 = math.exp %866 : vector<16x16xf32>
    %cst_316 = arith.constant dense<0.000000e+00> : vector<16xf32>
    %868 = vector.multi_reduction <add>, %867, %cst_316 [1] : vector<16x16xf32> to vector<16xf32>
    %869 = vector.shape_cast %868 : vector<16xf32> to vector<16x1xf32>
    %870 = tpu.reciprocal %869 {approx = true} : vector<16x1xf32> -> vector<16x1xf32>
    %871 = vector.broadcast %870 : vector<16x1xf32> to vector<16x16xf32>
    %872 = arith.mulf %867, %871 : vector<16x16xf32>
    %873 = arith.truncf %872 : vector<16x16xf32> to vector<16x16xbf16>
    %874 = vector.extract_strided_slice %731 {offsets = [0, 56], sizes = [16, 8], strides = [1, 1]} : vector<16x64xbf16> to vector<16x8xbf16>
    %cst_317 = arith.constant dense<0.000000e+00> : vector<16x8xf32>
    %875 = tpu.matmul %873, %874, %cst_317 {dimension_numbers = #tpu.dot_dimension_numbers<[1], [0], [0], [1], [0, 0, 1, 1], [], []>} : vector<16x16xbf16>, vector<16x8xbf16>, vector<16x8xf32> -> vector<16x8xf32>
    %876 = tpu.concatenate %749, %767, %785, %803, %821, %839, %857, %875 in 1 : vector<16x8xf32>, vector<16x8xf32>, vector<16x8xf32>, vector<16x8xf32>, vector<16x8xf32>, vector<16x8xf32>, vector<16x8xf32>, vector<16x8xf32> -> vector<16x64xf32>
    %877 = arith.truncf %876 : vector<16x64xf32> to vector<16x64xbf16>
    %cst_318 = arith.constant dense<0.000000e+00> : vector<16x64xf32>
    %878 = tpu.matmul %877, %726, %cst_318 {dimension_numbers = #tpu.dot_dimension_numbers<[1], [0], [0], [1], [0, 0, 1, 1], [], []>} : vector<16x64xbf16>, vector<64x64xbf16>, vector<16x64xf32> -> vector<16x64xf32>
    %879 = vector.broadcast %728 : vector<1x64xf32> to vector<16x64xf32>
    %880 = arith.addf %878, %879 : vector<16x64xf32>
    %881 = arith.addf %707, %880 : vector<16x64xf32>
    %c0_319 = arith.constant 0 : index
    %c0_320 = arith.constant 0 : index
    %c0_321 = arith.constant 0 : index
    %882 = vector.load %arg27[%c0_319, %c0_320, %c0_321] : memref<2x1x64xf32, #tpu.memory_space<vmem>>, vector<1x1x64xf32>
    %883 = vector.shape_cast %882 : vector<1x1x64xf32> to vector<1x64xf32>
    %c0_322 = arith.constant 0 : index
    %c0_323 = arith.constant 0 : index
    %c0_324 = arith.constant 0 : index
    %884 = vector.load %arg28[%c0_322, %c0_323, %c0_324] : memref<2x1x64xf32, #tpu.memory_space<vmem>>, vector<1x1x64xf32>
    %885 = vector.shape_cast %884 : vector<1x1x64xf32> to vector<1x64xf32>
    %cst_325 = arith.constant dense<0.000000e+00> : vector<16xf32>
    %886 = vector.multi_reduction <add>, %881, %cst_325 [1] : vector<16x64xf32> to vector<16xf32>
    %887 = vector.shape_cast %886 : vector<16xf32> to vector<16x1xf32>
    %cst_326 = arith.constant 6.400000e+01 : f32
    %888 = vector.broadcast %cst_326 : f32 to vector<16x1xf32>
    %889 = arith.divf %887, %888 : vector<16x1xf32>
    %890 = vector.broadcast %889 : vector<16x1xf32> to vector<16x64xf32>
    %891 = arith.subf %881, %890 : vector<16x64xf32>
    %892 = arith.mulf %891, %891 : vector<16x64xf32>
    %cst_327 = arith.constant dense<0.000000e+00> : vector<16xf32>
    %893 = vector.multi_reduction <add>, %892, %cst_327 [1] : vector<16x64xf32> to vector<16xf32>
    %894 = vector.shape_cast %893 : vector<16xf32> to vector<16x1xf32>
    %cst_328 = arith.constant 6.400000e+01 : f32
    %895 = vector.broadcast %cst_328 : f32 to vector<16x1xf32>
    %896 = arith.divf %894, %895 : vector<16x1xf32>
    %897 = vector.broadcast %889 : vector<16x1xf32> to vector<16x64xf32>
    %898 = arith.subf %881, %897 : vector<16x64xf32>
    %cst_329 = arith.constant 9.99999974E-6 : f32
    %899 = vector.broadcast %cst_329 : f32 to vector<16x1xf32>
    %900 = arith.addf %896, %899 : vector<16x1xf32>
    %901 = math.rsqrt %900 : vector<16x1xf32>
    %902 = vector.broadcast %901 : vector<16x1xf32> to vector<16x64xf32>
    %903 = arith.mulf %898, %902 : vector<16x64xf32>
    %904 = vector.broadcast %883 : vector<1x64xf32> to vector<16x64xf32>
    %905 = arith.mulf %903, %904 : vector<16x64xf32>
    %906 = vector.broadcast %885 : vector<1x64xf32> to vector<16x64xf32>
    %907 = arith.addf %905, %906 : vector<16x64xf32>
    %c0_330 = arith.constant 0 : index
    %c0_331 = arith.constant 0 : index
    %c0_332 = arith.constant 0 : index
    %908 = vector.load %arg29[%c0_330, %c0_331, %c0_332] : memref<2x64x256xbf16, #tpu.memory_space<vmem>>, vector<1x64x256xbf16>
    %909 = vector.shape_cast %908 : vector<1x64x256xbf16> to vector<64x256xbf16>
    %c0_333 = arith.constant 0 : index
    %c0_334 = arith.constant 0 : index
    %c0_335 = arith.constant 0 : index
    %910 = vector.load %arg30[%c0_333, %c0_334, %c0_335] : memref<2x1x256xf32, #tpu.memory_space<vmem>>, vector<1x1x256xf32>
    %911 = vector.shape_cast %910 : vector<1x1x256xf32> to vector<1x256xf32>
    %c0_336 = arith.constant 0 : index
    %c0_337 = arith.constant 0 : index
    %c0_338 = arith.constant 0 : index
    %912 = vector.load %arg31[%c0_336, %c0_337, %c0_338] : memref<2x256x64xbf16, #tpu.memory_space<vmem>>, vector<1x256x64xbf16>
    %913 = vector.shape_cast %912 : vector<1x256x64xbf16> to vector<256x64xbf16>
    %c0_339 = arith.constant 0 : index
    %c0_340 = arith.constant 0 : index
    %c0_341 = arith.constant 0 : index
    %914 = vector.load %arg32[%c0_339, %c0_340, %c0_341] : memref<2x1x64xf32, #tpu.memory_space<vmem>>, vector<1x1x64xf32>
    %915 = vector.shape_cast %914 : vector<1x1x64xf32> to vector<1x64xf32>
    %916 = arith.truncf %907 : vector<16x64xf32> to vector<16x64xbf16>
    %cst_342 = arith.constant dense<0.000000e+00> : vector<16x256xf32>
    %917 = tpu.matmul %916, %909, %cst_342 {dimension_numbers = #tpu.dot_dimension_numbers<[1], [0], [0], [1], [0, 0, 1, 1], [], []>} : vector<16x64xbf16>, vector<64x256xbf16>, vector<16x256xf32> -> vector<16x256xf32>
    %918 = vector.broadcast %911 : vector<1x256xf32> to vector<16x256xf32>
    %919 = arith.addf %917, %918 : vector<16x256xf32>
    %cst_343 = arith.constant 0.000000e+00 : f32
    %920 = vector.broadcast %cst_343 : f32 to vector<16x256xf32>
    %921 = arith.maximumf %919, %920 : vector<16x256xf32>
    %922 = arith.truncf %921 : vector<16x256xf32> to vector<16x256xbf16>
    %cst_344 = arith.constant dense<0.000000e+00> : vector<16x64xf32>
    %923 = tpu.matmul %922, %913, %cst_344 {dimension_numbers = #tpu.dot_dimension_numbers<[1], [0], [0], [1], [0, 0, 1, 1], [], []>} : vector<16x256xbf16>, vector<256x64xbf16>, vector<16x64xf32> -> vector<16x64xf32>
    %924 = vector.broadcast %915 : vector<1x64xf32> to vector<16x64xf32>
    %925 = arith.addf %923, %924 : vector<16x64xf32>
    %926 = arith.addf %907, %925 : vector<16x64xf32>
    %c0_345 = arith.constant 0 : index
    %c0_346 = arith.constant 0 : index
    %c0_347 = arith.constant 0 : index
    %927 = vector.load %arg33[%c0_345, %c0_346, %c0_347] : memref<2x1x64xf32, #tpu.memory_space<vmem>>, vector<1x1x64xf32>
    %928 = vector.shape_cast %927 : vector<1x1x64xf32> to vector<1x64xf32>
    %c0_348 = arith.constant 0 : index
    %c0_349 = arith.constant 0 : index
    %c0_350 = arith.constant 0 : index
    %929 = vector.load %arg34[%c0_348, %c0_349, %c0_350] : memref<2x1x64xf32, #tpu.memory_space<vmem>>, vector<1x1x64xf32>
    %930 = vector.shape_cast %929 : vector<1x1x64xf32> to vector<1x64xf32>
    %cst_351 = arith.constant dense<0.000000e+00> : vector<16xf32>
    %931 = vector.multi_reduction <add>, %926, %cst_351 [1] : vector<16x64xf32> to vector<16xf32>
    %932 = vector.shape_cast %931 : vector<16xf32> to vector<16x1xf32>
    %cst_352 = arith.constant 6.400000e+01 : f32
    %933 = vector.broadcast %cst_352 : f32 to vector<16x1xf32>
    %934 = arith.divf %932, %933 : vector<16x1xf32>
    %935 = vector.broadcast %934 : vector<16x1xf32> to vector<16x64xf32>
    %936 = arith.subf %926, %935 : vector<16x64xf32>
    %937 = arith.mulf %936, %936 : vector<16x64xf32>
    %cst_353 = arith.constant dense<0.000000e+00> : vector<16xf32>
    %938 = vector.multi_reduction <add>, %937, %cst_353 [1] : vector<16x64xf32> to vector<16xf32>
    %939 = vector.shape_cast %938 : vector<16xf32> to vector<16x1xf32>
    %cst_354 = arith.constant 6.400000e+01 : f32
    %940 = vector.broadcast %cst_354 : f32 to vector<16x1xf32>
    %941 = arith.divf %939, %940 : vector<16x1xf32>
    %942 = vector.broadcast %934 : vector<16x1xf32> to vector<16x64xf32>
    %943 = arith.subf %926, %942 : vector<16x64xf32>
    %cst_355 = arith.constant 9.99999974E-6 : f32
    %944 = vector.broadcast %cst_355 : f32 to vector<16x1xf32>
    %945 = arith.addf %941, %944 : vector<16x1xf32>
    %946 = math.rsqrt %945 : vector<16x1xf32>
    %947 = vector.broadcast %946 : vector<16x1xf32> to vector<16x64xf32>
    %948 = arith.mulf %943, %947 : vector<16x64xf32>
    %949 = vector.broadcast %928 : vector<1x64xf32> to vector<16x64xf32>
    %950 = arith.mulf %948, %949 : vector<16x64xf32>
    %951 = vector.broadcast %930 : vector<1x64xf32> to vector<16x64xf32>
    %952 = arith.addf %950, %951 : vector<16x64xf32>
    %953 = arith.truncf %952 : vector<16x64xf32> to vector<16x64xbf16>
    %c1_356 = arith.constant 1 : index
    %c0_357 = arith.constant 0 : index
    %c0_358 = arith.constant 0 : index
    %954 = vector.load %arg15[%c1_356, %c0_357, %c0_358] : memref<2x64x192xbf16, #tpu.memory_space<vmem>>, vector<1x64x192xbf16>
    %955 = vector.shape_cast %954 : vector<1x64x192xbf16> to vector<64x192xbf16>
    %cst_359 = arith.constant dense<0.000000e+00> : vector<16x192xf32>
    %956 = tpu.matmul %953, %955, %cst_359 {dimension_numbers = #tpu.dot_dimension_numbers<[1], [0], [0], [1], [0, 0, 1, 1], [], []>} : vector<16x64xbf16>, vector<64x192xbf16>, vector<16x192xf32> -> vector<16x192xf32>
    %c1_360 = arith.constant 1 : index
    %c0_361 = arith.constant 0 : index
    %c0_362 = arith.constant 0 : index
    %957 = vector.load %arg16[%c1_360, %c0_361, %c0_362] : memref<2x1x192xf32, #tpu.memory_space<vmem>>, vector<1x1x192xf32>
    %958 = vector.shape_cast %957 : vector<1x1x192xf32> to vector<1x192xf32>
    %959 = vector.broadcast %958 : vector<1x192xf32> to vector<16x192xf32>
    %960 = arith.addf %956, %959 : vector<16x192xf32>
    %961 = vector.extract_strided_slice %960 {offsets = [0, 0], sizes = [16, 64], strides = [1, 1]} : vector<16x192xf32> to vector<16x64xf32>
    %962 = vector.extract_strided_slice %960 {offsets = [0, 64], sizes = [16, 64], strides = [1, 1]} : vector<16x192xf32> to vector<16x64xf32>
    %963 = vector.extract_strided_slice %960 {offsets = [0, 128], sizes = [16, 64], strides = [1, 1]} : vector<16x192xf32> to vector<16x64xf32>
    %c1_363 = arith.constant 1 : index
    %c0_364 = arith.constant 0 : index
    %c0_365 = arith.constant 0 : index
    %964 = vector.load %arg17[%c1_363, %c0_364, %c0_365] : memref<2x64x64xbf16, #tpu.memory_space<vmem>>, vector<1x64x64xbf16>
    %965 = vector.shape_cast %964 : vector<1x64x64xbf16> to vector<64x64xbf16>
    %c1_366 = arith.constant 1 : index
    %c0_367 = arith.constant 0 : index
    %c0_368 = arith.constant 0 : index
    %966 = vector.load %arg18[%c1_366, %c0_367, %c0_368] : memref<2x1x64xf32, #tpu.memory_space<vmem>>, vector<1x1x64xf32>
    %967 = vector.shape_cast %966 : vector<1x1x64xf32> to vector<1x64xf32>
    %968 = arith.truncf %961 : vector<16x64xf32> to vector<16x64xbf16>
    %969 = arith.truncf %962 : vector<16x64xf32> to vector<16x64xbf16>
    %970 = arith.truncf %963 : vector<16x64xf32> to vector<16x64xbf16>
    %971 = vector.extract_strided_slice %968 {offsets = [0, 0], sizes = [16, 8], strides = [1, 1]} : vector<16x64xbf16> to vector<16x8xbf16>
    %972 = vector.extract_strided_slice %969 {offsets = [0, 0], sizes = [16, 8], strides = [1, 1]} : vector<16x64xbf16> to vector<16x8xbf16>
    %cst_369 = arith.constant dense<0.000000e+00> : vector<16x16xf32>
    %973 = tpu.matmul %971, %972, %cst_369 {dimension_numbers = #tpu.dot_dimension_numbers<[1], [1], [0], [0], [0, 0, 1, 0], [], []>} : vector<16x8xbf16>, vector<16x8xbf16>, vector<16x16xf32> -> vector<16x16xf32>
    %cst_370 = arith.constant 0.353553385 : f32
    %974 = vector.broadcast %cst_370 : f32 to vector<16x16xf32>
    %975 = arith.mulf %973, %974 : vector<16x16xf32>
    %976 = arith.addf %975, %2 : vector<16x16xf32>
    %cst_371 = arith.constant dense<0xFF800000> : vector<16xf32>
    %977 = vector.multi_reduction <maximumf>, %976, %cst_371 [1] : vector<16x16xf32> to vector<16xf32>
    %978 = vector.shape_cast %977 : vector<16xf32> to vector<16x1xf32>
    %979 = vector.broadcast %978 : vector<16x1xf32> to vector<16x16xf32>
    %980 = arith.subf %976, %979 : vector<16x16xf32>
    %981 = math.exp %980 : vector<16x16xf32>
    %cst_372 = arith.constant dense<0.000000e+00> : vector<16xf32>
    %982 = vector.multi_reduction <add>, %981, %cst_372 [1] : vector<16x16xf32> to vector<16xf32>
    %983 = vector.shape_cast %982 : vector<16xf32> to vector<16x1xf32>
    %984 = tpu.reciprocal %983 {approx = true} : vector<16x1xf32> -> vector<16x1xf32>
    %985 = vector.broadcast %984 : vector<16x1xf32> to vector<16x16xf32>
    %986 = arith.mulf %981, %985 : vector<16x16xf32>
    %987 = arith.truncf %986 : vector<16x16xf32> to vector<16x16xbf16>
    %988 = vector.extract_strided_slice %970 {offsets = [0, 0], sizes = [16, 8], strides = [1, 1]} : vector<16x64xbf16> to vector<16x8xbf16>
    %cst_373 = arith.constant dense<0.000000e+00> : vector<16x8xf32>
    %989 = tpu.matmul %987, %988, %cst_373 {dimension_numbers = #tpu.dot_dimension_numbers<[1], [0], [0], [1], [0, 0, 1, 1], [], []>} : vector<16x16xbf16>, vector<16x8xbf16>, vector<16x8xf32> -> vector<16x8xf32>
    %990 = vector.extract_strided_slice %968 {offsets = [0, 8], sizes = [16, 8], strides = [1, 1]} : vector<16x64xbf16> to vector<16x8xbf16>
    %991 = vector.extract_strided_slice %969 {offsets = [0, 8], sizes = [16, 8], strides = [1, 1]} : vector<16x64xbf16> to vector<16x8xbf16>
    %cst_374 = arith.constant dense<0.000000e+00> : vector<16x16xf32>
    %992 = tpu.matmul %990, %991, %cst_374 {dimension_numbers = #tpu.dot_dimension_numbers<[1], [1], [0], [0], [0, 0, 1, 0], [], []>} : vector<16x8xbf16>, vector<16x8xbf16>, vector<16x16xf32> -> vector<16x16xf32>
    %cst_375 = arith.constant 0.353553385 : f32
    %993 = vector.broadcast %cst_375 : f32 to vector<16x16xf32>
    %994 = arith.mulf %992, %993 : vector<16x16xf32>
    %995 = arith.addf %994, %2 : vector<16x16xf32>
    %cst_376 = arith.constant dense<0xFF800000> : vector<16xf32>
    %996 = vector.multi_reduction <maximumf>, %995, %cst_376 [1] : vector<16x16xf32> to vector<16xf32>
    %997 = vector.shape_cast %996 : vector<16xf32> to vector<16x1xf32>
    %998 = vector.broadcast %997 : vector<16x1xf32> to vector<16x16xf32>
    %999 = arith.subf %995, %998 : vector<16x16xf32>
    %1000 = math.exp %999 : vector<16x16xf32>
    %cst_377 = arith.constant dense<0.000000e+00> : vector<16xf32>
    %1001 = vector.multi_reduction <add>, %1000, %cst_377 [1] : vector<16x16xf32> to vector<16xf32>
    %1002 = vector.shape_cast %1001 : vector<16xf32> to vector<16x1xf32>
    %1003 = tpu.reciprocal %1002 {approx = true} : vector<16x1xf32> -> vector<16x1xf32>
    %1004 = vector.broadcast %1003 : vector<16x1xf32> to vector<16x16xf32>
    %1005 = arith.mulf %1000, %1004 : vector<16x16xf32>
    %1006 = arith.truncf %1005 : vector<16x16xf32> to vector<16x16xbf16>
    %1007 = vector.extract_strided_slice %970 {offsets = [0, 8], sizes = [16, 8], strides = [1, 1]} : vector<16x64xbf16> to vector<16x8xbf16>
    %cst_378 = arith.constant dense<0.000000e+00> : vector<16x8xf32>
    %1008 = tpu.matmul %1006, %1007, %cst_378 {dimension_numbers = #tpu.dot_dimension_numbers<[1], [0], [0], [1], [0, 0, 1, 1], [], []>} : vector<16x16xbf16>, vector<16x8xbf16>, vector<16x8xf32> -> vector<16x8xf32>
    %1009 = vector.extract_strided_slice %968 {offsets = [0, 16], sizes = [16, 8], strides = [1, 1]} : vector<16x64xbf16> to vector<16x8xbf16>
    %1010 = vector.extract_strided_slice %969 {offsets = [0, 16], sizes = [16, 8], strides = [1, 1]} : vector<16x64xbf16> to vector<16x8xbf16>
    %cst_379 = arith.constant dense<0.000000e+00> : vector<16x16xf32>
    %1011 = tpu.matmul %1009, %1010, %cst_379 {dimension_numbers = #tpu.dot_dimension_numbers<[1], [1], [0], [0], [0, 0, 1, 0], [], []>} : vector<16x8xbf16>, vector<16x8xbf16>, vector<16x16xf32> -> vector<16x16xf32>
    %cst_380 = arith.constant 0.353553385 : f32
    %1012 = vector.broadcast %cst_380 : f32 to vector<16x16xf32>
    %1013 = arith.mulf %1011, %1012 : vector<16x16xf32>
    %1014 = arith.addf %1013, %2 : vector<16x16xf32>
    %cst_381 = arith.constant dense<0xFF800000> : vector<16xf32>
    %1015 = vector.multi_reduction <maximumf>, %1014, %cst_381 [1] : vector<16x16xf32> to vector<16xf32>
    %1016 = vector.shape_cast %1015 : vector<16xf32> to vector<16x1xf32>
    %1017 = vector.broadcast %1016 : vector<16x1xf32> to vector<16x16xf32>
    %1018 = arith.subf %1014, %1017 : vector<16x16xf32>
    %1019 = math.exp %1018 : vector<16x16xf32>
    %cst_382 = arith.constant dense<0.000000e+00> : vector<16xf32>
    %1020 = vector.multi_reduction <add>, %1019, %cst_382 [1] : vector<16x16xf32> to vector<16xf32>
    %1021 = vector.shape_cast %1020 : vector<16xf32> to vector<16x1xf32>
    %1022 = tpu.reciprocal %1021 {approx = true} : vector<16x1xf32> -> vector<16x1xf32>
    %1023 = vector.broadcast %1022 : vector<16x1xf32> to vector<16x16xf32>
    %1024 = arith.mulf %1019, %1023 : vector<16x16xf32>
    %1025 = arith.truncf %1024 : vector<16x16xf32> to vector<16x16xbf16>
    %1026 = vector.extract_strided_slice %970 {offsets = [0, 16], sizes = [16, 8], strides = [1, 1]} : vector<16x64xbf16> to vector<16x8xbf16>
    %cst_383 = arith.constant dense<0.000000e+00> : vector<16x8xf32>
    %1027 = tpu.matmul %1025, %1026, %cst_383 {dimension_numbers = #tpu.dot_dimension_numbers<[1], [0], [0], [1], [0, 0, 1, 1], [], []>} : vector<16x16xbf16>, vector<16x8xbf16>, vector<16x8xf32> -> vector<16x8xf32>
    %1028 = vector.extract_strided_slice %968 {offsets = [0, 24], sizes = [16, 8], strides = [1, 1]} : vector<16x64xbf16> to vector<16x8xbf16>
    %1029 = vector.extract_strided_slice %969 {offsets = [0, 24], sizes = [16, 8], strides = [1, 1]} : vector<16x64xbf16> to vector<16x8xbf16>
    %cst_384 = arith.constant dense<0.000000e+00> : vector<16x16xf32>
    %1030 = tpu.matmul %1028, %1029, %cst_384 {dimension_numbers = #tpu.dot_dimension_numbers<[1], [1], [0], [0], [0, 0, 1, 0], [], []>} : vector<16x8xbf16>, vector<16x8xbf16>, vector<16x16xf32> -> vector<16x16xf32>
    %cst_385 = arith.constant 0.353553385 : f32
    %1031 = vector.broadcast %cst_385 : f32 to vector<16x16xf32>
    %1032 = arith.mulf %1030, %1031 : vector<16x16xf32>
    %1033 = arith.addf %1032, %2 : vector<16x16xf32>
    %cst_386 = arith.constant dense<0xFF800000> : vector<16xf32>
    %1034 = vector.multi_reduction <maximumf>, %1033, %cst_386 [1] : vector<16x16xf32> to vector<16xf32>
    %1035 = vector.shape_cast %1034 : vector<16xf32> to vector<16x1xf32>
    %1036 = vector.broadcast %1035 : vector<16x1xf32> to vector<16x16xf32>
    %1037 = arith.subf %1033, %1036 : vector<16x16xf32>
    %1038 = math.exp %1037 : vector<16x16xf32>
    %cst_387 = arith.constant dense<0.000000e+00> : vector<16xf32>
    %1039 = vector.multi_reduction <add>, %1038, %cst_387 [1] : vector<16x16xf32> to vector<16xf32>
    %1040 = vector.shape_cast %1039 : vector<16xf32> to vector<16x1xf32>
    %1041 = tpu.reciprocal %1040 {approx = true} : vector<16x1xf32> -> vector<16x1xf32>
    %1042 = vector.broadcast %1041 : vector<16x1xf32> to vector<16x16xf32>
    %1043 = arith.mulf %1038, %1042 : vector<16x16xf32>
    %1044 = arith.truncf %1043 : vector<16x16xf32> to vector<16x16xbf16>
    %1045 = vector.extract_strided_slice %970 {offsets = [0, 24], sizes = [16, 8], strides = [1, 1]} : vector<16x64xbf16> to vector<16x8xbf16>
    %cst_388 = arith.constant dense<0.000000e+00> : vector<16x8xf32>
    %1046 = tpu.matmul %1044, %1045, %cst_388 {dimension_numbers = #tpu.dot_dimension_numbers<[1], [0], [0], [1], [0, 0, 1, 1], [], []>} : vector<16x16xbf16>, vector<16x8xbf16>, vector<16x8xf32> -> vector<16x8xf32>
    %1047 = vector.extract_strided_slice %968 {offsets = [0, 32], sizes = [16, 8], strides = [1, 1]} : vector<16x64xbf16> to vector<16x8xbf16>
    %1048 = vector.extract_strided_slice %969 {offsets = [0, 32], sizes = [16, 8], strides = [1, 1]} : vector<16x64xbf16> to vector<16x8xbf16>
    %cst_389 = arith.constant dense<0.000000e+00> : vector<16x16xf32>
    %1049 = tpu.matmul %1047, %1048, %cst_389 {dimension_numbers = #tpu.dot_dimension_numbers<[1], [1], [0], [0], [0, 0, 1, 0], [], []>} : vector<16x8xbf16>, vector<16x8xbf16>, vector<16x16xf32> -> vector<16x16xf32>
    %cst_390 = arith.constant 0.353553385 : f32
    %1050 = vector.broadcast %cst_390 : f32 to vector<16x16xf32>
    %1051 = arith.mulf %1049, %1050 : vector<16x16xf32>
    %1052 = arith.addf %1051, %2 : vector<16x16xf32>
    %cst_391 = arith.constant dense<0xFF800000> : vector<16xf32>
    %1053 = vector.multi_reduction <maximumf>, %1052, %cst_391 [1] : vector<16x16xf32> to vector<16xf32>
    %1054 = vector.shape_cast %1053 : vector<16xf32> to vector<16x1xf32>
    %1055 = vector.broadcast %1054 : vector<16x1xf32> to vector<16x16xf32>
    %1056 = arith.subf %1052, %1055 : vector<16x16xf32>
    %1057 = math.exp %1056 : vector<16x16xf32>
    %cst_392 = arith.constant dense<0.000000e+00> : vector<16xf32>
    %1058 = vector.multi_reduction <add>, %1057, %cst_392 [1] : vector<16x16xf32> to vector<16xf32>
    %1059 = vector.shape_cast %1058 : vector<16xf32> to vector<16x1xf32>
    %1060 = tpu.reciprocal %1059 {approx = true} : vector<16x1xf32> -> vector<16x1xf32>
    %1061 = vector.broadcast %1060 : vector<16x1xf32> to vector<16x16xf32>
    %1062 = arith.mulf %1057, %1061 : vector<16x16xf32>
    %1063 = arith.truncf %1062 : vector<16x16xf32> to vector<16x16xbf16>
    %1064 = vector.extract_strided_slice %970 {offsets = [0, 32], sizes = [16, 8], strides = [1, 1]} : vector<16x64xbf16> to vector<16x8xbf16>
    %cst_393 = arith.constant dense<0.000000e+00> : vector<16x8xf32>
    %1065 = tpu.matmul %1063, %1064, %cst_393 {dimension_numbers = #tpu.dot_dimension_numbers<[1], [0], [0], [1], [0, 0, 1, 1], [], []>} : vector<16x16xbf16>, vector<16x8xbf16>, vector<16x8xf32> -> vector<16x8xf32>
    %1066 = vector.extract_strided_slice %968 {offsets = [0, 40], sizes = [16, 8], strides = [1, 1]} : vector<16x64xbf16> to vector<16x8xbf16>
    %1067 = vector.extract_strided_slice %969 {offsets = [0, 40], sizes = [16, 8], strides = [1, 1]} : vector<16x64xbf16> to vector<16x8xbf16>
    %cst_394 = arith.constant dense<0.000000e+00> : vector<16x16xf32>
    %1068 = tpu.matmul %1066, %1067, %cst_394 {dimension_numbers = #tpu.dot_dimension_numbers<[1], [1], [0], [0], [0, 0, 1, 0], [], []>} : vector<16x8xbf16>, vector<16x8xbf16>, vector<16x16xf32> -> vector<16x16xf32>
    %cst_395 = arith.constant 0.353553385 : f32
    %1069 = vector.broadcast %cst_395 : f32 to vector<16x16xf32>
    %1070 = arith.mulf %1068, %1069 : vector<16x16xf32>
    %1071 = arith.addf %1070, %2 : vector<16x16xf32>
    %cst_396 = arith.constant dense<0xFF800000> : vector<16xf32>
    %1072 = vector.multi_reduction <maximumf>, %1071, %cst_396 [1] : vector<16x16xf32> to vector<16xf32>
    %1073 = vector.shape_cast %1072 : vector<16xf32> to vector<16x1xf32>
    %1074 = vector.broadcast %1073 : vector<16x1xf32> to vector<16x16xf32>
    %1075 = arith.subf %1071, %1074 : vector<16x16xf32>
    %1076 = math.exp %1075 : vector<16x16xf32>
    %cst_397 = arith.constant dense<0.000000e+00> : vector<16xf32>
    %1077 = vector.multi_reduction <add>, %1076, %cst_397 [1] : vector<16x16xf32> to vector<16xf32>
    %1078 = vector.shape_cast %1077 : vector<16xf32> to vector<16x1xf32>
    %1079 = tpu.reciprocal %1078 {approx = true} : vector<16x1xf32> -> vector<16x1xf32>
    %1080 = vector.broadcast %1079 : vector<16x1xf32> to vector<16x16xf32>
    %1081 = arith.mulf %1076, %1080 : vector<16x16xf32>
    %1082 = arith.truncf %1081 : vector<16x16xf32> to vector<16x16xbf16>
    %1083 = vector.extract_strided_slice %970 {offsets = [0, 40], sizes = [16, 8], strides = [1, 1]} : vector<16x64xbf16> to vector<16x8xbf16>
    %cst_398 = arith.constant dense<0.000000e+00> : vector<16x8xf32>
    %1084 = tpu.matmul %1082, %1083, %cst_398 {dimension_numbers = #tpu.dot_dimension_numbers<[1], [0], [0], [1], [0, 0, 1, 1], [], []>} : vector<16x16xbf16>, vector<16x8xbf16>, vector<16x8xf32> -> vector<16x8xf32>
    %1085 = vector.extract_strided_slice %968 {offsets = [0, 48], sizes = [16, 8], strides = [1, 1]} : vector<16x64xbf16> to vector<16x8xbf16>
    %1086 = vector.extract_strided_slice %969 {offsets = [0, 48], sizes = [16, 8], strides = [1, 1]} : vector<16x64xbf16> to vector<16x8xbf16>
    %cst_399 = arith.constant dense<0.000000e+00> : vector<16x16xf32>
    %1087 = tpu.matmul %1085, %1086, %cst_399 {dimension_numbers = #tpu.dot_dimension_numbers<[1], [1], [0], [0], [0, 0, 1, 0], [], []>} : vector<16x8xbf16>, vector<16x8xbf16>, vector<16x16xf32> -> vector<16x16xf32>
    %cst_400 = arith.constant 0.353553385 : f32
    %1088 = vector.broadcast %cst_400 : f32 to vector<16x16xf32>
    %1089 = arith.mulf %1087, %1088 : vector<16x16xf32>
    %1090 = arith.addf %1089, %2 : vector<16x16xf32>
    %cst_401 = arith.constant dense<0xFF800000> : vector<16xf32>
    %1091 = vector.multi_reduction <maximumf>, %1090, %cst_401 [1] : vector<16x16xf32> to vector<16xf32>
    %1092 = vector.shape_cast %1091 : vector<16xf32> to vector<16x1xf32>
    %1093 = vector.broadcast %1092 : vector<16x1xf32> to vector<16x16xf32>
    %1094 = arith.subf %1090, %1093 : vector<16x16xf32>
    %1095 = math.exp %1094 : vector<16x16xf32>
    %cst_402 = arith.constant dense<0.000000e+00> : vector<16xf32>
    %1096 = vector.multi_reduction <add>, %1095, %cst_402 [1] : vector<16x16xf32> to vector<16xf32>
    %1097 = vector.shape_cast %1096 : vector<16xf32> to vector<16x1xf32>
    %1098 = tpu.reciprocal %1097 {approx = true} : vector<16x1xf32> -> vector<16x1xf32>
    %1099 = vector.broadcast %1098 : vector<16x1xf32> to vector<16x16xf32>
    %1100 = arith.mulf %1095, %1099 : vector<16x16xf32>
    %1101 = arith.truncf %1100 : vector<16x16xf32> to vector<16x16xbf16>
    %1102 = vector.extract_strided_slice %970 {offsets = [0, 48], sizes = [16, 8], strides = [1, 1]} : vector<16x64xbf16> to vector<16x8xbf16>
    %cst_403 = arith.constant dense<0.000000e+00> : vector<16x8xf32>
    %1103 = tpu.matmul %1101, %1102, %cst_403 {dimension_numbers = #tpu.dot_dimension_numbers<[1], [0], [0], [1], [0, 0, 1, 1], [], []>} : vector<16x16xbf16>, vector<16x8xbf16>, vector<16x8xf32> -> vector<16x8xf32>
    %1104 = vector.extract_strided_slice %968 {offsets = [0, 56], sizes = [16, 8], strides = [1, 1]} : vector<16x64xbf16> to vector<16x8xbf16>
    %1105 = vector.extract_strided_slice %969 {offsets = [0, 56], sizes = [16, 8], strides = [1, 1]} : vector<16x64xbf16> to vector<16x8xbf16>
    %cst_404 = arith.constant dense<0.000000e+00> : vector<16x16xf32>
    %1106 = tpu.matmul %1104, %1105, %cst_404 {dimension_numbers = #tpu.dot_dimension_numbers<[1], [1], [0], [0], [0, 0, 1, 0], [], []>} : vector<16x8xbf16>, vector<16x8xbf16>, vector<16x16xf32> -> vector<16x16xf32>
    %cst_405 = arith.constant 0.353553385 : f32
    %1107 = vector.broadcast %cst_405 : f32 to vector<16x16xf32>
    %1108 = arith.mulf %1106, %1107 : vector<16x16xf32>
    %1109 = arith.addf %1108, %2 : vector<16x16xf32>
    %cst_406 = arith.constant dense<0xFF800000> : vector<16xf32>
    %1110 = vector.multi_reduction <maximumf>, %1109, %cst_406 [1] : vector<16x16xf32> to vector<16xf32>
    %1111 = vector.shape_cast %1110 : vector<16xf32> to vector<16x1xf32>
    %1112 = vector.broadcast %1111 : vector<16x1xf32> to vector<16x16xf32>
    %1113 = arith.subf %1109, %1112 : vector<16x16xf32>
    %1114 = math.exp %1113 : vector<16x16xf32>
    %cst_407 = arith.constant dense<0.000000e+00> : vector<16xf32>
    %1115 = vector.multi_reduction <add>, %1114, %cst_407 [1] : vector<16x16xf32> to vector<16xf32>
    %1116 = vector.shape_cast %1115 : vector<16xf32> to vector<16x1xf32>
    %1117 = tpu.reciprocal %1116 {approx = true} : vector<16x1xf32> -> vector<16x1xf32>
    %1118 = vector.broadcast %1117 : vector<16x1xf32> to vector<16x16xf32>
    %1119 = arith.mulf %1114, %1118 : vector<16x16xf32>
    %1120 = arith.truncf %1119 : vector<16x16xf32> to vector<16x16xbf16>
    %1121 = vector.extract_strided_slice %970 {offsets = [0, 56], sizes = [16, 8], strides = [1, 1]} : vector<16x64xbf16> to vector<16x8xbf16>
    %cst_408 = arith.constant dense<0.000000e+00> : vector<16x8xf32>
    %1122 = tpu.matmul %1120, %1121, %cst_408 {dimension_numbers = #tpu.dot_dimension_numbers<[1], [0], [0], [1], [0, 0, 1, 1], [], []>} : vector<16x16xbf16>, vector<16x8xbf16>, vector<16x8xf32> -> vector<16x8xf32>
    %1123 = tpu.concatenate %989, %1008, %1027, %1046, %1065, %1084, %1103, %1122 in 1 : vector<16x8xf32>, vector<16x8xf32>, vector<16x8xf32>, vector<16x8xf32>, vector<16x8xf32>, vector<16x8xf32>, vector<16x8xf32>, vector<16x8xf32> -> vector<16x64xf32>
    %1124 = arith.truncf %1123 : vector<16x64xf32> to vector<16x64xbf16>
    %cst_409 = arith.constant dense<0.000000e+00> : vector<16x64xf32>
    %1125 = tpu.matmul %1124, %965, %cst_409 {dimension_numbers = #tpu.dot_dimension_numbers<[1], [0], [0], [1], [0, 0, 1, 1], [], []>} : vector<16x64xbf16>, vector<64x64xbf16>, vector<16x64xf32> -> vector<16x64xf32>
    %1126 = vector.broadcast %967 : vector<1x64xf32> to vector<16x64xf32>
    %1127 = arith.addf %1125, %1126 : vector<16x64xf32>
    %1128 = arith.addf %952, %1127 : vector<16x64xf32>
    %c1_410 = arith.constant 1 : index
    %c0_411 = arith.constant 0 : index
    %c0_412 = arith.constant 0 : index
    %1129 = vector.load %arg19[%c1_410, %c0_411, %c0_412] : memref<2x1x64xf32, #tpu.memory_space<vmem>>, vector<1x1x64xf32>
    %1130 = vector.shape_cast %1129 : vector<1x1x64xf32> to vector<1x64xf32>
    %c1_413 = arith.constant 1 : index
    %c0_414 = arith.constant 0 : index
    %c0_415 = arith.constant 0 : index
    %1131 = vector.load %arg20[%c1_413, %c0_414, %c0_415] : memref<2x1x64xf32, #tpu.memory_space<vmem>>, vector<1x1x64xf32>
    %1132 = vector.shape_cast %1131 : vector<1x1x64xf32> to vector<1x64xf32>
    %cst_416 = arith.constant dense<0.000000e+00> : vector<16xf32>
    %1133 = vector.multi_reduction <add>, %1128, %cst_416 [1] : vector<16x64xf32> to vector<16xf32>
    %1134 = vector.shape_cast %1133 : vector<16xf32> to vector<16x1xf32>
    %cst_417 = arith.constant 6.400000e+01 : f32
    %1135 = vector.broadcast %cst_417 : f32 to vector<16x1xf32>
    %1136 = arith.divf %1134, %1135 : vector<16x1xf32>
    %1137 = vector.broadcast %1136 : vector<16x1xf32> to vector<16x64xf32>
    %1138 = arith.subf %1128, %1137 : vector<16x64xf32>
    %1139 = arith.mulf %1138, %1138 : vector<16x64xf32>
    %cst_418 = arith.constant dense<0.000000e+00> : vector<16xf32>
    %1140 = vector.multi_reduction <add>, %1139, %cst_418 [1] : vector<16x64xf32> to vector<16xf32>
    %1141 = vector.shape_cast %1140 : vector<16xf32> to vector<16x1xf32>
    %cst_419 = arith.constant 6.400000e+01 : f32
    %1142 = vector.broadcast %cst_419 : f32 to vector<16x1xf32>
    %1143 = arith.divf %1141, %1142 : vector<16x1xf32>
    %1144 = vector.broadcast %1136 : vector<16x1xf32> to vector<16x64xf32>
    %1145 = arith.subf %1128, %1144 : vector<16x64xf32>
    %cst_420 = arith.constant 9.99999974E-6 : f32
    %1146 = vector.broadcast %cst_420 : f32 to vector<16x1xf32>
    %1147 = arith.addf %1143, %1146 : vector<16x1xf32>
    %1148 = math.rsqrt %1147 : vector<16x1xf32>
    %1149 = vector.broadcast %1148 : vector<16x1xf32> to vector<16x64xf32>
    %1150 = arith.mulf %1145, %1149 : vector<16x64xf32>
    %1151 = vector.broadcast %1130 : vector<1x64xf32> to vector<16x64xf32>
    %1152 = arith.mulf %1150, %1151 : vector<16x64xf32>
    %1153 = vector.broadcast %1132 : vector<1x64xf32> to vector<16x64xf32>
    %1154 = arith.addf %1152, %1153 : vector<16x64xf32>
    %1155 = arith.truncf %1154 : vector<16x64xf32> to vector<16x64xbf16>
    %c1_421 = arith.constant 1 : index
    %c0_422 = arith.constant 0 : index
    %c0_423 = arith.constant 0 : index
    %1156 = vector.load %arg21[%c1_421, %c0_422, %c0_423] : memref<2x64x64xbf16, #tpu.memory_space<vmem>>, vector<1x64x64xbf16>
    %1157 = vector.shape_cast %1156 : vector<1x64x64xbf16> to vector<64x64xbf16>
    %cst_424 = arith.constant dense<0.000000e+00> : vector<16x64xf32>
    %1158 = tpu.matmul %1155, %1157, %cst_424 {dimension_numbers = #tpu.dot_dimension_numbers<[1], [0], [0], [1], [0, 0, 1, 1], [], []>} : vector<16x64xbf16>, vector<64x64xbf16>, vector<16x64xf32> -> vector<16x64xf32>
    %c1_425 = arith.constant 1 : index
    %c0_426 = arith.constant 0 : index
    %c0_427 = arith.constant 0 : index
    %1159 = vector.load %arg22[%c1_425, %c0_426, %c0_427] : memref<2x1x64xf32, #tpu.memory_space<vmem>>, vector<1x1x64xf32>
    %1160 = vector.shape_cast %1159 : vector<1x1x64xf32> to vector<1x64xf32>
    %1161 = vector.broadcast %1160 : vector<1x64xf32> to vector<16x64xf32>
    %1162 = arith.addf %1158, %1161 : vector<16x64xf32>
    %c1_428 = arith.constant 1 : index
    %c0_429 = arith.constant 0 : index
    %c0_430 = arith.constant 0 : index
    %1163 = vector.load %arg23[%c1_428, %c0_429, %c0_430] : memref<2x64x128xbf16, #tpu.memory_space<vmem>>, vector<1x64x128xbf16>
    %1164 = vector.shape_cast %1163 : vector<1x64x128xbf16> to vector<64x128xbf16>
    %cst_431 = arith.constant dense<0.000000e+00> : vector<16x128xf32>
    %1165 = tpu.matmul %505, %1164, %cst_431 {dimension_numbers = #tpu.dot_dimension_numbers<[1], [0], [0], [1], [0, 0, 1, 1], [], []>} : vector<16x64xbf16>, vector<64x128xbf16>, vector<16x128xf32> -> vector<16x128xf32>
    %c1_432 = arith.constant 1 : index
    %c0_433 = arith.constant 0 : index
    %c0_434 = arith.constant 0 : index
    %1166 = vector.load %arg24[%c1_432, %c0_433, %c0_434] : memref<2x1x128xf32, #tpu.memory_space<vmem>>, vector<1x1x128xf32>
    %1167 = vector.shape_cast %1166 : vector<1x1x128xf32> to vector<1x128xf32>
    %1168 = vector.broadcast %1167 : vector<1x128xf32> to vector<16x128xf32>
    %1169 = arith.addf %1165, %1168 : vector<16x128xf32>
    %1170 = vector.extract_strided_slice %1169 {offsets = [0, 0], sizes = [16, 64], strides = [1, 1]} : vector<16x128xf32> to vector<16x64xf32>
    %1171 = vector.extract_strided_slice %1169 {offsets = [0, 64], sizes = [16, 64], strides = [1, 1]} : vector<16x128xf32> to vector<16x64xf32>
    %c1_435 = arith.constant 1 : index
    %c0_436 = arith.constant 0 : index
    %c0_437 = arith.constant 0 : index
    %1172 = vector.load %arg25[%c1_435, %c0_436, %c0_437] : memref<2x64x64xbf16, #tpu.memory_space<vmem>>, vector<1x64x64xbf16>
    %1173 = vector.shape_cast %1172 : vector<1x64x64xbf16> to vector<64x64xbf16>
    %c1_438 = arith.constant 1 : index
    %c0_439 = arith.constant 0 : index
    %c0_440 = arith.constant 0 : index
    %1174 = vector.load %arg26[%c1_438, %c0_439, %c0_440] : memref<2x1x64xf32, #tpu.memory_space<vmem>>, vector<1x1x64xf32>
    %1175 = vector.shape_cast %1174 : vector<1x1x64xf32> to vector<1x64xf32>
    %1176 = arith.truncf %1162 : vector<16x64xf32> to vector<16x64xbf16>
    %1177 = arith.truncf %1170 : vector<16x64xf32> to vector<16x64xbf16>
    %1178 = arith.truncf %1171 : vector<16x64xf32> to vector<16x64xbf16>
    %1179 = vector.extract_strided_slice %1176 {offsets = [0, 0], sizes = [16, 8], strides = [1, 1]} : vector<16x64xbf16> to vector<16x8xbf16>
    %1180 = vector.extract_strided_slice %1177 {offsets = [0, 0], sizes = [16, 8], strides = [1, 1]} : vector<16x64xbf16> to vector<16x8xbf16>
    %cst_441 = arith.constant dense<0.000000e+00> : vector<16x16xf32>
    %1181 = tpu.matmul %1179, %1180, %cst_441 {dimension_numbers = #tpu.dot_dimension_numbers<[1], [1], [0], [0], [0, 0, 1, 0], [], []>} : vector<16x8xbf16>, vector<16x8xbf16>, vector<16x16xf32> -> vector<16x16xf32>
    %cst_442 = arith.constant 0.353553385 : f32
    %1182 = vector.broadcast %cst_442 : f32 to vector<16x16xf32>
    %1183 = arith.mulf %1181, %1182 : vector<16x16xf32>
    %cst_443 = arith.constant dense<0xFF800000> : vector<16xf32>
    %1184 = vector.multi_reduction <maximumf>, %1183, %cst_443 [1] : vector<16x16xf32> to vector<16xf32>
    %1185 = vector.shape_cast %1184 : vector<16xf32> to vector<16x1xf32>
    %1186 = vector.broadcast %1185 : vector<16x1xf32> to vector<16x16xf32>
    %1187 = arith.subf %1183, %1186 : vector<16x16xf32>
    %1188 = math.exp %1187 : vector<16x16xf32>
    %cst_444 = arith.constant dense<0.000000e+00> : vector<16xf32>
    %1189 = vector.multi_reduction <add>, %1188, %cst_444 [1] : vector<16x16xf32> to vector<16xf32>
    %1190 = vector.shape_cast %1189 : vector<16xf32> to vector<16x1xf32>
    %1191 = tpu.reciprocal %1190 {approx = true} : vector<16x1xf32> -> vector<16x1xf32>
    %1192 = vector.broadcast %1191 : vector<16x1xf32> to vector<16x16xf32>
    %1193 = arith.mulf %1188, %1192 : vector<16x16xf32>
    %1194 = arith.truncf %1193 : vector<16x16xf32> to vector<16x16xbf16>
    %1195 = vector.extract_strided_slice %1178 {offsets = [0, 0], sizes = [16, 8], strides = [1, 1]} : vector<16x64xbf16> to vector<16x8xbf16>
    %cst_445 = arith.constant dense<0.000000e+00> : vector<16x8xf32>
    %1196 = tpu.matmul %1194, %1195, %cst_445 {dimension_numbers = #tpu.dot_dimension_numbers<[1], [0], [0], [1], [0, 0, 1, 1], [], []>} : vector<16x16xbf16>, vector<16x8xbf16>, vector<16x8xf32> -> vector<16x8xf32>
    %1197 = vector.extract_strided_slice %1176 {offsets = [0, 8], sizes = [16, 8], strides = [1, 1]} : vector<16x64xbf16> to vector<16x8xbf16>
    %1198 = vector.extract_strided_slice %1177 {offsets = [0, 8], sizes = [16, 8], strides = [1, 1]} : vector<16x64xbf16> to vector<16x8xbf16>
    %cst_446 = arith.constant dense<0.000000e+00> : vector<16x16xf32>
    %1199 = tpu.matmul %1197, %1198, %cst_446 {dimension_numbers = #tpu.dot_dimension_numbers<[1], [1], [0], [0], [0, 0, 1, 0], [], []>} : vector<16x8xbf16>, vector<16x8xbf16>, vector<16x16xf32> -> vector<16x16xf32>
    %cst_447 = arith.constant 0.353553385 : f32
    %1200 = vector.broadcast %cst_447 : f32 to vector<16x16xf32>
    %1201 = arith.mulf %1199, %1200 : vector<16x16xf32>
    %cst_448 = arith.constant dense<0xFF800000> : vector<16xf32>
    %1202 = vector.multi_reduction <maximumf>, %1201, %cst_448 [1] : vector<16x16xf32> to vector<16xf32>
    %1203 = vector.shape_cast %1202 : vector<16xf32> to vector<16x1xf32>
    %1204 = vector.broadcast %1203 : vector<16x1xf32> to vector<16x16xf32>
    %1205 = arith.subf %1201, %1204 : vector<16x16xf32>
    %1206 = math.exp %1205 : vector<16x16xf32>
    %cst_449 = arith.constant dense<0.000000e+00> : vector<16xf32>
    %1207 = vector.multi_reduction <add>, %1206, %cst_449 [1] : vector<16x16xf32> to vector<16xf32>
    %1208 = vector.shape_cast %1207 : vector<16xf32> to vector<16x1xf32>
    %1209 = tpu.reciprocal %1208 {approx = true} : vector<16x1xf32> -> vector<16x1xf32>
    %1210 = vector.broadcast %1209 : vector<16x1xf32> to vector<16x16xf32>
    %1211 = arith.mulf %1206, %1210 : vector<16x16xf32>
    %1212 = arith.truncf %1211 : vector<16x16xf32> to vector<16x16xbf16>
    %1213 = vector.extract_strided_slice %1178 {offsets = [0, 8], sizes = [16, 8], strides = [1, 1]} : vector<16x64xbf16> to vector<16x8xbf16>
    %cst_450 = arith.constant dense<0.000000e+00> : vector<16x8xf32>
    %1214 = tpu.matmul %1212, %1213, %cst_450 {dimension_numbers = #tpu.dot_dimension_numbers<[1], [0], [0], [1], [0, 0, 1, 1], [], []>} : vector<16x16xbf16>, vector<16x8xbf16>, vector<16x8xf32> -> vector<16x8xf32>
    %1215 = vector.extract_strided_slice %1176 {offsets = [0, 16], sizes = [16, 8], strides = [1, 1]} : vector<16x64xbf16> to vector<16x8xbf16>
    %1216 = vector.extract_strided_slice %1177 {offsets = [0, 16], sizes = [16, 8], strides = [1, 1]} : vector<16x64xbf16> to vector<16x8xbf16>
    %cst_451 = arith.constant dense<0.000000e+00> : vector<16x16xf32>
    %1217 = tpu.matmul %1215, %1216, %cst_451 {dimension_numbers = #tpu.dot_dimension_numbers<[1], [1], [0], [0], [0, 0, 1, 0], [], []>} : vector<16x8xbf16>, vector<16x8xbf16>, vector<16x16xf32> -> vector<16x16xf32>
    %cst_452 = arith.constant 0.353553385 : f32
    %1218 = vector.broadcast %cst_452 : f32 to vector<16x16xf32>
    %1219 = arith.mulf %1217, %1218 : vector<16x16xf32>
    %cst_453 = arith.constant dense<0xFF800000> : vector<16xf32>
    %1220 = vector.multi_reduction <maximumf>, %1219, %cst_453 [1] : vector<16x16xf32> to vector<16xf32>
    %1221 = vector.shape_cast %1220 : vector<16xf32> to vector<16x1xf32>
    %1222 = vector.broadcast %1221 : vector<16x1xf32> to vector<16x16xf32>
    %1223 = arith.subf %1219, %1222 : vector<16x16xf32>
    %1224 = math.exp %1223 : vector<16x16xf32>
    %cst_454 = arith.constant dense<0.000000e+00> : vector<16xf32>
    %1225 = vector.multi_reduction <add>, %1224, %cst_454 [1] : vector<16x16xf32> to vector<16xf32>
    %1226 = vector.shape_cast %1225 : vector<16xf32> to vector<16x1xf32>
    %1227 = tpu.reciprocal %1226 {approx = true} : vector<16x1xf32> -> vector<16x1xf32>
    %1228 = vector.broadcast %1227 : vector<16x1xf32> to vector<16x16xf32>
    %1229 = arith.mulf %1224, %1228 : vector<16x16xf32>
    %1230 = arith.truncf %1229 : vector<16x16xf32> to vector<16x16xbf16>
    %1231 = vector.extract_strided_slice %1178 {offsets = [0, 16], sizes = [16, 8], strides = [1, 1]} : vector<16x64xbf16> to vector<16x8xbf16>
    %cst_455 = arith.constant dense<0.000000e+00> : vector<16x8xf32>
    %1232 = tpu.matmul %1230, %1231, %cst_455 {dimension_numbers = #tpu.dot_dimension_numbers<[1], [0], [0], [1], [0, 0, 1, 1], [], []>} : vector<16x16xbf16>, vector<16x8xbf16>, vector<16x8xf32> -> vector<16x8xf32>
    %1233 = vector.extract_strided_slice %1176 {offsets = [0, 24], sizes = [16, 8], strides = [1, 1]} : vector<16x64xbf16> to vector<16x8xbf16>
    %1234 = vector.extract_strided_slice %1177 {offsets = [0, 24], sizes = [16, 8], strides = [1, 1]} : vector<16x64xbf16> to vector<16x8xbf16>
    %cst_456 = arith.constant dense<0.000000e+00> : vector<16x16xf32>
    %1235 = tpu.matmul %1233, %1234, %cst_456 {dimension_numbers = #tpu.dot_dimension_numbers<[1], [1], [0], [0], [0, 0, 1, 0], [], []>} : vector<16x8xbf16>, vector<16x8xbf16>, vector<16x16xf32> -> vector<16x16xf32>
    %cst_457 = arith.constant 0.353553385 : f32
    %1236 = vector.broadcast %cst_457 : f32 to vector<16x16xf32>
    %1237 = arith.mulf %1235, %1236 : vector<16x16xf32>
    %cst_458 = arith.constant dense<0xFF800000> : vector<16xf32>
    %1238 = vector.multi_reduction <maximumf>, %1237, %cst_458 [1] : vector<16x16xf32> to vector<16xf32>
    %1239 = vector.shape_cast %1238 : vector<16xf32> to vector<16x1xf32>
    %1240 = vector.broadcast %1239 : vector<16x1xf32> to vector<16x16xf32>
    %1241 = arith.subf %1237, %1240 : vector<16x16xf32>
    %1242 = math.exp %1241 : vector<16x16xf32>
    %cst_459 = arith.constant dense<0.000000e+00> : vector<16xf32>
    %1243 = vector.multi_reduction <add>, %1242, %cst_459 [1] : vector<16x16xf32> to vector<16xf32>
    %1244 = vector.shape_cast %1243 : vector<16xf32> to vector<16x1xf32>
    %1245 = tpu.reciprocal %1244 {approx = true} : vector<16x1xf32> -> vector<16x1xf32>
    %1246 = vector.broadcast %1245 : vector<16x1xf32> to vector<16x16xf32>
    %1247 = arith.mulf %1242, %1246 : vector<16x16xf32>
    %1248 = arith.truncf %1247 : vector<16x16xf32> to vector<16x16xbf16>
    %1249 = vector.extract_strided_slice %1178 {offsets = [0, 24], sizes = [16, 8], strides = [1, 1]} : vector<16x64xbf16> to vector<16x8xbf16>
    %cst_460 = arith.constant dense<0.000000e+00> : vector<16x8xf32>
    %1250 = tpu.matmul %1248, %1249, %cst_460 {dimension_numbers = #tpu.dot_dimension_numbers<[1], [0], [0], [1], [0, 0, 1, 1], [], []>} : vector<16x16xbf16>, vector<16x8xbf16>, vector<16x8xf32> -> vector<16x8xf32>
    %1251 = vector.extract_strided_slice %1176 {offsets = [0, 32], sizes = [16, 8], strides = [1, 1]} : vector<16x64xbf16> to vector<16x8xbf16>
    %1252 = vector.extract_strided_slice %1177 {offsets = [0, 32], sizes = [16, 8], strides = [1, 1]} : vector<16x64xbf16> to vector<16x8xbf16>
    %cst_461 = arith.constant dense<0.000000e+00> : vector<16x16xf32>
    %1253 = tpu.matmul %1251, %1252, %cst_461 {dimension_numbers = #tpu.dot_dimension_numbers<[1], [1], [0], [0], [0, 0, 1, 0], [], []>} : vector<16x8xbf16>, vector<16x8xbf16>, vector<16x16xf32> -> vector<16x16xf32>
    %cst_462 = arith.constant 0.353553385 : f32
    %1254 = vector.broadcast %cst_462 : f32 to vector<16x16xf32>
    %1255 = arith.mulf %1253, %1254 : vector<16x16xf32>
    %cst_463 = arith.constant dense<0xFF800000> : vector<16xf32>
    %1256 = vector.multi_reduction <maximumf>, %1255, %cst_463 [1] : vector<16x16xf32> to vector<16xf32>
    %1257 = vector.shape_cast %1256 : vector<16xf32> to vector<16x1xf32>
    %1258 = vector.broadcast %1257 : vector<16x1xf32> to vector<16x16xf32>
    %1259 = arith.subf %1255, %1258 : vector<16x16xf32>
    %1260 = math.exp %1259 : vector<16x16xf32>
    %cst_464 = arith.constant dense<0.000000e+00> : vector<16xf32>
    %1261 = vector.multi_reduction <add>, %1260, %cst_464 [1] : vector<16x16xf32> to vector<16xf32>
    %1262 = vector.shape_cast %1261 : vector<16xf32> to vector<16x1xf32>
    %1263 = tpu.reciprocal %1262 {approx = true} : vector<16x1xf32> -> vector<16x1xf32>
    %1264 = vector.broadcast %1263 : vector<16x1xf32> to vector<16x16xf32>
    %1265 = arith.mulf %1260, %1264 : vector<16x16xf32>
    %1266 = arith.truncf %1265 : vector<16x16xf32> to vector<16x16xbf16>
    %1267 = vector.extract_strided_slice %1178 {offsets = [0, 32], sizes = [16, 8], strides = [1, 1]} : vector<16x64xbf16> to vector<16x8xbf16>
    %cst_465 = arith.constant dense<0.000000e+00> : vector<16x8xf32>
    %1268 = tpu.matmul %1266, %1267, %cst_465 {dimension_numbers = #tpu.dot_dimension_numbers<[1], [0], [0], [1], [0, 0, 1, 1], [], []>} : vector<16x16xbf16>, vector<16x8xbf16>, vector<16x8xf32> -> vector<16x8xf32>
    %1269 = vector.extract_strided_slice %1176 {offsets = [0, 40], sizes = [16, 8], strides = [1, 1]} : vector<16x64xbf16> to vector<16x8xbf16>
    %1270 = vector.extract_strided_slice %1177 {offsets = [0, 40], sizes = [16, 8], strides = [1, 1]} : vector<16x64xbf16> to vector<16x8xbf16>
    %cst_466 = arith.constant dense<0.000000e+00> : vector<16x16xf32>
    %1271 = tpu.matmul %1269, %1270, %cst_466 {dimension_numbers = #tpu.dot_dimension_numbers<[1], [1], [0], [0], [0, 0, 1, 0], [], []>} : vector<16x8xbf16>, vector<16x8xbf16>, vector<16x16xf32> -> vector<16x16xf32>
    %cst_467 = arith.constant 0.353553385 : f32
    %1272 = vector.broadcast %cst_467 : f32 to vector<16x16xf32>
    %1273 = arith.mulf %1271, %1272 : vector<16x16xf32>
    %cst_468 = arith.constant dense<0xFF800000> : vector<16xf32>
    %1274 = vector.multi_reduction <maximumf>, %1273, %cst_468 [1] : vector<16x16xf32> to vector<16xf32>
    %1275 = vector.shape_cast %1274 : vector<16xf32> to vector<16x1xf32>
    %1276 = vector.broadcast %1275 : vector<16x1xf32> to vector<16x16xf32>
    %1277 = arith.subf %1273, %1276 : vector<16x16xf32>
    %1278 = math.exp %1277 : vector<16x16xf32>
    %cst_469 = arith.constant dense<0.000000e+00> : vector<16xf32>
    %1279 = vector.multi_reduction <add>, %1278, %cst_469 [1] : vector<16x16xf32> to vector<16xf32>
    %1280 = vector.shape_cast %1279 : vector<16xf32> to vector<16x1xf32>
    %1281 = tpu.reciprocal %1280 {approx = true} : vector<16x1xf32> -> vector<16x1xf32>
    %1282 = vector.broadcast %1281 : vector<16x1xf32> to vector<16x16xf32>
    %1283 = arith.mulf %1278, %1282 : vector<16x16xf32>
    %1284 = arith.truncf %1283 : vector<16x16xf32> to vector<16x16xbf16>
    %1285 = vector.extract_strided_slice %1178 {offsets = [0, 40], sizes = [16, 8], strides = [1, 1]} : vector<16x64xbf16> to vector<16x8xbf16>
    %cst_470 = arith.constant dense<0.000000e+00> : vector<16x8xf32>
    %1286 = tpu.matmul %1284, %1285, %cst_470 {dimension_numbers = #tpu.dot_dimension_numbers<[1], [0], [0], [1], [0, 0, 1, 1], [], []>} : vector<16x16xbf16>, vector<16x8xbf16>, vector<16x8xf32> -> vector<16x8xf32>
    %1287 = vector.extract_strided_slice %1176 {offsets = [0, 48], sizes = [16, 8], strides = [1, 1]} : vector<16x64xbf16> to vector<16x8xbf16>
    %1288 = vector.extract_strided_slice %1177 {offsets = [0, 48], sizes = [16, 8], strides = [1, 1]} : vector<16x64xbf16> to vector<16x8xbf16>
    %cst_471 = arith.constant dense<0.000000e+00> : vector<16x16xf32>
    %1289 = tpu.matmul %1287, %1288, %cst_471 {dimension_numbers = #tpu.dot_dimension_numbers<[1], [1], [0], [0], [0, 0, 1, 0], [], []>} : vector<16x8xbf16>, vector<16x8xbf16>, vector<16x16xf32> -> vector<16x16xf32>
    %cst_472 = arith.constant 0.353553385 : f32
    %1290 = vector.broadcast %cst_472 : f32 to vector<16x16xf32>
    %1291 = arith.mulf %1289, %1290 : vector<16x16xf32>
    %cst_473 = arith.constant dense<0xFF800000> : vector<16xf32>
    %1292 = vector.multi_reduction <maximumf>, %1291, %cst_473 [1] : vector<16x16xf32> to vector<16xf32>
    %1293 = vector.shape_cast %1292 : vector<16xf32> to vector<16x1xf32>
    %1294 = vector.broadcast %1293 : vector<16x1xf32> to vector<16x16xf32>
    %1295 = arith.subf %1291, %1294 : vector<16x16xf32>
    %1296 = math.exp %1295 : vector<16x16xf32>
    %cst_474 = arith.constant dense<0.000000e+00> : vector<16xf32>
    %1297 = vector.multi_reduction <add>, %1296, %cst_474 [1] : vector<16x16xf32> to vector<16xf32>
    %1298 = vector.shape_cast %1297 : vector<16xf32> to vector<16x1xf32>
    %1299 = tpu.reciprocal %1298 {approx = true} : vector<16x1xf32> -> vector<16x1xf32>
    %1300 = vector.broadcast %1299 : vector<16x1xf32> to vector<16x16xf32>
    %1301 = arith.mulf %1296, %1300 : vector<16x16xf32>
    %1302 = arith.truncf %1301 : vector<16x16xf32> to vector<16x16xbf16>
    %1303 = vector.extract_strided_slice %1178 {offsets = [0, 48], sizes = [16, 8], strides = [1, 1]} : vector<16x64xbf16> to vector<16x8xbf16>
    %cst_475 = arith.constant dense<0.000000e+00> : vector<16x8xf32>
    %1304 = tpu.matmul %1302, %1303, %cst_475 {dimension_numbers = #tpu.dot_dimension_numbers<[1], [0], [0], [1], [0, 0, 1, 1], [], []>} : vector<16x16xbf16>, vector<16x8xbf16>, vector<16x8xf32> -> vector<16x8xf32>
    %1305 = vector.extract_strided_slice %1176 {offsets = [0, 56], sizes = [16, 8], strides = [1, 1]} : vector<16x64xbf16> to vector<16x8xbf16>
    %1306 = vector.extract_strided_slice %1177 {offsets = [0, 56], sizes = [16, 8], strides = [1, 1]} : vector<16x64xbf16> to vector<16x8xbf16>
    %cst_476 = arith.constant dense<0.000000e+00> : vector<16x16xf32>
    %1307 = tpu.matmul %1305, %1306, %cst_476 {dimension_numbers = #tpu.dot_dimension_numbers<[1], [1], [0], [0], [0, 0, 1, 0], [], []>} : vector<16x8xbf16>, vector<16x8xbf16>, vector<16x16xf32> -> vector<16x16xf32>
    %cst_477 = arith.constant 0.353553385 : f32
    %1308 = vector.broadcast %cst_477 : f32 to vector<16x16xf32>
    %1309 = arith.mulf %1307, %1308 : vector<16x16xf32>
    %cst_478 = arith.constant dense<0xFF800000> : vector<16xf32>
    %1310 = vector.multi_reduction <maximumf>, %1309, %cst_478 [1] : vector<16x16xf32> to vector<16xf32>
    %1311 = vector.shape_cast %1310 : vector<16xf32> to vector<16x1xf32>
    %1312 = vector.broadcast %1311 : vector<16x1xf32> to vector<16x16xf32>
    %1313 = arith.subf %1309, %1312 : vector<16x16xf32>
    %1314 = math.exp %1313 : vector<16x16xf32>
    %cst_479 = arith.constant dense<0.000000e+00> : vector<16xf32>
    %1315 = vector.multi_reduction <add>, %1314, %cst_479 [1] : vector<16x16xf32> to vector<16xf32>
    %1316 = vector.shape_cast %1315 : vector<16xf32> to vector<16x1xf32>
    %1317 = tpu.reciprocal %1316 {approx = true} : vector<16x1xf32> -> vector<16x1xf32>
    %1318 = vector.broadcast %1317 : vector<16x1xf32> to vector<16x16xf32>
    %1319 = arith.mulf %1314, %1318 : vector<16x16xf32>
    %1320 = arith.truncf %1319 : vector<16x16xf32> to vector<16x16xbf16>
    %1321 = vector.extract_strided_slice %1178 {offsets = [0, 56], sizes = [16, 8], strides = [1, 1]} : vector<16x64xbf16> to vector<16x8xbf16>
    %cst_480 = arith.constant dense<0.000000e+00> : vector<16x8xf32>
    %1322 = tpu.matmul %1320, %1321, %cst_480 {dimension_numbers = #tpu.dot_dimension_numbers<[1], [0], [0], [1], [0, 0, 1, 1], [], []>} : vector<16x16xbf16>, vector<16x8xbf16>, vector<16x8xf32> -> vector<16x8xf32>
    %1323 = tpu.concatenate %1196, %1214, %1232, %1250, %1268, %1286, %1304, %1322 in 1 : vector<16x8xf32>, vector<16x8xf32>, vector<16x8xf32>, vector<16x8xf32>, vector<16x8xf32>, vector<16x8xf32>, vector<16x8xf32>, vector<16x8xf32> -> vector<16x64xf32>
    %1324 = arith.truncf %1323 : vector<16x64xf32> to vector<16x64xbf16>
    %cst_481 = arith.constant dense<0.000000e+00> : vector<16x64xf32>
    %1325 = tpu.matmul %1324, %1173, %cst_481 {dimension_numbers = #tpu.dot_dimension_numbers<[1], [0], [0], [1], [0, 0, 1, 1], [], []>} : vector<16x64xbf16>, vector<64x64xbf16>, vector<16x64xf32> -> vector<16x64xf32>
    %1326 = vector.broadcast %1175 : vector<1x64xf32> to vector<16x64xf32>
    %1327 = arith.addf %1325, %1326 : vector<16x64xf32>
    %1328 = arith.addf %1154, %1327 : vector<16x64xf32>
    %c1_482 = arith.constant 1 : index
    %c0_483 = arith.constant 0 : index
    %c0_484 = arith.constant 0 : index
    %1329 = vector.load %arg27[%c1_482, %c0_483, %c0_484] : memref<2x1x64xf32, #tpu.memory_space<vmem>>, vector<1x1x64xf32>
    %1330 = vector.shape_cast %1329 : vector<1x1x64xf32> to vector<1x64xf32>
    %c1_485 = arith.constant 1 : index
    %c0_486 = arith.constant 0 : index
    %c0_487 = arith.constant 0 : index
    %1331 = vector.load %arg28[%c1_485, %c0_486, %c0_487] : memref<2x1x64xf32, #tpu.memory_space<vmem>>, vector<1x1x64xf32>
    %1332 = vector.shape_cast %1331 : vector<1x1x64xf32> to vector<1x64xf32>
    %cst_488 = arith.constant dense<0.000000e+00> : vector<16xf32>
    %1333 = vector.multi_reduction <add>, %1328, %cst_488 [1] : vector<16x64xf32> to vector<16xf32>
    %1334 = vector.shape_cast %1333 : vector<16xf32> to vector<16x1xf32>
    %cst_489 = arith.constant 6.400000e+01 : f32
    %1335 = vector.broadcast %cst_489 : f32 to vector<16x1xf32>
    %1336 = arith.divf %1334, %1335 : vector<16x1xf32>
    %1337 = vector.broadcast %1336 : vector<16x1xf32> to vector<16x64xf32>
    %1338 = arith.subf %1328, %1337 : vector<16x64xf32>
    %1339 = arith.mulf %1338, %1338 : vector<16x64xf32>
    %cst_490 = arith.constant dense<0.000000e+00> : vector<16xf32>
    %1340 = vector.multi_reduction <add>, %1339, %cst_490 [1] : vector<16x64xf32> to vector<16xf32>
    %1341 = vector.shape_cast %1340 : vector<16xf32> to vector<16x1xf32>
    %cst_491 = arith.constant 6.400000e+01 : f32
    %1342 = vector.broadcast %cst_491 : f32 to vector<16x1xf32>
    %1343 = arith.divf %1341, %1342 : vector<16x1xf32>
    %1344 = vector.broadcast %1336 : vector<16x1xf32> to vector<16x64xf32>
    %1345 = arith.subf %1328, %1344 : vector<16x64xf32>
    %cst_492 = arith.constant 9.99999974E-6 : f32
    %1346 = vector.broadcast %cst_492 : f32 to vector<16x1xf32>
    %1347 = arith.addf %1343, %1346 : vector<16x1xf32>
    %1348 = math.rsqrt %1347 : vector<16x1xf32>
    %1349 = vector.broadcast %1348 : vector<16x1xf32> to vector<16x64xf32>
    %1350 = arith.mulf %1345, %1349 : vector<16x64xf32>
    %1351 = vector.broadcast %1330 : vector<1x64xf32> to vector<16x64xf32>
    %1352 = arith.mulf %1350, %1351 : vector<16x64xf32>
    %1353 = vector.broadcast %1332 : vector<1x64xf32> to vector<16x64xf32>
    %1354 = arith.addf %1352, %1353 : vector<16x64xf32>
    %c1_493 = arith.constant 1 : index
    %c0_494 = arith.constant 0 : index
    %c0_495 = arith.constant 0 : index
    %1355 = vector.load %arg29[%c1_493, %c0_494, %c0_495] : memref<2x64x256xbf16, #tpu.memory_space<vmem>>, vector<1x64x256xbf16>
    %1356 = vector.shape_cast %1355 : vector<1x64x256xbf16> to vector<64x256xbf16>
    %c1_496 = arith.constant 1 : index
    %c0_497 = arith.constant 0 : index
    %c0_498 = arith.constant 0 : index
    %1357 = vector.load %arg30[%c1_496, %c0_497, %c0_498] : memref<2x1x256xf32, #tpu.memory_space<vmem>>, vector<1x1x256xf32>
    %1358 = vector.shape_cast %1357 : vector<1x1x256xf32> to vector<1x256xf32>
    %c1_499 = arith.constant 1 : index
    %c0_500 = arith.constant 0 : index
    %c0_501 = arith.constant 0 : index
    %1359 = vector.load %arg31[%c1_499, %c0_500, %c0_501] : memref<2x256x64xbf16, #tpu.memory_space<vmem>>, vector<1x256x64xbf16>
    %1360 = vector.shape_cast %1359 : vector<1x256x64xbf16> to vector<256x64xbf16>
    %c1_502 = arith.constant 1 : index
    %c0_503 = arith.constant 0 : index
    %c0_504 = arith.constant 0 : index
    %1361 = vector.load %arg32[%c1_502, %c0_503, %c0_504] : memref<2x1x64xf32, #tpu.memory_space<vmem>>, vector<1x1x64xf32>
    %1362 = vector.shape_cast %1361 : vector<1x1x64xf32> to vector<1x64xf32>
    %1363 = arith.truncf %1354 : vector<16x64xf32> to vector<16x64xbf16>
    %cst_505 = arith.constant dense<0.000000e+00> : vector<16x256xf32>
    %1364 = tpu.matmul %1363, %1356, %cst_505 {dimension_numbers = #tpu.dot_dimension_numbers<[1], [0], [0], [1], [0, 0, 1, 1], [], []>} : vector<16x64xbf16>, vector<64x256xbf16>, vector<16x256xf32> -> vector<16x256xf32>
    %1365 = vector.broadcast %1358 : vector<1x256xf32> to vector<16x256xf32>
    %1366 = arith.addf %1364, %1365 : vector<16x256xf32>
    %cst_506 = arith.constant 0.000000e+00 : f32
    %1367 = vector.broadcast %cst_506 : f32 to vector<16x256xf32>
    %1368 = arith.maximumf %1366, %1367 : vector<16x256xf32>
    %1369 = arith.truncf %1368 : vector<16x256xf32> to vector<16x256xbf16>
    %cst_507 = arith.constant dense<0.000000e+00> : vector<16x64xf32>
    %1370 = tpu.matmul %1369, %1360, %cst_507 {dimension_numbers = #tpu.dot_dimension_numbers<[1], [0], [0], [1], [0, 0, 1, 1], [], []>} : vector<16x256xbf16>, vector<256x64xbf16>, vector<16x64xf32> -> vector<16x64xf32>
    %1371 = vector.broadcast %1362 : vector<1x64xf32> to vector<16x64xf32>
    %1372 = arith.addf %1370, %1371 : vector<16x64xf32>
    %1373 = arith.addf %1354, %1372 : vector<16x64xf32>
    %c1_508 = arith.constant 1 : index
    %c0_509 = arith.constant 0 : index
    %c0_510 = arith.constant 0 : index
    %1374 = vector.load %arg33[%c1_508, %c0_509, %c0_510] : memref<2x1x64xf32, #tpu.memory_space<vmem>>, vector<1x1x64xf32>
    %1375 = vector.shape_cast %1374 : vector<1x1x64xf32> to vector<1x64xf32>
    %c1_511 = arith.constant 1 : index
    %c0_512 = arith.constant 0 : index
    %c0_513 = arith.constant 0 : index
    %1376 = vector.load %arg34[%c1_511, %c0_512, %c0_513] : memref<2x1x64xf32, #tpu.memory_space<vmem>>, vector<1x1x64xf32>
    %1377 = vector.shape_cast %1376 : vector<1x1x64xf32> to vector<1x64xf32>
    %cst_514 = arith.constant dense<0.000000e+00> : vector<16xf32>
    %1378 = vector.multi_reduction <add>, %1373, %cst_514 [1] : vector<16x64xf32> to vector<16xf32>
    %1379 = vector.shape_cast %1378 : vector<16xf32> to vector<16x1xf32>
    %cst_515 = arith.constant 6.400000e+01 : f32
    %1380 = vector.broadcast %cst_515 : f32 to vector<16x1xf32>
    %1381 = arith.divf %1379, %1380 : vector<16x1xf32>
    %1382 = vector.broadcast %1381 : vector<16x1xf32> to vector<16x64xf32>
    %1383 = arith.subf %1373, %1382 : vector<16x64xf32>
    %1384 = arith.mulf %1383, %1383 : vector<16x64xf32>
    %cst_516 = arith.constant dense<0.000000e+00> : vector<16xf32>
    %1385 = vector.multi_reduction <add>, %1384, %cst_516 [1] : vector<16x64xf32> to vector<16xf32>
    %1386 = vector.shape_cast %1385 : vector<16xf32> to vector<16x1xf32>
    %cst_517 = arith.constant 6.400000e+01 : f32
    %1387 = vector.broadcast %cst_517 : f32 to vector<16x1xf32>
    %1388 = arith.divf %1386, %1387 : vector<16x1xf32>
    %1389 = vector.broadcast %1381 : vector<16x1xf32> to vector<16x64xf32>
    %1390 = arith.subf %1373, %1389 : vector<16x64xf32>
    %cst_518 = arith.constant 9.99999974E-6 : f32
    %1391 = vector.broadcast %cst_518 : f32 to vector<16x1xf32>
    %1392 = arith.addf %1388, %1391 : vector<16x1xf32>
    %1393 = math.rsqrt %1392 : vector<16x1xf32>
    %1394 = vector.broadcast %1393 : vector<16x1xf32> to vector<16x64xf32>
    %1395 = arith.mulf %1390, %1394 : vector<16x64xf32>
    %1396 = vector.broadcast %1375 : vector<1x64xf32> to vector<16x64xf32>
    %1397 = arith.mulf %1395, %1396 : vector<16x64xf32>
    %1398 = vector.broadcast %1377 : vector<1x64xf32> to vector<16x64xf32>
    %1399 = arith.addf %1397, %1398 : vector<16x64xf32>
    %c0_519 = arith.constant 0 : index
    %c0_520 = arith.constant 0 : index
    %1400 = vector.load %arg37[%c0_519, %c0_520] : memref<1x64xf32, #tpu.memory_space<vmem>>, vector<1x64xf32>
    %c0_521 = arith.constant 0 : index
    %c0_522 = arith.constant 0 : index
    %1401 = vector.load %arg38[%c0_521, %c0_522] : memref<1x64xf32, #tpu.memory_space<vmem>>, vector<1x64xf32>
    %cst_523 = arith.constant dense<0.000000e+00> : vector<16xf32>
    %1402 = vector.multi_reduction <add>, %1399, %cst_523 [1] : vector<16x64xf32> to vector<16xf32>
    %1403 = vector.shape_cast %1402 : vector<16xf32> to vector<16x1xf32>
    %cst_524 = arith.constant 6.400000e+01 : f32
    %1404 = vector.broadcast %cst_524 : f32 to vector<16x1xf32>
    %1405 = arith.divf %1403, %1404 : vector<16x1xf32>
    %1406 = vector.broadcast %1405 : vector<16x1xf32> to vector<16x64xf32>
    %1407 = arith.subf %1399, %1406 : vector<16x64xf32>
    %1408 = arith.mulf %1407, %1407 : vector<16x64xf32>
    %cst_525 = arith.constant dense<0.000000e+00> : vector<16xf32>
    %1409 = vector.multi_reduction <add>, %1408, %cst_525 [1] : vector<16x64xf32> to vector<16xf32>
    %1410 = vector.shape_cast %1409 : vector<16xf32> to vector<16x1xf32>
    %cst_526 = arith.constant 6.400000e+01 : f32
    %1411 = vector.broadcast %cst_526 : f32 to vector<16x1xf32>
    %1412 = arith.divf %1410, %1411 : vector<16x1xf32>
    %1413 = vector.broadcast %1405 : vector<16x1xf32> to vector<16x64xf32>
    %1414 = arith.subf %1399, %1413 : vector<16x64xf32>
    %cst_527 = arith.constant 9.99999974E-6 : f32
    %1415 = vector.broadcast %cst_527 : f32 to vector<16x1xf32>
    %1416 = arith.addf %1412, %1415 : vector<16x1xf32>
    %1417 = math.rsqrt %1416 : vector<16x1xf32>
    %1418 = vector.broadcast %1417 : vector<16x1xf32> to vector<16x64xf32>
    %1419 = arith.mulf %1414, %1418 : vector<16x64xf32>
    %1420 = vector.broadcast %1400 : vector<1x64xf32> to vector<16x64xf32>
    %1421 = arith.mulf %1419, %1420 : vector<16x64xf32>
    %1422 = vector.broadcast %1401 : vector<1x64xf32> to vector<16x64xf32>
    %1423 = arith.addf %1421, %1422 : vector<16x64xf32>
    %c0_528 = arith.constant 0 : index
    %c0_529 = arith.constant 0 : index
    %c0_530 = arith.constant 0 : index
    %1424 = vector.load %arg39[%c0_528, %c0_529, %c0_530] : memref<1x16x64xf32, #tpu.memory_space<vmem>>, vector<1x16x64xf32>
    %1425 = vector.shape_cast %1424 : vector<1x16x64xf32> to vector<16x64xf32>
    %1426 = vector.shape_cast %1423 : vector<16x64xf32> to vector<1x16x64xf32>
    tpu.vector_store %arg39[%c0_528, %c0_529, %c0_530], %1426 {strides = array<i32>} : memref<1x16x64xf32, #tpu.memory_space<vmem>>, vector<1x16x64xf32>,
    return
  }
  func.func @transform_0(%arg0: i32) -> (i32, i32, i32) {
    %c0_i32 = arith.constant 0 : i32
    %c0_i32_0 = arith.constant 0 : i32
    %c0_i32_1 = arith.constant 0 : i32
    return %arg0, %c0_i32, %c0_i32_0 : i32, i32, i32
  }
  func.func @transform_1(%arg0: i32) -> (i32, i32) {
    %c0_i32 = arith.constant 0 : i32
    %c0_i32_0 = arith.constant 0 : i32
    %c0_i32_1 = arith.constant 0 : i32
    return %c0_i32, %c0_i32_0 : i32, i32
  }
  func.func @transform_2(%arg0: i32) -> (i32, i32, i32) {
    %c0_i32 = arith.constant 0 : i32
    %c0_i32_0 = arith.constant 0 : i32
    %c0_i32_1 = arith.constant 0 : i32
    %c0_i32_2 = arith.constant 0 : i32
    return %c0_i32, %c0_i32_0, %c0_i32_1 : i32, i32, i32
  }
  func.func @transform_3(%arg0: i32) -> (i32, i32, i32) {
    %c0_i32 = arith.constant 0 : i32
    %c0_i32_0 = arith.constant 0 : i32
    %c0_i32_1 = arith.constant 0 : i32
    %c0_i32_2 = arith.constant 0 : i32
    return %c0_i32, %c0_i32_0, %c0_i32_1 : i32, i32, i32
  }
  func.func @transform_4(%arg0: i32) -> (i32, i32, i32) {
    %c0_i32 = arith.constant 0 : i32
    %c0_i32_0 = arith.constant 0 : i32
    %c0_i32_1 = arith.constant 0 : i32
    %c0_i32_2 = arith.constant 0 : i32
    return %c0_i32, %c0_i32_0, %c0_i32_1 : i32, i32, i32
  }
  func.func @transform_5(%arg0: i32) -> (i32, i32, i32) {
    %c0_i32 = arith.constant 0 : i32
    %c0_i32_0 = arith.constant 0 : i32
    %c0_i32_1 = arith.constant 0 : i32
    %c0_i32_2 = arith.constant 0 : i32
    return %c0_i32, %c0_i32_0, %c0_i32_1 : i32, i32, i32
  }
  func.func @transform_6(%arg0: i32) -> (i32, i32, i32) {
    %c0_i32 = arith.constant 0 : i32
    %c0_i32_0 = arith.constant 0 : i32
    %c0_i32_1 = arith.constant 0 : i32
    %c0_i32_2 = arith.constant 0 : i32
    return %c0_i32, %c0_i32_0, %c0_i32_1 : i32, i32, i32
  }
  func.func @transform_7(%arg0: i32) -> (i32, i32, i32) {
    %c0_i32 = arith.constant 0 : i32
    %c0_i32_0 = arith.constant 0 : i32
    %c0_i32_1 = arith.constant 0 : i32
    %c0_i32_2 = arith.constant 0 : i32
    return %c0_i32, %c0_i32_0, %c0_i32_1 : i32, i32, i32
  }
  func.func @transform_8(%arg0: i32) -> (i32, i32, i32) {
    %c0_i32 = arith.constant 0 : i32
    %c0_i32_0 = arith.constant 0 : i32
    %c0_i32_1 = arith.constant 0 : i32
    %c0_i32_2 = arith.constant 0 : i32
    return %c0_i32, %c0_i32_0, %c0_i32_1 : i32, i32, i32
  }
  func.func @transform_9(%arg0: i32) -> (i32, i32, i32) {
    %c0_i32 = arith.constant 0 : i32
    %c0_i32_0 = arith.constant 0 : i32
    %c0_i32_1 = arith.constant 0 : i32
    %c0_i32_2 = arith.constant 0 : i32
    return %c0_i32, %c0_i32_0, %c0_i32_1 : i32, i32, i32
  }
  func.func @transform_10(%arg0: i32) -> (i32, i32, i32) {
    %c0_i32 = arith.constant 0 : i32
    %c0_i32_0 = arith.constant 0 : i32
    %c0_i32_1 = arith.constant 0 : i32
    %c0_i32_2 = arith.constant 0 : i32
    return %c0_i32, %c0_i32_0, %c0_i32_1 : i32, i32, i32
  }
  func.func @transform_11(%arg0: i32) -> (i32, i32, i32) {
    %c0_i32 = arith.constant 0 : i32
    %c0_i32_0 = arith.constant 0 : i32
    %c0_i32_1 = arith.constant 0 : i32
    %c0_i32_2 = arith.constant 0 : i32
    return %c0_i32, %c0_i32_0, %c0_i32_1 : i32, i32, i32
  }
  func.func @transform_12(%arg0: i32) -> (i32, i32, i32) {
    %c0_i32 = arith.constant 0 : i32
    %c0_i32_0 = arith.constant 0 : i32
    %c0_i32_1 = arith.constant 0 : i32
    %c0_i32_2 = arith.constant 0 : i32
    return %c0_i32, %c0_i32_0, %c0_i32_1 : i32, i32, i32
  }
  func.func @transform_13(%arg0: i32) -> (i32, i32, i32) {
    %c0_i32 = arith.constant 0 : i32
    %c0_i32_0 = arith.constant 0 : i32
    %c0_i32_1 = arith.constant 0 : i32
    %c0_i32_2 = arith.constant 0 : i32
    return %c0_i32, %c0_i32_0, %c0_i32_1 : i32, i32, i32
  }
  func.func @transform_14(%arg0: i32) -> (i32, i32, i32) {
    %c0_i32 = arith.constant 0 : i32
    %c0_i32_0 = arith.constant 0 : i32
    %c0_i32_1 = arith.constant 0 : i32
    %c0_i32_2 = arith.constant 0 : i32
    return %c0_i32, %c0_i32_0, %c0_i32_1 : i32, i32, i32
  }
  func.func @transform_15(%arg0: i32) -> (i32, i32, i32) {
    %c0_i32 = arith.constant 0 : i32
    %c0_i32_0 = arith.constant 0 : i32
    %c0_i32_1 = arith.constant 0 : i32
    %c0_i32_2 = arith.constant 0 : i32
    return %c0_i32, %c0_i32_0, %c0_i32_1 : i32, i32, i32
  }
  func.func @transform_16(%arg0: i32) -> (i32, i32, i32) {
    %c0_i32 = arith.constant 0 : i32
    %c0_i32_0 = arith.constant 0 : i32
    %c0_i32_1 = arith.constant 0 : i32
    %c0_i32_2 = arith.constant 0 : i32
    return %c0_i32, %c0_i32_0, %c0_i32_1 : i32, i32, i32
  }
  func.func @transform_17(%arg0: i32) -> (i32, i32, i32) {
    %c0_i32 = arith.constant 0 : i32
    %c0_i32_0 = arith.constant 0 : i32
    %c0_i32_1 = arith.constant 0 : i32
    %c0_i32_2 = arith.constant 0 : i32
    return %c0_i32, %c0_i32_0, %c0_i32_1 : i32, i32, i32
  }
  func.func @transform_18(%arg0: i32) -> (i32, i32, i32) {
    %c0_i32 = arith.constant 0 : i32
    %c0_i32_0 = arith.constant 0 : i32
    %c0_i32_1 = arith.constant 0 : i32
    %c0_i32_2 = arith.constant 0 : i32
    return %c0_i32, %c0_i32_0, %c0_i32_1 : i32, i32, i32
  }
  func.func @transform_19(%arg0: i32) -> (i32, i32, i32) {
    %c0_i32 = arith.constant 0 : i32
    %c0_i32_0 = arith.constant 0 : i32
    %c0_i32_1 = arith.constant 0 : i32
    %c0_i32_2 = arith.constant 0 : i32
    return %c0_i32, %c0_i32_0, %c0_i32_1 : i32, i32, i32
  }
  func.func @transform_20(%arg0: i32) -> (i32, i32, i32) {
    %c0_i32 = arith.constant 0 : i32
    %c0_i32_0 = arith.constant 0 : i32
    %c0_i32_1 = arith.constant 0 : i32
    %c0_i32_2 = arith.constant 0 : i32
    return %c0_i32, %c0_i32_0, %c0_i32_1 : i32, i32, i32
  }
  func.func @transform_21(%arg0: i32) -> (i32, i32, i32) {
    %c0_i32 = arith.constant 0 : i32
    %c0_i32_0 = arith.constant 0 : i32
    %c0_i32_1 = arith.constant 0 : i32
    %c0_i32_2 = arith.constant 0 : i32
    return %c0_i32, %c0_i32_0, %c0_i32_1 : i32, i32, i32
  }
  func.func @transform_22(%arg0: i32) -> (i32, i32, i32) {
    %c0_i32 = arith.constant 0 : i32
    %c0_i32_0 = arith.constant 0 : i32
    %c0_i32_1 = arith.constant 0 : i32
    %c0_i32_2 = arith.constant 0 : i32
    return %c0_i32, %c0_i32_0, %c0_i32_1 : i32, i32, i32
  }
  func.func @transform_23(%arg0: i32) -> (i32, i32, i32) {
    %c0_i32 = arith.constant 0 : i32
    %c0_i32_0 = arith.constant 0 : i32
    %c0_i32_1 = arith.constant 0 : i32
    %c0_i32_2 = arith.constant 0 : i32
    return %c0_i32, %c0_i32_0, %c0_i32_1 : i32, i32, i32
  }
  func.func @transform_24(%arg0: i32) -> (i32, i32, i32) {
    %c0_i32 = arith.constant 0 : i32
    %c0_i32_0 = arith.constant 0 : i32
    %c0_i32_1 = arith.constant 0 : i32
    %c0_i32_2 = arith.constant 0 : i32
    return %c0_i32, %c0_i32_0, %c0_i32_1 : i32, i32, i32
  }
  func.func @transform_25(%arg0: i32) -> (i32, i32, i32) {
    %c0_i32 = arith.constant 0 : i32
    %c0_i32_0 = arith.constant 0 : i32
    %c0_i32_1 = arith.constant 0 : i32
    %c0_i32_2 = arith.constant 0 : i32
    return %c0_i32, %c0_i32_0, %c0_i32_1 : i32, i32, i32
  }
  func.func @transform_26(%arg0: i32) -> (i32, i32, i32) {
    %c0_i32 = arith.constant 0 : i32
    %c0_i32_0 = arith.constant 0 : i32
    %c0_i32_1 = arith.constant 0 : i32
    %c0_i32_2 = arith.constant 0 : i32
    return %c0_i32, %c0_i32_0, %c0_i32_1 : i32, i32, i32
  }
  func.func @transform_27(%arg0: i32) -> (i32, i32, i32) {
    %c0_i32 = arith.constant 0 : i32
    %c0_i32_0 = arith.constant 0 : i32
    %c0_i32_1 = arith.constant 0 : i32
    %c0_i32_2 = arith.constant 0 : i32
    return %c0_i32, %c0_i32_0, %c0_i32_1 : i32, i32, i32
  }
  func.func @transform_28(%arg0: i32) -> (i32, i32, i32) {
    %c0_i32 = arith.constant 0 : i32
    %c0_i32_0 = arith.constant 0 : i32
    %c0_i32_1 = arith.constant 0 : i32
    %c0_i32_2 = arith.constant 0 : i32
    return %c0_i32, %c0_i32_0, %c0_i32_1 : i32, i32, i32
  }
  func.func @transform_29(%arg0: i32) -> (i32, i32, i32) {
    %c0_i32 = arith.constant 0 : i32
    %c0_i32_0 = arith.constant 0 : i32
    %c0_i32_1 = arith.constant 0 : i32
    %c0_i32_2 = arith.constant 0 : i32
    return %c0_i32, %c0_i32_0, %c0_i32_1 : i32, i32, i32
  }
  func.func @transform_30(%arg0: i32) -> (i32, i32, i32) {
    %c0_i32 = arith.constant 0 : i32
    %c0_i32_0 = arith.constant 0 : i32
    %c0_i32_1 = arith.constant 0 : i32
    %c0_i32_2 = arith.constant 0 : i32
    return %c0_i32, %c0_i32_0, %c0_i32_1 : i32, i32, i32
  }
  func.func @transform_31(%arg0: i32) -> (i32, i32, i32) {
    %c0_i32 = arith.constant 0 : i32
    %c0_i32_0 = arith.constant 0 : i32
    %c0_i32_1 = arith.constant 0 : i32
    %c0_i32_2 = arith.constant 0 : i32
    return %c0_i32, %c0_i32_0, %c0_i32_1 : i32, i32, i32
  }
  func.func @transform_32(%arg0: i32) -> (i32, i32, i32) {
    %c0_i32 = arith.constant 0 : i32
    %c0_i32_0 = arith.constant 0 : i32
    %c0_i32_1 = arith.constant 0 : i32
    %c0_i32_2 = arith.constant 0 : i32
    return %c0_i32, %c0_i32_0, %c0_i32_1 : i32, i32, i32
  }
  func.func @transform_33(%arg0: i32) -> (i32, i32, i32) {
    %c0_i32 = arith.constant 0 : i32
    %c0_i32_0 = arith.constant 0 : i32
    %c0_i32_1 = arith.constant 0 : i32
    %c0_i32_2 = arith.constant 0 : i32
    return %c0_i32, %c0_i32_0, %c0_i32_1 : i32, i32, i32
  }
  func.func @transform_34(%arg0: i32) -> (i32, i32) {
    %c0_i32 = arith.constant 0 : i32
    %c0_i32_0 = arith.constant 0 : i32
    %c0_i32_1 = arith.constant 0 : i32
    return %c0_i32, %c0_i32_0 : i32, i32
  }
  func.func @transform_35(%arg0: i32) -> (i32, i32) {
    %c0_i32 = arith.constant 0 : i32
    %c0_i32_0 = arith.constant 0 : i32
    %c0_i32_1 = arith.constant 0 : i32
    return %c0_i32, %c0_i32_0 : i32, i32
  }
  func.func @transform_36(%arg0: i32) -> (i32, i32) {
    %c0_i32 = arith.constant 0 : i32
    %c0_i32_0 = arith.constant 0 : i32
    %c0_i32_1 = arith.constant 0 : i32
    return %c0_i32, %c0_i32_0 : i32, i32
  }
  func.func @transform_37(%arg0: i32) -> (i32, i32) {
    %c0_i32 = arith.constant 0 : i32
    %c0_i32_0 = arith.constant 0 : i32
    %c0_i32_1 = arith.constant 0 : i32
    return %c0_i32, %c0_i32_0 : i32, i32
  }
  func.func @transform_38(%arg0: i32) -> (i32, i32, i32) {
    %c0_i32 = arith.constant 0 : i32
    %c0_i32_0 = arith.constant 0 : i32
    %c0_i32_1 = arith.constant 0 : i32
    return %arg0, %c0_i32, %c0_i32_0 : i32, i32, i32
  }
}

</mosaic_0001>

<bundles_post_ra>
// kernel: transformer_layer_forward.1
= control target key start
LH: loop header
LB: loop body
LE: loop exit
PB: predicated region body
PF: predicated region fallthrough
CT: control target
= control target key end

     0   :  { %s13807_s6 = smov 1   ;;  %s13808_s10 = smov 2   ;;  %s16611_s0 = inlined_call_operand.smem [shape: u32[39], index: -1, kind: input, shape index: {}] }
   0x1   :  { %s13891_s5 = sld [smem:[%s16611_s0]]   ;;  %s13809_s14 = smov 3  }
   0x2   :  { %s13896_s9 = sld [smem:[%s16611_s0 + %s13807_s6]]   ;;  %s13810_s18 = smov 4  }
   0x3   :  { %s13901_s13 = sld [smem:[%s16611_s0 + %s13808_s10]]   ;;  %s13811_s22 = smov 5  }
   0x4   :  { %s13906_s17 = sld [smem:[%s16611_s0 + %s13809_s14]]   ;;  %s13812_s26 = smov 6  }
   0x5   :  { %s13911_s21 = sld [smem:[%s16611_s0 + %s13810_s18]]   ;;  %s13813_s30 = smov 7  }
   0x6   :  { %s13916_s25 = sld [smem:[%s16611_s0 + %s13811_s22]]   ;;  %s13814_s4 = smov 8  }
   0x7   :  { %16701 = sst [smem:[#allocation27_spill]] %s13891_s5  ;;  %s13815_s10 = smov 9  }
   0x8   :  { %16702 = sst [smem:[#allocation28_spill]] %s13896_s9  ;;  %s13816_s15 = smov 10  }
   0x9   :  { %16703 = sst [smem:[#allocation29_spill]] %s13901_s13  ;;  %s13817_s20 = smov 11  }
   0xa   :  { %16704 = sst [smem:[#allocation30_spill]] %s13906_s17  ;;  %s13819_s1 = smov 13  }
   0xb   :  { %16705 = sst [smem:[#allocation31_spill]] %s13911_s21  ;;  %s13820_s7 = smov 14  }
   0xc   :  { %16706 = sst [smem:[#allocation32_spill]] %s13916_s25  ;;  %s13822_s22 = smov 16  }
   0xd   :  { %s13921_s29 = sld [smem:[%s16611_s0 + %s13812_s26]]   ;;  %s13818_s26 = smov 12  }
   0xe   :  { %s13926_s3 = sld [smem:[%s16611_s0 + %s13813_s30]]   ;;  %s13823_s28 = smov 17  }
   0xf   :  { %s13931_s8 = sld [smem:[%s16611_s0 + %s13814_s4]]  }
  0x10   :  { %s13936_s14 = sld [smem:[%s16611_s0 + %s13815_s10]]  }
  0x11   :  { %s13941_s19 = sld [smem:[%s16611_s0 + %s13816_s15]]   ;;  %s13821_s15 = smov 15  }
  0x12   :  { %s13946_s24 = sld [smem:[%s16611_s0 + %s13817_s20]]  }
  0x13   :  { %16707 = sst [smem:[#allocation33_spill]] %s13921_s29 }
  0x14   :  { %16708 = sst [smem:[#allocation34_spill]] %s13926_s3 }
  0x15   :  { %16709 = sst [smem:[#allocation35_spill]] %s13931_s8 }
  0x16   :  { %16710 = sst [smem:[#allocation36_spill]] %s13936_s14 }
  0x17   :  { %16711 = sst [smem:[#allocation37_spill]] %s13941_s19 }
  0x18   :  { %16712 = sst [smem:[#allocation38_spill]] %s13946_s24 }
  0x19   :  { %s13951_s30 = sld [smem:[%s16611_s0 + %s13818_s26]]  }
  0x1a   :  { %s13956_s6 = sld [smem:[%s16611_s0 + %s13819_s1]]  }
  0x1b   :  { %s13961_s12 = sld [smem:[%s16611_s0 + %s13820_s7]]   ;;  %s13824_s7 = smov 18  }
  0x1c   :  { %s13966_s20 = sld [smem:[%s16611_s0 + %s13821_s15]]   ;;  %s13825_s15 = smov 19  }
  0x1d   :  { %s13971_s27 = sld [smem:[%s16611_s0 + %s13822_s22]]   ;;  %s13826_s22 = smov 20  }
  0x1e   :  { %s13976_s4 = sld [smem:[%s16611_s0 + %s13823_s28]]   ;;  %s13827_s28 = smov 21  }
  0x1f   :  { %16713 = sst [smem:[#allocation39_spill]] %s13951_s30 }
  0x20   :  { %16714 = sst [smem:[#allocation40_spill]] %s13956_s6 }
  0x21   :  { %16715 = sst [smem:[#allocation41_spill]] %s13961_s12 }
  0x22   :  { %16716 = sst [smem:[#allocation42_spill]] %s13966_s20 }
  0x23   :  { %16717 = sst [smem:[#allocation43_spill]] %s13971_s27 }
  0x24   :  { %16718 = sst [smem:[#allocation44_spill]] %s13976_s4 }
  0x25   :  { %s13981_s12 = sld [smem:[%s16611_s0 + %s13824_s7]]   ;;  %s13828_s7 = smov 22  }
  0x26   :  { %s13986_s20 = sld [smem:[%s16611_s0 + %s13825_s15]]   ;;  %s13829_s15 = smov 23  }
  0x27   :  { %s13991_s27 = sld [smem:[%s16611_s0 + %s13826_s22]]   ;;  %s13830_s22 = smov 24  }
  0x28   :  { %s13996_s4 = sld [smem:[%s16611_s0 + %s13827_s28]]   ;;  %s13831_s28 = smov 25  }
  0x29   :  { %s14011_s6 = sld [smem:[%s16611_s0 + %s13830_s22]]   ;;  %s13834_s22 = smov 28  }
  0x2a   :  { %s14016_s30 = sld [smem:[%s16611_s0 + %s13831_s28]]   ;;  %s13835_s28 = smov 29  }
  0x2b   :  { %16719 = sst [smem:[#allocation45_spill]] %s13981_s12 }
  0x2c   :  { %16720 = sst [smem:[#allocation46_spill]] %s13986_s20 }
  0x2d   :  { %16721 = sst [smem:[#allocation47_spill]] %s13991_s27 }
  0x2e   :  { %16722 = sst [smem:[#allocation48_spill]] %s13996_s4 }
  0x2f   :  { %s14001_s12 = sld [smem:[%s16611_s0 + %s13828_s7]]   ;;  %s13832_s7 = smov 26  }
  0x30   :  { %s14006_s20 = sld [smem:[%s16611_s0 + %s13829_s15]]   ;;  %s13833_s15 = smov 27  }
  0x31   :  { %16725 = sst [smem:[#allocation51_spill]] %s14011_s6 }
  0x32   :  { %16726 = sst [smem:[#allocation52_spill]] %s14016_s30 }
  0x33   :  { %s14021_s24 = sld [smem:[%s16611_s0 + %s13832_s7]]   ;;  %s13836_s7 = smov 30  }
  0x34   :  { %s14026_s14 = sld [smem:[%s16611_s0 + %s13833_s15]]   ;;  %s13837_s15 = smov 31  }
  0x35   :  { %16723 = sst [smem:[#allocation49_spill]] %s14001_s12 }
  0x36   :  { %16724 = sst [smem:[#allocation50_spill]] %s14006_s20 }
  0x37   :  { %s14031_s3 = sld [smem:[%s16611_s0 + %s13834_s22]]   ;;  %s13838_s22 = smov 32  }
  0x38   :  { %s14036_s29 = sld [smem:[%s16611_s0 + %s13835_s28]]   ;;  %s13839_s28 = smov 33  }
  0x39   :  { %16727 = sst [smem:[#allocation53_spill]] %s14021_s24 }
  0x3a   :  { %16728 = sst [smem:[#allocation54_spill]] %s14026_s14 }
  0x3b   :  { %s14041_s24 = sld [smem:[%s16611_s0 + %s13836_s7]]   ;;  %s13840_s7 = smov 34  }
  0x3c   :  { %s14046_s14 = sld [smem:[%s16611_s0 + %s13837_s15]]   ;;  %s13841_s15 = smov 35  }
  0x3d   :  { %16729 = sst [smem:[#allocation55_spill]] %s14031_s3 }
  0x3e   :  { %16730 = sst [smem:[#allocation56_spill]] %s14036_s29 }
  0x3f   :  { %s14051_s3 = sld [smem:[%s16611_s0 + %s13838_s22]]   ;;  %s13842_s22 = smov 36  }
  0x40   :  { %s14056_s19 = sld [smem:[%s16611_s0 + %s13839_s28]]   ;;  %s13843_s28 = smov 37  }
  0x41   :  { %16731 = sst [smem:[#allocation57_spill]] %s14041_s24 }
  0x42   :  { %16732 = sst [smem:[#allocation58_spill]] %s14046_s14 }
  0x43   :  { %s14061_s24 = sld [smem:[%s16611_s0 + %s13840_s7]]   ;;  %s13844_s7 = smov 38  }
  0x44   :  { %s14066_s8 = sld [smem:[%s16611_s0 + %s13841_s15]]  }
  0x45   :  { %16733 = sst [smem:[#allocation59_spill]] %s14051_s3 }
  0x46   :  { %16734 = sst [smem:[#allocation60_spill]] %s14056_s19 }
  0x47   :  { %s14071_s3 = sld [smem:[%s16611_s0 + %s13842_s22]]  }
  0x48   :  { %s14076_s19 = sld [smem:[%s16611_s0 + %s13843_s28]]  }
  0x49   :  { %16735 = sst [smem:[#allocation61_spill]] %s14061_s24 }
  0x4a   :  { %16736 = sst [smem:[#allocation62_spill]] %s14066_s8 }
  0x4b   :  { %s14081_s24 = sld [smem:[%s16611_s0 + %s13844_s7]]  }
  0x4e   :  { %16737 = sst [smem:[#allocation63_spill]] %s14076_s19 }
  0x51   :  { %16738 = sst [smem:[#allocation64_spill]] %s14081_s24 }
  0x52   :  { %82 = vsyncpa [#allocation3], 0 }
  0x53   :  { %84 = vsyncpa [#allocation3 + $0x1], 0 }
  0x54   :  { %85 = vsyncpa [#allocation6], 0 }
  0x55   :  { %86 = vsyncpa [#allocation9], 0 }
  0x56   :  { %87 = vsyncpa [#allocation12], 0 }
  0x57   :  { %88 = vsyncpa [#allocation15], 0 }
  0x58   :  { %89 = vsyncpa [#allocation18], 0 }
  0x59   :  { %90 = vsyncpa [#allocation4], 0 }
  0x5a   :  { %92 = vsyncpa [#allocation4 + $0x1], 0  ;;  %s14083_s15 = smov 0   ;;  %s14085_s16 = smov 0  }
  0x5b   :  { %s14087_s18 = smov 0   ;;  %s14089_s22 = smov 0  }
  0x5c LB: > { %s16739_s25 = sld [smem:[#allocation32_spill]]  ;;  %s16740_s21 = sld [smem:[#allocation31_spill]]  ;;  %s13797_s16 = sphi %s14085_s16, %s16832_s16   ;;  %s13793_s15 = sphi %s14083_s15, %s16831_s15   ;;  %s13805_s22 = sphi %s14089_s22, %s16830_s22   ;;  %s13801_s18 = sphi %s14087_s18, %s16833_s18  }
  0x5d   : > { %s16741_s30 = sld [smem:[#allocation52_spill]]  ;;  %s16742_s29 = sld [smem:[#allocation56_spill]] }
  0x5e   : > { %s16743_s17 = sld [smem:[#allocation30_spill]]  ;;  %s16744_s13 = sld [smem:[#allocation29_spill]] }
  0x5f   : > { %s16745_s27 = sld [smem:[#allocation47_spill]]  ;;  %s16746_s20 = sld [smem:[#allocation50_spill]] }
  0x60   : > { %s16747_s5 = sld [smem:[#allocation27_spill]]  ;;  %s16748_s14 = sld [smem:[#allocation58_spill]] }
  0x61   : > { %s16749_s12 = sld [smem:[#allocation49_spill]]  ;;  %s16750_s6 = sld [smem:[#allocation51_spill]] }
  0x62   : > { %s16751_s9 = sld [smem:[#allocation28_spill]]  ;;  %s16752_s4 = sld [smem:[#allocation48_spill]] }
  0x63   : > { %16753 = sst [smem:[#allocation65_spill]] %s13793_s15  ;;  %s13845_s0 = smov [#allocation5]  }
  0x64   : > { %16754 = sst [smem:[#allocation66_spill]] %s13797_s16  ;;  %s944_s23 = sshll.u32 %s13845_s0, 4  ;;  %s14109_s23 = int_to_ptr.vmem [resolvable:$true] %s944_s23 }
  0x65   : > { %16755 = sst [smem:[#allocation67_spill]] %s13801_s18  ;;  %s14104_s26 = sadd.s32 4294967295, %s13805_s22  }
  0x66   : > { %16756 = sst [smem:[#allocation68_spill]] %s13805_s22  ;;  %p10880_p0 = scmp.ge.s32.totalorder %s13805_s22, 1 }
  0x67   : > { %p16633_p1 = scmp.eq.s32.totalorder %s14104_s26, 0  ;;  %p932_p2 = scmp.lt.s32.totalorder %s13805_s22, 3 }
  0x68   : > { %s13846_s1 = smov [#allocation8]   ;;  %s13847_s10 = smov [#allocation11]  }
  0x69   : > { %p14111_p3 = pnand %p10880_p0, %p932_p2  ;;  %s1024_s2 = sshll.u32 %s13846_s1, 4  ;;  %s14124_s2 = int_to_ptr.vmem [resolvable:$true] %s1024_s2 }
  0x6a   : > { %s14126_s11 = sshll.u32 %s13847_s10, 4  ;;  %s13437_s0 = scalar_lea.hbm %s16751_s9, 256  ;;  %s1051_s11 = int_to_ptr.vmem [resolvable:$true] %s14126_s11 }
  0x6b   : > { %s16757_s28 = scalar_select %p14111_p3, 1, 0 }
  0x6c   : > { %p12427_p5 = pneg %p14111_p3  ;;  %p13438_p7 = scmp.ne.s32.totalorder %s16751_s9, %s13437_s0 }
  0x6d   : > { %p13444_p11 = scmp.lt.u32.totalorder %s13437_s0, %s16751_s9 }
  0x6e   : > { %p14120_p6 = pnand %p12427_p5, %p16633_p1 }
  0x70   : > { %p14132_p8 = pneg %p14120_p6 }
  0x72   : > { %p13440_p9 = pnand %p14132_p8, %p13438_p7 }
  0x74   : > { %p13441_p10 = pneg %p13440_p9 }
  0x76   : > { %p13446_p12 = pnand %p13444_p11, %p13441_p10 }
  0x78   : > { %13449 = shalt.err (!%p13446_p12)
}
  0x79   : > { %s13450_s1 = scalar_lea.vmem %s14109_s23, 256  ;;  %p13458_p5 = scmp.lt.s32.totalorder %s14109_s23, %s14109_s23 }
  0x7a   : > { %p13451_p13 = scmp.ne.s32.totalorder %s14109_s23, %s13450_s1  ;;  %p13459_p4 = scmp.lt.s32.totalorder %s13450_s1, %s13450_s1 }
  0x7c   : > { %p13453_p0 = pnand %p13451_p13, %p14132_p8  ;;  %p13460_p1 = por %p13459_p4, %p13458_p5 }
  0x7e   : > { %p13454_p2 = pneg %p13453_p0 }
  0x80   : > { %p13461_p3 = pnand %p13460_p1, %p13454_p2 }
  0x82   : > { %13464 = shalt.err (!%p13461_p3)
}
  0x83   : > { %s16635_s10 = smov 128   ;;  %s16636_s0 = smov 8  }
  0x84   : > { %12430 = dma.hbm_to_vmem [thread:$0]  (!%p14120_p6), %s16751_s9, 256, %s14109_s23, [#allocation6], %s16635_s10, %s16635_s10, %s16636_s0  }
  0x85   : > { %s13465_s19 = scalar_lea.hbm %s16752_s4, 32 }
  0x86   : > { %p13466_p7 = scmp.ne.s32.totalorder %s16752_s4, %s13465_s19  ;;  %p13472_p3 = scmp.lt.u32.totalorder %s13465_s19, %s16752_s4 }
  0x88   : > { %p13468_p4 = pnand %p13466_p7, %p14132_p8 }
  0x8a   : > { %p13469_p1 = pneg %p13468_p4 }
  0x8c   : > { %p13474_p9 = pnand %p13472_p3, %p13469_p1 }
  0x8e   : > { %13477 = shalt.err (!%p13474_p9)
}
  0x8f   : > { %s13478_s1 = scalar_lea.vmem %s14124_s2, 32  ;;  %p13486_p13 = scmp.lt.s32.totalorder %s14124_s2, %s14124_s2 }
  0x90   : > { %p13479_p10 = scmp.ne.s32.totalorder %s14124_s2, %s13478_s1  ;;  %p13487_p0 = scmp.lt.s32.totalorder %s13478_s1, %s13478_s1 }
  0x92   : > { %p13481_p11 = pnand %p13479_p10, %p14132_p8  ;;  %p13488_p2 = por %p13487_p0, %p13486_p13 }
  0x94   : > { %p13482_p12 = pneg %p13481_p11 }
  0x96   : > { %p13489_p5 = pnand %p13488_p2, %p13482_p12 }
  0x98   : > { %13492 = shalt.err (!%p13489_p5)
}
  0x99   : > { %s16639_s23 = smov 16   ;;  %s16640_s19 = smov 1  }
  0x9a   : > { %12436 = dma.hbm_to_vmem [thread:$0]  (!%p14120_p6), %s16752_s4, 32, %s14124_s2, [#allocation9], %s16639_s23, %s16639_s23, %s16640_s19  }
  0x9b   : > { %s13493_s1 = scalar_lea.hbm %s16746_s20, 32 }
  0x9c   : > { %p13494_p7 = scmp.ne.s32.totalorder %s16746_s20, %s13493_s1  ;;  %p13500_p3 = scmp.lt.u32.totalorder %s13493_s1, %s16746_s20 }
  0x9e   : > { %p13496_p4 = pnand %p13494_p7, %p14132_p8 }
  0xa0   : > { %p13497_p1 = pneg %p13496_p4 }
  0xa2   : > { %p13502_p9 = pnand %p13500_p3, %p13497_p1 }
  0xa4   : > { %13505 = shalt.err (!%p13502_p9)
}
  0xa5   : > { %s13506_s10 = scalar_lea.vmem %s1051_s11, 32  ;;  %p13514_p13 = scmp.lt.s32.totalorder %s1051_s11, %s1051_s11 }
  0xa6   : > { %p13507_p10 = scmp.ne.s32.totalorder %s1051_s11, %s13506_s10  ;;  %p13515_p0 = scmp.lt.s32.totalorder %s13506_s10, %s13506_s10 }
  0xa8   : > { %p13509_p11 = pnand %p13507_p10, %p14132_p8  ;;  %p13516_p2 = por %p13515_p0, %p13514_p13 }
  0xaa   : > { %p13510_p12 = pneg %p13509_p11 }
  0xac   : > { %p13517_p5 = pnand %p13516_p2, %p13510_p12 }
  0xae   : > { %13520 = shalt.err (!%p13517_p5)
}
  0xaf   : > { %12442 = dma.hbm_to_vmem [thread:$0]  (!%p14120_p6), %s16746_s20, 32, %s1051_s11, [#allocation12], %s16639_s23, %s16639_s23, %s16640_s19  }
  0xb0   : > { %s13852_s2 = smov [#allocation14]   ;;  %s13853_s0 = smov [#allocation7]  }
  0xb1   : > { %s1076_s1 = sshll.u32 %s13852_s2, 4  ;;  %s1011_s4 = sshll.u32 %s13853_s0, 4  ;;  %s1077_s1 = int_to_ptr.vmem [resolvable:$true] %s1076_s1  ;;  %s1012_s4 = int_to_ptr.vmem [resolvable:$true] %s1011_s4 }
  0xb2   : > { %s13521_s10 = scalar_lea.hbm %s16741_s30, 32 }
  0xb3   : > { %p13522_p7 = scmp.ne.s32.totalorder %s16741_s30, %s13521_s10  ;;  %p13528_p3 = scmp.lt.u32.totalorder %s13521_s10, %s16741_s30 }
  0xb5   : > { %p13524_p4 = pnand %p13522_p7, %p14132_p8 }
  0xb7   : > { %p13525_p1 = pneg %p13524_p4 }
  0xb9   : > { %p13530_p9 = pnand %p13528_p3, %p13525_p1 }
  0xbb   : > { %13533 = shalt.err (!%p13530_p9)
}
  0xbc   : > { %s13534_s9 = scalar_lea.vmem %s1077_s1, 32  ;;  %p13542_p13 = scmp.lt.s32.totalorder %s1077_s1, %s1077_s1 }
  0xbd   : > { %p13535_p10 = scmp.ne.s32.totalorder %s1077_s1, %s13534_s9  ;;  %p13543_p0 = scmp.lt.s32.totalorder %s13534_s9, %s13534_s9 }
  0xbf   : > { %p13537_p11 = pnand %p13535_p10, %p14132_p8  ;;  %p13544_p2 = por %p13543_p0, %p13542_p13 }
  0xc1   : > { %p13538_p12 = pneg %p13537_p11 }
  0xc3   : > { %p13545_p5 = pnand %p13544_p2, %p13538_p12 }
  0xc5   : > { %13548 = shalt.err (!%p13545_p5)
}
  0xc6   : > { %12448 = dma.hbm_to_vmem [thread:$0]  (!%p14120_p6), %s16741_s30, 32, %s1077_s1, [#allocation15], %s16639_s23, %s16639_s23, %s16640_s19  }
  0xc7   : > { %s13549_s11 = scalar_lea.hbm %s16745_s27, 1024 }
  0xc8   : > { %p13550_p7 = scmp.ne.s32.totalorder %s16745_s27, %s13549_s11  ;;  %p13556_p3 = scmp.lt.u32.totalorder %s13549_s11, %s16745_s27 }
  0xca   : > { %p13552_p4 = pnand %p13550_p7, %p14132_p8 }
  0xcc   : > { %p13553_p1 = pneg %p13552_p4 }
  0xce   : > { %p13558_p9 = pnand %p13556_p3, %p13553_p1 }
  0xd0   : > { %13561 = shalt.err (!%p13558_p9)
}
  0xd1   : > { %s13562_s9 = scalar_lea.vmem %s1012_s4, 1024  ;;  %p13570_p13 = scmp.lt.s32.totalorder %s1012_s4, %s1012_s4 }
  0xd2   : > { %p13563_p10 = scmp.ne.s32.totalorder %s1012_s4, %s13562_s9  ;;  %p13571_p0 = scmp.lt.s32.totalorder %s13562_s9, %s13562_s9 }
  0xd4   : > { %p13565_p11 = pnand %p13563_p10, %p14132_p8  ;;  %p13572_p2 = por %p13571_p0, %p13570_p13 }
  0xd6   : > { %p13566_p12 = pneg %p13565_p11 }
  0xd8   : > { %p13573_p5 = pnand %p13572_p2, %p13566_p12 }
  0xda   : > { %13576 = shalt.err (!%p13573_p5)
}
  0xdb   : > { %s13854_s0 = smov 64   ;;  %s13855_s2 = smov 4  }
  0xdc   : > { %12433 = dma.hbm_to_vmem [thread:$0]  (!%p14120_p6), %s16745_s27, 1024, %s1012_s4, [#allocation6], %s13854_s0, %s13854_s0, %s13855_s2  }
  0xdd   : > { %s13856_s1 = smov [#allocation10]   ;;  %s13857_s11 = smov [#allocation13]  }
  0xde   : > { %s1037_s10 = sshll.u32 %s13856_s1, 4  ;;  %s1063_s9 = sshll.u32 %s13857_s11, 4  ;;  %s1038_s10 = int_to_ptr.vmem [resolvable:$true] %s1037_s10  ;;  %s1064_s9 = int_to_ptr.vmem [resolvable:$true] %s1063_s9 }
  0xdf   : > { %s13577_s23 = scalar_lea.hbm %s16749_s12, 1024 }
  0xe0   : > { %p13578_p7 = scmp.ne.s32.totalorder %s16749_s12, %s13577_s23  ;;  %p13584_p3 = scmp.lt.u32.totalorder %s13577_s23, %s16749_s12 }
  0xe2   : > { %p13580_p4 = pnand %p13578_p7, %p14132_p8 }
  0xe4   : > { %p13581_p1 = pneg %p13580_p4 }
  0xe6   : > { %p13586_p9 = pnand %p13584_p3, %p13581_p1 }
  0xe8   : > { %13589 = shalt.err (!%p13586_p9)
}
  0xe9   : > { %s13590_s19 = scalar_lea.vmem %s1038_s10, 1024  ;;  %p13598_p13 = scmp.lt.s32.totalorder %s1038_s10, %s1038_s10 }
  0xea   : > { %p13591_p10 = scmp.ne.s32.totalorder %s1038_s10, %s13590_s19  ;;  %p13599_p0 = scmp.lt.s32.totalorder %s13590_s19, %s13590_s19 }
  0xec   : > { %p13593_p11 = pnand %p13591_p10, %p14132_p8  ;;  %p13600_p2 = por %p13599_p0, %p13598_p13 }
  0xee   : > { %p13594_p12 = pneg %p13593_p11 }
  0xf0   : > { %p13601_p5 = pnand %p13600_p2, %p13594_p12 }
  0xf2   : > { %13604 = shalt.err (!%p13601_p5)
}
  0xf3   : > { %12439 = dma.hbm_to_vmem [thread:$0]  (!%p14120_p6), %s16749_s12, 1024, %s1038_s10, [#allocation9], %s13854_s0, %s13854_s0, %s13855_s2  }
  0xf4   : > { %s13605_s4 = scalar_lea.hbm %s16750_s6, 1024 }
  0xf5   : > { %p13606_p7 = scmp.ne.s32.totalorder %s16750_s6, %s13605_s4  ;;  %p13612_p3 = scmp.lt.u32.totalorder %s13605_s4, %s16750_s6 }
  0xf7   : > { %p13608_p4 = pnand %p13606_p7, %p14132_p8 }
  0xf9   : > { %p13609_p1 = pneg %p13608_p4 }
  0xfb   : > { %p13614_p9 = pnand %p13612_p3, %p13609_p1 }
  0xfd   : > { %13617 = shalt.err (!%p13614_p9)
}
  0xfe   : > { %s13618_s23 = scalar_lea.vmem %s1064_s9, 1024  ;;  %p13626_p13 = scmp.lt.s32.totalorder %s1064_s9, %s1064_s9 }
  0xff   : > { %p13619_p10 = scmp.ne.s32.totalorder %s1064_s9, %s13618_s23  ;;  %p13627_p0 = scmp.lt.s32.totalorder %s13618_s23, %s13618_s23 }
 0x101   : > { %p13621_p11 = pnand %p13619_p10, %p14132_p8  ;;  %p13628_p2 = por %p13627_p0, %p13626_p13 }
 0x103   : > { %p13622_p12 = pneg %p13621_p11 }
 0x105   : > { %p13629_p5 = pnand %p13628_p2, %p13622_p12 }
 0x107   : > { %13632 = shalt.err (!%p13629_p5)
}
 0x108   : > { %12445 = dma.hbm_to_vmem [thread:$0]  (!%p14120_p6), %s16750_s6, 1024, %s1064_s9, [#allocation12], %s13854_s0, %s13854_s0, %s13855_s2  }
 0x109   : > { %s13858_s19 = smov [#allocation16]   ;;  %s13633_s10 = scalar_lea.hbm %s16742_s29, 64 }
 0x10a   : > { %s1098_s1 = sshll.u32 %s13858_s19, 4  ;;  %p13634_p7 = scmp.ne.s32.totalorder %s16742_s29, %s13633_s10  ;;  %s1099_s1 = int_to_ptr.vmem [resolvable:$true] %s1098_s1 }
 0x10b   : > { %p13640_p3 = scmp.lt.u32.totalorder %s13633_s10, %s16742_s29 }
 0x10c   : > { %p13636_p4 = pnand %p13634_p7, %p14132_p8 }
 0x10e   : > { %p13637_p1 = pneg %p13636_p4 }
 0x110   : > { %p13642_p9 = pnand %p13640_p3, %p13637_p1 }
 0x112   : > { %13645 = shalt.err (!%p13642_p9)
}
 0x113   : > { %s13646_s11 = scalar_lea.vmem %s1099_s1, 64  ;;  %p13654_p13 = scmp.lt.s32.totalorder %s1099_s1, %s1099_s1 }
 0x114   : > { %p13647_p10 = scmp.ne.s32.totalorder %s1099_s1, %s13646_s11  ;;  %p13655_p0 = scmp.lt.s32.totalorder %s13646_s11, %s13646_s11 }
 0x116   : > { %p13649_p11 = pnand %p13647_p10, %p14132_p8  ;;  %p13656_p2 = por %p13655_p0, %p13654_p13 }
 0x118   : > { %p13650_p12 = pneg %p13649_p11 }
 0x11a   : > { %p13657_p5 = pnand %p13656_p2, %p13650_p12 }
 0x11c   : > { %13660 = shalt.err (!%p13657_p5)
}
 0x11d   : > { %s13859_s0 = smov 32   ;;  %s13860_s2 = smov 2  }
 0x11e   : > { %12451 = dma.hbm_to_vmem [thread:$0]  (!%p14120_p6), %s16742_s29, 64, %s1099_s1, [#allocation15], %s13859_s0, %s13859_s0, %s13860_s2  }
 0x11f   : > { %s13861_s9 = smov [#allocation17]   ;;  %s13661_s23 = scalar_lea.hbm %s16748_s14, 32 }
 0x120   : > { %s1114_s4 = sshll.u32 %s13861_s9, 4  ;;  %p13662_p7 = scmp.ne.s32.totalorder %s16748_s14, %s13661_s23  ;;  %s1115_s4 = int_to_ptr.vmem [resolvable:$true] %s1114_s4 }
 0x121   : > { %p13668_p3 = scmp.lt.u32.totalorder %s13661_s23, %s16748_s14 }
 0x122   : > { %p13664_p4 = pnand %p13662_p7, %p14132_p8 }
 0x124   : > { %p13665_p1 = pneg %p13664_p4 }
 0x126   : > { %p13670_p9 = pnand %p13668_p3, %p13665_p1 }
 0x128   : > { %13673 = shalt.err (!%p13670_p9)
}
 0x129   : > { %s13674_s19 = scalar_lea.vmem %s1115_s4, 32  ;;  %p13682_p13 = scmp.lt.s32.totalorder %s1115_s4, %s1115_s4 }
 0x12a   : > { %p13675_p10 = scmp.ne.s32.totalorder %s1115_s4, %s13674_s19  ;;  %p13683_p0 = scmp.lt.s32.totalorder %s13674_s19, %s13674_s19 }
 0x12c   : > { %p13677_p11 = pnand %p13675_p10, %p14132_p8  ;;  %p13684_p2 = por %p13683_p0, %p13682_p13 }
 0x12e   : > { %p13678_p12 = pneg %p13677_p11 }
 0x130   : > { %p13685_p5 = pnand %p13684_p2, %p13678_p12 }
 0x132   : > { %13688 = shalt.err (!%p13685_p5)
}
 0x133   : > { %s16760_s1 = smov 1   ;;  %s16761_s10 = smov 16  }
 0x134   : > { %12454 = dma.hbm_to_vmem [thread:$0]  (!%p14120_p6), %s16748_s14, 32, %s1115_s4, [#allocation18], %s16761_s10, %s16761_s10, %s16760_s1  }
 0x135   : > { %s10879_s24 = sadd.s32 4294967294, %s13805_s22   ;;  %s14261_s7 = sadd.s32 1, %s13805_s22  }
 0x136   : > { %16762 = sst [smem:[#allocation69_spill]] %s14261_s7  ;;  %s105_s11 = sadd.s32 1, %s13801_s18 }
 0x137   : > { %s102_s0 = ssub.s32 %s13805_s22, %s14261_s7  ;;  %p112_p8 = scmp.ne.s32.totalorder %s13801_s18, %s13797_s16 }
 0x138   : > { %p103_p7 = scmp.eq.s32.totalorder %s102_s0, 0  ;;  %p113_p4 = scmp.eq.s32.totalorder %s13805_s22, 0 }
 0x139   : > { %p118_p1 = scmp.ne.s32.totalorder %s13797_s16, %s13793_s15  ;;  %p919_p3 = scmp.eq.s32.totalorder %s14104_s26, 1 }
 0x13a   : > { %s14273_s2 = scalar_select %p103_p7, %s13801_s18, %s105_s11  }
 0x13b   : > { %p114_p9 = por %p113_p4, %p112_p8  ;;  %p16764_p10 = scmp.eq.s32.totalorder %s14104_s26, 0 }
 0x13c   : > { %16763 = sst [smem:[#allocation70_spill]] %s14273_s2  ;;  %p14281_p6 = por %p919_p3, %p112_p8 }
 0x13d   : > { %p14277_p11 = por %p16764_p10, %p118_p1  ;;  %p925_p12 = scmp.eq.s32.totalorder %s10879_s24, 1 }
 0x13e   : > { %s16766_s4 = scalar_select %p14281_p6, 1, 0 }
 0x13f   : > { %s16765_s9 = scalar_select %p14277_p11, 1, 0 }
 0x140   : > { %p12472_p13 = scmp.lt.s32.totalorder %s13805_s22, 2  ;;  %s1146_s23 = sand.u32 1, %s13801_s18  }
 0x141   : > { %p14287_p0 = por %p925_p12, %p118_p1  ;;  %s10891_s1 = sshll.u32 %s1146_s23, 4 }
 0x142   : > { %s11359_s10 = sshll.u32 %s13805_s22, 8  ;;  %s1150_s0 = scalar_lea.vmem [#allocation2], %s10891_s1 }
 0x143   : > { %s16767_s19 = scalar_select %p14287_p0, 1, 0 }
 0x144   : > { %s14293_s11 = scalar_lea.hbm %s16747_s5, %s11359_s10  ;;  %s1157_s6 = sshll.u32 %s1150_s0, 4  ;;  %s14299_s6 = int_to_ptr.vmem [resolvable:$true] %s1157_s6 }
 0x145   : > { %16768 = sst [smem:[#allocation71_spill]] %s16767_s19  ;;  %p14295_p2 = pnand %p12472_p13, %p114_p9 }
 0x146   : > { %s14301_s12 = scalar_lea.sflag [#allocation3], %s1146_s23  ;;  %s13689_s14 = scalar_lea.hbm %s14293_s11, 256 }
 0x147   : > { %p13690_p5 = scmp.ne.s32.totalorder %s14293_s11, %s13689_s14  ;;  %p13691_p8 = pneg %p14295_p2 }
 0x148   : > { %s13694_s1 = scalar_lea.hbm %s16747_s5, 512  ;;  %p13695_p1 = scmp.lt.u32.totalorder %s14293_s11, %s16747_s5 }
 0x149   : > { %p13692_p7 = pnand %p13691_p8, %p13690_p5  ;;  %p13696_p3 = scmp.lt.u32.totalorder %s13694_s1, %s13689_s14 }
 0x14a   : > { %p13698_p10 = scmp.lt.u32.totalorder %s13689_s14, %s14293_s11 }
 0x14b   : > { %p13693_p4 = pneg %p13692_p7  ;;  %p13697_p9 = por %p13696_p3, %p13695_p1 }
 0x14d   : > { %p13699_p12 = por %p13698_p10, %p13697_p9 }
 0x14f   : > { %p13700_p13 = pnand %p13699_p12, %p13693_p4 }
 0x151   : > { %13703 = shalt.err (!%p13700_p13)
}
 0x152   : > { %s13704_s23 = scalar_lea.vmem %s14299_s6, 256  ;;  %s13862_s10 = smov [#allocation2]  }
 0x153   : > { %p13705_p0 = scmp.ne.s32.totalorder %s14299_s6, %s13704_s23  ;;  %s13709_s0 = sshll.u32 %s13862_s10, 4  ;;  %s13710_s0 = int_to_ptr.vmem [resolvable:$false] %s13709_s0 }
 0x154   : > { %s13711_s5 = scalar_lea.vmem %s13710_s0, 512  ;;  %p13712_p5 = scmp.lt.s32.totalorder %s14299_s6, %s13710_s0 }
 0x155   : > { %p13707_p6 = pnand %p13705_p0, %p13691_p8  ;;  %p13713_p7 = scmp.lt.s32.totalorder %s13711_s5, %s13704_s23 }
 0x157   : > { %p13708_p11 = pneg %p13707_p6  ;;  %p13714_p1 = por %p13713_p7, %p13712_p5 }
 0x159   : > { %p13715_p3 = pnand %p13714_p1, %p13708_p11 }
 0x15b   : > { %13718 = shalt.err (!%p13715_p3)
}
 0x15c   : > { %s16770_s14 = smov 8   ;;  %s16771_s1 = smov 128  }
 0x15d   : > { %12458 = dma.hbm_to_vmem [thread:$0]  (!%p14295_p2), %s14293_s11, 256, %s14299_s6, %s14301_s12, %s16771_s1, %s16771_s1, %s16770_s14  }
 0x15e   : > { %p16772_p6 = scmp.ne.s32.totalorder %s16757_s28, 0 }
 0x15f   : > { %s14331_s10 = sand.u32 (!%p16772_p6), 1, %s13797_s16   ;;  %p16773_p11 = scmp.ne.s32.totalorder (!%p16772_p6), %s16765_s9, 0 }
 0x160   : > { %1169 = sbr.rel (%p16772_p6) target bundleno = 14084 (0x3704), region = 172  ;;  %s16647_s5 = sshll.u32 (!%p16772_p6), %s14331_s10, 4 }
 0x161   : > { %s1172_s23 = scalar_lea.sflag (!%p16772_p6), [#allocation3], %s14331_s10  ;;  %s14337_s24 = scalar_lea.vmem (!%p16772_p6), [#allocation2], %s16647_s5 }
 0x167   : > { %13764 = dma.done.wait (%p16773_p11), %s1172_s23, 256  }
 0x168   : > { %13766 = vsyncadd (%p16773_p11), %s1172_s23, 4294967040  ;;  %p16774_p0 = scmp.eq.s32.totalorder %s14104_s26, 0 }
 0x16a   : > { %13768 = dma.done.wait (%p16774_p0), [#allocation6], 1280   ;;  %p16775_p2 = pmov %p16774_p0 }
 0x16b   : > { %p16776_p8 = pmov %p16774_p0 }
 0x16c   : > { %13770 = vsyncadd (%p16775_p2), [#allocation6], 4294966016 }
 0x16d   : > { %13772 = dma.done.wait (%p16776_p8), [#allocation9], 1056   ;;  %p16777_p4 = pmov %p16774_p0 }
 0x16e   : > { %p16778_p9 = pmov %p16774_p0 }
 0x16f   : > { %13774 = vsyncadd (%p16777_p4), [#allocation9], 4294966240 }
 0x170   : > { %13776 = dma.done.wait (%p16778_p9), [#allocation12], 1056   ;;  %p16779_p10 = pmov %p16774_p0 }
 0x171   : > { %p16780_p12 = pmov %p16774_p0 }
 0x172   : > { %13778 = vsyncadd (%p16779_p10), [#allocation12], 4294966240 }
 0x173   : > { %13780 = dma.done.wait (%p16780_p12), [#allocation15], 96   ;;  %p16781_p13 = pmov %p16774_p0 }
 0x174   : > { %p16782_p5 = pmov %p16774_p0 }
 0x175   : > { %13782 = vsyncadd (%p16781_p13), [#allocation15], 4294967200 }
 0x176   : > { %13784 = dma.done.wait (%p16782_p5), [#allocation18], 32   ;;  %p16783_p7 = pmov %p16774_p0 }
 0x177   : > { %v13863_v0 = vmov 0   ;;  %v12799_v1 = vld [vmem:[%s16744_s13 + $0x4] ss:$8 sps:$4 sm:$0xff]   ;;  %v12801_v2 = vld [vmem:[%s16744_s13] ss:$8 sps:$4 sm:$0xff]   ;;  %vm1370_vm0 = vcmask 523264   ;;  %v1320_v12 = vlaneseq }
 0x178   : > { %13786 = vsyncadd (%p16783_p7), [#allocation18], 4294967264  ;;  %1406 = vmatprep.mubr.bf16.mxu1 %v13863_v0  ;;  %1374 = vmatprep.subr.bf16.mxu1 %v12799_v1  ;;  %v12802_v3 = vld [vmem:[%s16744_s13 + $0x14] ss:$8 sps:$4 sm:$0xff]   ;;  %v12804_v4 = vld [vmem:[%s16744_s13 + $0x10] ss:$8 sps:$4 sm:$0xff]  }
 0x179   : > { %1375 = vmatpush1.bf16.msra.mxu1 %v12801_v2  ;;  %v12805_v5 = vld [vmem:[%s16744_s13 + $0x24] ss:$8 sps:$4 sm:$0xff]   ;;  %v12807_v6 = vld [vmem:[%s16744_s13 + $0x20] ss:$8 sps:$4 sm:$0xff]   ;;  %v12808_v7 = vld [vmem:[%s16744_s13 + $0x34] ss:$8 sps:$4 sm:$0xff]  }
 0x17a   : > { %1376 = vmatprep.subr.bf16.mxu1 %v12802_v3  ;;  %v12810_v8 = vld [vmem:[%s16744_s13 + $0x30] ss:$8 sps:$4 sm:$0xff]   ;;  %v1321_v13 = vshrl.u32 %v1320_v12, 7  ;;  %v13864_v14 = vmov 0.0   ;;  %v1318_v16 = vld [vmem:[%s16743_s17] sm:$0x3] }
 0x17b   : > { %v1305_v9 = vld [vmem:[%s14337_s24] sm:$0xff]  ;;  %v1306_v10 = vld [vmem:[%s14337_s24 + $0x8] sm:$0xff]  ;;  %11703 = vmatprep.subr.bf16.mxu0 %v13864_v14  ;;  %vm13865_vm1 = vmmov 0   ;;  %s16676_s6 = smov 120   ;;  %s16648_s12 = smov 64   ;;  %vm1431_vm2 = vcmask 64512  }
 0x17c   : > { %v14374_v11 = vpack.c.bf16 %v1306_v10, %v1305_v9  ;;  %v14380_v15 = vsub.s32 0, %v1321_v13  ;;  %v14383_v17 = vsub.s32 1, %v1321_v13  ;;  %11705 = vmatprep.mubr.msk.bf16.mxu0 %vm13865_vm1, %v13864_v14  ;;  %s16652_s28 = smov 48   ;;  %s16650_s9 = smov 56   ;;  %vm1481_vm3 = vcmask 130048  }
 0x17d   : > { %1377 = vmatpush1.bf16.msra.mxu1 %v12804_v4  ;;  %s16654_s11 = smov 40   ;;  %s16674_s0 = smov 112   ;;  %vm2471_vm4 = vcmask 195584   ;;  %vm2474_vm5 = vcmask 261120   ;;  %vm2477_vm6 = vcmask 326656   ;;  %vm2480_vm7 = vcmask 392192  }
 0x17e   : > { %1378 = vmatprep.subr.bf16.mxu1 %v12805_v5  ;;  %v1323_v18 = vrot.slane %v1318_v16, %v14380_v15  ;;  %v1327_v20 = vrot.slane %v1318_v16, %v14383_v17  ;;  %s16656_s14 = smov 32   ;;  %s16672_s1 = smov 104   ;;  %vm2483_vm8 = vcmask 457728  }
 0x17f   : > { %s16668_s23 = smov 24   ;;  %s16670_s5 = smov 96  }
 0x180   : > { %s16794_s20 = sld [smem:[#allocation39_spill]]  ;;  %s16795_s27 = sld [smem:[#allocation40_spill]] }
 0x181   : > { %1379 = vmatpush1.bf16.msra.mxu1 %v12807_v6  ;;  %s16798_s29 = smov 112   ;;  %s16799_s30 = smov 104  }
 0x182   : > { %1380 = vmatprep.subr.bf16.mxu1 %v12808_v7  ;;  %s16800_s2 = smov 96   ;;  %s16801_s18 = smov 24  }
 0x183   : > { %s16802_s16 = smov 88   ;;  %s16803_s7 = smov 16  }
 0x184   : > { %s16804_s22 = smov 80   ;;  %s16805_s19 = smov 8  }
 0x185   : > { %1381 = vmatpush1.bf16.msra.mxu1 %v12810_v8  ;;  %s16806_s15 = smov 72   ;;  %s16813_s8 = sld [smem:[#allocation62_spill]] }
 0x186   : > { %11691 = vmatprep.subr.bf16.mxu1 %v13864_v14  ;;  %p16824_p3 = scmp.ne.s32.totalorder %s16766_s4, 0 }
 0x188   : > { %10914 = vmatmul.mubr.msk.bf16.vlgmr.msra.gmra.mrb[0].mxu1 %vm1370_vm0, %v14374_v11 }
 0x189   : > { %11693 = vmatprep.mubr.msk.bf16.mxu1 %vm13865_vm1, %v13864_v14 }
 0x25b   : > { %v1408_v19 = vpop.f32.mrb[0].mxu1 }
 0x25c   : > { %v1410_v21 = vpop.f32.mrb[1].mxu1  ;;  %v1409_v23 = vadd.f32 %v1408_v19, %v1323_v18 }
 0x25d   : > { %v1412_v22 = vpop.f32.mrb[2].mxu1  ;;  %v1411_v26 = vadd.f32 %v1410_v21, %v1327_v20 }
 0x25e   : > { %v1413_v24 = vadd.f32 %v1412_v22, %v1323_v18  ;;  %v1414_v25 = vpop.f32.mrb[3].mxu1 }
 0x25f   : > { %v1415_v27 = vadd.f32 %v1414_v25, %v1327_v20 }
 0x260   : > { %v1426_v28 = vpack.c.bf16 %v1413_v24, %v1409_v23 }
 0x261   : > { %v14391_v29 = vpack.c.bf16 %v1415_v27, %v1411_v26 }
 0x262   : > { %1549 = vrot.lane.b32.xlu1 %v1426_v28, %s16676_s6  ;;  %1429 = vrot.lane.b32.xlu0 %v1426_v28, %s16648_s12  ;;  %s16664_s12 = smov 16  }
 0x266   : > { %1675 = vrot.lane.b32.xlu1 %v1426_v28, %s16652_s28  ;;  %1551 = vrot.lane.b32.xlu0 %v1426_v28, %s16650_s9  ;;  %s16666_s9 = smov 88   ;;  %s16660_s28 = smov 8  }
 0x26a   : > { %1798 = vrot.lane.b32.xlu1 %v1426_v28, %s16654_s11  ;;  %1673 = vrot.lane.b32.xlu0 %v1426_v28, %s16674_s0  ;;  %s16662_s11 = smov 80  }
 0x26e   : > { %1921 = vrot.lane.b32.xlu1 %v1426_v28, %s16656_s14  ;;  %1796 = vrot.lane.b32.xlu0 %v1426_v28, %s16672_s1  ;;  %s16658_s14 = smov 72  }
 0x272   : > { %2044 = vrot.lane.b32.xlu1 %v1426_v28, %s16668_s23  ;;  %1919 = vrot.lane.b32.xlu0 %v1426_v28, %s16670_s5 }
 0x276   : > { %2167 = vrot.lane.b32.xlu1 %v1426_v28, %s16664_s12  ;;  %2042 = vrot.lane.b32.xlu0 %v1426_v28, %s16666_s9 }
 0x27a   : > { %2290 = vrot.lane.b32.xlu1 %v1426_v28, %s16660_s28  ;;  %2165 = vrot.lane.b32.xlu0 %v1426_v28, %s16662_s11 }
 0x27e   : > { %2288 = vrot.lane.b32.xlu0 %v1426_v28, %s16658_s14 }
 0x2d4   : > { %v1430_v30 = vpop.permute.xlu0 %1429  ;;  %v1550_v32 = vpop.permute.xlu1 %1549 }
 0x2d5   : > { %v1436_v31 = vsel %vm1431_vm2, %v1430_v30, 0 }
 0x2d6   : > { %11692 = vmatpush3.bf16.xpose.msra.mxu1 %v1436_v31 }
 0x2d7   : > { %11697 = vmatprep.subr.bf16.mxu1 %v13864_v14 }
 0x2d8   : > { %v1552_v33 = vpop.permute.xlu0 %1551  ;;  %v1676_v35 = vpop.permute.xlu1 %1675 }
 0x2d9   : > { %v1557_v34 = vsel %vm1431_vm2, %v1552_v33, 0  ;;  %v1681_v36 = vsel %vm1431_vm2, %v1676_v35, 0 }
 0x2da   : > { %11704 = vmatpush3.bf16.xpose.msra.mxu0 %v1557_v34 }
 0x2db   : > { %11715 = vmatprep.subr.bf16.mxu0 %v13864_v14 }
 0x2dc   : > { %v1799_v37 = vpop.permute.xlu1 %1798  ;;  %v1674_v38 = vpop.permute.xlu0 %1673 }
 0x2dd   : > { %11694 = vmatmul.mubr.msk.bf16.vlgmr.msra.gmra.mrb[4].mxu1 %vm1431_vm2, %v1426_v28  ;;  %v1804_v39 = vsel %vm1431_vm2, %v1799_v37, 0 }
 0x2de   : > { %11698 = vmatpush3.bf16.msra.mxu1 %v14391_v29  ;;  %11699 = vmatprep.mubr.msk.bf16.mxu1 %vm13865_vm1, %v13864_v14 }
 0x2df   : > { %11709 = vmatprep.subr.bf16.mxu1 %v13864_v14 }
 0x2e0   : > { %v1922_v40 = vpop.permute.xlu1 %1921  ;;  %v1797_v41 = vpop.permute.xlu0 %1796 }
 0x2e1   : > { %11706 = vmatmul.mubr.msk.bf16.vlgmr.msra.gmra.mrb[0].mxu0 %vm1431_vm2, %v1550_v32  ;;  %v1927_v42 = vsel %vm1431_vm2, %v1922_v40, 0 }
 0x2e2   : > { %11716 = vmatpush3.bf16.xpose.msra.mxu0 %v1681_v36  ;;  %11717 = vmatprep.mubr.msk.bf16.mxu0 %vm13865_vm1, %v13864_v14 }
 0x2e3   : > { %11727 = vmatprep.subr.bf16.mxu0 %v13864_v14 }
 0x2e4   : > { %v2045_v43 = vpop.permute.xlu1 %2044  ;;  %v1920_v44 = vpop.permute.xlu0 %1919 }
 0x2e5   : > { %v2050_v45 = vsel %vm1431_vm2, %v2045_v43, 0 }
 0x2e8   : > { %v2168_v46 = vpop.permute.xlu1 %2167  ;;  %v2043_v47 = vpop.permute.xlu0 %2042 }
 0x2e9   : > { %11718 = vmatmul.mubr.msk.bf16.vlgmr.msra.gmra.mrb[4].mxu0 %vm1431_vm2, %v1674_v38  ;;  %v2173_v48 = vsel %vm1431_vm2, %v2168_v46, 0 }
 0x2ea   : > { %11728 = vmatpush3.bf16.xpose.msra.mxu0 %v1804_v39  ;;  %11729 = vmatprep.mubr.msk.bf16.mxu0 %vm13865_vm1, %v13864_v14 }
 0x2eb   : > { %11739 = vmatprep.subr.bf16.mxu0 %v13864_v14 }
 0x2ec   : > { %v2291_v49 = vpop.permute.xlu1 %2290  ;;  %v2166_v50 = vpop.permute.xlu0 %2165 }
 0x2ed   : > { %v2296_v51 = vsel %vm1431_vm2, %v2291_v49, 0 }
 0x2f0   : > { %v2289_v52 = vpop.permute.xlu0 %2288 }
 0x2f1   : > { %11730 = vmatmul.mubr.msk.bf16.vlgmr.msra.gmra.mrb[8].mxu0 %vm1431_vm2, %v1797_v41 }
 0x2f2   : > { %11740 = vmatpush3.bf16.xpose.msra.mxu0 %v1927_v42  ;;  %11741 = vmatprep.mubr.msk.bf16.mxu0 %vm13865_vm1, %v13864_v14 }
 0x2f3   : > { %11751 = vmatprep.subr.bf16.mxu0 %v13864_v14 }
 0x2f9   : > { %11742 = vmatmul.mubr.msk.bf16.vlgmr.msra.gmra.mrb[12].mxu0 %vm1431_vm2, %v1920_v44 }
 0x2fa   : > { %11752 = vmatpush3.bf16.xpose.msra.mxu0 %v2050_v45  ;;  %11753 = vmatprep.mubr.msk.bf16.mxu0 %vm13865_vm1, %v13864_v14 }
 0x2fb   : > { %11763 = vmatprep.subr.bf16.mxu0 %v13864_v14 }
 0x301   : > { %11754 = vmatmul.mubr.msk.bf16.vlgmr.msra.gmra.mrb[16].mxu0 %vm1431_vm2, %v2043_v47 }
 0x302   : > { %11764 = vmatpush3.bf16.xpose.msra.mxu0 %v2173_v48  ;;  %11765 = vmatprep.mubr.msk.bf16.mxu0 %vm13865_vm1, %v13864_v14 }
 0x303   : > { %11775 = vmatprep.subr.bf16.mxu0 %v13864_v14 }
 0x309   : > { %11766 = vmatmul.mubr.msk.bf16.vlgmr.msra.gmra.mrb[20].mxu0 %vm1431_vm2, %v2166_v50 }
 0x30a   : > { %11776 = vmatpush3.bf16.xpose.msra.mxu0 %v2296_v51  ;;  %11777 = vmatprep.mubr.msk.bf16.mxu0 %vm13865_vm1, %v13864_v14 }
 0x30b   : > { %11787 = vmatprep.subr.bf16.mxu0 %v13864_v14 }
 0x311   : > { %11778 = vmatmul.mubr.msk.bf16.vlgmr.msra.gmra.mrb[24].mxu0 %vm1431_vm2, %v2289_v52 }
 0x312   : > { %11795 = vmatprep.mubr.msk.bf16.mxu0 %vm13865_vm1, %v13864_v14 }
 0x3b0   : > { %v1472_v53 = vpop.f32.mrb[4].mxu1 }
 0x3b1   : > { %v14450_v54 = vmul.f32 0.35355338, %v1472_v53  ;;  %v11695_v55 = vpop.f32.mrb[5].mxu1 }
 0x3b2   : > { %v1475_v56 = vpop.f32.mrb[6].mxu1 }
 0x3b3   : > { %v11696_v57 = vpop.f32.mrb[7].mxu1  ;;  %v1482_v58 = vsel %vm1481_vm3, %v14450_v54, -inf  ;;  %v14456_v63 = vmul.f32 0.35355338, %v1475_v56 }
 0x3b4   : > { %1483 = vmax.xlane.f32.xlu1 %v1482_v58  ;;  %v1593_v59 = vpop.f32.mrb[0].mxu0 }
 0x3b5   : > { %v14454_v60 = vmul.f32 0.35355338, %v1593_v59  ;;  %v11707_v61 = vpop.f32.mrb[1].mxu0  ;;  %v1485_v5 = vsel %vm1481_vm3, %v14456_v63, -inf }
 0x3b6   : > { %v1596_v62 = vpop.f32.mrb[2].mxu0 }
 0x3b7   : > { %v14458_v1 = vmul.f32 0.35355338, %v1596_v62  ;;  %v11708_v2 = vpop.f32.mrb[3].mxu0  ;;  %v1602_v3 = vsel %vm1481_vm3, %v14454_v60, -inf }
 0x3b8   : > { %1603 = vmax.xlane.f32.xlu0 %v1602_v3 }
 0x3b9   : > { %v1605_v4 = vsel %vm1481_vm3, %v14458_v1, -inf }
 0x3ba   : > { %1606 = vmax.xlane.f32.xlu1 %v1605_v4 }
 0x3bc   : > { %1486 = vmax.xlane.f32.xlu0 %v1485_v5  ;;  %v1717_v6 = vpop.f32.mrb[4].mxu0 }
 0x3bd   : > { %v14466_v7 = vmul.f32 0.35355338, %v1717_v6  ;;  %v11719_v8 = vpop.f32.mrb[5].mxu0 }
 0x3be   : > { %v1720_v9 = vpop.f32.mrb[6].mxu0 }
 0x3bf   : > { %v14468_v10 = vmul.f32 0.35355338, %v1720_v9  ;;  %v11720_v12 = vpop.f32.mrb[7].mxu0  ;;  %v1726_v13 = vsel %vm1481_vm3, %v14466_v7, -inf }
 0x3c0   : > { %1727 = vmax.xlane.f32.xlu0 %v1726_v13 }
 0x3c1   : > { %v1729_v16 = vsel %vm1481_vm3, %v14468_v10, -inf }
 0x3c2   : > { %1730 = vmax.xlane.f32.xlu1 %v1729_v16 }
 0x3c4   : > { %v1840_v18 = vpop.f32.mrb[8].mxu0 }
 0x3c5   : > { %v14474_v19 = vmul.f32 0.35355338, %v1840_v18  ;;  %v11731_v20 = vpop.f32.mrb[9].mxu0 }
 0x3c6   : > { %v1843_v21 = vpop.f32.mrb[10].mxu0 }
 0x3c7   : > { %v14476_v22 = vmul.f32 0.35355338, %v1843_v21  ;;  %v11732_v23 = vpop.f32.mrb[11].mxu0  ;;  %v1849_v24 = vsel %vm1481_vm3, %v14474_v19, -inf }
 0x3c8   : > { %1850 = vmax.xlane.f32.xlu0 %v1849_v24 }
 0x3c9   : > { %v1852_v25 = vsel %vm1481_vm3, %v14476_v22, -inf }
 0x3ca   : > { %1853 = vmax.xlane.f32.xlu1 %v1852_v25 }
 0x3cc   : > { %v1963_v26 = vpop.f32.mrb[12].mxu0 }
 0x3cd   : > { %v14482_v27 = vmul.f32 0.35355338, %v1963_v26  ;;  %v11743_v28 = vpop.f32.mrb[13].mxu0 }
 0x3ce   : > { %v1966_v30 = vpop.f32.mrb[14].mxu0 }
 0x3cf   : > { %v14484_v31 = vmul.f32 0.35355338, %v1966_v30  ;;  %v11744_v32 = vpop.f32.mrb[15].mxu0  ;;  %v1972_v33 = vsel %vm1481_vm3, %v14482_v27, -inf }
 0x3d0   : > { %1973 = vmax.xlane.f32.xlu0 %v1972_v33 }
 0x3d1   : > { %v1975_v34 = vsel %vm1481_vm3, %v14484_v31, -inf }
 0x3d2   : > { %1976 = vmax.xlane.f32.xlu1 %v1975_v34 }
 0x3d4   : > { %v2086_v35 = vpop.f32.mrb[16].mxu0 }
 0x3d5   : > { %v14490_v36 = vmul.f32 0.35355338, %v2086_v35  ;;  %v11755_v37 = vpop.f32.mrb[17].mxu0 }
 0x3d6   : > { %v2089_v38 = vpop.f32.mrb[18].mxu0 }
 0x3d7   : > { %v14492_v39 = vmul.f32 0.35355338, %v2089_v38  ;;  %v11756_v40 = vpop.f32.mrb[19].mxu0  ;;  %v2095_v41 = vsel %vm1481_vm3, %v14490_v36, -inf }
 0x3d8   : > { %2096 = vmax.xlane.f32.xlu0 %v2095_v41 }
 0x3d9   : > { %v2098_v42 = vsel %vm1481_vm3, %v14492_v39, -inf }
 0x3da   : > { %2099 = vmax.xlane.f32.xlu1 %v2098_v42 }
 0x3dc   : > { %v2209_v43 = vpop.f32.mrb[20].mxu0 }
 0x3dd   : > { %v11767_v44 = vpop.f32.mrb[21].mxu0  ;;  %v14510_v56 = vmul.f32 0.35355338, %v2209_v43 }
 0x3de   : > { %v2212_v45 = vpop.f32.mrb[22].mxu0 }
 0x3df   : > { %v14498_v46 = vmul.f32 0.35355338, %v2212_v45  ;;  %v11768_v47 = vpop.f32.mrb[23].mxu0  ;;  %v2218_v58 = vsel %vm1481_vm3, %v14510_v56, -inf }
 0x3e1   : > { %v2221_v48 = vsel %vm1481_vm3, %v14498_v46, -inf }
 0x3e2   : > { %2222 = vmax.xlane.f32.xlu1 %v2221_v48 }
 0x3e4   : > { %v2332_v49 = vpop.f32.mrb[24].mxu0 }
 0x3e5   : > { %v11779_v50 = vpop.f32.mrb[25].mxu0  ;;  %v14512_v57 = vmul.f32 0.35355338, %v2332_v49 }
 0x3e6   : > { %v2335_v51 = vpop.f32.mrb[26].mxu0 }
 0x3e7   : > { %v14502_v52 = vmul.f32 0.35355338, %v2335_v51  ;;  %v11780_v53 = vpop.f32.mrb[27].mxu0  ;;  %v2341_v59 = vsel %vm1481_vm3, %v14512_v57, -inf }
 0x3e9   : > { %v2344_v55 = vsel %vm1481_vm3, %v14502_v52, -inf }
 0x3ea   : > { %2345 = vmax.xlane.f32.xlu1 %v2344_v55 }
 0x3ee   : > { %1626 = vrot.lane.b32.xlu0 %v14391_v29, %s16676_s6  ;;  %s16793_s6 = sld [smem:[#allocation38_spill]] }
 0x3fb   : > { %1749 = vrot.lane.b32.xlu1 %v14391_v29, %s16674_s0  ;;  %s16792_s0 = sld [smem:[#allocation36_spill]] }
 0x40d   : > { %2219 = vmax.xlane.f32.xlu0 %v2218_v58 }
 0x411   : > { %2342 = vmax.xlane.f32.xlu0 %v2341_v59 }
 0x441   : > { %v1484_v61 = vpop.xlane.xlu1 %1483 }
 0x442   : > { %v1488_v62 = vsub.f32 %v14450_v54, %v1484_v61 }
 0x444   : > { %v1490_v2 = vmul.f32 1.442695, %v1488_v62 }
 0x445   : > { %v1604_v3 = vpop.xlane.xlu0 %1603 }
 0x446   : > { %12999 = vpow2.f32 %v1490_v2  ;;  %v1608_v4 = vsub.f32 %v14454_v60, %v1604_v3 }
 0x447   : > { %v1607_v5 = vpop.xlane.xlu1 %1606 }
 0x448   : > { %v1610_v6 = vmul.f32 1.442695, %v1608_v4  ;;  %v1609_v8 = vsub.f32 %v14458_v1, %v1607_v5 }
 0x449   : > { %v1487_v9 = vpop.xlane.xlu0 %1486 }
 0x44a   : > { %13001 = vpow2.f32 %v1610_v6  ;;  %v1489_v12 = vsub.f32 %v14456_v63, %v1487_v9  ;;  %v1612_v13 = vmul.f32 1.442695, %v1609_v8 }
 0x44c   : > { %v1492_v16 = vmul.f32 1.442695, %v1489_v12 }
 0x44d   : > { %v1728_v18 = vpop.xlane.xlu0 %1727 }
 0x44e   : > { %13003 = vpow2.f32 %v1492_v16  ;;  %v1732_v20 = vsub.f32 %v14466_v7, %v1728_v18 }
 0x44f   : > { %v1731_v54 = vpop.xlane.xlu1 %1730  ;;  %13005 = vpow2.f32 %v1612_v13 }
 0x450   : > { %v14523_v21 = vpop.eup %12999  ;;  %v1734_v23 = vmul.f32 1.442695, %v1732_v20  ;;  %v1733_v60 = vsub.f32 %v14468_v10, %v1731_v54 }
 0x451   : > { %v1494_v1 = vsel %vm1481_vm3, %v14523_v21, 0.0 }
 0x452   : > { %13007 = vpow2.f32 %v1734_v23  ;;  %v1736_v24 = vmul.f32 1.442695, %v1733_v60  ;;  %1495 = vadd.xlane.f32.xlu0 %v1494_v1 }
 0x454   : > { %v14528_v63 = vpop.eup %13001  ;;  %13009 = vpow2.f32 %v1736_v24 }
 0x455   : > { %v1851_v25 = vpop.xlane.xlu0 %1850  ;;  %v1614_v7 = vsel %vm1481_vm3, %v14528_v63, 0.0 }
 0x456   : > { %v1855_v26 = vsub.f32 %v14474_v19, %v1851_v25  ;;  %1615 = vadd.xlane.f32.xlu0 %v1614_v7 }
 0x457   : > { %v1854_v28 = vpop.xlane.xlu1 %1853 }
 0x458   : > { %v14533_v30 = vpop.eup %13003  ;;  %v1857_v10 = vmul.f32 1.442695, %v1855_v26  ;;  %v1856_v32 = vsub.f32 %v14476_v22, %v1854_v28 }
 0x459   : > { %v1497_v33 = vsel %vm1481_vm3, %v14533_v30, 0.0  ;;  %v14538_v34 = vpop.eup %13005 }
 0x45a   : > { %13011 = vpow2.f32 %v1857_v10  ;;  %v1859_v35 = vmul.f32 1.442695, %v1856_v32  ;;  %1498 = vadd.xlane.f32.xlu1 %v1497_v33  ;;  %v1617_v19 = vsel %vm1481_vm3, %v14538_v34, 0.0 }
 0x45c   : > { %v14540_v37 = vpop.eup %13007  ;;  %13013 = vpow2.f32 %v1859_v35 }
 0x45d   : > { %v1738_v38 = vsel %vm1481_vm3, %v14540_v37, 0.0  ;;  %v1974_v42 = vpop.xlane.xlu0 %1973 }
 0x45e   : > { %v14546_v40 = vpop.eup %13009  ;;  %1618 = vadd.xlane.f32.xlu1 %v1617_v19  ;;  %1739 = vadd.xlane.f32.xlu0 %v1738_v38  ;;  %v1978_v8 = vsub.f32 %v14482_v27, %v1974_v42 }
 0x45f   : > { %v1977_v22 = vpop.xlane.xlu1 %1976  ;;  %v1741_v43 = vsel %vm1481_vm3, %v14546_v40, 0.0 }
 0x460   : > { %v1979_v41 = vsub.f32 %v14484_v31, %v1977_v22  ;;  %v1980_v9 = vmul.f32 1.442695, %v1978_v8 }
 0x462   : > { %v1982_v44 = vmul.f32 1.442695, %v1979_v41  ;;  %1742 = vadd.xlane.f32.xlu1 %v1741_v43 }
 0x464   : > { %v14551_v45 = vpop.eup %13011  ;;  %13015 = vpow2.f32 %v1982_v44 }
 0x465   : > { %v2097_v47 = vpop.xlane.xlu0 %2096  ;;  %v1861_v48 = vsel %vm1481_vm3, %v14551_v45, 0.0 }
 0x466   : > { %v14555_v49 = vpop.eup %13013  ;;  %v2101_v50 = vsub.f32 %v14490_v36, %v2097_v47  ;;  %1862 = vadd.xlane.f32.xlu0 %v1861_v48 }
 0x467   : > { %v2100_v51 = vpop.xlane.xlu1 %2099  ;;  %v1864_v31 = vsel %vm1481_vm3, %v14555_v49, 0.0 }
 0x468   : > { %v2103_v53 = vmul.f32 1.442695, %v2101_v50  ;;  %v2102_v55 = vsub.f32 %v14492_v39, %v2100_v51  ;;  %1865 = vadd.xlane.f32.xlu1 %v1864_v31 }
 0x469   : > { %v1627_v12 = vpop.permute.xlu0 %1626 }
 0x46a   : > { %13017 = vpow2.f32 %v2103_v53  ;;  %v2105_v58 = vmul.f32 1.442695, %v2102_v55 }
 0x46c   : > { %13019 = vpow2.f32 %v2105_v58 }
 0x46e   : > { %v14561_v59 = vpop.eup %13015 }
 0x46f   : > { %v2223_v61 = vpop.xlane.xlu1 %2222  ;;  %v1987_v62 = vsel %vm1481_vm3, %v14561_v59, 0.0 }
 0x470   : > { %v2225_v36 = vsub.f32 %v14498_v46, %v2223_v61  ;;  %1988 = vadd.xlane.f32.xlu1 %v1987_v62 }
 0x472   : > { %v2228_v2 = vmul.f32 1.442695, %v2225_v36 }
 0x474   : > { %v14566_v3 = vpop.eup %13017  ;;  %13021 = vpow2.f32 %v2228_v2 }
 0x475   : > { %v2107_v39 = vsel %vm1481_vm3, %v14566_v3, 0.0  ;;  %13023 = vpow2.f32 %v1980_v9 }
 0x476   : > { %v14570_v4 = vpop.eup %13019  ;;  %2108 = vadd.xlane.f32.xlu1 %v2107_v39 }
 0x477   : > { %v2110_v5 = vsel %vm1481_vm3, %v14570_v4, 0.0  ;;  %v2346_v16 = vpop.xlane.xlu1 %2345 }
 0x478   : > { %v2348_v23 = vsub.f32 %v14502_v52, %v2346_v16 }
 0x47a   : > { %2111 = vadd.xlane.f32.xlu1 %v2110_v5  ;;  %v2351_v24 = vmul.f32 1.442695, %v2348_v23 }
 0x47b   : > { %v1750_v10 = vpop.permute.xlu1 %1749 }
 0x47c   : > { %1872 = vrot.lane.b32.xlu0 %v14391_v29, %s16672_s1  ;;  %s16791_s1 = sld [smem:[#allocation34_spill]] }
 0x47e   : > { %v14576_v6 = vpop.eup %13021 }
 0x47f   : > { %v2233_v46 = vsel %vm1481_vm3, %v14576_v6, 0.0  ;;  %v14581_v13 = vpop.eup %13023 }
 0x480   : > { %2234 = vadd.xlane.f32.xlu1 %v2233_v46  ;;  %v1984_v20 = vsel %vm1481_vm3, %v14581_v13, 0.0 }
 0x49a   : > { %v2220_v18 = vpop.xlane.xlu0 %2219 }
 0x49b   : > { %v2224_v54 = vsub.f32 %v14510_v56, %v2220_v18  ;;  %1985 = vadd.xlane.f32.xlu0 %v1984_v20 }
 0x49d   : > { %v2226_v60 = vmul.f32 1.442695, %v2224_v54 }
 0x49e   : > { %v2343_v1 = vpop.xlane.xlu0 %2342 }
 0x49f   : > { %13025 = vpow2.f32 %v2226_v60  ;;  %v2347_v27 = vsub.f32 %v14512_v57, %v2343_v1 }
 0x4a1   : > { %v2349_v25 = vmul.f32 1.442695, %v2347_v27 }
 0x4a3   : > { %13027 = vpow2.f32 %v2349_v25 }
 0x4a4   : > { %13029 = vpow2.f32 %v2351_v24 }
 0x4a9   : > { %v14588_v7 = vpop.eup %13025 }
 0x4aa   : > { %v2230_v26 = vsel %vm1481_vm3, %v14588_v7, 0.0 }
 0x4ab   : > { %2231 = vadd.xlane.f32.xlu0 %v2230_v26 }
 0x4ad   : > { %v14592_v28 = vpop.eup %13027 }
 0x4ae   : > { %v2353_v52 = vsel %vm1481_vm3, %v14592_v28, 0.0  ;;  %v14596_v56 = vpop.eup %13029 }
 0x4af   : > { %2354 = vadd.xlane.f32.xlu1 %v2353_v52  ;;  %v2356_v57 = vsel %vm1481_vm3, %v14596_v56, 0.0 }
 0x4b3   : > { %2357 = vadd.xlane.f32.xlu1 %v2356_v57 }
 0x4c1   : > { %2118 = vrot.lane.b32.xlu0 %v14391_v29, %s16666_s9  ;;  %s16788_s9 = sld [smem:[#allocation35_spill]] }
 0x4c4   : > { %1995 = vrot.lane.b32.xlu1 %v14391_v29, %s16670_s5  ;;  %s16790_s5 = sld [smem:[#allocation33_spill]] }
 0x4c5   : > { %2241 = vrot.lane.b32.xlu0 %v14391_v29, %s16662_s11  ;;  %s16786_s11 = smov 48  }
 0x4c9   : > { %2364 = vrot.lane.b32.xlu0 %v14391_v29, %s16658_s14  ;;  %s16784_s14 = smov 32  }
 0x4df   : > { %v1496_v32 = vpop.xlane.xlu0 %1495 }
 0x4e0   : > { %13031 = vrcp.f32 %v1496_v32 }
 0x4e3   : > { %v1616_v35 = vpop.xlane.xlu0 %1615 }
 0x4e7   : > { %v1499_v33 = vpop.xlane.xlu1 %1498 }
 0x4e8   : > { %13033 = vrcp.f32 %v1499_v33 }
 0x4ea   : > { %v13032_v38 = vpop.eup %13031 }
 0x4eb   : > { %v1619_v19 = vpop.xlane.xlu1 %1618  ;;  %v1502_v42 = vmul.f32 %v13032_v38, %v14523_v21  ;;  %v1740_v44 = vpop.xlane.xlu0 %1739 }
 0x4ec   : > { %13035 = vrcp.f32 %v1619_v19 }
 0x4ed   : > { %13037 = vrcp.f32 %v1616_v35 }
 0x4ef   : > { %v1743_v22 = vpop.xlane.xlu1 %1742 }
 0x4f0   : > { %13039 = vrcp.f32 %v1743_v22 }
 0x4f1   : > { %13041 = vrcp.f32 %v1740_v44 }
 0x4f2   : > { %v13034_v41 = vpop.eup %13033 }
 0x4f3   : > { %v1503_v43 = vmul.f32 %v13034_v41, %v14533_v30  ;;  %v1863_v30 = vpop.xlane.xlu0 %1862 }
 0x4f5   : > { %v1504_v47 = vpack.c.bf16 %v1503_v43, %v1502_v42  ;;  %v1866_v51 = vpop.xlane.xlu1 %1865 }
 0x4f6   : > { %v13036_v29 = vpop.eup %13035  ;;  %13043 = vrcp.f32 %v1866_v51 }
 0x4f7   : > { %11700 = vmatmul.mubr.msk.bf16.vlgmr.msra.gmra.mrb[8].mxu1 %vm1481_vm3, %v1504_v47  ;;  %v13038_v48 = vpop.eup %13037  ;;  %v1623_v50 = vmul.f32 %v13036_v29, %v14538_v34  ;;  %13045 = vrcp.f32 %v1863_v30  ;;  %v1873_v62 = vpop.permute.xlu0 %1872 }
 0x4f8   : > { %11710 = vmatpush3.bf16.msra.mxu1 %v1627_v12  ;;  %11711 = vmatprep.mubr.msk.bf16.mxu1 %vm13865_vm1, %v13864_v14  ;;  %v1622_v21 = vmul.f32 %v13038_v48, %v14528_v63 }
 0x4f9   : > { %11721 = vmatprep.subr.bf16.mxu1 %v13864_v14 }
 0x4fa   : > { %v1624_v31 = vpack.c.bf16 %v1623_v50, %v1622_v21  ;;  %v13040_v53 = vpop.eup %13039 }
 0x4fb   : > { %v13042_v55 = vpop.eup %13041  ;;  %v1747_v58 = vmul.f32 %v13040_v53, %v14546_v40 }
 0x4fc   : > { %v1746_v34 = vmul.f32 %v13042_v55, %v14540_v37 }
 0x4fd   : > { %v1989_v37 = vpop.xlane.xlu1 %1988 }
 0x4fe   : > { %v1748_v61 = vpack.c.bf16 %v1747_v58, %v1746_v34 }
 0x4ff   : > { %11712 = vmatmul.mubr.msk.bf16.vlgmr.msra.gmra.mrb[12].mxu1 %vm1481_vm3, %v1624_v31 }
 0x500   : > { %11722 = vmatpush3.bf16.msra.mxu1 %v1750_v10  ;;  %11723 = vmatprep.mubr.msk.bf16.mxu1 %vm13865_vm1, %v13864_v14  ;;  %v13044_v63 = vpop.eup %13043 }
 0x501   : > { %11733 = vmatprep.subr.bf16.mxu1 %v13864_v14  ;;  %v13046_v36 = vpop.eup %13045  ;;  %v1870_v2 = vmul.f32 %v13044_v63, %v14555_v49 }
 0x502   : > { %v1869_v40 = vmul.f32 %v13046_v36, %v14551_v45 }
 0x503   : > { %v2109_v5 = vpop.xlane.xlu1 %2108 }
 0x504   : > { %v1871_v39 = vpack.c.bf16 %v1870_v2, %v1869_v40 }
 0x507   : > { %11724 = vmatmul.mubr.msk.bf16.vlgmr.msra.gmra.mrb[16].mxu1 %vm1481_vm3, %v1748_v61  ;;  %v2112_v8 = vpop.xlane.xlu1 %2111 }
 0x508   : > { %11734 = vmatpush3.bf16.msra.mxu1 %v1873_v62  ;;  %11735 = vmatprep.mubr.msk.bf16.mxu1 %vm13865_vm1, %v13864_v14  ;;  %v12811_v62 = vld [vmem:[%s16740_s21] sm:$0xff]  }
 0x509   : > { %11745 = vmatprep.subr.bf16.mxu1 %v13864_v14  ;;  %11788 = vmatpush3.bf16.msra.mxu0 %v12811_v62 }
 0x50a   : > { %11789 = vmatprep.subr.bf16.mxu0 %v13864_v14 }
 0x50d   : > { %v2235_v9 = vpop.xlane.xlu1 %2234 }
 0x50f   : > { %11736 = vmatmul.mubr.msk.bf16.vlgmr.msra.gmra.mrb[20].mxu1 %vm1481_vm3, %v1871_v39 }
 0x510   : > { %11747 = vmatprep.mubr.msk.bf16.mxu1 %vm13865_vm1, %v13864_v14 }
 0x528   : > { %v1986_v46 = vpop.xlane.xlu0 %1985 }
 0x529   : > { %13047 = vrcp.f32 %v1986_v46 }
 0x52a   : > { %13049 = vrcp.f32 %v1989_v37  ;;  %v12812_v37 = vld [vmem:[%s16740_s21 + $0x8] sm:$0xff]  }
 0x52b   : > { %13051 = vrcp.f32 %v2112_v8  ;;  %11790 = vmatpush3.bf16.msra.mxu0 %v12812_v37  ;;  %v13431_v37 = vld [vmem:[%s14337_s24] sm:$0xff] }
 0x52c   : > { %13053 = vrcp.f32 %v2109_v5  ;;  %11791 = vmatprep.subr.bf16.mxu0 %v13864_v14 }
 0x533   : > { %v13048_v49 = vpop.eup %13047 }
 0x534   : > { %v13050_v18 = vpop.eup %13049  ;;  %v1992_v45 = vmul.f32 %v13048_v49, %v14581_v13 }
 0x535   : > { %v1993_v54 = vmul.f32 %v13050_v18, %v14561_v59  ;;  %v13052_v1 = vpop.eup %13051 }
 0x536   : > { %v13054_v24 = vpop.eup %13053  ;;  %v2116_v13 = vmul.f32 %v13052_v1, %v14570_v4 }
 0x537   : > { %v1994_v60 = vpack.c.bf16 %v1993_v54, %v1992_v45  ;;  %v2115_v59 = vmul.f32 %v13054_v24, %v14566_v3 }
 0x538   : > { %v2232_v20 = vpop.xlane.xlu0 %2231 }
 0x539   : > { %13055 = vrcp.f32 %v2232_v20  ;;  %v2117_v25 = vpack.c.bf16 %v2116_v13, %v2115_v59 }
 0x53a   : > { %13057 = vrcp.f32 %v2235_v9  ;;  %v12813_v9 = vld [vmem:[%s16740_s21 + $0x10] sm:$0xff]  }
 0x53b   : > { %11792 = vmatpush3.bf16.msra.mxu0 %v12813_v9 }
 0x53c   : > { %v2355_v12 = vpop.xlane.xlu1 %2354  ;;  %v2119_v27 = vpop.permute.xlu0 %2118  ;;  %11793 = vmatprep.subr.bf16.mxu0 %v13864_v14 }
 0x540   : > { %v2358_v16 = vpop.xlane.xlu1 %2357  ;;  %v2242_v52 = vpop.permute.xlu0 %2241 }
 0x541   : > { %13059 = vrcp.f32 %v2358_v16  ;;  %v12814_v16 = vld [vmem:[%s16740_s21 + $0x18] sm:$0xff]  }
 0x542   : > { %13061 = vrcp.f32 %v2355_v12  ;;  %11794 = vmatpush3.bf16.msra.mxu0 %v12814_v16 }
 0x543   : > { %v13056_v26 = vpop.eup %13055 }
 0x544   : > { %v1996_v23 = vpop.permute.xlu1 %1995  ;;  %v13058_v57 = vpop.eup %13057  ;;  %v2238_v10 = vmul.f32 %v13056_v26, %v14588_v7 }
 0x545   : > { %11746 = vmatpush3.bf16.msra.mxu1 %v1996_v23  ;;  %v2239_v4 = vmul.f32 %v13058_v57, %v14576_v6  ;;  %v2365_v33 = vpop.permute.xlu0 %2364 }
 0x546   : > { %11757 = vmatprep.subr.bf16.mxu1 %v13864_v14 }
 0x547   : > { %v2240_v32 = vpack.c.bf16 %v2239_v4, %v2238_v10 }
 0x548   : > { %11748 = vmatmul.mubr.msk.bf16.vlgmr.msra.gmra.mrb[24].mxu1 %vm1481_vm3, %v1994_v60 }
 0x549   : > { %11758 = vmatpush3.bf16.msra.mxu1 %v2119_v27  ;;  %11759 = vmatprep.mubr.msk.bf16.mxu1 %vm13865_vm1, %v13864_v14 }
 0x54a   : > { %11769 = vmatprep.subr.bf16.mxu1 %v13864_v14 }
 0x54b   : > { %v13060_v3 = vpop.eup %13059 }
 0x54c   : > { %v13062_v35 = vpop.eup %13061  ;;  %v2362_v19 = vmul.f32 %v13060_v3, %v14596_v56 }
 0x54d   : > { %v2361_v38 = vmul.f32 %v13062_v35, %v14592_v28 }
 0x54f   : > { %v2363_v22 = vpack.c.bf16 %v2362_v19, %v2361_v38 }
 0x550   : > { %11760 = vmatmul.mubr.msk.bf16.vlgmr.msra.gmra.mrb[28].mxu1 %vm1481_vm3, %v2117_v25 }
 0x551   : > { %11770 = vmatpush3.bf16.msra.mxu1 %v2242_v52  ;;  %11771 = vmatprep.mubr.msk.bf16.mxu1 %vm13865_vm1, %v13864_v14 }
 0x552   : > { %11781 = vmatprep.subr.bf16.mxu1 %v13864_v14 }
 0x558   : > { %11772 = vmatmul.mubr.msk.bf16.vlgmr.msra.gmra.mrb[32].mxu1 %vm1481_vm3, %v2240_v32 }
 0x559   : > { %11782 = vmatpush3.bf16.msra.mxu1 %v2365_v33  ;;  %11783 = vmatprep.mubr.msk.bf16.mxu1 %vm13865_vm1, %v13864_v14 }
 0x560   : > { %11784 = vmatmul.mubr.msk.bf16.vlgmr.msra.gmra.mrb[36].mxu1 %vm1481_vm3, %v2363_v22 }
 0x561   : > { %2737 = vmatprep.mubr.bf16.mxu1 %v13863_v0 }
 0x5ca   : > { %v14653_v6 = vpop.f32.mrb[8].mxu1 }
 0x5cb   : > { %v11701_v7 = vpop.f32.mrb[9].mxu1 }
 0x5cc   : > { %v14655_v41 = vpop.f32.mrb[10].mxu1 }
 0x5cd   : > { %v11702_v42 = vpop.f32.mrb[11].mxu1 }
 0x5d2   : > { %v1666_v43 = vpop.f32.mrb[12].mxu1 }
 0x5d3   : > { %v11713_v44 = vpop.f32.mrb[13].mxu1 }
 0x5d4   : > { %v1669_v47 = vpop.f32.mrb[14].mxu1 }
 0x5d5   : > { %v12589_v29 = vpack.i.bf16 %v1669_v47, %v1666_v43  ;;  %v11714_v48 = vpop.f32.mrb[15].mxu1 }
 0x5d7   : > { %12590 = vrot.lane.b32.xlu0 %v12589_v29, %s16660_s28  ;;  %s16785_s28 = smov 40  }
 0x5da   : > { %v1789_v28 = vpop.f32.mrb[16].mxu1 }
 0x5db   : > { %v11725_v56 = vpop.f32.mrb[17].mxu1 }
 0x5dc   : > { %v1792_v50 = vpop.f32.mrb[18].mxu1 }
 0x5dd   : > { %v12594_v51 = vpack.i.bf16 %v1792_v50, %v1789_v28  ;;  %v11726_v21 = vpop.f32.mrb[19].mxu1 }
 0x5df   : > { %12595 = vrot.lane.b32.xlu1 %v12594_v51, %s16664_s12  ;;  %s16787_s12 = smov 56  }
 0x5e2   : > { %v1912_v30 = vpop.f32.mrb[20].mxu1 }
 0x5e3   : > { %v11737_v31 = vpop.f32.mrb[21].mxu1 }
 0x5e4   : > { %v1915_v53 = vpop.f32.mrb[22].mxu1 }
 0x5e5   : > { %v12599_v55 = vpack.i.bf16 %v1915_v53, %v1912_v30  ;;  %v11738_v58 = vpop.f32.mrb[23].mxu1 }
 0x5e7   : > { %12600 = vrot.lane.b32.xlu0 %v12599_v55, %s16668_s23  ;;  %s16789_s23 = sld [smem:[#allocation37_spill]] }
 0x61b   : > { %v2035_v34 = vpop.f32.mrb[24].mxu1 }
 0x61c   : > { %v11749_v61 = vpop.f32.mrb[25].mxu1 }
 0x61d   : > { %v2038_v63 = vpop.f32.mrb[26].mxu1  ;;  %v10931_v61 = vld [vmem:[%s16739_s25] ss:$0 sm:$0xff] }
 0x61e   : > { %v12604_v36 = vpack.i.bf16 %v2038_v63, %v2035_v34  ;;  %v11750_v2 = vpop.f32.mrb[27].mxu1 }
 0x620   : > { %12605 = vrot.lane.b32.xlu1 %v12604_v36, %s16784_s14 }
 0x623   : > { %v2158_v40 = vpop.f32.mrb[28].mxu1 }
 0x624   : > { %v11761_v39 = vpop.f32.mrb[29].mxu1 }
 0x625   : > { %v2161_v5 = vpop.f32.mrb[30].mxu1 }
 0x626   : > { %v12609_v46 = vpack.i.bf16 %v2161_v5, %v2158_v40  ;;  %v11762_v8 = vpop.f32.mrb[31].mxu1 }
 0x627   : > { %v13432_v8 = vld [vmem:[%s14337_s24 + $0x8] sm:$0xff] }
 0x628   : > { %12610 = vrot.lane.b32.xlu0 %v12609_v46, %s16785_s28 }
 0x62b   : > { %v2281_v12 = vpop.f32.mrb[32].mxu1 }
 0x62c   : > { %v11773_v49 = vpop.f32.mrb[33].mxu1 }
 0x62d   : > { %v2284_v18 = vpop.f32.mrb[34].mxu1 }
 0x62e   : > { %v12614_v45 = vpack.i.bf16 %v2284_v18, %v2281_v12  ;;  %v11774_v20 = vpop.f32.mrb[35].mxu1 }
 0x630   : > { %12615 = vrot.lane.b32.xlu1 %v12614_v45, %s16786_s11 }
 0x633   : > { %v2404_v54 = vpop.f32.mrb[36].mxu1 }
 0x634   : > { %v11785_v23 = vpop.f32.mrb[37].mxu1 }
 0x635   : > { %v2407_v60 = vpop.f32.mrb[38].mxu1 }
 0x636   : > { %v12619_v1 = vpack.i.bf16 %v2407_v60, %v2404_v54  ;;  %v11786_v27 = vpop.f32.mrb[39].mxu1 }
 0x638   : > { %12620 = vrot.lane.b32.xlu0 %v12619_v1, %s16787_s12 }
 0x649   : > { %v12591_v24 = vpop.permute.xlu0 %12590 }
 0x64a   : > { %v12593_v26 = vunpack.i.h.bf16 %v12591_v24  ;;  %v12592_v52 = vunpack.i.l.bf16 %v12591_v24  ;;  %v12817_v24 = vld [vmem:[%s16788_s9 + $0x4] ss:$8 sps:$4 sm:$0xff]  }
 0x64b   : > { %2705 = vmatprep.subr.bf16.mxu1 %v12817_v24  ;;  %v10948_v24 = vld [vmem:[%s16793_s6] ss:$0 sm:$0xff] }
 0x64c   : > { %v2468_v38 = vsel %vm1431_vm2, %v14655_v41, %v12593_v26  ;;  %v2467_v22 = vsel %vm1431_vm2, %v14653_v6, %v12592_v52  ;;  %v12823_v26 = vld [vmem:[%s16788_s9 + $0x24] ss:$8 sps:$4 sm:$0xff]   ;;  %v12821_v52 = vld [vmem:[%s16788_s9 + $0x20] ss:$8 sps:$4 sm:$0xff]  }
 0x651   : > { %v12596_v13 = vpop.permute.xlu1 %12595 }
 0x652   : > { %v12598_v57 = vunpack.i.h.bf16 %v12596_v13  ;;  %v12597_v10 = vunpack.i.l.bf16 %v12596_v13  ;;  %v12815_v13 = vld [vmem:[%s16788_s9] ss:$8 sps:$4 sm:$0xff]  }
 0x653   : > { %2706 = vmatpush1.bf16.msra.mxu1 %v12815_v13 }
 0x654   : > { %v2469_v43 = vsel %vm1481_vm3, %v2467_v22, %v12597_v10  ;;  %v2470_v44 = vsel %vm1481_vm3, %v2468_v38, %v12598_v57  ;;  %v12824_v57 = vld [vmem:[%s16788_s9 + $0x30] ss:$8 sps:$4 sm:$0xff]   ;;  %v12826_v10 = vld [vmem:[%s16788_s9 + $0x34] ss:$8 sps:$4 sm:$0xff]  }
 0x655   : > { %v12833_v38 = vld [vmem:[%s16789_s23 + $0x58] sm:$0xff]  }
 0x656   : > { %v12834_v22 = vld [vmem:[%s16789_s23 + $0x18] sm:$0xff]  }
 0x659   : > { %v12601_v59 = vpop.permute.xlu0 %12600 }
 0x65a   : > { %v12603_v32 = vunpack.i.h.bf16 %v12601_v59  ;;  %v12602_v3 = vunpack.i.l.bf16 %v12601_v59  ;;  %v12820_v59 = vld [vmem:[%s16788_s9 + $0x14] ss:$8 sps:$4 sm:$0xff]  }
 0x65b   : > { %2707 = vmatprep.subr.bf16.mxu1 %v12820_v59 }
 0x65c   : > { %v2472_v48 = vsel %vm2471_vm4, %v2469_v43, %v12602_v3  ;;  %v2473_v28 = vsel %vm2471_vm4, %v2470_v44, %v12603_v32  ;;  %v12828_v32 = vld [vmem:[%s16789_s23] sm:$0xff]   ;;  %v12829_v3 = vld [vmem:[%s16789_s23 + $0x48] sm:$0xff]  }
 0x65d   : > { %v12837_v43 = vld [vmem:[%s16789_s23 + $0x68] sm:$0xff]  }
 0x692   : > { %v12606_v25 = vpop.permute.xlu1 %12605 }
 0x693   : > { %v12608_v35 = vunpack.i.h.bf16 %v12606_v25  ;;  %v12607_v19 = vunpack.i.l.bf16 %v12606_v25  ;;  %v12818_v25 = vld [vmem:[%s16788_s9 + $0x10] ss:$8 sps:$4 sm:$0xff]  }
 0x694   : > { %2708 = vmatpush1.bf16.msra.mxu1 %v12818_v25 }
 0x695   : > { %v2475_v56 = vsel %vm2474_vm5, %v2472_v48, %v12607_v19  ;;  %v2476_v41 = vsel %vm2474_vm5, %v2473_v28, %v12608_v35  ;;  %2709 = vmatprep.subr.bf16.mxu1 %v12823_v26  ;;  %v12831_v35 = vld [vmem:[%s16789_s23 + $0x50] sm:$0xff]  }
 0x696   : > { %v12832_v19 = vld [vmem:[%s16789_s23 + $0x10] sm:$0xff]  }
 0x698   : > { %2710 = vmatpush1.bf16.msra.mxu1 %v12821_v52 }
 0x699   : > { %2711 = vmatprep.subr.bf16.mxu1 %v12826_v10 }
 0x69a   : > { %v12611_v4 = vpop.permute.xlu0 %12610 }
 0x69b   : > { %v12613_v7 = vunpack.i.h.bf16 %v12611_v4  ;;  %v12612_v42 = vunpack.i.l.bf16 %v12611_v4  ;;  %v12827_v4 = vld [vmem:[%s16789_s23 + $0x40] sm:$0xff]  }
 0x69c   : > { %2712 = vmatpush1.bf16.msra.mxu1 %v12824_v57  ;;  %11398 = vmatprep.subr.bf16.mxu0 %v12827_v4 }
 0x69d   : > { %v2478_v50 = vsel %vm2477_vm6, %v2475_v56, %v12612_v42  ;;  %v2479_v51 = vsel %vm2477_vm6, %v2476_v41, %v12613_v7  ;;  %v12835_v7 = vld [vmem:[%s16789_s23 + $0x60] sm:$0xff]  }
 0x69e   : > { %v12836_v42 = vld [vmem:[%s16789_s23 + $0x20] sm:$0xff]  }
 0x6a2   : > { %v12616_v33 = vpop.permute.xlu1 %12615 }
 0x6a3   : > { %v12618_v47 = vunpack.i.h.bf16 %v12616_v33  ;;  %v12617_v29 = vunpack.i.l.bf16 %v12616_v33  ;;  %v12830_v33 = vld [vmem:[%s16789_s23 + $0x8] sm:$0xff]  }
 0x6a5   : > { %v2481_v31 = vsel %vm2480_vm7, %v2478_v50, %v12617_v29  ;;  %v2482_v53 = vsel %vm2480_vm7, %v2479_v51, %v12618_v47 }
 0x6aa   : > { %v12621_v6 = vpop.permute.xlu0 %12620 }
 0x6ab   : > { %v12623_v21 = vunpack.i.h.bf16 %v12621_v6  ;;  %v12622_v30 = vunpack.i.l.bf16 %v12621_v6  ;;  %v10937_v6 = vld [vmem:[%s16790_s5] ss:$0 sm:$0xff] }
 0x6ad   : > { %v2484_v55 = vsel %vm2483_vm8, %v2481_v31, %v12622_v30  ;;  %v2485_v58 = vsel %vm2483_vm8, %v2482_v53, %v12623_v21  ;;  %v10938_v31 = vld [vmem:[%s16791_s1] ss:$0 sm:$0xff] }
 0x6ae   : > { %v2486_v34 = vpack.c.bf16 %v2485_v58, %v2484_v55 }
 0x6b0   : > { %11796 = vmatmul.mubr.msk.bf16.vlgmr.msra.gmra.mrb[28].mxu0 %vm1370_vm0, %v2486_v34 }
 0x6b1   : > { %11399 = vmatpush3.bf16.msra.mxu0 %v12828_v32 }
 0x6b2   : > { %11400 = vmatprep.subr.bf16.mxu0 %v12829_v3 }
 0x6b5   : > { %11401 = vmatpush3.bf16.msra.mxu0 %v12830_v33 }
 0x6b6   : > { %11402 = vmatprep.subr.bf16.mxu0 %v12831_v35 }
 0x6b9   : > { %11403 = vmatpush3.bf16.msra.mxu0 %v12832_v19 }
 0x6ba   : > { %11404 = vmatprep.subr.bf16.mxu0 %v12833_v38 }
 0x6bd   : > { %11405 = vmatpush3.bf16.msra.mxu0 %v12834_v22 }
 0x6be   : > { %11406 = vmatprep.subr.bf16.mxu0 %v12835_v7 }
 0x6c1   : > { %11407 = vmatpush3.bf16.msra.mxu0 %v12836_v42 }
 0x6c2   : > { %11408 = vmatprep.subr.bf16.mxu0 %v12837_v43 }
 0x783   : > { %v2554_v63 = vpop.f32.mrb[28].mxu0 }
 0x784   : > { %v2555_v62 = vadd.f32 %v10931_v61, %v2554_v63  ;;  %v11797_v36 = vpop.f32.mrb[29].mxu0  ;;  %v12839_v63 = vld [vmem:[%s16789_s23 + $0x70] sm:$0xff]  }
 0x785   : > { %v2557_v2 = vpop.f32.mrb[30].mxu0  ;;  %v12841_v36 = vld [vmem:[%s16789_s23 + $0x78] sm:$0xff]  }
 0x786   : > { %v2558_v40 = vadd.f32 %v10931_v61, %v2557_v2  ;;  %v11798_v39 = vpop.f32.mrb[31].mxu0  ;;  %v2561_v5 = vadd.f32 %v13431_v37, %v2555_v62  ;;  %v12838_v61 = vld [vmem:[%s16789_s23 + $0x28] sm:$0xff]   ;;  %v12840_v62 = vld [vmem:[%s16789_s23 + $0x30] sm:$0xff]   ;;  %v12842_v2 = vld [vmem:[%s16789_s23 + $0x38] sm:$0xff]  }
 0x787   : > { %11409 = vmatpush3.bf16.msra.mxu0 %v12838_v61 }
 0x788   : > { %v2565_v46 = vsel %vm1370_vm0, %v2561_v5, 0.0  ;;  %v2562_v9 = vadd.f32 %v13432_v8, %v2558_v40  ;;  %11410 = vmatprep.subr.bf16.mxu0 %v12839_v63  ;;  %v2616_v40 = vld [vmem:[%s16792_s0] sm:$0x3] }
 0x789   : > { %2566 = vadd.xlane.f32.xlu1 %v2565_v46  ;;  %v2655_v39 = vrot.slane %v2616_v40, %v14380_v15  ;;  %v2659_v37 = vrot.slane %v2616_v40, %v14383_v17  ;;  %v10965_v63 = vld [vmem:[%s16794_s20] ss:$0 sm:$0xff] }
 0x78a   : > { %v2568_v12 = vsel %vm1370_vm0, %v2562_v9, 0.0 }
 0x78b   : > { %2569 = vadd.xlane.f32.xlu0 %v2568_v12  ;;  %11411 = vmatpush3.bf16.msra.mxu0 %v12840_v62 }
 0x78c   : > { %11412 = vmatprep.subr.bf16.mxu0 %v12841_v36 }
 0x78f   : > { %11413 = vmatpush3.bf16.msra.mxu0 %v12842_v2 }
 0x790   : > { %11811 = vmatprep.subr.bf16.mxu0 %v13864_v14 }
 0x816   : > { %v2567_v49 = vpop.xlane.xlu1 %2566 }
 0x817   : > { %v2572_v16 = vmul.f32 0.015625, %v2567_v49 }
 0x818   : > { %v2570_v18 = vpop.xlane.xlu0 %2569 }
 0x819   : > { %v2574_v45 = vsub.f32 %v2561_v5, %v2572_v16  ;;  %v2573_v20 = vmul.f32 0.015625, %v2570_v18 }
 0x81b   : > { %v2575_v54 = vsub.f32 %v2562_v9, %v2573_v20  ;;  %v2576_v23 = vmul.f32 %v2574_v45, %v2574_v45 }
 0x81d   : > { %v2578_v60 = vsel %vm1370_vm0, %v2576_v23, 0.0  ;;  %v2577_v1 = vmul.f32 %v2575_v54, %v2575_v54 }
 0x81e   : > { %2579 = vadd.xlane.f32.xlu0 %v2578_v60 }
 0x81f   : > { %v2581_v27 = vsel %vm1370_vm0, %v2577_v1, 0.0 }
 0x820   : > { %2582 = vadd.xlane.f32.xlu1 %v2581_v27 }
 0x8ab   : > { %v2580_v44 = vpop.xlane.xlu0 %2579 }
 0x8ac   : > { %v2584_v47 = vmul.f32 0.015625, %v2580_v44 }
 0x8ad   : > { %v2583_v29 = vpop.xlane.xlu1 %2582 }
 0x8ae   : > { %v2586_v48 = vadd.f32 1e-05, %v2584_v47  ;;  %v2585_v28 = vmul.f32 0.015625, %v2583_v29 }
 0x8b0   : > { %13063 = vrsqrt.f32 %v2586_v48  ;;  %v2587_v56 = vadd.f32 1e-05, %v2585_v28  ;;  %v12845_v48 = vld [vmem:[%s16744_s13 + $0x44] ss:$8 sps:$4 sm:$0xff]   ;;  %v12843_v28 = vld [vmem:[%s16744_s13 + $0x40] ss:$8 sps:$4 sm:$0xff]  }
 0x8b1   : > { %3009 = vmatprep.subr.bf16.mxu1 %v12845_v48 }
 0x8b2   : > { %13065 = vrsqrt.f32 %v2587_v56  ;;  %v12848_v56 = vld [vmem:[%s16744_s13 + $0x54] ss:$8 sps:$4 sm:$0xff]  }
 0x8ba   : > { %v13064_v41 = vpop.eup %13063 }
 0x8bb   : > { %v2590_v50 = vmul.f32 %v13064_v41, %v2574_v45  ;;  %v12846_v41 = vld [vmem:[%s16744_s13 + $0x50] ss:$8 sps:$4 sm:$0xff]  }
 0x8bc   : > { %v13066_v51 = vpop.eup %13065 }
 0x8bd   : > { %v2598_v21 = vmul.f32 %v10937_v6, %v2590_v50  ;;  %v2591_v30 = vmul.f32 %v13066_v51, %v2575_v54  ;;  %v12849_v50 = vld [vmem:[%s16744_s13 + $0x60] ss:$8 sps:$4 sm:$0xff]   ;;  %v12852_v51 = vld [vmem:[%s16744_s13 + $0x70] ss:$8 sps:$4 sm:$0xff]  }
 0x8bf   : > { %v2599_v53 = vmul.f32 %v10937_v6, %v2591_v30  ;;  %v2606_v55 = vadd.f32 %v10938_v31, %v2598_v21  ;;  %v12851_v6 = vld [vmem:[%s16744_s13 + $0x64] ss:$8 sps:$4 sm:$0xff]   ;;  %v12854_v21 = vld [vmem:[%s16744_s13 + $0x74] ss:$8 sps:$4 sm:$0xff]   ;;  %s16796_s13 = smov 64  }
 0x8c1   : > { %v2607_v58 = vadd.f32 %v10938_v31, %v2599_v53 }
 0x8c3   : > { %v2650_v34 = vpack.c.bf16 %v2607_v58, %v2606_v55 }
 0x8c5   : > { %10947 = vmatmul.mubr.msk.bf16.vlgmr.msra.gmra.mrb[40].mxu1 %vm1370_vm0, %v2650_v34 }
 0x8c6   : > { %3041 = vmatprep.mubr.bf16.mxu1 %v13863_v0  ;;  %3010 = vmatpush1.bf16.msra.mxu1 %v12843_v28 }
 0x8c7   : > { %3011 = vmatprep.subr.bf16.mxu1 %v12848_v56 }
 0x8ca   : > { %3012 = vmatpush1.bf16.msra.mxu1 %v12846_v41 }
 0x8cb   : > { %3013 = vmatprep.subr.bf16.mxu1 %v12851_v6 }
 0x8ce   : > { %3014 = vmatpush1.bf16.msra.mxu1 %v12849_v50 }
 0x8cf   : > { %3015 = vmatprep.subr.bf16.mxu1 %v12854_v21 }
 0x8d2   : > { %3016 = vmatpush1.bf16.msra.mxu1 %v12852_v51 }
 0x8d3   : > { %11799 = vmatprep.subr.bf16.mxu1 %v13864_v14 }
 0x998   : > { %v2739_v5 = vpop.f32.mrb[40].mxu1 }
 0x999   : > { %v2740_v46 = vadd.f32 %v2739_v5, %v2655_v39  ;;  %v2741_v8 = vpop.f32.mrb[41].mxu1 }
 0x99a   : > { %v2742_v9 = vadd.f32 %v2741_v8, %v2659_v37  ;;  %v2743_v12 = vpop.f32.mrb[42].mxu1 }
 0x99b   : > { %v2744_v49 = vadd.f32 %v2743_v12, %v2655_v39  ;;  %v2745_v16 = vpop.f32.mrb[43].mxu1  ;;  %v2748_v45 = vmax.f32 %v2740_v46, 0.0  ;;  %v10966_v39 = vld [vmem:[%s16795_s27] ss:$0 sm:$0xff] }
 0x99c   : > { %v2746_v18 = vadd.f32 %v2745_v16, %v2659_v37  ;;  %v2749_v54 = vmax.f32 %v2742_v9, 0.0  ;;  %v10975_v9 = vld [vmem:[%s16743_s17 + $0x2] sm:$0x3]  ;;  %s16797_s17 = smov 120  }
 0x99d   : > { %v2750_v20 = vmax.f32 %v2744_v49, 0.0  ;;  %v2959_v12 = vrot.slane %v10975_v9, %v14380_v15  ;;  %v2963_v16 = vrot.slane %v10975_v9, %v14383_v17 }
 0x99e   : > { %v2751_v23 = vmax.f32 %v2746_v18, 0.0 }
 0x99f   : > { %v2752_v60 = vpack.c.bf16 %v2750_v20, %v2748_v45 }
 0x9a0   : > { %v2753_v1 = vpack.c.bf16 %v2751_v23, %v2749_v54 }
 0x9a2   : > { %2888 = vmatprep.mubr.bf16.mxu0 %v2753_v1 }
 0x9a3   : > { %2889 = vmatmul.mubr.bf16.vlgmr.msra.gmra.mrb[32].mxu0 %v2752_v60 }
 0x9a4   : > { %11813 = vmatprep.mubr.msk.bf16.mxu0 %vm13865_vm1, %v13864_v14 }
 0xa76   : > { %v11414_v27 = vpop.f32.mrb[32].mxu0 }
 0xa77   : > { %v11415_v13 = vpop.f32.mrb[33].mxu0 }
 0xa78   : > { %v11416_v59 = vadd.f32 %v11415_v13, %v11414_v27  ;;  %v11417_v25 = vpop.f32.mrb[34].mxu0 }
 0xa79   : > { %v11418_v26 = vpop.f32.mrb[35].mxu0 }
 0xa7a   : > { %v2891_v52 = vadd.f32 %v11416_v59, %v10948_v24  ;;  %v11419_v57 = vadd.f32 %v11418_v26, %v11417_v25 }
 0xa7c   : > { %v2894_v10 = vadd.f32 %v11419_v57, %v10948_v24  ;;  %v2897_v4 = vadd.f32 %v2891_v52, %v2606_v55 }
 0xa7e   : > { %v2901_v32 = vsel %vm1370_vm0, %v2897_v4, 0.0  ;;  %v2898_v3 = vadd.f32 %v2894_v10, %v2607_v58 }
 0xa7f   : > { %2902 = vadd.xlane.f32.xlu0 %v2901_v32 }
 0xa80   : > { %v2904_v33 = vsel %vm1370_vm0, %v2898_v3, 0.0 }
 0xa81   : > { %2905 = vadd.xlane.f32.xlu1 %v2904_v33 }
 0xb0c   : > { %v2903_v35 = vpop.xlane.xlu0 %2902 }
 0xb0d   : > { %v2907_v19 = vmul.f32 0.015625, %v2903_v35 }
 0xb0e   : > { %v2906_v38 = vpop.xlane.xlu1 %2905 }
 0xb0f   : > { %v2909_v22 = vsub.f32 %v2897_v4, %v2907_v19  ;;  %v2908_v7 = vmul.f32 0.015625, %v2906_v38 }
 0xb11   : > { %v2910_v42 = vsub.f32 %v2898_v3, %v2908_v7  ;;  %v2911_v43 = vmul.f32 %v2909_v22, %v2909_v22 }
 0xb13   : > { %v2913_v44 = vsel %vm1370_vm0, %v2911_v43, 0.0  ;;  %v2912_v47 = vmul.f32 %v2910_v42, %v2910_v42 }
 0xb14   : > { %2914 = vadd.xlane.f32.xlu0 %v2913_v44 }
 0xb15   : > { %v2916_v29 = vsel %vm1370_vm0, %v2912_v47, 0.0 }
 0xb16   : > { %2917 = vadd.xlane.f32.xlu1 %v2916_v29 }
 0xba1   : > { %v2915_v30 = vpop.xlane.xlu0 %2914 }
 0xba2   : > { %v2919_v31 = vmul.f32 0.015625, %v2915_v30 }
 0xba3   : > { %v2918_v53 = vpop.xlane.xlu1 %2917 }
 0xba4   : > { %v2921_v55 = vadd.f32 1e-05, %v2919_v31  ;;  %v2920_v58 = vmul.f32 0.015625, %v2918_v53 }
 0xba6   : > { %13067 = vrsqrt.f32 %v2921_v55  ;;  %v2922_v34 = vadd.f32 1e-05, %v2920_v58 }
 0xba8   : > { %13069 = vrsqrt.f32 %v2922_v34 }
 0xbb0   : > { %v13068_v61 = vpop.eup %13067 }
 0xbb1   : > { %v2925_v62 = vmul.f32 %v13068_v61, %v2909_v22 }
 0xbb2   : > { %v13070_v36 = vpop.eup %13069 }
 0xbb3   : > { %v2933_v2 = vmul.f32 %v10965_v63, %v2925_v62  ;;  %v2926_v40 = vmul.f32 %v13070_v36, %v2910_v42 }
 0xbb5   : > { %v2934_v37 = vmul.f32 %v10965_v63, %v2926_v40  ;;  %v14745_v5 = vadd.f32 %v10966_v39, %v2933_v2 }
 0xbb7   : > { %v14747_v46 = vadd.f32 %v10966_v39, %v2934_v37 }
 0xbb9   : > { %v2943_v8 = vpack.c.bf16 %v14747_v46, %v14745_v5 }
 0xbbb   : > { %10984 = vmatmul.mubr.msk.bf16.vlgmr.msra.gmra.mrb[44].mxu1 %vm1370_vm0, %v2943_v8 }
 0xbbc   : > { %11801 = vmatprep.mubr.msk.bf16.mxu1 %vm13865_vm1, %v13864_v14 }
 0xc8e   : > { %v3043_v49 = vpop.f32.mrb[44].mxu1 }
 0xc8f   : > { %v3045_v18 = vpop.f32.mrb[45].mxu1  ;;  %v3044_v20 = vadd.f32 %v3043_v49, %v2959_v12 }
 0xc90   : > { %v3047_v45 = vpop.f32.mrb[46].mxu1  ;;  %v3046_v60 = vadd.f32 %v3045_v18, %v2963_v16 }
 0xc91   : > { %v3048_v54 = vadd.f32 %v3047_v45, %v2959_v12  ;;  %v3049_v23 = vpop.f32.mrb[47].mxu1 }
 0xc92   : > { %v3050_v1 = vadd.f32 %v3049_v23, %v2963_v16 }
 0xc93   : > { %v3063_v27 = vpack.c.bf16 %v3048_v54, %v3044_v20 }
 0xc94   : > { %v14757_v24 = vpack.c.bf16 %v3050_v1, %v3046_v60 }
 0xc95   : > { %3186 = vrot.lane.b32.xlu1 %v3063_v27, %s16787_s12  ;;  %3066 = vrot.lane.b32.xlu0 %v3063_v27, %s16796_s13 }
 0xc99   : > { %3184 = vrot.lane.b32.xlu1 %v3063_v27, %s16797_s17  ;;  %3310 = vrot.lane.b32.xlu0 %v3063_v27, %s16786_s11 }
 0xc9d   : > { %3308 = vrot.lane.b32.xlu1 %v3063_v27, %s16798_s29  ;;  %3433 = vrot.lane.b32.xlu0 %v3063_v27, %s16785_s28 }
 0xca1   : > { %3431 = vrot.lane.b32.xlu1 %v3063_v27, %s16799_s30  ;;  %3556 = vrot.lane.b32.xlu0 %v3063_v27, %s16784_s14 }
 0xca5   : > { %3554 = vrot.lane.b32.xlu1 %v3063_v27, %s16800_s2  ;;  %3679 = vrot.lane.b32.xlu0 %v3063_v27, %s16801_s18 }
 0xca9   : > { %3677 = vrot.lane.b32.xlu1 %v3063_v27, %s16802_s16  ;;  %3802 = vrot.lane.b32.xlu0 %v3063_v27, %s16803_s7 }
 0xcad   : > { %3800 = vrot.lane.b32.xlu1 %v3063_v27, %s16804_s22  ;;  %3925 = vrot.lane.b32.xlu0 %v3063_v27, %s16805_s19 }
 0xcb1   : > { %3923 = vrot.lane.b32.xlu1 %v3063_v27, %s16806_s15 }
 0xd07   : > { %v3187_v13 = vpop.permute.xlu1 %3186  ;;  %v3067_v59 = vpop.permute.xlu0 %3066 }
 0xd08   : > { %v3192_v25 = vsel %vm1431_vm2, %v3187_v13, 0  ;;  %v3072_v26 = vsel %vm1431_vm2, %v3067_v59, 0 }
 0xd09   : > { %11800 = vmatpush3.bf16.xpose.msra.mxu1 %v3072_v26  ;;  %11812 = vmatpush3.bf16.xpose.msra.mxu0 %v3192_v25 }
 0xd0a   : > { %11805 = vmatprep.subr.bf16.mxu1 %v13864_v14  ;;  %11823 = vmatprep.subr.bf16.mxu0 %v13864_v14 }
 0xd0b   : > { %v3311_v52 = vpop.permute.xlu0 %3310  ;;  %v3185_v57 = vpop.permute.xlu1 %3184 }
 0xd0c   : > { %v3316_v10 = vsel %vm1431_vm2, %v3311_v52, 0 }
 0xd0f   : > { %v3434_v4 = vpop.permute.xlu0 %3433  ;;  %v3309_v32 = vpop.permute.xlu1 %3308 }
 0xd10   : > { %11802 = vmatmul.mubr.msk.bf16.vlgmr.msra.gmra.mrb[48].mxu1 %vm1431_vm2, %v3063_v27  ;;  %11814 = vmatmul.mubr.msk.bf16.vlgmr.msra.gmra.mrb[36].mxu0 %vm1431_vm2, %v3185_v57  ;;  %v3439_v3 = vsel %vm1431_vm2, %v3434_v4, 0 }
 0xd11   : > { %11806 = vmatpush3.bf16.msra.mxu1 %v14757_v24  ;;  %11824 = vmatpush3.bf16.xpose.msra.mxu0 %v3316_v10 }
 0xd12   : > { %11825 = vmatprep.mubr.msk.bf16.mxu0 %vm13865_vm1, %v13864_v14  ;;  %11835 = vmatprep.subr.bf16.mxu0 %v13864_v14 }
 0xd13   : > { %11807 = vmatprep.mubr.msk.bf16.mxu1 %vm13865_vm1, %v13864_v14  ;;  %11817 = vmatprep.subr.bf16.mxu1 %v13864_v14  ;;  %v3557_v33 = vpop.permute.xlu0 %3556  ;;  %v3432_v35 = vpop.permute.xlu1 %3431 }
 0xd14   : > { %v3562_v19 = vsel %vm1431_vm2, %v3557_v33, 0 }
 0xd17   : > { %v3680_v38 = vpop.permute.xlu0 %3679  ;;  %v3555_v22 = vpop.permute.xlu1 %3554 }
 0xd18   : > { %11826 = vmatmul.mubr.msk.bf16.vlgmr.msra.gmra.mrb[40].mxu0 %vm1431_vm2, %v3309_v32  ;;  %v3685_v7 = vsel %vm1431_vm2, %v3680_v38, 0 }
 0xd19   : > { %11836 = vmatpush3.bf16.xpose.msra.mxu0 %v3439_v3  ;;  %11837 = vmatprep.mubr.msk.bf16.mxu0 %vm13865_vm1, %v13864_v14 }
 0xd1a   : > { %11847 = vmatprep.subr.bf16.mxu0 %v13864_v14 }
 0xd1b   : > { %v3803_v42 = vpop.permute.xlu0 %3802  ;;  %v3678_v43 = vpop.permute.xlu1 %3677 }
 0xd1c   : > { %v3808_v44 = vsel %vm1431_vm2, %v3803_v42, 0 }
 0xd1f   : > { %v3926_v47 = vpop.permute.xlu0 %3925  ;;  %v3801_v29 = vpop.permute.xlu1 %3800 }
 0xd20   : > { %11838 = vmatmul.mubr.msk.bf16.vlgmr.msra.gmra.mrb[44].mxu0 %vm1431_vm2, %v3432_v35  ;;  %v3931_v48 = vsel %vm1431_vm2, %v3926_v47, 0 }
 0xd21   : > { %11848 = vmatpush3.bf16.xpose.msra.mxu0 %v3562_v19  ;;  %11849 = vmatprep.mubr.msk.bf16.mxu0 %vm13865_vm1, %v13864_v14 }
 0xd22   : > { %11859 = vmatprep.subr.bf16.mxu0 %v13864_v14 }
 0xd23   : > { %v3924_v28 = vpop.permute.xlu1 %3923 }
 0xd28   : > { %11850 = vmatmul.mubr.msk.bf16.vlgmr.msra.gmra.mrb[48].mxu0 %vm1431_vm2, %v3555_v22 }
 0xd29   : > { %11860 = vmatpush3.bf16.xpose.msra.mxu0 %v3685_v7  ;;  %11861 = vmatprep.mubr.msk.bf16.mxu0 %vm13865_vm1, %v13864_v14 }
 0xd2a   : > { %11871 = vmatprep.subr.bf16.mxu0 %v13864_v14 }
 0xd30   : > { %11862 = vmatmul.mubr.msk.bf16.vlgmr.msra.gmra.mrb[52].mxu0 %vm1431_vm2, %v3678_v43 }
 0xd31   : > { %11872 = vmatpush3.bf16.xpose.msra.mxu0 %v3808_v44  ;;  %11873 = vmatprep.mubr.msk.bf16.mxu0 %vm13865_vm1, %v13864_v14 }
 0xd32   : > { %11883 = vmatprep.subr.bf16.mxu0 %v13864_v14 }
 0xd38   : > { %11874 = vmatmul.mubr.msk.bf16.vlgmr.msra.gmra.mrb[56].mxu0 %vm1431_vm2, %v3801_v29 }
 0xd39   : > { %11884 = vmatpush3.bf16.xpose.msra.mxu0 %v3931_v48  ;;  %11885 = vmatprep.mubr.msk.bf16.mxu0 %vm13865_vm1, %v13864_v14 }
 0xd3a   : > { %11895 = vmatprep.subr.bf16.mxu0 %v13864_v14 }
 0xd40   : > { %11886 = vmatmul.mubr.msk.bf16.vlgmr.msra.gmra.mrb[60].mxu0 %vm1431_vm2, %v3924_v28 }
 0xd41   : > { %11903 = vmatprep.mubr.msk.bf16.mxu0 %vm13865_vm1, %v13864_v14 }
 0xde3   : > { %v3108_v56 = vpop.f32.mrb[48].mxu1  ;;  %v3228_v41 = vpop.f32.mrb[36].mxu0 }
 0xde4   : > { %v14816_v6 = vmul.f32 0.35355338, %v3108_v56  ;;  %v11803_v50 = vpop.f32.mrb[49].mxu1  ;;  %v11815_v51 = vpop.f32.mrb[37].mxu0  ;;  %v14820_v58 = vmul.f32 0.35355338, %v3228_v41 }
 0xde5   : > { %v3111_v21 = vpop.f32.mrb[50].mxu1  ;;  %v3231_v30 = vpop.f32.mrb[38].mxu0 }
 0xde6   : > { %v14818_v31 = vmul.f32 0.35355338, %v3111_v21  ;;  %v11804_v53 = vpop.f32.mrb[51].mxu1  ;;  %v11816_v55 = vpop.f32.mrb[39].mxu0  ;;  %v3117_v34 = vsel %vm1481_vm3, %v14816_v6, -inf  ;;  %v3237_v62 = vsel %vm1481_vm3, %v14820_v58, -inf }
 0xde7   : > { %3118 = vmax.xlane.f32.xlu0 %v3117_v34  ;;  %v14826_v63 = vmul.f32 0.35355338, %v3231_v30 }
 0xde8   : > { %v3120_v61 = vsel %vm1481_vm3, %v14818_v31, -inf }
 0xde9   : > { %3121 = vmax.xlane.f32.xlu1 %v3120_v61  ;;  %v3240_v8 = vsel %vm1481_vm3, %v14826_v63, -inf }
 0xdeb   : > { %v3352_v36 = vpop.f32.mrb[40].mxu0  ;;  %3238 = vmax.xlane.f32.xlu0 %v3237_v62 }
 0xdec   : > { %v11827_v2 = vpop.f32.mrb[41].mxu0  ;;  %v14858_v47 = vmul.f32 0.35355338, %v3352_v36 }
 0xded   : > { %v3355_v40 = vpop.f32.mrb[42].mxu0 }
 0xdee   : > { %v11828_v39 = vpop.f32.mrb[43].mxu0  ;;  %v14830_v37 = vmul.f32 0.35355338, %v3355_v40  ;;  %v3361_v48 = vsel %vm1481_vm3, %v14858_v47, -inf }
 0xdef   : > { %3241 = vmax.xlane.f32.xlu0 %v3240_v8 }
 0xdf0   : > { %v3364_v9 = vsel %vm1481_vm3, %v14830_v37, -inf }
 0xdf3   : > { %v3475_v12 = vpop.f32.mrb[44].mxu0  ;;  %3365 = vmax.xlane.f32.xlu0 %v3364_v9 }
 0xdf4   : > { %v11839_v49 = vpop.f32.mrb[45].mxu0  ;;  %v14860_v29 = vmul.f32 0.35355338, %v3475_v12 }
 0xdf5   : > { %v3478_v16 = vpop.f32.mrb[46].mxu0 }
 0xdf6   : > { %v14836_v18 = vmul.f32 0.35355338, %v3478_v16  ;;  %v11840_v45 = vpop.f32.mrb[47].mxu0  ;;  %v3484_v56 = vsel %vm1481_vm3, %v14860_v29, -inf }
 0xdf8   : > { %v3487_v20 = vsel %vm1481_vm3, %v14836_v18, -inf }
 0xdf9   : > { %3488 = vmax.xlane.f32.xlu0 %v3487_v20 }
 0xdfa   : > { %3261 = vrot.lane.b32.xlu1 %v14757_v24, %s16797_s17 }
 0xdfb   : > { %v3598_v54 = vpop.f32.mrb[48].mxu0 }
 0xdfc   : > { %v11851_v23 = vpop.f32.mrb[49].mxu0  ;;  %v14864_v28 = vmul.f32 0.35355338, %v3598_v54 }
 0xdfd   : > { %v3601_v60 = vpop.f32.mrb[50].mxu0 }
 0xdfe   : > { %v14842_v1 = vmul.f32 0.35355338, %v3601_v60  ;;  %v11852_v27 = vpop.f32.mrb[51].mxu0  ;;  %v3607_v50 = vsel %vm1481_vm3, %v14864_v28, -inf }
 0xe00   : > { %v3610_v13 = vsel %vm1481_vm3, %v14842_v1, -inf }
 0xe01   : > { %3611 = vmax.xlane.f32.xlu0 %v3610_v13 }
 0xe03   : > { %v3721_v59 = vpop.f32.mrb[52].mxu0 }
 0xe04   : > { %v11863_v25 = vpop.f32.mrb[53].mxu0  ;;  %v14868_v41 = vmul.f32 0.35355338, %v3721_v59 }
 0xe05   : > { %v3724_v26 = vpop.f32.mrb[54].mxu0 }
 0xe06   : > { %v14846_v52 = vmul.f32 0.35355338, %v3724_v26  ;;  %v11864_v57 = vpop.f32.mrb[55].mxu0  ;;  %v3730_v21 = vsel %vm1481_vm3, %v14868_v41, -inf }
 0xe08   : > { %v3733_v10 = vsel %vm1481_vm3, %v14846_v52, -inf }
 0xe09   : > { %3734 = vmax.xlane.f32.xlu0 %v3733_v10 }
 0xe0b   : > { %v3844_v4 = vpop.f32.mrb[56].mxu0 }
 0xe0c   : > { %v11875_v32 = vpop.f32.mrb[57].mxu0  ;;  %v14872_v51 = vmul.f32 0.35355338, %v3844_v4 }
 0xe0d   : > { %v3847_v3 = vpop.f32.mrb[58].mxu0 }
 0xe0e   : > { %v14850_v33 = vmul.f32 0.35355338, %v3847_v3  ;;  %v11876_v35 = vpop.f32.mrb[59].mxu0  ;;  %v3853_v53 = vsel %vm1481_vm3, %v14872_v51, -inf }
 0xe10   : > { %v3856_v19 = vsel %vm1481_vm3, %v14850_v33, -inf }
 0xe11   : > { %3857 = vmax.xlane.f32.xlu0 %v3856_v19 }
 0xe13   : > { %v3967_v38 = vpop.f32.mrb[60].mxu0 }
 0xe14   : > { %v11887_v22 = vpop.f32.mrb[61].mxu0  ;;  %v14876_v30 = vmul.f32 0.35355338, %v3967_v38 }
 0xe15   : > { %v3970_v7 = vpop.f32.mrb[62].mxu0 }
 0xe16   : > { %v14854_v42 = vmul.f32 0.35355338, %v3970_v7  ;;  %v11888_v43 = vpop.f32.mrb[63].mxu0  ;;  %v3976_v55 = vsel %vm1481_vm3, %v14876_v30, -inf }
 0xe18   : > { %v3979_v44 = vsel %vm1481_vm3, %v14854_v42, -inf }
 0xe19   : > { %3980 = vmax.xlane.f32.xlu0 %v3979_v44 }
 0xe1e   : > { %3362 = vmax.xlane.f32.xlu1 %v3361_v48 }
 0xe22   : > { %3485 = vmax.xlane.f32.xlu1 %v3484_v56 }
 0xe26   : > { %3608 = vmax.xlane.f32.xlu1 %v3607_v50 }
 0xe2a   : > { %3731 = vmax.xlane.f32.xlu1 %v3730_v21 }
 0xe2e   : > { %3854 = vmax.xlane.f32.xlu1 %v3853_v53 }
 0xe2f   : > { %3384 = vrot.lane.b32.xlu0 %v14757_v24, %s16798_s29 }
 0xe32   : > { %3977 = vmax.xlane.f32.xlu1 %v3976_v55 }
 0xe43   : > { %3507 = vrot.lane.b32.xlu1 %v14757_v24, %s16799_s30 }
 0xe74   : > { %v3119_v34 = vpop.xlane.xlu0 %3118 }
 0xe75   : > { %v3123_v61 = vsub.f32 %v14816_v6, %v3119_v34 }
 0xe76   : > { %v3122_v62 = vpop.xlane.xlu1 %3121 }
 0xe77   : > { %v3124_v36 = vsub.f32 %v14818_v31, %v3122_v62  ;;  %v3125_v2 = vmul.f32 1.442695, %v3123_v61 }
 0xe78   : > { %v3239_v39 = vpop.xlane.xlu0 %3238 }
 0xe79   : > { %v3127_v40 = vmul.f32 1.442695, %v3124_v36  ;;  %13071 = vpow2.f32 %v3125_v2  ;;  %v3243_v8 = vsub.f32 %v14820_v58, %v3239_v39 }
 0xe7b   : > { %13073 = vpow2.f32 %v3127_v40  ;;  %v3245_v9 = vmul.f32 1.442695, %v3243_v8 }
 0xe7c   : > { %v3242_v12 = vpop.xlane.xlu0 %3241 }
 0xe7d   : > { %13075 = vpow2.f32 %v3245_v9  ;;  %v3244_v49 = vsub.f32 %v14826_v63, %v3242_v12 }
 0xe7f   : > { %v3247_v16 = vmul.f32 1.442695, %v3244_v49 }
 0xe80   : > { %v3366_v45 = vpop.xlane.xlu0 %3365 }
 0xe81   : > { %13077 = vpow2.f32 %v3247_v16  ;;  %v3368_v6 = vsub.f32 %v14830_v37, %v3366_v45 }
 0xe83   : > { %v14891_v20 = vpop.eup %13071  ;;  %v3371_v31 = vmul.f32 1.442695, %v3368_v6 }
 0xe84   : > { %v3129_v23 = vsel %vm1481_vm3, %v14891_v20, 0.0 }
 0xe85   : > { %v14893_v54 = vpop.eup %13073  ;;  %13079 = vpow2.f32 %v3371_v31  ;;  %3130 = vadd.xlane.f32.xlu1 %v3129_v23 }
 0xe86   : > { %v3489_v58 = vpop.xlane.xlu0 %3488  ;;  %v3132_v60 = vsel %vm1481_vm3, %v14893_v54, 0.0 }
 0xe87   : > { %v3491_v63 = vsub.f32 %v14836_v18, %v3489_v58  ;;  %3133 = vadd.xlane.f32.xlu0 %v3132_v60  ;;  %v14900_v27 = vpop.eup %13075 }
 0xe88   : > { %v3249_v13 = vsel %vm1481_vm3, %v14900_v27, 0.0 }
 0xe89   : > { %v3494_v37 = vmul.f32 1.442695, %v3491_v63  ;;  %3250 = vadd.xlane.f32.xlu1 %v3249_v13 }
 0xe8b   : > { %13081 = vpow2.f32 %v3494_v37  ;;  %v14904_v59 = vpop.eup %13077 }
 0xe8c   : > { %v3252_v25 = vsel %vm1481_vm3, %v14904_v59, 0.0 }
 0xe8d   : > { %3253 = vadd.xlane.f32.xlu0 %v3252_v25 }
 0xe8e   : > { %v3612_v26 = vpop.xlane.xlu0 %3611 }
 0xe8f   : > { %v3614_v57 = vsub.f32 %v14842_v1, %v3612_v26  ;;  %v14909_v10 = vpop.eup %13079  ;;  %v14921_v1 = vpop.permute.xlu1 %3261 }
 0xe90   : > { %v3376_v4 = vsel %vm1481_vm3, %v14909_v10, 0.0 }
 0xe91   : > { %v3617_v18 = vmul.f32 1.442695, %v3614_v57  ;;  %3377 = vadd.xlane.f32.xlu0 %v3376_v4 }
 0xe93   : > { %13083 = vpow2.f32 %v3617_v18 }
 0xe95   : > { %v14913_v32 = vpop.eup %13081 }
 0xe96   : > { %v3499_v3 = vsel %vm1481_vm3, %v14913_v32, 0.0  ;;  %v3735_v56 = vpop.xlane.xlu0 %3734 }
 0xe97   : > { %3500 = vadd.xlane.f32.xlu0 %v3499_v3  ;;  %v3737_v53 = vsub.f32 %v14846_v52, %v3735_v56 }
 0xe99   : > { %v3740_v36 = vmul.f32 1.442695, %v3737_v53 }
 0xe9d   : > { %v14917_v35 = vpop.eup %13083 }
 0xe9e   : > { %v3622_v19 = vsel %vm1481_vm3, %v14917_v35, 0.0  ;;  %v3858_v34 = vpop.xlane.xlu0 %3857 }
 0xe9f   : > { %3623 = vadd.xlane.f32.xlu0 %v3622_v19  ;;  %v3860_v2 = vsub.f32 %v14850_v33, %v3858_v34 }
 0xea1   : > { %v3863_v52 = vmul.f32 1.442695, %v3860_v2 }
 0xea6   : > { %v3981_v8 = vpop.xlane.xlu0 %3980 }
 0xea7   : > { %v3983_v49 = vsub.f32 %v14854_v42, %v3981_v8 }
 0xea9   : > { %v3986_v31 = vmul.f32 1.442695, %v3983_v49 }
 0xeaa   : > { %v3385_v19 = vpop.permute.xlu0 %3384 }
 0xeab   : > { %v3363_v38 = vpop.xlane.xlu1 %3362 }
 0xeac   : > { %v3367_v22 = vsub.f32 %v14858_v47, %v3363_v38 }
 0xeae   : > { %v3369_v7 = vmul.f32 1.442695, %v3367_v22 }
 0xeaf   : > { %v3486_v43 = vpop.xlane.xlu1 %3485 }
 0xeb0   : > { %13085 = vpow2.f32 %v3369_v7  ;;  %v3490_v44 = vsub.f32 %v14860_v29, %v3486_v43 }
 0xeb2   : > { %v3492_v48 = vmul.f32 1.442695, %v3490_v44 }
 0xeb3   : > { %v3609_v50 = vpop.xlane.xlu1 %3608 }
 0xeb4   : > { %13087 = vpow2.f32 %v3492_v48  ;;  %v3613_v21 = vsub.f32 %v14864_v28, %v3609_v50 }
 0xeb6   : > { %v3615_v55 = vmul.f32 1.442695, %v3613_v21 }
 0xeb7   : > { %v3732_v61 = vpop.xlane.xlu1 %3731 }
 0xeb8   : > { %13089 = vpow2.f32 %v3615_v55  ;;  %v3736_v62 = vsub.f32 %v14868_v41, %v3732_v61 }
 0xeba   : > { %v14928_v47 = vpop.eup %13085  ;;  %v3738_v29 = vmul.f32 1.442695, %v3736_v62 }
 0xebb   : > { %v3855_v40 = vpop.xlane.xlu1 %3854  ;;  %v3373_v39 = vsel %vm1481_vm3, %v14928_v47, 0.0 }
 0xebc   : > { %13091 = vpow2.f32 %v3738_v29  ;;  %3374 = vadd.xlane.f32.xlu1 %v3373_v39  ;;  %v3859_v26 = vsub.f32 %v14872_v51, %v3855_v40 }
 0xebd   : > { %13093 = vpow2.f32 %v3740_v36 }
 0xebe   : > { %v14933_v28 = vpop.eup %13087  ;;  %13095 = vpow2.f32 %v3863_v52  ;;  %v3861_v57 = vmul.f32 1.442695, %v3859_v26 }
 0xebf   : > { %v3978_v9 = vpop.xlane.xlu1 %3977  ;;  %v3496_v41 = vsel %vm1481_vm3, %v14933_v28, 0.0 }
 0xec0   : > { %v3982_v12 = vsub.f32 %v14876_v30, %v3978_v9  ;;  %3497 = vadd.xlane.f32.xlu1 %v3496_v41 }
 0xec2   : > { %v14938_v33 = vpop.eup %13089  ;;  %v3984_v16 = vmul.f32 1.442695, %v3982_v12 }
 0xec3   : > { %v3619_v45 = vsel %vm1481_vm3, %v14938_v33, 0.0  ;;  %v3508_v3 = vpop.permute.xlu1 %3507 }
 0xec4   : > { %3620 = vadd.xlane.f32.xlu1 %v3619_v45  ;;  %13097 = vpow2.f32 %v3984_v16 }
 0xec5   : > { %13099 = vpow2.f32 %v3986_v31 }
 0xec6   : > { %v14943_v6 = vpop.eup %13091  ;;  %13101 = vpow2.f32 %v3861_v57 }
 0xec7   : > { %v3742_v23 = vsel %vm1481_vm3, %v14943_v6, 0.0  ;;  %v14947_v58 = vpop.eup %13093 }
 0xec8   : > { %3743 = vadd.xlane.f32.xlu0 %v3742_v23  ;;  %v3745_v30 = vsel %vm1481_vm3, %v14947_v58, 0.0  ;;  %v14951_v42 = vpop.eup %13095 }
 0xec9   : > { %v3868_v60 = vsel %vm1481_vm3, %v14951_v42, 0.0 }
 0xecc   : > { %3746 = vadd.xlane.f32.xlu0 %v3745_v30 }
 0xece   : > { %v14955_v63 = vpop.eup %13097 }
 0xecf   : > { %v3988_v37 = vsel %vm1481_vm3, %v14955_v63, 0.0  ;;  %v14959_v13 = vpop.eup %13099 }
 0xed0   : > { %3869 = vadd.xlane.f32.xlu0 %v3868_v60  ;;  %v3991_v25 = vsel %vm1481_vm3, %v14959_v13, 0.0  ;;  %v14968_v18 = vpop.eup %13101 }
 0xed1   : > { %v3865_v4 = vsel %vm1481_vm3, %v14968_v18, 0.0 }
 0xed4   : > { %3989 = vadd.xlane.f32.xlu0 %v3988_v37 }
 0xed5   : > { %3630 = vrot.lane.b32.xlu1 %v14757_v24, %s16800_s2 }
 0xed8   : > { %3992 = vadd.xlane.f32.xlu0 %v3991_v25 }
 0xeee   : > { %3753 = vrot.lane.b32.xlu0 %v14757_v24, %s16802_s16 }
 0xef9   : > { %3866 = vadd.xlane.f32.xlu1 %v3865_v4 }
 0xf0a   : > { %3876 = vrot.lane.b32.xlu1 %v14757_v24, %s16804_s22 }
 0xf0e   : > { %3999 = vrot.lane.b32.xlu1 %v14757_v24, %s16806_s15 }
 0xf12   : > { %v3131_v51 = vpop.xlane.xlu1 %3130 }
 0xf13   : > { %13103 = vrcp.f32 %v3131_v51 }
 0xf14   : > { %v3134_v38 = vpop.xlane.xlu0 %3133 }
 0xf15   : > { %13105 = vrcp.f32 %v3134_v38 }
 0xf16   : > { %v3251_v22 = vpop.xlane.xlu1 %3250 }
 0xf17   : > { %13107 = vrcp.f32 %v3251_v22 }
 0xf1a   : > { %v3254_v7 = vpop.xlane.xlu0 %3253 }
 0xf1b   : > { %13109 = vrcp.f32 %v3254_v7 }
 0xf1d   : > { %v13104_v43 = vpop.eup %13103 }
 0xf1e   : > { %v3137_v48 = vmul.f32 %v13104_v43, %v14891_v20  ;;  %v3378_v20 = vpop.xlane.xlu0 %3377 }
 0xf1f   : > { %v13106_v44 = vpop.eup %13105  ;;  %13111 = vrcp.f32 %v3378_v20 }
 0xf20   : > { %v3138_v56 = vmul.f32 %v13106_v44, %v14893_v54 }
 0xf21   : > { %v13108_v24 = vpop.eup %13107 }
 0xf22   : > { %v3139_v50 = vpack.c.bf16 %v3138_v56, %v3137_v48  ;;  %v3257_v55 = vmul.f32 %v13108_v24, %v14900_v27 }
 0xf24   : > { %11808 = vmatmul.mubr.msk.bf16.vlgmr.msra.gmra.mrb[52].mxu1 %vm1481_vm3, %v3139_v50 }
 0xf25   : > { %11818 = vmatpush3.bf16.msra.mxu1 %v14921_v1  ;;  %11819 = vmatprep.mubr.msk.bf16.mxu1 %vm13865_vm1, %v13864_v14  ;;  %v13110_v21 = vpop.eup %13109  ;;  %v3501_v1 = vpop.xlane.xlu0 %3500 }
 0xf26   : > { %11829 = vmatprep.subr.bf16.mxu1 %v13864_v14  ;;  %v3258_v53 = vmul.f32 %v13110_v21, %v14904_v59 }
 0xf28   : > { %v3259_v34 = vpack.c.bf16 %v3258_v53, %v3257_v55 }
 0xf29   : > { %v13112_v62 = vpop.eup %13111 }
 0xf2a   : > { %v3382_v2 = vmul.f32 %v13112_v62, %v14909_v10 }
 0xf2c   : > { %11820 = vmatmul.mubr.msk.bf16.vlgmr.msra.gmra.mrb[56].mxu1 %vm1481_vm3, %v3259_v34  ;;  %v3624_v59 = vpop.xlane.xlu0 %3623 }
 0xf2d   : > { %11830 = vmatpush3.bf16.msra.mxu1 %v3385_v19  ;;  %11831 = vmatprep.mubr.msk.bf16.mxu1 %vm13865_vm1, %v13864_v14 }
 0xf2e   : > { %11841 = vmatprep.subr.bf16.mxu1 %v13864_v14 }
 0xf49   : > { %v3375_v54 = vpop.xlane.xlu1 %3374 }
 0xf4a   : > { %13113 = vrcp.f32 %v3375_v54 }
 0xf4d   : > { %v3498_v61 = vpop.xlane.xlu1 %3497 }
 0xf4e   : > { %13115 = vrcp.f32 %v3498_v61 }
 0xf4f   : > { %13117 = vrcp.f32 %v3501_v1 }
 0xf51   : > { %v3621_v27 = vpop.xlane.xlu1 %3620 }
 0xf52   : > { %13119 = vrcp.f32 %v3621_v27 }
 0xf53   : > { %13121 = vrcp.f32 %v3624_v59 }
 0xf54   : > { %v13114_v36 = vpop.eup %13113 }
 0xf55   : > { %v3381_v29 = vmul.f32 %v13114_v36, %v14928_v47  ;;  %v3744_v40 = vpop.xlane.xlu0 %3743  ;;  %v3631_v16 = vpop.permute.xlu1 %3630 }
 0xf57   : > { %v3383_v39 = vpack.c.bf16 %v3382_v2, %v3381_v29 }
 0xf58   : > { %v13116_v52 = vpop.eup %13115 }
 0xf59   : > { %11832 = vmatmul.mubr.msk.bf16.vlgmr.msra.gmra.mrb[60].mxu1 %vm1481_vm3, %v3383_v39  ;;  %v3747_v8 = vpop.xlane.xlu0 %3746  ;;  %v13118_v9 = vpop.eup %13117  ;;  %v3504_v41 = vmul.f32 %v13116_v52, %v14933_v28  ;;  %v12855_v39 = vld [vmem:[%s16740_s21 + $0x20] sm:$0xff]  }
 0xf5a   : > { %11842 = vmatpush3.bf16.msra.mxu1 %v3508_v3  ;;  %11843 = vmatprep.mubr.msk.bf16.mxu1 %vm13865_vm1, %v13864_v14  ;;  %v3505_v10 = vmul.f32 %v13118_v9, %v14913_v32  ;;  %13123 = vrcp.f32 %v3747_v8 }
 0xf5b   : > { %11853 = vmatprep.subr.bf16.mxu1 %v13864_v14  ;;  %13125 = vrcp.f32 %v3744_v40  ;;  %11896 = vmatpush3.bf16.msra.mxu0 %v12855_v39  ;;  %v11010_v39 = vld [vmem:[%s16739_s25 + $0x1] ss:$0 sm:$0xff]  ;;  %s16819_s25 = sld [smem:[#allocation59_spill]] }
 0xf5c   : > { %v3506_v12 = vpack.c.bf16 %v3505_v10, %v3504_v41  ;;  %v13120_v49 = vpop.eup %13119  ;;  %11897 = vmatprep.subr.bf16.mxu0 %v13864_v14 }
 0xf5d   : > { %v3870_v47 = vpop.xlane.xlu0 %3869  ;;  %v13122_v31 = vpop.eup %13121  ;;  %v3627_v28 = vmul.f32 %v13120_v49, %v14938_v33  ;;  %v12856_v49 = vld [vmem:[%s16740_s21 + $0x28] sm:$0xff]  }
 0xf5e   : > { %v3628_v32 = vmul.f32 %v13122_v31, %v14917_v35  ;;  %13127 = vrcp.f32 %v3870_v47 }
 0xf5f   : > { %11898 = vmatpush3.bf16.msra.mxu0 %v12856_v49 }
 0xf60   : > { %v3629_v30 = vpack.c.bf16 %v3628_v32, %v3627_v28  ;;  %11899 = vmatprep.subr.bf16.mxu0 %v13864_v14  ;;  %v12858_v28 = vld [vmem:[%s16740_s21 + $0x38] sm:$0xff]  }
 0xf61   : > { %11844 = vmatmul.mubr.msk.bf16.vlgmr.msra.gmra.mrb[64].mxu1 %vm1481_vm3, %v3506_v12  ;;  %v3990_v45 = vpop.xlane.xlu0 %3989 }
 0xf62   : > { %11854 = vmatpush3.bf16.msra.mxu1 %v3631_v16  ;;  %11855 = vmatprep.mubr.msk.bf16.mxu1 %vm13865_vm1, %v13864_v14  ;;  %v12857_v16 = vld [vmem:[%s16740_s21 + $0x30] sm:$0xff]   ;;  %s16807_s21 = sld [smem:[#allocation41_spill]] }
 0xf63   : > { %11865 = vmatprep.subr.bf16.mxu1 %v13864_v14  ;;  %11900 = vmatpush3.bf16.msra.mxu0 %v12857_v16 }
 0xf64   : > { %v13124_v60 = vpop.eup %13123  ;;  %11901 = vmatprep.subr.bf16.mxu0 %v13864_v14 }
 0xf65   : > { %v3993_v23 = vpop.xlane.xlu0 %3992  ;;  %v13126_v25 = vpop.eup %13125  ;;  %v3751_v26 = vmul.f32 %v13124_v60, %v14947_v58 }
 0xf66   : > { %v3750_v33 = vmul.f32 %v13126_v25, %v14943_v6 }
 0xf67   : > { %11902 = vmatpush3.bf16.msra.mxu0 %v12858_v28 }
 0xf68   : > { %v3752_v57 = vpack.c.bf16 %v3751_v26, %v3750_v33  ;;  %v13128_v58 = vpop.eup %13127 }
 0xf69   : > { %11856 = vmatmul.mubr.msk.bf16.vlgmr.msra.gmra.mrb[68].mxu1 %vm1481_vm3, %v3629_v30  ;;  %v3754_v37 = vpop.permute.xlu0 %3753  ;;  %v3874_v19 = vmul.f32 %v13128_v58, %v14951_v42 }
 0xf6a   : > { %11866 = vmatpush3.bf16.msra.mxu1 %v3754_v37  ;;  %11867 = vmatprep.mubr.msk.bf16.mxu1 %vm13865_vm1, %v13864_v14 }
 0xf6b   : > { %11877 = vmatprep.subr.bf16.mxu1 %v13864_v14 }
 0xf71   : > { %11868 = vmatmul.mubr.msk.bf16.vlgmr.msra.gmra.mrb[72].mxu1 %vm1481_vm3, %v3752_v57 }
 0xf72   : > { %11879 = vmatprep.mubr.msk.bf16.mxu1 %vm13865_vm1, %v13864_v14 }
 0xf86   : > { %v3867_v35 = vpop.xlane.xlu1 %3866 }
 0xf87   : > { %13129 = vrcp.f32 %v3867_v35 }
 0xf88   : > { %13131 = vrcp.f32 %v3993_v23 }
 0xf89   : > { %13133 = vrcp.f32 %v3990_v45 }
 0xf8a   : > { %v3877_v4 = vpop.permute.xlu1 %3876 }
 0xf8b   : > { %11878 = vmatpush3.bf16.msra.mxu1 %v3877_v4 }
 0xf8c   : > { %11889 = vmatprep.subr.bf16.mxu1 %v13864_v14 }
 0xf8e   : > { %v4000_v22 = vpop.permute.xlu1 %3999 }
 0xf91   : > { %v13130_v3 = vpop.eup %13129 }
 0xf92   : > { %v3873_v6 = vmul.f32 %v13130_v3, %v14968_v18  ;;  %v13132_v38 = vpop.eup %13131 }
 0xf93   : > { %v13134_v7 = vpop.eup %13133  ;;  %v3997_v43 = vmul.f32 %v13132_v38, %v14959_v13 }
 0xf94   : > { %v3875_v51 = vpack.c.bf16 %v3874_v19, %v3873_v6  ;;  %v3996_v44 = vmul.f32 %v13134_v7, %v14955_v63 }
 0xf96   : > { %11880 = vmatmul.mubr.msk.bf16.vlgmr.msra.gmra.mrb[76].mxu1 %vm1481_vm3, %v3875_v51  ;;  %v3998_v48 = vpack.c.bf16 %v3997_v43, %v3996_v44 }
 0xf97   : > { %11890 = vmatpush3.bf16.msra.mxu1 %v4000_v22  ;;  %11891 = vmatprep.mubr.msk.bf16.mxu1 %vm13865_vm1, %v13864_v14 }
 0xf9e   : > { %11892 = vmatmul.mubr.msk.bf16.vlgmr.msra.gmra.mrb[80].mxu1 %vm1481_vm3, %v3998_v48 }
 0xf9f   : > { %4372 = vmatprep.mubr.bf16.mxu1 %v13863_v0 }
 0xff7   : > { %v15022_v42 = vpop.f32.mrb[52].mxu1 }
 0xff8   : > { %v11809_v18 = vpop.f32.mrb[53].mxu1 }
 0xff9   : > { %v15024_v56 = vpop.f32.mrb[54].mxu1 }
 0xffa   : > { %v11810_v50 = vpop.f32.mrb[55].mxu1 }
 0xfff   : > { %v3301_v24 = vpop.f32.mrb[56].mxu1 }
0x1000   : > { %v11821_v21 = vpop.f32.mrb[57].mxu1 }
0x1001   : > { %v3304_v53 = vpop.f32.mrb[58].mxu1 }
0x1002   : > { %v12624_v55 = vpack.i.bf16 %v3304_v53, %v3301_v24  ;;  %v11822_v34 = vpop.f32.mrb[59].mxu1 }
0x1004   : > { %12625 = vrot.lane.b32.xlu1 %v12624_v55, %s16805_s19 }
0x102c   : > { %v3424_v63 = vpop.f32.mrb[60].mxu1 }
0x102d   : > { %v11833_v13 = vpop.f32.mrb[61].mxu1 }
0x102e   : > { %v3427_v20 = vpop.f32.mrb[62].mxu1 }
0x102f   : > { %v12629_v54 = vpack.i.bf16 %v3427_v20, %v3424_v63  ;;  %v11834_v1 = vpop.f32.mrb[63].mxu1 }
0x1031   : > { %12630 = vrot.lane.b32.xlu1 %v12629_v54, %s16803_s7 }
0x1034   : > { %v3547_v61 = vpop.f32.mrb[64].mxu1 }
0x1035   : > { %v11845_v59 = vpop.f32.mrb[65].mxu1 }
0x1036   : > { %v3550_v62 = vpop.f32.mrb[66].mxu1 }
0x1037   : > { %v12634_v27 = vpack.i.bf16 %v3550_v62, %v3547_v61  ;;  %v11846_v36 = vpop.f32.mrb[67].mxu1 }
0x1039   : > { %12635 = vrot.lane.b32.xlu1 %v12634_v27, %s16801_s18 }
0x103c   : > { %v3670_v2 = vpop.f32.mrb[68].mxu1 }
0x103d   : > { %v11857_v29 = vpop.f32.mrb[69].mxu1 }
0x103e   : > { %v3673_v40 = vpop.f32.mrb[70].mxu1 }
0x103f   : > { %v12639_v52 = vpack.i.bf16 %v3673_v40, %v3670_v2  ;;  %v11858_v8 = vpop.f32.mrb[71].mxu1 }
0x1041   : > { %12640 = vrot.lane.b32.xlu0 %v12639_v52, %s16784_s14 }
0x1044   : > { %v3793_v9 = vpop.f32.mrb[72].mxu1 }
0x1045   : > { %v11869_v41 = vpop.f32.mrb[73].mxu1 }
0x1046   : > { %v3796_v10 = vpop.f32.mrb[74].mxu1 }
0x1047   : > { %v12644_v47 = vpack.i.bf16 %v3796_v10, %v3793_v9  ;;  %v11870_v12 = vpop.f32.mrb[75].mxu1 }
0x1049   : > { %12645 = vrot.lane.b32.xlu1 %v12644_v47, %s16785_s28 }
0x1069   : > { %v3916_v45 = vpop.f32.mrb[76].mxu1 }
0x106a   : > { %v11881_v31 = vpop.f32.mrb[77].mxu1 }
0x106b   : > { %v3919_v32 = vpop.f32.mrb[78].mxu1 }
0x106c   : > { %v12649_v23 = vpack.i.bf16 %v3919_v32, %v3916_v45  ;;  %v11882_v30 = vpop.f32.mrb[79].mxu1 }
0x106e   : > { %12650 = vrot.lane.b32.xlu0 %v12649_v23, %s16786_s11 }
0x1071   : > { %v4039_v60 = vpop.f32.mrb[80].mxu1 }
0x1072   : > { %v11893_v37 = vpop.f32.mrb[81].mxu1 }
0x1073   : > { %v4042_v25 = vpop.f32.mrb[82].mxu1 }
0x1074   : > { %v12654_v26 = vpack.i.bf16 %v4042_v25, %v4039_v60  ;;  %v11894_v33 = vpop.f32.mrb[83].mxu1 }
0x1075   : > { %v12859_v33 = vld [vmem:[%s16788_s9 + $0x40] ss:$8 sps:$4 sm:$0xff]  }
0x1076   : > { %12655 = vrot.lane.b32.xlu1 %v12654_v26, %s16787_s12  ;;  %v12626_v57 = vpop.permute.xlu1 %12625  ;;  %v12861_v26 = vld [vmem:[%s16788_s9 + $0x44] ss:$8 sps:$4 sm:$0xff]  }
0x1077   : > { %v12628_v3 = vunpack.i.h.bf16 %v12626_v57  ;;  %v12627_v19 = vunpack.i.l.bf16 %v12626_v57  ;;  %4340 = vmatprep.subr.bf16.mxu1 %v12861_v26  ;;  %v12864_v57 = vld [vmem:[%s16788_s9 + $0x54] ss:$8 sps:$4 sm:$0xff]  }
0x1078   : > { %4341 = vmatpush1.bf16.msra.mxu1 %v12859_v33 }
0x1079   : > { %v4103_v18 = vsel %vm1431_vm2, %v15024_v56, %v12628_v3  ;;  %v4102_v50 = vsel %vm1431_vm2, %v15022_v42, %v12627_v19  ;;  %4342 = vmatprep.subr.bf16.mxu1 %v12864_v57  ;;  %v12868_v3 = vld [vmem:[%s16788_s9 + $0x70] ss:$8 sps:$4 sm:$0xff]   ;;  %v12870_v19 = vld [vmem:[%s16788_s9 + $0x74] ss:$8 sps:$4 sm:$0xff]  }
0x10a3   : > { %v12631_v35 = vpop.permute.xlu1 %12630 }
0x10a4   : > { %v12633_v6 = vunpack.i.h.bf16 %v12631_v35  ;;  %v12632_v51 = vunpack.i.l.bf16 %v12631_v35  ;;  %v12862_v35 = vld [vmem:[%s16788_s9 + $0x50] ss:$8 sps:$4 sm:$0xff]  }
0x10a5   : > { %4343 = vmatpush1.bf16.msra.mxu1 %v12862_v35 }
0x10a6   : > { %v4105_v53 = vsel %vm1481_vm3, %v4103_v18, %v12633_v6  ;;  %v4104_v55 = vsel %vm1481_vm3, %v4102_v50, %v12632_v51  ;;  %v12873_v6 = vld [vmem:[%s16807_s21 + $0x4] ss:$8 sps:$4 sm:$0xff]   ;;  %v12890_v18 = vld [vmem:[%s16789_s23 + $0x98] sm:$0xff]  }
0x10a7   : > { %v12883_v51 = vld [vmem:[%s16789_s23 + $0xc0] sm:$0xff]  }
0x10a8   : > { %11457 = vmatprep.subr.bf16.mxu0 %v12883_v51  ;;  %v12891_v50 = vld [vmem:[%s16789_s23 + $0xe0] sm:$0xff]  }
0x10ab   : > { %v12636_v4 = vpop.permute.xlu1 %12635 }
0x10ac   : > { %v12638_v22 = vunpack.i.h.bf16 %v12636_v4  ;;  %v12637_v7 = vunpack.i.l.bf16 %v12636_v4  ;;  %v12867_v4 = vld [vmem:[%s16788_s9 + $0x64] ss:$8 sps:$4 sm:$0xff]  }
0x10ad   : > { %4344 = vmatprep.subr.bf16.mxu1 %v12867_v4 }
0x10ae   : > { %v4107_v13 = vsel %vm2471_vm4, %v4105_v53, %v12638_v22  ;;  %v4106_v20 = vsel %vm2471_vm4, %v4104_v55, %v12637_v7  ;;  %v12885_v22 = vld [vmem:[%s16789_s23 + $0xc8] sm:$0xff]  }
0x10af   : > { %v12886_v7 = vld [vmem:[%s16789_s23 + $0x88] sm:$0xff]  }
0x10b3   : > { %v12641_v58 = vpop.permute.xlu0 %12640 }
0x10b4   : > { %v12643_v44 = vunpack.i.h.bf16 %v12641_v58  ;;  %v12642_v48 = vunpack.i.l.bf16 %v12641_v58  ;;  %v12865_v58 = vld [vmem:[%s16788_s9 + $0x60] ss:$8 sps:$4 sm:$0xff]   ;;  %s16814_s9 = sld [smem:[#allocation46_spill]] }
0x10b5   : > { %4345 = vmatpush1.bf16.msra.mxu1 %v12865_v58 }
0x10b6   : > { %v4109_v54 = vsel %vm2474_vm5, %v4107_v13, %v12643_v44  ;;  %v4108_v56 = vsel %vm2474_vm5, %v4106_v20, %v12642_v48  ;;  %4346 = vmatprep.subr.bf16.mxu1 %v12870_v19  ;;  %v12888_v44 = vld [vmem:[%s16789_s23 + $0x90] sm:$0xff]   ;;  %v12889_v48 = vld [vmem:[%s16789_s23 + $0xd8] sm:$0xff]  }
0x10b9   : > { %4347 = vmatpush1.bf16.msra.mxu1 %v12868_v3 }
0x10ba   : > { %4685 = vmatprep.subr.bf16.mxu1 %v12873_v6 }
0x10bb   : > { %v12646_v38 = vpop.permute.xlu1 %12645 }
0x10bc   : > { %v12648_v24 = vunpack.i.h.bf16 %v12646_v38  ;;  %v12647_v21 = vunpack.i.l.bf16 %v12646_v38  ;;  %v12884_v38 = vld [vmem:[%s16789_s23 + $0x80] sm:$0xff]  }
0x10be   : > { %v4110_v42 = vsel %vm2477_vm6, %v4108_v56, %v12647_v21  ;;  %v4111_v61 = vsel %vm2477_vm6, %v4109_v54, %v12648_v24  ;;  %v12892_v24 = vld [vmem:[%s16789_s23 + $0xa0] sm:$0xff]   ;;  %v12893_v21 = vld [vmem:[%s16789_s23 + $0xe8] sm:$0xff]  }
0x10e0   : > { %v12651_v43 = vpop.permute.xlu0 %12650 }
0x10e1   : > { %v12653_v34 = vunpack.i.h.bf16 %v12651_v43  ;;  %v12652_v63 = vunpack.i.l.bf16 %v12651_v43  ;;  %v12887_v43 = vld [vmem:[%s16789_s23 + $0xd0] sm:$0xff]  }
0x10e3   : > { %v4112_v27 = vsel %vm2480_vm7, %v4110_v42, %v12652_v63  ;;  %v4113_v36 = vsel %vm2480_vm7, %v4111_v61, %v12653_v34 }
0x10e8   : > { %v12656_v1 = vpop.permute.xlu1 %12655 }
0x10e9   : > { %v12658_v59 = vunpack.i.h.bf16 %v12656_v1  ;;  %v12657_v62 = vunpack.i.l.bf16 %v12656_v1  ;;  %v11018_v1 = vld [vmem:[%s16790_s5 + $0x1] ss:$0 sm:$0xff]  ;;  %s16810_s5 = sld [smem:[#allocation44_spill]] }
0x10eb   : > { %v4114_v2 = vsel %vm2483_vm8, %v4112_v27, %v12657_v62  ;;  %v4115_v29 = vsel %vm2483_vm8, %v4113_v36, %v12658_v59  ;;  %v11019_v62 = vld [vmem:[%s16791_s1 + $0x1] ss:$0 sm:$0xff]  ;;  %s16808_s1 = sld [smem:[#allocation42_spill]] }
0x10ec   : > { %v4116_v40 = vpack.c.bf16 %v4115_v29, %v4114_v2  ;;  %v12871_v29 = vld [vmem:[%s16807_s21] ss:$8 sps:$4 sm:$0xff]  }
0x10ee   : > { %11904 = vmatmul.mubr.msk.bf16.vlgmr.msra.gmra.mrb[64].mxu0 %vm1370_vm0, %v4116_v40 }
0x10ef   : > { %11458 = vmatpush3.bf16.msra.mxu0 %v12884_v38 }
0x10f0   : > { %11459 = vmatprep.subr.bf16.mxu0 %v12885_v22 }
0x10f1   : > { %v4633_v3 = vld [vmem:[%s16808_s1] sm:$0x3] }
0x10f2   : > { %v4642_v19 = vrot.slane %v4633_v3, %v14383_v17  ;;  %v4638_v6 = vrot.slane %v4633_v3, %v14380_v15 }
0x10f3   : > { %11460 = vmatpush3.bf16.msra.mxu0 %v12886_v7 }
0x10f4   : > { %11461 = vmatprep.subr.bf16.mxu0 %v12887_v43 }
0x10f7   : > { %11462 = vmatpush3.bf16.msra.mxu0 %v12888_v44 }
0x10f8   : > { %11463 = vmatprep.subr.bf16.mxu0 %v12889_v48 }
0x10fb   : > { %11464 = vmatpush3.bf16.msra.mxu0 %v12890_v18 }
0x10fc   : > { %11465 = vmatprep.subr.bf16.mxu0 %v12891_v50 }
0x10ff   : > { %11466 = vmatpush3.bf16.msra.mxu0 %v12892_v24 }
0x1100   : > { %11467 = vmatprep.subr.bf16.mxu0 %v12893_v21 }
0x11c1   : > { %v4184_v52 = vpop.f32.mrb[64].mxu0 }
0x11c2   : > { %v4185_v8 = vadd.f32 %v11010_v39, %v4184_v52  ;;  %v11905_v9 = vpop.f32.mrb[65].mxu0  ;;  %v12874_v52 = vld [vmem:[%s16807_s21 + $0x10] ss:$8 sps:$4 sm:$0xff]  }
0x11c3   : > { %v4187_v41 = vpop.f32.mrb[66].mxu0  ;;  %v12877_v9 = vld [vmem:[%s16807_s21 + $0x20] ss:$8 sps:$4 sm:$0xff]  }
0x11c4   : > { %v4191_v10 = vadd.f32 %v4185_v8, %v14745_v5  ;;  %v4188_v47 = vadd.f32 %v11010_v39, %v4187_v41  ;;  %v11906_v12 = vpop.f32.mrb[67].mxu0  ;;  %v12876_v39 = vld [vmem:[%s16807_s21 + $0x14] ss:$8 sps:$4 sm:$0xff]   ;;  %v12879_v8 = vld [vmem:[%s16807_s21 + $0x24] ss:$8 sps:$4 sm:$0xff]  }
0x11c5   : > { %v12882_v41 = vld [vmem:[%s16807_s21 + $0x34] ss:$8 sps:$4 sm:$0xff]  }
0x11c6   : > { %v4192_v49 = vadd.f32 %v4188_v47, %v14747_v46  ;;  %v4197_v16 = vsel %vm1370_vm0, %v4191_v10, 0.0  ;;  %v12894_v47 = vld [vmem:[%s16789_s23 + $0xa8] sm:$0xff]   ;;  %v12895_v12 = vld [vmem:[%s16789_s23 + $0xf0] sm:$0xff]  }
0x11c7   : > { %4198 = vadd.xlane.f32.xlu0 %v4197_v16  ;;  %11468 = vmatpush3.bf16.msra.mxu0 %v12894_v47  ;;  %v12897_v16 = vld [vmem:[%s16789_s23 + $0xf8] sm:$0xff]  }
0x11c8   : > { %v4200_v45 = vsel %vm1370_vm0, %v4192_v49, 0.0  ;;  %11469 = vmatprep.subr.bf16.mxu0 %v12895_v12 }
0x11c9   : > { %4201 = vadd.xlane.f32.xlu1 %v4200_v45  ;;  %v12898_v45 = vld [vmem:[%s16789_s23 + $0xb8] sm:$0xff]  }
0x1254   : > { %v4199_v31 = vpop.xlane.xlu0 %4198 }
0x1255   : > { %v4203_v28 = vmul.f32 0.015625, %v4199_v31  ;;  %v11028_v31 = vld [vmem:[%s16792_s0 + $0x2] sm:$0x3]  ;;  %s16809_s0 = sld [smem:[#allocation43_spill]] }
0x1256   : > { %v4202_v32 = vpop.xlane.xlu1 %4201 }
0x1257   : > { %v4205_v23 = vsub.f32 %v4191_v10, %v4203_v28  ;;  %v4204_v30 = vmul.f32 0.015625, %v4202_v32  ;;  %v12880_v10 = vld [vmem:[%s16807_s21 + $0x30] ss:$8 sps:$4 sm:$0xff]   ;;  %v4290_v28 = vrot.slane %v11028_v31, %v14380_v15 }
0x1259   : > { %v4206_v5 = vsub.f32 %v4192_v49, %v4204_v30  ;;  %v4207_v60 = vmul.f32 %v4205_v23, %v4205_v23  ;;  %v12896_v49 = vld [vmem:[%s16789_s23 + $0xb0] sm:$0xff]   ;;  %s16818_s23 = sld [smem:[#allocation54_spill]] }
0x125a   : > { %11470 = vmatpush3.bf16.msra.mxu0 %v12896_v49 }
0x125b   : > { %v4209_v46 = vsel %vm1370_vm0, %v4207_v60, 0.0  ;;  %v4208_v37 = vmul.f32 %v4206_v5, %v4206_v5  ;;  %11471 = vmatprep.subr.bf16.mxu0 %v12897_v16 }
0x125c   : > { %4210 = vadd.xlane.f32.xlu0 %v4209_v46 }
0x125d   : > { %v4212_v25 = vsel %vm1370_vm0, %v4208_v37, 0.0 }
0x125e   : > { %11472 = vmatpush3.bf16.msra.mxu0 %v12898_v45 }
0x125f   : > { %11919 = vmatprep.subr.bf16.mxu0 %v13864_v14 }
0x1260   : > { %4213 = vadd.xlane.f32.xlu0 %v4212_v25 }
0x12e9   : > { %v4211_v53 = vpop.xlane.xlu0 %4210 }
0x12ea   : > { %v4215_v55 = vmul.f32 0.015625, %v4211_v53 }
0x12ec   : > { %v4217_v34 = vadd.f32 1e-05, %v4215_v55 }
0x12ed   : > { %v4214_v63 = vpop.xlane.xlu0 %4213 }
0x12ee   : > { %13135 = vrsqrt.f32 %v4217_v34  ;;  %v4216_v13 = vmul.f32 0.015625, %v4214_v63 }
0x12f0   : > { %v4218_v20 = vadd.f32 1e-05, %v4216_v13 }
0x12f2   : > { %13137 = vrsqrt.f32 %v4218_v20 }
0x12f8   : > { %v13136_v54 = vpop.eup %13135 }
0x12f9   : > { %v4221_v56 = vmul.f32 %v13136_v54, %v4205_v23 }
0x12fb   : > { %v4229_v61 = vmul.f32 %v11018_v1, %v4221_v56 }
0x12fc   : > { %v13138_v42 = vpop.eup %13137 }
0x12fd   : > { %v4222_v59 = vmul.f32 %v13138_v42, %v4206_v5  ;;  %v15086_v36 = vadd.f32 %v11019_v62, %v4229_v61 }
0x12ff   : > { %v4230_v27 = vmul.f32 %v11018_v1, %v4222_v59 }
0x1301   : > { %v15088_v2 = vadd.f32 %v11019_v62, %v4230_v27 }
0x1303   : > { %v4285_v40 = vpack.c.bf16 %v15088_v2, %v15086_v36 }
0x1305   : > { %11070 = vmatmul.mubr.msk.bf16.vlgmr.msra.gmra.mrb[84].mxu1 %vm1370_vm0, %v4285_v40 }
0x1306   : > { %4686 = vmatpush1.bf16.msra.mxu1 %v12871_v29  ;;  %4717 = vmatprep.mubr.bf16.mxu1 %v13863_v0 }
0x1307   : > { %4687 = vmatprep.subr.bf16.mxu1 %v12876_v39 }
0x130a   : > { %4688 = vmatpush1.bf16.msra.mxu1 %v12874_v52 }
0x130b   : > { %4689 = vmatprep.subr.bf16.mxu1 %v12879_v8 }
0x130e   : > { %4690 = vmatpush1.bf16.msra.mxu1 %v12877_v9 }
0x130f   : > { %4691 = vmatprep.subr.bf16.mxu1 %v12882_v41 }
0x1312   : > { %4692 = vmatpush1.bf16.msra.mxu1 %v12880_v10 }
0x1313   : > { %11907 = vmatprep.subr.bf16.mxu1 %v13864_v14 }
0x1315   : > { %11102 = vmatmul.mubr.msk.bf16.vlgmr.msra.gmra.mrb[88].mxu1 %vm1370_vm0, %v14374_v11  ;;  %v4294_v11 = vrot.slane %v11028_v31, %v14383_v17 }
0x1316   : > { %11909 = vmatprep.mubr.msk.bf16.mxu1 %vm13865_vm1, %v13864_v14 }
0x13d8   : > { %v4374_v32 = vpop.f32.mrb[84].mxu1 }
0x13d9   : > { %v4375_v23 = vadd.f32 %v4374_v32, %v4290_v28  ;;  %v4376_v30 = vpop.f32.mrb[85].mxu1 }
0x13da   : > { %v4377_v5 = vadd.f32 %v4376_v30, %v4294_v11  ;;  %v4378_v60 = vpop.f32.mrb[86].mxu1 }
0x13db   : > { %v4379_v46 = vadd.f32 %v4378_v60, %v4290_v28  ;;  %v4380_v37 = vpop.f32.mrb[87].mxu1  ;;  %v4383_v26 = vmax.f32 %v4375_v23, 0.0  ;;  %v15183_v28 = vld [vmem:[#allocation5] sm:$0xff] }
0x13dc   : > { %v4381_v25 = vadd.f32 %v4380_v37, %v4294_v11  ;;  %v4384_v57 = vmax.f32 %v4377_v5, 0.0 }
0x13dd   : > { %v4385_v33 = vmax.f32 %v4379_v46, 0.0  ;;  %v15185_v46 = vld [vmem:[#allocation5 + $0x8] sm:$0xff] }
0x13de   : > { %v4386_v35 = vmax.f32 %v4381_v25, 0.0 }
0x13df   : > { %v4387_v4 = vpack.c.bf16 %v4385_v33, %v4383_v26 }
0x13e0   : > { %v4388_v58 = vpack.c.bf16 %v4386_v35, %v4384_v57 }
0x13e2   : > { %4523 = vmatprep.mubr.bf16.mxu0 %v4388_v58 }
0x13e3   : > { %4524 = vmatmul.mubr.bf16.vlgmr.msra.gmra.mrb[68].mxu0 %v4387_v4 }
0x13e4   : > { %11921 = vmatprep.mubr.msk.bf16.mxu0 %vm13865_vm1, %v13864_v14 }
0x13e8   : > { %v4719_v51 = vpop.f32.mrb[88].mxu1 }
0x13e9   : > { %v4721_v38 = vpop.f32.mrb[89].mxu1  ;;  %v4720_v43 = vadd.f32 %v4719_v51, %v4638_v6 }
0x13ea   : > { %v4722_v22 = vadd.f32 %v4721_v38, %v4642_v19  ;;  %v4723_v7 = vpop.f32.mrb[90].mxu1 }
0x13eb   : > { %v4724_v44 = vadd.f32 %v4723_v7, %v4638_v6  ;;  %v4725_v48 = vpop.f32.mrb[91].mxu1 }
0x13ec   : > { %v4726_v18 = vadd.f32 %v4725_v48, %v4642_v19 }
0x13ed   : > { %v4737_v50 = vpack.c.bf16 %v4724_v44, %v4720_v43 }
0x13ee   : > { %v15120_v24 = vpack.c.bf16 %v4726_v18, %v4722_v22 }
0x13ef   : > { %4862 = vrot.lane.b32.xlu0 %v4737_v50, %s16787_s12  ;;  %4740 = vrot.lane.b32.xlu1 %v4737_v50, %s16796_s13 }
0x13f3   : > { %4986 = vrot.lane.b32.xlu0 %v4737_v50, %s16798_s29  ;;  %4860 = vrot.lane.b32.xlu1 %v4737_v50, %s16797_s17 }
0x13f7   : > { %5111 = vrot.lane.b32.xlu0 %v4737_v50, %s16799_s30  ;;  %4988 = vrot.lane.b32.xlu1 %v4737_v50, %s16786_s11 }
0x13fb   : > { %5236 = vrot.lane.b32.xlu0 %v4737_v50, %s16800_s2  ;;  %5113 = vrot.lane.b32.xlu1 %v4737_v50, %s16785_s28 }
0x13ff   : > { %5361 = vrot.lane.b32.xlu0 %v4737_v50, %s16802_s16  ;;  %5238 = vrot.lane.b32.xlu1 %v4737_v50, %s16784_s14 }
0x1403   : > { %5486 = vrot.lane.b32.xlu0 %v4737_v50, %s16804_s22  ;;  %5363 = vrot.lane.b32.xlu1 %v4737_v50, %s16801_s18 }
0x1407   : > { %5611 = vrot.lane.b32.xlu0 %v4737_v50, %s16806_s15  ;;  %5488 = vrot.lane.b32.xlu1 %v4737_v50, %s16803_s7 }
0x140b   : > { %5613 = vrot.lane.b32.xlu1 %v4737_v50, %s16805_s19 }
0x1461   : > { %v4863_v21 = vpop.permute.xlu0 %4862  ;;  %v4741_v53 = vpop.permute.xlu1 %4740 }
0x1462   : > { %v4868_v55 = vsel %vm1431_vm2, %v4863_v21, 0  ;;  %v4746_v34 = vsel %vm1431_vm2, %v4741_v53, 0 }
0x1463   : > { %11908 = vmatpush3.bf16.xpose.msra.mxu1 %v4746_v34  ;;  %11920 = vmatpush3.bf16.xpose.msra.mxu0 %v4868_v55 }
0x1464   : > { %11913 = vmatprep.subr.bf16.mxu1 %v13864_v14  ;;  %11931 = vmatprep.subr.bf16.mxu0 %v13864_v14 }
0x1465   : > { %v4861_v63 = vpop.permute.xlu1 %4860  ;;  %v4987_v56 = vpop.permute.xlu0 %4986 }
0x1469   : > { %v4989_v13 = vpop.permute.xlu1 %4988  ;;  %v5112_v61 = vpop.permute.xlu0 %5111 }
0x146a   : > { %v4994_v20 = vsel %vm1431_vm2, %v4989_v13, 0  ;;  %11910 = vmatmul.mubr.msk.bf16.vlgmr.msra.gmra.mrb[92].mxu1 %vm1431_vm2, %v4737_v50  ;;  %11922 = vmatmul.mubr.msk.bf16.vlgmr.msra.gmra.mrb[72].mxu0 %vm1431_vm2, %v4861_v63 }
0x146b   : > { %11914 = vmatpush3.bf16.msra.mxu1 %v15120_v24  ;;  %11932 = vmatpush3.bf16.xpose.msra.mxu0 %v4994_v20 }
0x146c   : > { %11933 = vmatprep.mubr.msk.bf16.mxu0 %vm13865_vm1, %v13864_v14  ;;  %11943 = vmatprep.subr.bf16.mxu0 %v13864_v14 }
0x146d   : > { %11915 = vmatprep.mubr.msk.bf16.mxu1 %vm13865_vm1, %v13864_v14  ;;  %11925 = vmatprep.subr.bf16.mxu1 %v13864_v14  ;;  %v5114_v54 = vpop.permute.xlu1 %5113  ;;  %v5237_v27 = vpop.permute.xlu0 %5236 }
0x146e   : > { %v5119_v1 = vsel %vm1431_vm2, %v5114_v54, 0 }
0x1471   : > { %v5239_v42 = vpop.permute.xlu1 %5238  ;;  %v5362_v39 = vpop.permute.xlu0 %5361 }
0x1472   : > { %11934 = vmatmul.mubr.msk.bf16.vlgmr.msra.gmra.mrb[76].mxu0 %vm1431_vm2, %v4987_v56  ;;  %v5244_v59 = vsel %vm1431_vm2, %v5239_v42, 0 }
0x1473   : > { %11944 = vmatpush3.bf16.xpose.msra.mxu0 %v5119_v1  ;;  %11945 = vmatprep.mubr.msk.bf16.mxu0 %vm13865_vm1, %v13864_v14 }
0x1474   : > { %11955 = vmatprep.subr.bf16.mxu0 %v13864_v14 }
0x1475   : > { %v5364_v62 = vpop.permute.xlu1 %5363  ;;  %v5487_v9 = vpop.permute.xlu0 %5486 }
0x1476   : > { %v5369_v29 = vsel %vm1431_vm2, %v5364_v62, 0 }
0x1479   : > { %v5489_v40 = vpop.permute.xlu1 %5488  ;;  %v5612_v10 = vpop.permute.xlu0 %5611 }
0x147a   : > { %11946 = vmatmul.mubr.msk.bf16.vlgmr.msra.gmra.mrb[80].mxu0 %vm1431_vm2, %v5112_v61  ;;  %v5494_v52 = vsel %vm1431_vm2, %v5489_v40, 0 }
0x147b   : > { %11956 = vmatpush3.bf16.xpose.msra.mxu0 %v5244_v59  ;;  %11957 = vmatprep.mubr.msk.bf16.mxu0 %vm13865_vm1, %v13864_v14 }
0x147c   : > { %11967 = vmatprep.subr.bf16.mxu0 %v13864_v14 }
0x147d   : > { %v5614_v8 = vpop.permute.xlu1 %5613 }
0x147e   : > { %v5619_v41 = vsel %vm1431_vm2, %v5614_v8, 0 }
0x1482   : > { %11958 = vmatmul.mubr.msk.bf16.vlgmr.msra.gmra.mrb[84].mxu0 %vm1431_vm2, %v5237_v27 }
0x1483   : > { %11968 = vmatpush3.bf16.xpose.msra.mxu0 %v5369_v29  ;;  %11969 = vmatprep.mubr.msk.bf16.mxu0 %vm13865_vm1, %v13864_v14 }
0x1484   : > { %11979 = vmatprep.subr.bf16.mxu0 %v13864_v14 }
0x148a   : > { %11970 = vmatmul.mubr.msk.bf16.vlgmr.msra.gmra.mrb[88].mxu0 %vm1431_vm2, %v5362_v39 }
0x148b   : > { %11980 = vmatpush3.bf16.xpose.msra.mxu0 %v5494_v52  ;;  %11981 = vmatprep.mubr.msk.bf16.mxu0 %vm13865_vm1, %v13864_v14 }
0x148c   : > { %11991 = vmatprep.subr.bf16.mxu0 %v13864_v14 }
0x1492   : > { %11982 = vmatmul.mubr.msk.bf16.vlgmr.msra.gmra.mrb[92].mxu0 %vm1431_vm2, %v5487_v9 }
0x1493   : > { %11992 = vmatpush3.bf16.xpose.msra.mxu0 %v5619_v41  ;;  %11993 = vmatprep.mubr.msk.bf16.mxu0 %vm13865_vm1, %v13864_v14 }
0x1494   : > { %12003 = vmatprep.subr.bf16.mxu0 %v13864_v14 }
0x149a   : > { %11994 = vmatmul.mubr.msk.bf16.vlgmr.msra.gmra.mrb[96].mxu0 %vm1431_vm2, %v5612_v10 }
0x149b   : > { %12011 = vmatprep.mubr.msk.bf16.mxu0 %vm13865_vm1, %v13864_v14 }
0x14b6   : > { %v11473_v47 = vpop.f32.mrb[68].mxu0 }
0x14b7   : > { %v11474_v12 = vpop.f32.mrb[69].mxu0 }
0x14b8   : > { %v15179_v49 = vadd.f32 %v11474_v12, %v11473_v47  ;;  %v11476_v16 = vpop.f32.mrb[70].mxu0 }
0x14b9   : > { %v11477_v45 = vpop.f32.mrb[71].mxu0 }
0x14ba   : > { %v15181_v31 = vadd.f32 %v11477_v45, %v11476_v16 }
0x153d   : > { %v4782_v11 = vpop.f32.mrb[92].mxu1  ;;  %v4904_v32 = vpop.f32.mrb[72].mxu0 }
0x153e   : > { %v4789_v23 = vmul.f32 0.35355338, %v4782_v11  ;;  %v4911_v30 = vmul.f32 0.35355338, %v4904_v32  ;;  %v11911_v5 = vpop.f32.mrb[93].mxu1  ;;  %v11923_v60 = vpop.f32.mrb[73].mxu0 }
0x153f   : > { %v4785_v37 = vpop.f32.mrb[94].mxu1  ;;  %v4907_v25 = vpop.f32.mrb[74].mxu0 }
0x1540   : > { %v15188_v26 = vadd.f32 %v4789_v23, %v15183_v28  ;;  %v15191_v33 = vadd.f32 %v4911_v30, %v15183_v28  ;;  %v4790_v57 = vmul.f32 0.35355338, %v4785_v37  ;;  %v4912_v35 = vmul.f32 0.35355338, %v4907_v25  ;;  %v11912_v4 = vpop.f32.mrb[95].mxu1  ;;  %v11924_v58 = vpop.f32.mrb[75].mxu0 }
0x1542   : > { %v15194_v3 = vadd.f32 %v4790_v57, %v15185_v46  ;;  %v15197_v19 = vadd.f32 %v4912_v35, %v15185_v46  ;;  %v4793_v6 = vsel %vm1481_vm3, %v15188_v26, -inf  ;;  %v4915_v51 = vsel %vm1481_vm3, %v15191_v33, -inf }
0x1543   : > { %4794 = vmax.xlane.f32.xlu1 %v4793_v6  ;;  %4916 = vmax.xlane.f32.xlu0 %v4915_v51 }
0x1544   : > { %v4796_v43 = vsel %vm1481_vm3, %v15194_v3, -inf  ;;  %v4918_v44 = vsel %vm1481_vm3, %v15197_v19, -inf }
0x1545   : > { %v5030_v38 = vpop.f32.mrb[76].mxu0 }
0x1546   : > { %v5037_v22 = vmul.f32 0.35355338, %v5030_v38  ;;  %v11935_v7 = vpop.f32.mrb[77].mxu0 }
0x1547   : > { %4797 = vmax.xlane.f32.xlu0 %v4796_v43  ;;  %4919 = vmax.xlane.f32.xlu1 %v4918_v44  ;;  %v5033_v48 = vpop.f32.mrb[78].mxu0 }
0x1548   : > { %v15208_v18 = vadd.f32 %v5037_v22, %v15183_v28  ;;  %v5038_v50 = vmul.f32 0.35355338, %v5033_v48  ;;  %v11936_v21 = vpop.f32.mrb[79].mxu0 }
0x154a   : > { %v15211_v53 = vadd.f32 %v5038_v50, %v15185_v46  ;;  %v5041_v55 = vsel %vm1481_vm3, %v15208_v18, -inf }
0x154b   : > { %5042 = vmax.xlane.f32.xlu0 %v5041_v55 }
0x154c   : > { %v5044_v34 = vsel %vm1481_vm3, %v15211_v53, -inf }
0x154d   : > { %5045 = vmax.xlane.f32.xlu1 %v5044_v34  ;;  %v5155_v63 = vpop.f32.mrb[80].mxu0 }
0x154e   : > { %v5162_v13 = vmul.f32 0.35355338, %v5155_v63  ;;  %v11947_v20 = vpop.f32.mrb[81].mxu0 }
0x154f   : > { %v5158_v54 = vpop.f32.mrb[82].mxu0 }
0x1550   : > { %v15218_v56 = vadd.f32 %v5162_v13, %v15183_v28  ;;  %v5163_v1 = vmul.f32 0.35355338, %v5158_v54  ;;  %v11948_v42 = vpop.f32.mrb[83].mxu0 }
0x1552   : > { %v15221_v61 = vadd.f32 %v5163_v1, %v15185_v46  ;;  %v5166_v59 = vsel %vm1481_vm3, %v15218_v56, -inf }
0x1553   : > { %5167 = vmax.xlane.f32.xlu0 %v5166_v59 }
0x1554   : > { %v5169_v62 = vsel %vm1481_vm3, %v15221_v61, -inf }
0x1555   : > { %5170 = vmax.xlane.f32.xlu1 %v5169_v62  ;;  %v5280_v27 = vpop.f32.mrb[84].mxu0 }
0x1556   : > { %v5287_v29 = vmul.f32 0.35355338, %v5280_v27  ;;  %v11959_v40 = vpop.f32.mrb[85].mxu0 }
0x1557   : > { %v5283_v39 = vpop.f32.mrb[86].mxu0 }
0x1558   : > { %v15228_v52 = vadd.f32 %v5287_v29, %v15183_v28  ;;  %v5288_v8 = vmul.f32 0.35355338, %v5283_v39  ;;  %v11960_v9 = vpop.f32.mrb[87].mxu0 }
0x155a   : > { %v15231_v41 = vadd.f32 %v5288_v8, %v15185_v46  ;;  %v5291_v10 = vsel %vm1481_vm3, %v15228_v52, -inf }
0x155b   : > { %5292 = vmax.xlane.f32.xlu0 %v5291_v10 }
0x155c   : > { %v5294_v47 = vsel %vm1481_vm3, %v15231_v41, -inf }
0x155d   : > { %5295 = vmax.xlane.f32.xlu1 %v5294_v47  ;;  %v5405_v12 = vpop.f32.mrb[88].mxu0 }
0x155e   : > { %v5412_v16 = vmul.f32 0.35355338, %v5405_v12  ;;  %v11971_v45 = vpop.f32.mrb[89].mxu0 }
0x155f   : > { %v5408_v11 = vpop.f32.mrb[90].mxu0 }
0x1560   : > { %v15238_v32 = vadd.f32 %v5412_v16, %v15183_v28  ;;  %v5413_v23 = vmul.f32 0.35355338, %v5408_v11  ;;  %v11972_v30 = vpop.f32.mrb[91].mxu0 }
0x1562   : > { %v15241_v5 = vadd.f32 %v5413_v23, %v15185_v46  ;;  %v5416_v60 = vsel %vm1481_vm3, %v15238_v32, -inf }
0x1563   : > { %5417 = vmax.xlane.f32.xlu0 %v5416_v60 }
0x1564   : > { %v5419_v37 = vsel %vm1481_vm3, %v15241_v5, -inf }
0x1565   : > { %5420 = vmax.xlane.f32.xlu1 %v5419_v37  ;;  %v5530_v25 = vpop.f32.mrb[92].mxu0 }
0x1566   : > { %v11983_v57 = vpop.f32.mrb[93].mxu0  ;;  %v5537_v21 = vmul.f32 0.35355338, %v5530_v25 }
0x1567   : > { %v5533_v35 = vpop.f32.mrb[94].mxu0 }
0x1568   : > { %v5538_v4 = vmul.f32 0.35355338, %v5533_v35  ;;  %v11984_v58 = vpop.f32.mrb[95].mxu0  ;;  %v15262_v55 = vadd.f32 %v5537_v21, %v15183_v28 }
0x156a   : > { %v15248_v6 = vadd.f32 %v5538_v4, %v15185_v46 }
0x156c   : > { %v5544_v51 = vsel %vm1481_vm3, %v15248_v6, -inf }
0x156d   : > { %5545 = vmax.xlane.f32.xlu1 %v5544_v51  ;;  %v5655_v38 = vpop.f32.mrb[96].mxu0 }
0x156e   : > { %v11995_v22 = vpop.f32.mrb[97].mxu0  ;;  %v5662_v34 = vmul.f32 0.35355338, %v5655_v38 }
0x156f   : > { %v5658_v7 = vpop.f32.mrb[98].mxu0 }
0x1570   : > { %v5663_v43 = vmul.f32 0.35355338, %v5658_v7  ;;  %v11996_v44 = vpop.f32.mrb[99].mxu0  ;;  %v15265_v63 = vadd.f32 %v5662_v34, %v15183_v28 }
0x1572   : > { %v15253_v48 = vadd.f32 %v5663_v43, %v15185_v46  ;;  %v5541_v46 = vsel %vm1481_vm3, %v15262_v55, -inf  ;;  %v5666_v13 = vsel %vm1481_vm3, %v15265_v63, -inf }
0x1574   : > { %v5669_v50 = vsel %vm1481_vm3, %v15253_v48, -inf }
0x1575   : > { %5670 = vmax.xlane.f32.xlu1 %v5669_v50 }
0x1579   : > { %4939 = vrot.lane.b32.xlu0 %v15120_v24, %s16797_s17 }
0x1586   : > { %5064 = vrot.lane.b32.xlu1 %v15120_v24, %s16798_s29 }
0x1598   : > { %5542 = vmax.xlane.f32.xlu0 %v5541_v46 }
0x159c   : > { %5667 = vmax.xlane.f32.xlu0 %v5666_v13 }
0x15d0   : > { %v4795_v20 = vpop.xlane.xlu1 %4794  ;;  %v4917_v54 = vpop.xlane.xlu0 %4916 }
0x15d1   : > { %v4799_v1 = vsub.f32 %v15188_v26, %v4795_v20  ;;  %v4921_v42 = vsub.f32 %v15191_v33, %v4917_v54 }
0x15d3   : > { %v4801_v59 = vmul.f32 1.442695, %v4799_v1  ;;  %v4923_v62 = vmul.f32 1.442695, %v4921_v42 }
0x15d4   : > { %v4798_v27 = vpop.xlane.xlu0 %4797  ;;  %v4920_v29 = vpop.xlane.xlu1 %4919 }
0x15d5   : > { %13139 = vpow2.f32 %v4801_v59  ;;  %v4800_v28 = vsub.f32 %v15194_v3, %v4798_v27  ;;  %v4922_v40 = vsub.f32 %v15197_v19, %v4920_v29 }
0x15d6   : > { %13141 = vpow2.f32 %v4923_v62 }
0x15d7   : > { %v4803_v39 = vmul.f32 1.442695, %v4800_v28  ;;  %v4925_v8 = vmul.f32 1.442695, %v4922_v40 }
0x15d8   : > { %v5043_v9 = vpop.xlane.xlu0 %5042 }
0x15d9   : > { %13143 = vpow2.f32 %v4803_v39  ;;  %v5047_v10 = vsub.f32 %v15208_v18, %v5043_v9 }
0x15da   : > { %v5046_v47 = vpop.xlane.xlu1 %5045  ;;  %13145 = vpow2.f32 %v4925_v8 }
0x15db   : > { %v5049_v26 = vmul.f32 1.442695, %v5047_v10  ;;  %v5048_v33 = vsub.f32 %v15211_v53, %v5046_v47 }
0x15dd   : > { %13147 = vpow2.f32 %v5049_v26  ;;  %v5051_v12 = vmul.f32 1.442695, %v5048_v33 }
0x15df   : > { %v15277_v16 = vpop.eup %13139  ;;  %13149 = vpow2.f32 %v5051_v12 }
0x15e0   : > { %v5168_v3 = vpop.xlane.xlu0 %5167  ;;  %v4805_v19 = vsel %vm1481_vm3, %v15277_v16, 0.0  ;;  %v15281_v45 = vpop.eup %13141 }
0x15e1   : > { %v5172_v11 = vsub.f32 %v15218_v56, %v5168_v3  ;;  %4806 = vadd.xlane.f32.xlu0 %v4805_v19  ;;  %v4927_v60 = vsel %vm1481_vm3, %v15281_v45, 0.0 }
0x15e2   : > { %v5171_v18 = vpop.xlane.xlu1 %5170 }
0x15e3   : > { %v15284_v23 = vpop.eup %13143  ;;  %v5174_v30 = vmul.f32 1.442695, %v5172_v11  ;;  %v5173_v53 = vsub.f32 %v15221_v61, %v5171_v18 }
0x15e4   : > { %v4808_v37 = vsel %vm1481_vm3, %v15284_v23, 0.0  ;;  %v15291_v25 = vpop.eup %13145 }
0x15e5   : > { %13151 = vpow2.f32 %v5174_v30  ;;  %v5176_v57 = vmul.f32 1.442695, %v5173_v53  ;;  %4928 = vadd.xlane.f32.xlu0 %v4927_v60  ;;  %4809 = vadd.xlane.f32.xlu1 %v4808_v37  ;;  %v4930_v61 = vsel %vm1481_vm3, %v15291_v25, 0.0 }
0x15e7   : > { %v15293_v56 = vpop.eup %13147  ;;  %13153 = vpow2.f32 %v5176_v57 }
0x15e8   : > { %v5053_v35 = vsel %vm1481_vm3, %v15293_v56, 0.0  ;;  %v5293_v38 = vpop.xlane.xlu0 %5292 }
0x15e9   : > { %v15299_v4 = vpop.eup %13149  ;;  %5054 = vadd.xlane.f32.xlu0 %v5053_v35  ;;  %4931 = vadd.xlane.f32.xlu1 %v4930_v61  ;;  %v5297_v39 = vsub.f32 %v15228_v52, %v5293_v38 }
0x15ea   : > { %v5296_v58 = vpop.xlane.xlu1 %5295  ;;  %v5056_v22 = vsel %vm1481_vm3, %v15299_v4, 0.0 }
0x15eb   : > { %v5298_v51 = vsub.f32 %v15231_v41, %v5296_v58  ;;  %v5299_v8 = vmul.f32 1.442695, %v5297_v39 }
0x15ed   : > { %v5301_v7 = vmul.f32 1.442695, %v5298_v51  ;;  %5057 = vadd.xlane.f32.xlu1 %v5056_v22 }
0x15ef   : > { %v15304_v43 = vpop.eup %13151  ;;  %13155 = vpow2.f32 %v5301_v7 }
0x15f0   : > { %v5418_v44 = vpop.xlane.xlu0 %5417  ;;  %v5178_v50 = vsel %vm1481_vm3, %v15304_v43, 0.0 }
0x15f1   : > { %v15308_v21 = vpop.eup %13153  ;;  %v5422_v34 = vsub.f32 %v15238_v32, %v5418_v44  ;;  %5179 = vadd.xlane.f32.xlu0 %v5178_v50 }
0x15f2   : > { %v5421_v46 = vpop.xlane.xlu1 %5420  ;;  %v5181_v41 = vsel %vm1481_vm3, %v15308_v21, 0.0 }
0x15f3   : > { %v5424_v13 = vmul.f32 1.442695, %v5422_v34  ;;  %v5423_v20 = vsub.f32 %v15241_v5, %v5421_v46  ;;  %5182 = vadd.xlane.f32.xlu1 %v5181_v41 }
0x15f4   : > { %v4940_v9 = vpop.permute.xlu0 %4939 }
0x15f5   : > { %13157 = vpow2.f32 %v5424_v13  ;;  %v5426_v54 = vmul.f32 1.442695, %v5423_v20 }
0x15f7   : > { %13159 = vpow2.f32 %v5426_v54 }
0x15f9   : > { %v15314_v1 = vpop.eup %13155 }
0x15fa   : > { %v5546_v42 = vpop.xlane.xlu1 %5545  ;;  %v5306_v59 = vsel %vm1481_vm3, %v15314_v1, 0.0 }
0x15fb   : > { %v5548_v32 = vsub.f32 %v15248_v6, %v5546_v42  ;;  %5307 = vadd.xlane.f32.xlu1 %v5306_v59 }
0x15fd   : > { %v5551_v62 = vmul.f32 1.442695, %v5548_v32 }
0x15ff   : > { %v15319_v27 = vpop.eup %13157  ;;  %13161 = vpow2.f32 %v5551_v62 }
0x1600   : > { %v5428_v5 = vsel %vm1481_vm3, %v15319_v27, 0.0  ;;  %13163 = vpow2.f32 %v5299_v8 }
0x1601   : > { %v15323_v29 = vpop.eup %13159  ;;  %5429 = vadd.xlane.f32.xlu1 %v5428_v5 }
0x1602   : > { %v5431_v28 = vsel %vm1481_vm3, %v15323_v29, 0.0  ;;  %v5671_v47 = vpop.xlane.xlu1 %5670 }
0x1603   : > { %v5673_v3 = vsub.f32 %v15253_v48, %v5671_v47 }
0x1605   : > { %5432 = vadd.xlane.f32.xlu1 %v5431_v28  ;;  %v5676_v18 = vmul.f32 1.442695, %v5673_v3 }
0x1606   : > { %v5065_v57 = vpop.permute.xlu1 %5064 }
0x1607   : > { %5189 = vrot.lane.b32.xlu0 %v15120_v24, %s16799_s30 }
0x1609   : > { %v15329_v40 = vpop.eup %13161 }
0x160a   : > { %v5556_v6 = vsel %vm1481_vm3, %v15329_v40, 0.0  ;;  %v15334_v10 = vpop.eup %13163 }
0x160b   : > { %5557 = vadd.xlane.f32.xlu1 %v5556_v6  ;;  %v5303_v33 = vsel %vm1481_vm3, %v15334_v10, 0.0 }
0x1625   : > { %v5543_v26 = vpop.xlane.xlu0 %5542 }
0x1626   : > { %v5547_v12 = vsub.f32 %v15262_v55, %v5543_v26  ;;  %5304 = vadd.xlane.f32.xlu0 %v5303_v33 }
0x1628   : > { %v5549_v19 = vmul.f32 1.442695, %v5547_v12 }
0x1629   : > { %v5668_v11 = vpop.xlane.xlu0 %5667 }
0x162a   : > { %13165 = vpow2.f32 %v5549_v19  ;;  %v5672_v52 = vsub.f32 %v15265_v63, %v5668_v11 }
0x162c   : > { %v5674_v30 = vmul.f32 1.442695, %v5672_v52 }
0x162e   : > { %13167 = vpow2.f32 %v5674_v30 }
0x162f   : > { %13169 = vpow2.f32 %v5676_v18 }
0x1634   : > { %v15341_v53 = vpop.eup %13165 }
0x1635   : > { %v5553_v60 = vsel %vm1481_vm3, %v15341_v53, 0.0 }
0x1636   : > { %5554 = vadd.xlane.f32.xlu0 %v5553_v60 }
0x1638   : > { %v15345_v37 = vpop.eup %13167 }
0x1639   : > { %v5678_v48 = vsel %vm1481_vm3, %v15345_v37, 0.0  ;;  %v15349_v55 = vpop.eup %13169 }
0x163a   : > { %5679 = vadd.xlane.f32.xlu1 %v5678_v48  ;;  %v5681_v63 = vsel %vm1481_vm3, %v15349_v55, 0.0 }
0x163e   : > { %5682 = vadd.xlane.f32.xlu1 %v5681_v63 }
0x164c   : > { %5439 = vrot.lane.b32.xlu0 %v15120_v24, %s16802_s16 }
0x164f   : > { %5314 = vrot.lane.b32.xlu1 %v15120_v24, %s16800_s2 }
0x1650   : > { %5564 = vrot.lane.b32.xlu0 %v15120_v24, %s16804_s22 }
0x1654   : > { %5689 = vrot.lane.b32.xlu0 %v15120_v24, %s16806_s15 }
0x166e   : > { %v4807_v35 = vpop.xlane.xlu0 %4806 }
0x166f   : > { %13171 = vrcp.f32 %v4807_v35 }
0x1672   : > { %v4810_v61 = vpop.xlane.xlu1 %4809  ;;  %v4929_v51 = vpop.xlane.xlu0 %4928 }
0x1673   : > { %13173 = vrcp.f32 %v4810_v61 }
0x1676   : > { %v4932_v58 = vpop.xlane.xlu1 %4931  ;;  %v5055_v34 = vpop.xlane.xlu0 %5054 }
0x1677   : > { %13175 = vrcp.f32 %v4932_v58 }
0x1678   : > { %13177 = vrcp.f32 %v4929_v51 }
0x1679   : > { %v13172_v38 = vpop.eup %13171 }
0x167a   : > { %v5058_v22 = vpop.xlane.xlu1 %5057  ;;  %v4813_v44 = vmul.f32 %v13172_v38, %v15277_v16 }
0x167b   : > { %13179 = vrcp.f32 %v5058_v22 }
0x167c   : > { %13181 = vrcp.f32 %v5055_v34 }
0x167d   : > { %v13174_v7 = vpop.eup %13173 }
0x167e   : > { %v4814_v50 = vmul.f32 %v13174_v7, %v15284_v23  ;;  %v5180_v23 = vpop.xlane.xlu0 %5179 }
0x1680   : > { %v4815_v46 = vpack.c.bf16 %v4814_v50, %v4813_v44  ;;  %v5183_v20 = vpop.xlane.xlu1 %5182 }
0x1681   : > { %v13176_v24 = vpop.eup %13175  ;;  %13183 = vrcp.f32 %v5183_v20 }
0x1682   : > { %11916 = vmatmul.mubr.msk.bf16.vlgmr.msra.gmra.mrb[96].mxu1 %vm1481_vm3, %v4815_v46  ;;  %v13178_v41 = vpop.eup %13177  ;;  %v4936_v13 = vmul.f32 %v13176_v24, %v15291_v25  ;;  %13185 = vrcp.f32 %v5180_v23  ;;  %v5190_v5 = vpop.permute.xlu0 %5189 }
0x1683   : > { %11926 = vmatpush3.bf16.msra.mxu1 %v4940_v9  ;;  %11927 = vmatprep.mubr.msk.bf16.mxu1 %vm13865_vm1, %v13864_v14  ;;  %v4935_v16 = vmul.f32 %v13178_v41, %v15281_v45 }
0x1684   : > { %11937 = vmatprep.subr.bf16.mxu1 %v13864_v14 }
0x1685   : > { %v4937_v54 = vpack.c.bf16 %v4936_v13, %v4935_v16  ;;  %v13180_v42 = vpop.eup %13179 }
0x1686   : > { %v13182_v59 = vpop.eup %13181  ;;  %v5062_v32 = vmul.f32 %v13180_v42, %v15299_v4 }
0x1687   : > { %v5061_v25 = vmul.f32 %v13182_v59, %v15293_v56 }
0x1688   : > { %v5308_v56 = vpop.xlane.xlu1 %5307 }
0x1689   : > { %v5063_v62 = vpack.c.bf16 %v5062_v32, %v5061_v25 }
0x168a   : > { %11928 = vmatmul.mubr.msk.bf16.vlgmr.msra.gmra.mrb[100].mxu1 %vm1481_vm3, %v4937_v54 }
0x168b   : > { %11938 = vmatpush3.bf16.msra.mxu1 %v5065_v57  ;;  %11939 = vmatprep.mubr.msk.bf16.mxu1 %vm13865_vm1, %v13864_v14  ;;  %v13184_v45 = vpop.eup %13183 }
0x168c   : > { %11949 = vmatprep.subr.bf16.mxu1 %v13864_v14  ;;  %v13186_v28 = vpop.eup %13185  ;;  %v5187_v6 = vmul.f32 %v13184_v45, %v15308_v21 }
0x168d   : > { %v5186_v4 = vmul.f32 %v13186_v28, %v15304_v43 }
0x168e   : > { %v5430_v8 = vpop.xlane.xlu1 %5429 }
0x168f   : > { %v5188_v39 = vpack.c.bf16 %v5187_v6, %v5186_v4  ;;  %v12899_v4 = vld [vmem:[%s16809_s0] sm:$0xff]  }
0x1690   : > { %12004 = vmatpush3.bf16.msra.mxu0 %v12899_v4 }
0x1691   : > { %12005 = vmatprep.subr.bf16.mxu0 %v13864_v14 }
0x1692   : > { %11940 = vmatmul.mubr.msk.bf16.vlgmr.msra.gmra.mrb[104].mxu1 %vm1481_vm3, %v5063_v62  ;;  %v5433_v47 = vpop.xlane.xlu1 %5432 }
0x1693   : > { %11950 = vmatpush3.bf16.msra.mxu1 %v5190_v5  ;;  %11951 = vmatprep.mubr.msk.bf16.mxu1 %vm13865_vm1, %v13864_v14 }
0x1694   : > { %11961 = vmatprep.subr.bf16.mxu1 %v13864_v14 }
0x1698   : > { %v5558_v26 = vpop.xlane.xlu1 %5557 }
0x169a   : > { %11952 = vmatmul.mubr.msk.bf16.vlgmr.msra.gmra.mrb[108].mxu1 %vm1481_vm3, %v5188_v39 }
0x169b   : > { %11963 = vmatprep.mubr.msk.bf16.mxu1 %vm13865_vm1, %v13864_v14 }
0x16b3   : > { %v5305_v9 = vpop.xlane.xlu0 %5304 }
0x16b4   : > { %13187 = vrcp.f32 %v5305_v9 }
0x16b5   : > { %13189 = vrcp.f32 %v5308_v56 }
0x16b6   : > { %13191 = vrcp.f32 %v5433_v47 }
0x16b7   : > { %13193 = vrcp.f32 %v5430_v8 }
0x16be   : > { %v13188_v21 = vpop.eup %13187 }
0x16bf   : > { %v13190_v3 = vpop.eup %13189  ;;  %v5311_v43 = vmul.f32 %v13188_v21, %v15334_v10 }
0x16c0   : > { %v5312_v11 = vmul.f32 %v13190_v3, %v15314_v1  ;;  %v13192_v30 = vpop.eup %13191 }
0x16c1   : > { %v13194_v48 = vpop.eup %13193  ;;  %v5437_v10 = vmul.f32 %v13192_v30, %v15323_v29 }
0x16c2   : > { %v5313_v18 = vpack.c.bf16 %v5312_v11, %v5311_v43  ;;  %v5436_v1 = vmul.f32 %v13194_v48, %v15319_v27  ;;  %v12902_v11 = vld [vmem:[%s16809_s0 + $0x18] sm:$0xff]  }
0x16c3   : > { %v5555_v19 = vpop.xlane.xlu0 %5554 }
0x16c4   : > { %13195 = vrcp.f32 %v5555_v19  ;;  %v5438_v63 = vpack.c.bf16 %v5437_v10, %v5436_v1 }
0x16c5   : > { %13197 = vrcp.f32 %v5558_v26  ;;  %v12900_v26 = vld [vmem:[%s16809_s0 + $0x8] sm:$0xff]  }
0x16c6   : > { %12006 = vmatpush3.bf16.msra.mxu0 %v12900_v26 }
0x16c7   : > { %v5680_v33 = vpop.xlane.xlu1 %5679  ;;  %v5440_v60 = vpop.permute.xlu0 %5439  ;;  %12007 = vmatprep.subr.bf16.mxu0 %v13864_v14 }
0x16cb   : > { %v5683_v12 = vpop.xlane.xlu1 %5682  ;;  %v5565_v35 = vpop.permute.xlu0 %5564 }
0x16cc   : > { %13199 = vrcp.f32 %v5683_v12  ;;  %v12901_v12 = vld [vmem:[%s16809_s0 + $0x10] sm:$0xff]  }
0x16cd   : > { %13201 = vrcp.f32 %v5680_v33  ;;  %12008 = vmatpush3.bf16.msra.mxu0 %v12901_v12 }
0x16ce   : > { %v13196_v57 = vpop.eup %13195  ;;  %12009 = vmatprep.subr.bf16.mxu0 %v13864_v14 }
0x16cf   : > { %v5315_v52 = vpop.permute.xlu1 %5314  ;;  %v13198_v61 = vpop.eup %13197  ;;  %v5561_v58 = vmul.f32 %v13196_v57, %v15341_v53 }
0x16d0   : > { %11962 = vmatpush3.bf16.msra.mxu1 %v5315_v52  ;;  %v5562_v29 = vmul.f32 %v13198_v61, %v15329_v40  ;;  %v5690_v38 = vpop.permute.xlu0 %5689 }
0x16d1   : > { %11973 = vmatprep.subr.bf16.mxu1 %v13864_v14  ;;  %12010 = vmatpush3.bf16.msra.mxu0 %v12902_v11 }
0x16d2   : > { %v5563_v51 = vpack.c.bf16 %v5562_v29, %v5561_v58  ;;  %12027 = vmatprep.subr.bf16.mxu0 %v13864_v14 }
0x16d3   : > { %11964 = vmatmul.mubr.msk.bf16.vlgmr.msra.gmra.mrb[112].mxu1 %vm1481_vm3, %v5313_v18 }
0x16d4   : > { %11974 = vmatpush3.bf16.msra.mxu1 %v5440_v60  ;;  %11975 = vmatprep.mubr.msk.bf16.mxu1 %vm13865_vm1, %v13864_v14 }
0x16d5   : > { %11985 = vmatprep.subr.bf16.mxu1 %v13864_v14 }
0x16d6   : > { %v13200_v27 = vpop.eup %13199 }
0x16d7   : > { %v13202_v22 = vpop.eup %13201  ;;  %v5687_v7 = vmul.f32 %v13200_v27, %v15349_v55 }
0x16d8   : > { %v5686_v53 = vmul.f32 %v13202_v22, %v15345_v37 }
0x16da   : > { %v5688_v44 = vpack.c.bf16 %v5687_v7, %v5686_v53 }
0x16db   : > { %11976 = vmatmul.mubr.msk.bf16.vlgmr.msra.gmra.mrb[116].mxu1 %vm1481_vm3, %v5438_v63  ;;  %v11071_v63 = vld [vmem:[%s16793_s6 + $0x1] ss:$0 sm:$0xff]  ;;  %s16812_s6 = sld [smem:[#allocation45_spill]] }
0x16dc   : > { %11986 = vmatpush3.bf16.msra.mxu1 %v5565_v35  ;;  %11987 = vmatprep.mubr.msk.bf16.mxu1 %vm13865_vm1, %v13864_v14  ;;  %v4526_v57 = vadd.f32 %v15179_v49, %v11071_v63  ;;  %v4529_v35 = vadd.f32 %v15181_v31, %v11071_v63 }
0x16dd   : > { %11997 = vmatprep.subr.bf16.mxu1 %v13864_v14 }
0x16de   : > { %v4532_v61 = vadd.f32 %v4526_v57, %v15086_v36  ;;  %v4533_v58 = vadd.f32 %v4529_v35, %v15088_v2  ;;  %v11119_v35 = vld [vmem:[%s16810_s5] ss:$0 sm:$0xff] }
0x16e0   : > { %v4538_v29 = vsel %vm1370_vm0, %v4532_v61, 0.0 }
0x16e3   : > { %11988 = vmatmul.mubr.msk.bf16.vlgmr.msra.gmra.mrb[120].mxu1 %vm1481_vm3, %v5563_v51  ;;  %v4541_v51 = vsel %vm1370_vm0, %v4533_v58, 0.0 }
0x16e4   : > { %11998 = vmatpush3.bf16.msra.mxu1 %v5690_v38  ;;  %11999 = vmatprep.mubr.msk.bf16.mxu1 %vm13865_vm1, %v13864_v14 }
0x16e5   : > { %12015 = vmatprep.subr.bf16.mxu1 %v13864_v14 }
0x16eb   : > { %12000 = vmatmul.mubr.msk.bf16.vlgmr.msra.gmra.mrb[124].mxu1 %vm1481_vm3, %v5688_v44 }
0x16ec   : > { %12023 = vmatprep.mubr.msk.bf16.mxu1 %vm13865_vm1, %v13864_v14 }
0x1755   : > { %v15408_v40 = vpop.f32.mrb[96].mxu1 }
0x1756   : > { %v11917_v50 = vpop.f32.mrb[97].mxu1 }
0x1757   : > { %v15410_v34 = vpop.f32.mrb[98].mxu1 }
0x1758   : > { %v11918_v46 = vpop.f32.mrb[99].mxu1 }
0x175d   : > { %v4979_v24 = vpop.f32.mrb[100].mxu1 }
0x175e   : > { %v11929_v41 = vpop.f32.mrb[101].mxu1 }
0x175f   : > { %v4982_v13 = vpop.f32.mrb[102].mxu1 }
0x1760   : > { %v12659_v55 = vpack.i.bf16 %v4982_v13, %v4979_v24  ;;  %v11930_v20 = vpop.f32.mrb[103].mxu1 }
0x1762   : > { %12660 = vrot.lane.b32.xlu0 %v12659_v55, %s16805_s19 }
0x1765   : > { %v5104_v37 = vpop.f32.mrb[104].mxu1 }
0x1766   : > { %v11941_v16 = vpop.f32.mrb[105].mxu1 }
0x1767   : > { %v5107_v23 = vpop.f32.mrb[106].mxu1 }
0x1768   : > { %v12664_v54 = vpack.i.bf16 %v5107_v23, %v5104_v37  ;;  %v11942_v42 = vpop.f32.mrb[107].mxu1 }
0x176a   : > { %12665 = vrot.lane.b32.xlu1 %v12664_v54, %s16803_s7 }
0x176d   : > { %v5229_v59 = vpop.f32.mrb[108].mxu1 }
0x176e   : > { %v11953_v32 = vpop.f32.mrb[109].mxu1 }
0x176f   : > { %v5232_v25 = vpop.f32.mrb[110].mxu1 }
0x1770   : > { %v12669_v62 = vpack.i.bf16 %v5232_v25, %v5229_v59  ;;  %v11954_v45 = vpop.f32.mrb[111].mxu1 }
0x1772   : > { %12670 = vrot.lane.b32.xlu0 %v12669_v62, %s16801_s18 }
0x17a6   : > { %v5354_v5 = vpop.f32.mrb[112].mxu1 }
0x17a7   : > { %v11965_v28 = vpop.f32.mrb[113].mxu1 }
0x17a8   : > { %v5357_v6 = vpop.f32.mrb[114].mxu1 }
0x17a9   : > { %v12674_v39 = vpack.i.bf16 %v5357_v6, %v5354_v5  ;;  %v11966_v56 = vpop.f32.mrb[115].mxu1 }
0x17ab   : > { %12675 = vrot.lane.b32.xlu1 %v12674_v39, %s16784_s14 }
0x17ae   : > { %v5479_v8 = vpop.f32.mrb[116].mxu1 }
0x17af   : > { %v11977_v9 = vpop.f32.mrb[117].mxu1 }
0x17b0   : > { %v5482_v47 = vpop.f32.mrb[118].mxu1 }
0x17b1   : > { %v12679_v33 = vpack.i.bf16 %v5482_v47, %v5479_v8  ;;  %v11978_v21 = vpop.f32.mrb[119].mxu1 }
0x17b3   : > { %12680 = vrot.lane.b32.xlu0 %v12679_v33, %s16785_s28 }
0x17b6   : > { %v5604_v3 = vpop.f32.mrb[120].mxu1 }
0x17b7   : > { %v11989_v43 = vpop.f32.mrb[121].mxu1 }
0x17b8   : > { %v5607_v19 = vpop.f32.mrb[122].mxu1 }
0x17b9   : > { %v12684_v52 = vpack.i.bf16 %v5607_v19, %v5604_v3  ;;  %v11990_v18 = vpop.f32.mrb[123].mxu1 }
0x17bb   : > { %12685 = vrot.lane.b32.xlu1 %v12684_v52, %s16786_s11 }
0x17be   : > { %v5729_v30 = vpop.f32.mrb[124].mxu1 }
0x17bf   : > { %v12001_v60 = vpop.f32.mrb[125].mxu1 }
0x17c0   : > { %v5732_v48 = vpop.f32.mrb[126].mxu1 }
0x17c1   : > { %v12689_v10 = vpack.i.bf16 %v5732_v48, %v5729_v30  ;;  %v12002_v1 = vpop.f32.mrb[127].mxu1 }
0x17c3   : > { %12690 = vrot.lane.b32.xlu0 %v12689_v10, %s16787_s12 }
0x17d4   : > { %v12661_v27 = vpop.permute.xlu0 %12660 }
0x17d5   : > { %v12663_v53 = vunpack.i.h.bf16 %v12661_v27  ;;  %v12662_v44 = vunpack.i.l.bf16 %v12661_v27  ;;  %v11091_v27 = vld [vmem:[%s16795_s27 + $0x1] ss:$0 sm:$0xff]  ;;  %s16820_s27 = sld [smem:[#allocation60_spill]] }
0x17d7   : > { %v5793_v13 = vsel %vm1431_vm2, %v15410_v34, %v12663_v53  ;;  %v5792_v55 = vsel %vm1431_vm2, %v15408_v40, %v12662_v44 }
0x17dc   : > { %v12666_v38 = vpop.permute.xlu1 %12665 }
0x17dd   : > { %v12668_v50 = vunpack.i.h.bf16 %v12666_v38  ;;  %v12667_v49 = vunpack.i.l.bf16 %v12666_v38 }
0x17df   : > { %4539 = vadd.xlane.f32.xlu1 %v4538_v29  ;;  %v5795_v16 = vsel %vm1481_vm3, %v5793_v13, %v12668_v50  ;;  %v5794_v23 = vsel %vm1481_vm3, %v5792_v55, %v12667_v49 }
0x17e2   : > { %4542 = vadd.xlane.f32.xlu0 %v4541_v51 }
0x17e4   : > { %v12671_v22 = vpop.permute.xlu0 %12670 }
0x17e5   : > { %v12673_v31 = vunpack.i.h.bf16 %v12671_v22  ;;  %v12672_v24 = vunpack.i.l.bf16 %v12671_v22 }
0x17e7   : > { %v5796_v59 = vsel %vm2471_vm4, %v5794_v23, %v12672_v24  ;;  %v5797_v32 = vsel %vm2471_vm4, %v5795_v16, %v12673_v31 }
0x181d   : > { %v12676_v7 = vpop.permute.xlu1 %12675 }
0x181e   : > { %v12678_v41 = vunpack.i.h.bf16 %v12676_v7  ;;  %v12677_v2 = vunpack.i.l.bf16 %v12676_v7 }
0x1820   : > { %v5798_v25 = vsel %vm2474_vm5, %v5796_v59, %v12677_v2  ;;  %v5799_v62 = vsel %vm2474_vm5, %v5797_v32, %v12678_v41  ;;  %v13434_v41 = vld [vmem:[%s14337_s24 + $0x8] sm:$0xff] }
0x1825   : > { %v12681_v46 = vpop.permute.xlu0 %12680 }
0x1826   : > { %v12683_v20 = vunpack.i.h.bf16 %v12681_v46  ;;  %v12682_v37 = vunpack.i.l.bf16 %v12681_v46  ;;  %v13433_v46 = vld [vmem:[%s14337_s24] sm:$0xff]  ;;  %s16811_s24 = sld [smem:[#allocation61_spill]] }
0x1828   : > { %v5800_v45 = vsel %vm2477_vm6, %v5798_v25, %v12682_v37  ;;  %v5801_v40 = vsel %vm2477_vm6, %v5799_v62, %v12683_v20 }
0x182d   : > { %v12686_v36 = vpop.permute.xlu1 %12685 }
0x182e   : > { %v12688_v54 = vunpack.i.h.bf16 %v12686_v36  ;;  %v12687_v42 = vunpack.i.l.bf16 %v12686_v36 }
0x1830   : > { %v5802_v6 = vsel %vm2480_vm7, %v5800_v45, %v12687_v42  ;;  %v5803_v4 = vsel %vm2480_vm7, %v5801_v40, %v12688_v54 }
0x1835   : > { %v12691_v34 = vpop.permute.xlu0 %12690 }
0x1836   : > { %v12693_v5 = vunpack.i.h.bf16 %v12691_v34  ;;  %v12692_v28 = vunpack.i.l.bf16 %v12691_v34 }
0x1838   : > { %v5804_v39 = vsel %vm2483_vm8, %v5802_v6, %v12692_v28  ;;  %v5805_v56 = vsel %vm2483_vm8, %v5803_v4, %v12693_v5 }
0x1839   : > { %v5806_v8 = vpack.c.bf16 %v5805_v56, %v5804_v39 }
0x183b   : > { %12012 = vmatmul.mubr.msk.bf16.vlgmr.msra.gmra.mrb[100].mxu0 %vm1370_vm0, %v5806_v8 }
0x183c   : > { %12035 = vmatprep.mubr.msk.bf16.mxu0 %vm13865_vm1, %v13864_v14 }
0x186c   : > { %v4540_v9 = vpop.xlane.xlu1 %4539 }
0x186d   : > { %v4544_v47 = vmul.f32 0.015625, %v4540_v9 }
0x186f   : > { %v4546_v26 = vsub.f32 %v4532_v61, %v4544_v47  ;;  %v4543_v33 = vpop.xlane.xlu0 %4542  ;;  %v12903_v47 = vld [vmem:[#allocation10] sm:$0xff]  }
0x1870   : > { %v4545_v21 = vmul.f32 0.015625, %v4543_v33  ;;  %12028 = vmatpush3.bf16.msra.mxu0 %v12903_v47  ;;  %v12905_v33 = vld [vmem:[#allocation10 + $0x8] sm:$0xff]  }
0x1871   : > { %v4548_v12 = vmul.f32 %v4546_v26, %v4546_v26  ;;  %12029 = vmatprep.subr.bf16.mxu0 %v13864_v14 }
0x1872   : > { %v4547_v3 = vsub.f32 %v4533_v58, %v4545_v21  ;;  %v11090_v58 = vld [vmem:[%s16794_s20 + $0x1] ss:$0 sm:$0xff]  ;;  %v12906_v21 = vld [vmem:[#allocation7 + $0x8] sm:$0xff]   ;;  %s16817_s20 = sld [smem:[#allocation53_spill]] }
0x1873   : > { %v4550_v43 = vsel %vm1370_vm0, %v4548_v12, 0.0  ;;  %v12907_v12 = vld [vmem:[#allocation10 + $0x10] sm:$0xff]  }
0x1874   : > { %4551 = vadd.xlane.f32.xlu0 %v4550_v43  ;;  %v4549_v19 = vmul.f32 %v4547_v3, %v4547_v3  ;;  %12030 = vmatpush3.bf16.msra.mxu0 %v12905_v33  ;;  %v12909_v43 = vld [vmem:[#allocation10 + $0x18] sm:$0xff]  }
0x1875   : > { %12031 = vmatprep.subr.bf16.mxu0 %v13864_v14 }
0x1876   : > { %v4553_v11 = vsel %vm1370_vm0, %v4549_v19, 0.0  ;;  %v12910_v19 = vld [vmem:[#allocation7 + $0x18] sm:$0xff]  }
0x1877   : > { %4554 = vadd.xlane.f32.xlu1 %v4553_v11 }
0x1878   : > { %12032 = vmatpush3.bf16.msra.mxu0 %v12907_v12 }
0x1879   : > { %12033 = vmatprep.subr.bf16.mxu0 %v13864_v14 }
0x187c   : > { %12034 = vmatpush3.bf16.msra.mxu0 %v12909_v43 }
0x187d   : > { %12051 = vmatprep.subr.bf16.mxu0 %v13864_v14 }
0x1901   : > { %v4552_v52 = vpop.xlane.xlu0 %4551 }
0x1902   : > { %v4556_v18 = vmul.f32 0.015625, %v4552_v52 }
0x1904   : > { %v4558_v30 = vadd.f32 1e-05, %v4556_v18  ;;  %v4555_v60 = vpop.xlane.xlu1 %4554 }
0x1905   : > { %v4557_v48 = vmul.f32 0.015625, %v4555_v60 }
0x1906   : > { %13203 = vrsqrt.f32 %v4558_v30 }
0x1907   : > { %v4559_v10 = vadd.f32 1e-05, %v4557_v48 }
0x1909   : > { %13205 = vrsqrt.f32 %v4559_v10 }
0x190e   : > { %v5874_v1 = vpop.f32.mrb[100].mxu0 }
0x190f   : > { %v12013_v63 = vpop.f32.mrb[101].mxu0  ;;  %v5875_v22 = vadd.f32 %v11119_v35, %v5874_v1 }
0x1910   : > { %v13204_v57 = vpop.eup %13203  ;;  %v5877_v61 = vpop.f32.mrb[102].mxu0 }
0x1911   : > { %v12014_v29 = vpop.f32.mrb[103].mxu0  ;;  %v4562_v51 = vmul.f32 %v13204_v57, %v4546_v26  ;;  %v5878_v50 = vadd.f32 %v11119_v35, %v5877_v61  ;;  %v5881_v31 = vadd.f32 %v13433_v46, %v5875_v22  ;;  %v12904_v26 = vld [vmem:[#allocation7] sm:$0xff]  }
0x1912   : > { %12016 = vmatpush3.bf16.msra.mxu1 %v12904_v26  ;;  %v11092_v29 = vld [vmem:[%s16811_s24] ss:$0 sm:$0xff]  ;;  %s16815_s24 = sld [smem:[#allocation55_spill]] }
0x1913   : > { %v13206_v38 = vpop.eup %13205  ;;  %v4570_v7 = vmul.f32 %v11090_v58, %v4562_v51  ;;  %v5882_v2 = vadd.f32 %v13434_v41, %v5878_v50  ;;  %v5885_v55 = vsel %vm1370_vm0, %v5881_v31, 0.0  ;;  %12017 = vmatprep.subr.bf16.mxu1 %v13864_v14  ;;  %v11093_v50 = vld [vmem:[%s16813_s8] ss:$0 sm:$0xff]  ;;  %s16816_s8 = sld [smem:[#allocation57_spill]] }
0x1914   : > { %v4563_v53 = vmul.f32 %v13206_v38, %v4547_v3  ;;  %v12908_v3 = vld [vmem:[#allocation7 + $0x10] sm:$0xff]  }
0x1915   : > { %v4578_v44 = vadd.f32 %v11091_v27, %v4570_v7  ;;  %v5888_v20 = vsel %vm1370_vm0, %v5882_v2, 0.0 }
0x1916   : > { %v4571_v49 = vmul.f32 %v11090_v58, %v4563_v53  ;;  %12018 = vmatpush3.bf16.msra.mxu1 %v12906_v21  ;;  %v11125_v53 = vld [vmem:[%s16812_s6] ss:$0 sm:$0xff] }
0x1917   : > { %v4582_v24 = vsel %vm1370_vm0, %v4578_v44, 0.0  ;;  %12019 = vmatprep.subr.bf16.mxu1 %v13864_v14 }
0x1918   : > { %4583 = vadd.xlane.f32.xlu0 %v4582_v24  ;;  %v4579_v36 = vadd.f32 %v11091_v27, %v4571_v49 }
0x191a   : > { %v4585_v13 = vsel %vm1370_vm0, %v4579_v36, 0.0  ;;  %12020 = vmatpush3.bf16.msra.mxu1 %v12908_v3 }
0x191b   : > { %4586 = vadd.xlane.f32.xlu1 %v4585_v13  ;;  %12021 = vmatprep.subr.bf16.mxu1 %v13864_v14 }
0x191c   : > { %5886 = vadd.xlane.f32.xlu0 %v5885_v55 }
0x191e   : > { %12022 = vmatpush3.bf16.msra.mxu1 %v12910_v19 }
0x191f   : > { %5889 = vadd.xlane.f32.xlu1 %v5888_v20  ;;  %12039 = vmatprep.subr.bf16.mxu1 %v13864_v14 }
0x19a5   : > { %v4584_v37 = vpop.xlane.xlu0 %4583 }
0x19a6   : > { %v4588_v16 = vmul.f32 0.015625, %v4584_v37 }
0x19a8   : > { %v15464_v23 = vsub.f32 %v4578_v44, %v4588_v16  ;;  %v4587_v54 = vpop.xlane.xlu1 %4586 }
0x19a9   : > { %v4589_v42 = vmul.f32 0.015625, %v4587_v54  ;;  %v5887_v59 = vpop.xlane.xlu0 %5886 }
0x19aa   : > { %v5891_v32 = vmul.f32 0.015625, %v5887_v59  ;;  %v4592_v25 = vmul.f32 %v15464_v23, %v15464_v23 }
0x19ab   : > { %v4591_v62 = vsub.f32 %v4579_v36, %v4589_v42 }
0x19ac   : > { %v15468_v34 = vsub.f32 %v5881_v31, %v5891_v32  ;;  %v5890_v45 = vpop.xlane.xlu1 %5889  ;;  %v4594_v40 = vsel %vm1370_vm0, %v4592_v25, 0.0 }
0x19ad   : > { %v5892_v5 = vmul.f32 0.015625, %v5890_v45  ;;  %4595 = vadd.xlane.f32.xlu0 %v4594_v40  ;;  %v4593_v28 = vmul.f32 %v4591_v62, %v4591_v62 }
0x19ae   : > { %v5895_v6 = vmul.f32 %v15468_v34, %v15468_v34 }
0x19af   : > { %v5894_v4 = vsub.f32 %v5882_v2, %v5892_v5  ;;  %v4597_v39 = vsel %vm1370_vm0, %v4593_v28, 0.0  ;;  %v11126_v2 = vld [vmem:[%s16814_s9] ss:$0 sm:$0xff] }
0x19b0   : > { %4598 = vadd.xlane.f32.xlu1 %v4597_v39  ;;  %v5897_v56 = vsel %vm1370_vm0, %v5895_v6, 0.0 }
0x19b1   : > { %5898 = vadd.xlane.f32.xlu0 %v5897_v56  ;;  %v5896_v8 = vmul.f32 %v5894_v4, %v5894_v4 }
0x19b3   : > { %v5900_v9 = vsel %vm1370_vm0, %v5896_v8, 0.0 }
0x19b4   : > { %5901 = vadd.xlane.f32.xlu1 %v5900_v9 }
0x1a3a   : > { %v4596_v11 = vpop.xlane.xlu0 %4595 }
0x1a3b   : > { %v4600_v52 = vmul.f32 0.015625, %v4596_v11 }
0x1a3d   : > { %v4602_v18 = vadd.f32 1e-05, %v4600_v52  ;;  %v4599_v30 = vpop.xlane.xlu1 %4598 }
0x1a3e   : > { %v4601_v60 = vmul.f32 0.015625, %v4599_v30  ;;  %v5899_v48 = vpop.xlane.xlu0 %5898 }
0x1a3f   : > { %13207 = vrsqrt.f32 %v4602_v18  ;;  %v5903_v10 = vmul.f32 0.015625, %v5899_v48 }
0x1a40   : > { %v4603_v1 = vadd.f32 1e-05, %v4601_v60 }
0x1a41   : > { %v5905_v63 = vadd.f32 1e-05, %v5903_v10  ;;  %v5902_v57 = vpop.xlane.xlu1 %5901 }
0x1a42   : > { %13209 = vrsqrt.f32 %v4603_v1  ;;  %v5904_v35 = vmul.f32 0.015625, %v5902_v57 }
0x1a43   : > { %13211 = vrsqrt.f32 %v5905_v63 }
0x1a44   : > { %v5906_v61 = vadd.f32 1e-05, %v5904_v35 }
0x1a46   : > { %13213 = vrsqrt.f32 %v5906_v61 }
0x1a49   : > { %v13208_v58 = vpop.eup %13207 }
0x1a4a   : > { %v4606_v51 = vmul.f32 %v13208_v58, %v15464_v23  ;;  %v11133_v23 = vld [vmem:[#allocation11] ss:$0 sm:$0xff] }
0x1a4c   : > { %v13210_v27 = vpop.eup %13209  ;;  %v4614_v22 = vmul.f32 %v11092_v29, %v4606_v51 }
0x1a4d   : > { %v13212_v38 = vpop.eup %13211  ;;  %v4607_v7 = vmul.f32 %v13210_v27, %v4591_v62 }
0x1a4e   : > { %v5909_v44 = vmul.f32 %v13212_v38, %v15468_v34  ;;  %v4622_v36 = vadd.f32 %v11093_v50, %v4614_v22  ;;  %v11127_v34 = vld [vmem:[#allocation8] ss:$0 sm:$0xff] }
0x1a4f   : > { %v4615_v49 = vmul.f32 %v11092_v29, %v4607_v7 }
0x1a50   : > { %v13214_v46 = vpop.eup %13213  ;;  %v5917_v31 = vmul.f32 %v11125_v53, %v5909_v44 }
0x1a51   : > { %v5910_v24 = vmul.f32 %v13214_v46, %v5894_v4  ;;  %v4623_v41 = vadd.f32 %v11093_v50, %v4615_v49 }
0x1a52   : > { %v15494_v20 = vadd.f32 %v11126_v2, %v5917_v31 }
0x1a53   : > { %v5918_v13 = vmul.f32 %v11125_v53, %v5910_v24  ;;  %v15490_v55 = vpack.c.bf16 %v4623_v41, %v4622_v36 }
0x1a55   : > { %12036 = vmatmul.mubr.msk.bf16.vlgmr.msra.gmra.mrb[104].mxu0 %vm1370_vm0, %v15490_v55  ;;  %v15496_v37 = vadd.f32 %v11126_v2, %v5918_v13 }
0x1a56   : > { %12053 = vmatprep.mubr.msk.bf16.mxu0 %vm13865_vm1, %v13864_v14 }
0x1a57   : > { %v5927_v16 = vpack.c.bf16 %v15496_v37, %v15494_v20 }
0x1a59   : > { %12024 = vmatmul.mubr.msk.bf16.vlgmr.msra.gmra.mrb[128].mxu1 %vm1370_vm0, %v5927_v16 }
0x1a5a   : > { %12041 = vmatprep.mubr.msk.bf16.mxu1 %vm13865_vm1, %v13864_v14 }
0x1b28   : > { %v6087_v54 = vpop.f32.mrb[104].mxu0 }
0x1b29   : > { %v12037_v42 = vpop.f32.mrb[105].mxu0  ;;  %v6088_v32 = vadd.f32 %v11133_v23, %v6087_v54 }
0x1b2a   : > { %v6090_v59 = vpop.f32.mrb[106].mxu0 }
0x1b2b   : > { %v6091_v25 = vadd.f32 %v11133_v23, %v6090_v59  ;;  %v12038_v62 = vpop.f32.mrb[107].mxu0 }
0x1b2c   : > { %v6004_v45 = vpop.f32.mrb[128].mxu1 }
0x1b2d   : > { %v15505_v40 = vpack.c.bf16 %v6091_v25, %v6088_v32  ;;  %v12025_v5 = vpop.f32.mrb[129].mxu1  ;;  %v6005_v6 = vadd.f32 %v11127_v34, %v6004_v45 }
0x1b2e   : > { %v6007_v28 = vpop.f32.mrb[130].mxu1 }
0x1b2f   : > { %v6008_v4 = vadd.f32 %v11127_v34, %v6007_v28  ;;  %6228 = vrot.lane.b32.xlu0 %v15505_v40, %s16797_s17  ;;  %v12026_v39 = vpop.f32.mrb[131].mxu1  ;;  %v6109_v56 = vsel %vm1431_vm2, %v15505_v40, 0 }
0x1b30   : > { %12040 = vmatpush3.bf16.xpose.msra.mxu1 %v6109_v56 }
0x1b31   : > { %v6103_v8 = vpack.c.bf16 %v6008_v4, %v6005_v6  ;;  %12045 = vmatprep.subr.bf16.mxu1 %v13864_v14 }
0x1b33   : > { %6349 = vrot.lane.b32.xlu0 %v6103_v8, %s16798_s29  ;;  %6226 = vrot.lane.b32.xlu1 %v6103_v8, %s16797_s17 }
0x1b37   : > { %6472 = vrot.lane.b32.xlu0 %v6103_v8, %s16799_s30  ;;  %6351 = vrot.lane.b32.xlu1 %v15505_v40, %s16798_s29 }
0x1b38   : > { %12042 = vmatmul.mubr.msk.bf16.vlgmr.msra.gmra.mrb[132].mxu1 %vm1431_vm2, %v6103_v8 }
0x1b39   : > { %12047 = vmatprep.mubr.msk.bf16.mxu1 %vm13865_vm1, %v13864_v14 }
0x1b3b   : > { %6595 = vrot.lane.b32.xlu0 %v6103_v8, %s16800_s2  ;;  %6474 = vrot.lane.b32.xlu1 %v15505_v40, %s16799_s30 }
0x1b3f   : > { %6718 = vrot.lane.b32.xlu0 %v6103_v8, %s16802_s16  ;;  %6597 = vrot.lane.b32.xlu1 %v15505_v40, %s16800_s2 }
0x1b43   : > { %6841 = vrot.lane.b32.xlu0 %v6103_v8, %s16804_s22  ;;  %6720 = vrot.lane.b32.xlu1 %v15505_v40, %s16802_s16 }
0x1b47   : > { %6964 = vrot.lane.b32.xlu0 %v6103_v8, %s16806_s15  ;;  %6843 = vrot.lane.b32.xlu1 %v15505_v40, %s16804_s22 }
0x1b4b   : > { %6178 = vrot.lane.b32.xlu0 %v15505_v40, %s16796_s13  ;;  %6966 = vrot.lane.b32.xlu1 %v15505_v40, %s16806_s15 }
0x1ba1   : > { %v6229_v9 = vpop.permute.xlu0 %6228 }
0x1ba2   : > { %v6234_v47 = vsel %vm1431_vm2, %v6229_v9, 0 }
0x1ba3   : > { %12052 = vmatpush3.bf16.xpose.msra.mxu0 %v6234_v47 }
0x1ba4   : > { %12063 = vmatprep.subr.bf16.mxu0 %v13864_v14 }
0x1ba5   : > { %v6350_v26 = vpop.permute.xlu0 %6349  ;;  %v6227_v33 = vpop.permute.xlu1 %6226 }
0x1ba9   : > { %v6473_v21 = vpop.permute.xlu0 %6472  ;;  %v6352_v12 = vpop.permute.xlu1 %6351 }
0x1baa   : > { %v6357_v3 = vsel %vm1431_vm2, %v6352_v12, 0  ;;  %12054 = vmatmul.mubr.msk.bf16.vlgmr.msra.gmra.mrb[108].mxu0 %vm1431_vm2, %v6227_v33 }
0x1bab   : > { %12064 = vmatpush3.bf16.xpose.msra.mxu0 %v6357_v3  ;;  %12065 = vmatprep.mubr.msk.bf16.mxu0 %vm13865_vm1, %v13864_v14 }
0x1bac   : > { %12075 = vmatprep.subr.bf16.mxu0 %v13864_v14 }
0x1bad   : > { %v6596_v43 = vpop.permute.xlu0 %6595  ;;  %v6475_v19 = vpop.permute.xlu1 %6474 }
0x1bae   : > { %v6480_v52 = vsel %vm1431_vm2, %v6475_v19, 0 }
0x1bb1   : > { %v6719_v11 = vpop.permute.xlu0 %6718  ;;  %v6598_v30 = vpop.permute.xlu1 %6597 }
0x1bb2   : > { %12066 = vmatmul.mubr.msk.bf16.vlgmr.msra.gmra.mrb[112].mxu0 %vm1431_vm2, %v6350_v26  ;;  %v6603_v48 = vsel %vm1431_vm2, %v6598_v30, 0 }
0x1bb3   : > { %12076 = vmatpush3.bf16.xpose.msra.mxu0 %v6480_v52  ;;  %12077 = vmatprep.mubr.msk.bf16.mxu0 %vm13865_vm1, %v13864_v14 }
0x1bb4   : > { %12087 = vmatprep.subr.bf16.mxu0 %v13864_v14 }
0x1bb5   : > { %v6842_v18 = vpop.permute.xlu0 %6841  ;;  %v6721_v1 = vpop.permute.xlu1 %6720 }
0x1bb6   : > { %v6726_v63 = vsel %vm1431_vm2, %v6721_v1, 0 }
0x1bb9   : > { %v6965_v60 = vpop.permute.xlu0 %6964  ;;  %v6844_v57 = vpop.permute.xlu1 %6843 }
0x1bba   : > { %12078 = vmatmul.mubr.msk.bf16.vlgmr.msra.gmra.mrb[116].mxu0 %vm1431_vm2, %v6473_v21  ;;  %v6849_v35 = vsel %vm1431_vm2, %v6844_v57, 0 }
0x1bbb   : > { %12088 = vmatpush3.bf16.xpose.msra.mxu0 %v6603_v48  ;;  %12089 = vmatprep.mubr.msk.bf16.mxu0 %vm13865_vm1, %v13864_v14 }
0x1bbc   : > { %12099 = vmatprep.subr.bf16.mxu0 %v13864_v14 }
0x1bbd   : > { %v6179_v10 = vpop.permute.xlu0 %6178  ;;  %v6967_v61 = vpop.permute.xlu1 %6966 }
0x1bbe   : > { %12046 = vmatpush3.bf16.msra.mxu1 %v6179_v10  ;;  %v6972_v58 = vsel %vm1431_vm2, %v6967_v61, 0 }
0x1bbf   : > { %12057 = vmatprep.subr.bf16.mxu1 %v13864_v14 }
0x1bc2   : > { %12090 = vmatmul.mubr.msk.bf16.vlgmr.msra.gmra.mrb[120].mxu0 %vm1431_vm2, %v6596_v43 }
0x1bc3   : > { %12100 = vmatpush3.bf16.xpose.msra.mxu0 %v6726_v63  ;;  %12101 = vmatprep.mubr.msk.bf16.mxu0 %vm13865_vm1, %v13864_v14 }
0x1bc4   : > { %12111 = vmatprep.subr.bf16.mxu0 %v13864_v14 }
0x1bca   : > { %12102 = vmatmul.mubr.msk.bf16.vlgmr.msra.gmra.mrb[124].mxu0 %vm1431_vm2, %v6719_v11 }
0x1bcb   : > { %12112 = vmatpush3.bf16.xpose.msra.mxu0 %v6849_v35  ;;  %12113 = vmatprep.mubr.msk.bf16.mxu0 %vm13865_vm1, %v13864_v14 }
0x1bcc   : > { %12123 = vmatprep.subr.bf16.mxu0 %v13864_v14 }
0x1bd2   : > { %12114 = vmatmul.mubr.msk.bf16.vlgmr.msra.gmra.mrb[128].mxu0 %vm1431_vm2, %v6842_v18 }
0x1bd3   : > { %12124 = vmatpush3.bf16.xpose.msra.mxu0 %v6972_v58  ;;  %12125 = vmatprep.mubr.msk.bf16.mxu0 %vm13865_vm1, %v13864_v14 }
0x1bd4   : > { %12135 = vmatprep.subr.bf16.mxu0 %v13864_v14 }
0x1bda   : > { %12126 = vmatmul.mubr.msk.bf16.vlgmr.msra.gmra.mrb[132].mxu0 %vm1431_vm2, %v6965_v60 }
0x1bdb   : > { %12143 = vmatprep.mubr.msk.bf16.mxu0 %vm13865_vm1, %v13864_v14 }
0x1c0b   : > { %v6145_v29 = vpop.f32.mrb[132].mxu1 }
0x1c0c   : > { %v6152_v51 = vmul.f32 0.35355338, %v6145_v29  ;;  %v12043_v27 = vpop.f32.mrb[133].mxu1 }
0x1c0d   : > { %v6148_v38 = vpop.f32.mrb[134].mxu1 }
0x1c0e   : > { %v6153_v22 = vmul.f32 0.35355338, %v6148_v38  ;;  %v12044_v7 = vpop.f32.mrb[135].mxu1  ;;  %v6154_v53 = vsel %vm1481_vm3, %v6152_v51, -inf }
0x1c0f   : > { %6155 = vmax.xlane.f32.xlu1 %v6154_v53 }
0x1c10   : > { %v6157_v44 = vsel %vm1481_vm3, %v6153_v22, -inf }
0x1c11   : > { %6158 = vmax.xlane.f32.xlu0 %v6157_v44 }
0x1c20   : > { %6302 = vrot.lane.b32.xlu1 %v15505_v40, %s16787_s12 }
0x1c7d   : > { %v6270_v50 = vpop.f32.mrb[108].mxu0 }
0x1c7e   : > { %v15576_v49 = vmul.f32 0.35355338, %v6270_v50  ;;  %v12055_v46 = vpop.f32.mrb[109].mxu0 }
0x1c7f   : > { %v6273_v31 = vpop.f32.mrb[110].mxu0 }
0x1c80   : > { %v15578_v24 = vmul.f32 0.35355338, %v6273_v31  ;;  %v12056_v36 = vpop.f32.mrb[111].mxu0  ;;  %v6279_v41 = vsel %vm1481_vm3, %v15576_v49, -inf }
0x1c81   : > { %6280 = vmax.xlane.f32.xlu0 %v6279_v41 }
0x1c82   : > { %v6282_v2 = vsel %vm1481_vm3, %v15578_v24, -inf }
0x1c83   : > { %6283 = vmax.xlane.f32.xlu1 %v6282_v2 }
0x1c85   : > { %v6393_v13 = vpop.f32.mrb[112].mxu0 }
0x1c86   : > { %v15584_v16 = vmul.f32 0.35355338, %v6393_v13  ;;  %v12067_v23 = vpop.f32.mrb[113].mxu0 }
0x1c87   : > { %v6396_v54 = vpop.f32.mrb[114].mxu0 }
0x1c88   : > { %v15586_v42 = vmul.f32 0.35355338, %v6396_v54  ;;  %v12068_v59 = vpop.f32.mrb[115].mxu0  ;;  %v6402_v32 = vsel %vm1481_vm3, %v15584_v16, -inf }
0x1c89   : > { %6403 = vmax.xlane.f32.xlu0 %v6402_v32 }
0x1c8a   : > { %v6405_v25 = vsel %vm1481_vm3, %v15586_v42, -inf }
0x1c8b   : > { %6406 = vmax.xlane.f32.xlu1 %v6405_v25 }
0x1c8d   : > { %v6516_v62 = vpop.f32.mrb[116].mxu0 }
0x1c8e   : > { %v15592_v34 = vmul.f32 0.35355338, %v6516_v62  ;;  %v12079_v45 = vpop.f32.mrb[117].mxu0 }
0x1c8f   : > { %v6519_v5 = vpop.f32.mrb[118].mxu0 }
0x1c90   : > { %v15594_v28 = vmul.f32 0.35355338, %v6519_v5  ;;  %v12080_v6 = vpop.f32.mrb[119].mxu0  ;;  %v6525_v4 = vsel %vm1481_vm3, %v15592_v34, -inf }
0x1c91   : > { %6526 = vmax.xlane.f32.xlu0 %v6525_v4 }
0x1c92   : > { %v6528_v39 = vsel %vm1481_vm3, %v15594_v28, -inf }
0x1c93   : > { %6529 = vmax.xlane.f32.xlu1 %v6528_v39 }
0x1c95   : > { %v6639_v56 = vpop.f32.mrb[120].mxu0 }
0x1c96   : > { %v15600_v8 = vmul.f32 0.35355338, %v6639_v56  ;;  %v12091_v9 = vpop.f32.mrb[121].mxu0 }
0x1c97   : > { %v6642_v47 = vpop.f32.mrb[122].mxu0 }
0x1c98   : > { %v15602_v26 = vmul.f32 0.35355338, %v6642_v47  ;;  %v12092_v33 = vpop.f32.mrb[123].mxu0  ;;  %v6648_v21 = vsel %vm1481_vm3, %v15600_v8, -inf }
0x1c99   : > { %6649 = vmax.xlane.f32.xlu0 %v6648_v21 }
0x1c9a   : > { %v6651_v12 = vsel %vm1481_vm3, %v15602_v26, -inf }
0x1c9b   : > { %6652 = vmax.xlane.f32.xlu1 %v6651_v12 }
0x1c9c   : > { %v6156_v3 = vpop.xlane.xlu1 %6155 }
0x1c9d   : > { %v6160_v43 = vsub.f32 %v6152_v51, %v6156_v3  ;;  %v6762_v19 = vpop.f32.mrb[124].mxu0 }
0x1c9e   : > { %v15608_v11 = vmul.f32 0.35355338, %v6762_v19  ;;  %v6159_v52 = vpop.xlane.xlu0 %6158  ;;  %v12103_v18 = vpop.f32.mrb[125].mxu0 }
0x1c9f   : > { %v6162_v30 = vmul.f32 1.442695, %v6160_v43  ;;  %v6161_v60 = vsub.f32 %v6153_v22, %v6159_v52  ;;  %v6765_v48 = vpop.f32.mrb[126].mxu0 }
0x1ca0   : > { %v15610_v10 = vmul.f32 0.35355338, %v6765_v48  ;;  %v12104_v1 = vpop.f32.mrb[127].mxu0  ;;  %v6771_v63 = vsel %vm1481_vm3, %v15608_v11, -inf  ;;  %v15644_v32 = vpop.permute.xlu1 %6302 }
0x1ca1   : > { %13215 = vpow2.f32 %v6162_v30  ;;  %v6164_v57 = vmul.f32 1.442695, %v6161_v60  ;;  %6772 = vmax.xlane.f32.xlu0 %v6771_v63 }
0x1ca2   : > { %v6774_v35 = vsel %vm1481_vm3, %v15610_v10, -inf }
0x1ca3   : > { %13217 = vpow2.f32 %v6164_v57  ;;  %6775 = vmax.xlane.f32.xlu1 %v6774_v35 }
0x1ca5   : > { %v6885_v61 = vpop.f32.mrb[128].mxu0 }
0x1ca6   : > { %v15616_v58 = vmul.f32 0.35355338, %v6885_v61  ;;  %v12115_v29 = vpop.f32.mrb[129].mxu0 }
0x1ca7   : > { %v6888_v51 = vpop.f32.mrb[130].mxu0 }
0x1ca8   : > { %v15618_v27 = vmul.f32 0.35355338, %v6888_v51  ;;  %v12116_v38 = vpop.f32.mrb[131].mxu0  ;;  %v6894_v22 = vsel %vm1481_vm3, %v15616_v58, -inf }
0x1ca9   : > { %6895 = vmax.xlane.f32.xlu0 %v6894_v22 }
0x1caa   : > { %v6897_v7 = vsel %vm1481_vm3, %v15618_v27, -inf }
0x1cab   : > { %v15624_v53 = vpop.eup %13215  ;;  %6898 = vmax.xlane.f32.xlu1 %v6897_v7 }
0x1cac   : > { %v6166_v44 = vsel %vm1481_vm3, %v15624_v53, 0.0 }
0x1cad   : > { %v15628_v50 = vpop.eup %13217  ;;  %v7008_v46 = vpop.f32.mrb[132].mxu0  ;;  %6167 = vadd.xlane.f32.xlu0 %v6166_v44 }
0x1cae   : > { %v15630_v31 = vmul.f32 0.35355338, %v7008_v46  ;;  %v12127_v36 = vpop.f32.mrb[133].mxu0  ;;  %v6169_v41 = vsel %vm1481_vm3, %v15628_v50, 0.0 }
0x1caf   : > { %v7011_v2 = vpop.f32.mrb[134].mxu0  ;;  %6170 = vadd.xlane.f32.xlu1 %v6169_v41 }
0x1cb0   : > { %v15634_v13 = vmul.f32 0.35355338, %v7011_v2  ;;  %v12128_v23 = vpop.f32.mrb[135].mxu0  ;;  %v7017_v54 = vsel %vm1481_vm3, %v15630_v31, -inf }
0x1cb1   : > { %7018 = vmax.xlane.f32.xlu0 %v7017_v54 }
0x1cb2   : > { %v7020_v59 = vsel %vm1481_vm3, %v15634_v13, -inf }
0x1cb3   : > { %7021 = vmax.xlane.f32.xlu1 %v7020_v59 }
0x1cc4   : > { %6548 = vrot.lane.b32.xlu1 %v15505_v40, %s16785_s28 }
0x1cc7   : > { %6425 = vrot.lane.b32.xlu0 %v15505_v40, %s16786_s11 }
0x1d0e   : > { %v6281_v25 = vpop.xlane.xlu0 %6280 }
0x1d0f   : > { %v6285_v62 = vsub.f32 %v15576_v49, %v6281_v25 }
0x1d10   : > { %v6284_v45 = vpop.xlane.xlu1 %6283 }
0x1d11   : > { %v6287_v5 = vmul.f32 1.442695, %v6285_v62  ;;  %v6286_v6 = vsub.f32 %v15578_v24, %v6284_v45 }
0x1d13   : > { %13219 = vpow2.f32 %v6287_v5  ;;  %v6289_v4 = vmul.f32 1.442695, %v6286_v6 }
0x1d15   : > { %13221 = vpow2.f32 %v6289_v4 }
0x1d16   : > { %v6404_v39 = vpop.xlane.xlu0 %6403 }
0x1d17   : > { %v6408_v56 = vsub.f32 %v15584_v16, %v6404_v39 }
0x1d18   : > { %v6407_v9 = vpop.xlane.xlu1 %6406 }
0x1d19   : > { %v6410_v47 = vmul.f32 1.442695, %v6408_v56  ;;  %v6409_v33 = vsub.f32 %v15586_v42, %v6407_v9 }
0x1d1b   : > { %13223 = vpow2.f32 %v6410_v47  ;;  %v6412_v21 = vmul.f32 1.442695, %v6409_v33 }
0x1d1d   : > { %v15650_v12 = vpop.eup %13219  ;;  %13225 = vpow2.f32 %v6412_v21 }
0x1d1e   : > { %v6527_v49 = vpop.xlane.xlu0 %6526  ;;  %v6291_v3 = vsel %vm1481_vm3, %v15650_v12, 0.0 }
0x1d1f   : > { %v15654_v24 = vpop.eup %13221  ;;  %v6531_v43 = vsub.f32 %v15592_v34, %v6527_v49  ;;  %6292 = vadd.xlane.f32.xlu0 %v6291_v3 }
0x1d20   : > { %v6530_v19 = vpop.xlane.xlu1 %6529  ;;  %v6294_v16 = vsel %vm1481_vm3, %v15654_v24, 0.0 }
0x1d21   : > { %v6533_v52 = vmul.f32 1.442695, %v6531_v43  ;;  %v6532_v42 = vsub.f32 %v15594_v28, %v6530_v19  ;;  %6295 = vadd.xlane.f32.xlu1 %v6294_v16 }
0x1d23   : > { %13227 = vpow2.f32 %v6533_v52  ;;  %v6535_v18 = vmul.f32 1.442695, %v6532_v42 }
0x1d25   : > { %v15660_v30 = vpop.eup %13223  ;;  %13229 = vpow2.f32 %v6535_v18 }
0x1d26   : > { %v6650_v60 = vpop.xlane.xlu0 %6649  ;;  %v6414_v48 = vsel %vm1481_vm3, %v15660_v30, 0.0 }
0x1d27   : > { %v15664_v1 = vpop.eup %13225  ;;  %v6654_v34 = vsub.f32 %v15600_v8, %v6650_v60  ;;  %6415 = vadd.xlane.f32.xlu0 %v6414_v48 }
0x1d28   : > { %v6653_v63 = vpop.xlane.xlu1 %6652  ;;  %v6417_v57 = vsel %vm1481_vm3, %v15664_v1, 0.0 }
0x1d29   : > { %v6656_v28 = vmul.f32 1.442695, %v6654_v34  ;;  %v6655_v35 = vsub.f32 %v15602_v26, %v6653_v63  ;;  %6418 = vadd.xlane.f32.xlu1 %v6417_v57 }
0x1d2b   : > { %13231 = vpow2.f32 %v6656_v28  ;;  %v6658_v61 = vmul.f32 1.442695, %v6655_v35 }
0x1d2d   : > { %v15670_v29 = vpop.eup %13227  ;;  %13233 = vpow2.f32 %v6658_v61 }
0x1d2e   : > { %v6537_v51 = vsel %vm1481_vm3, %v15670_v29, 0.0  ;;  %v6773_v26 = vpop.xlane.xlu0 %6772 }
0x1d2f   : > { %v15674_v38 = vpop.eup %13229  ;;  %6538 = vadd.xlane.f32.xlu0 %v6537_v51  ;;  %v6777_v19 = vsub.f32 %v15608_v11, %v6773_v26 }
0x1d30   : > { %v6776_v8 = vpop.xlane.xlu1 %6775  ;;  %v6540_v22 = vsel %vm1481_vm3, %v15674_v38, 0.0 }
0x1d31   : > { %v6778_v7 = vsub.f32 %v15610_v10, %v6776_v8  ;;  %6541 = vadd.xlane.f32.xlu1 %v6540_v22 }
0x1d33   : > { %v6781_v44 = vmul.f32 1.442695, %v6778_v7 }
0x1d35   : > { %v15679_v46 = vpop.eup %13231  ;;  %13235 = vpow2.f32 %v6781_v44 }
0x1d36   : > { %v6896_v36 = vpop.xlane.xlu0 %6895  ;;  %v6660_v41 = vsel %vm1481_vm3, %v15679_v46, 0.0 }
0x1d37   : > { %v15683_v2 = vpop.eup %13233  ;;  %v6900_v23 = vsub.f32 %v15616_v58, %v6896_v36  ;;  %6661 = vadd.xlane.f32.xlu1 %v6660_v41 }
0x1d38   : > { %v6899_v54 = vpop.xlane.xlu1 %6898  ;;  %v6663_v62 = vsel %vm1481_vm3, %v15683_v2, 0.0 }
0x1d39   : > { %v6902_v59 = vmul.f32 1.442695, %v6900_v23  ;;  %v6901_v25 = vsub.f32 %v15618_v27, %v6899_v54 }
0x1d3a   : > { %v6168_v10 = vpop.xlane.xlu0 %6167 }
0x1d3b   : > { %13237 = vpow2.f32 %v6902_v59  ;;  %v6904_v45 = vmul.f32 1.442695, %v6901_v25  ;;  %6664 = vadd.xlane.f32.xlu1 %v6663_v62 }
0x1d3c   : > { %13239 = vrcp.f32 %v6168_v10  ;;  %v6171_v5 = vpop.xlane.xlu1 %6170 }
0x1d3d   : > { %13241 = vpow2.f32 %v6904_v45 }
0x1d3e   : > { %13243 = vrcp.f32 %v6171_v5  ;;  %v7019_v52 = vpop.xlane.xlu0 %7018 }
0x1d3f   : > { %v15689_v6 = vpop.eup %13235  ;;  %v7023_v42 = vsub.f32 %v15630_v31, %v7019_v52 }
0x1d40   : > { %v7022_v4 = vpop.xlane.xlu1 %7021  ;;  %v6786_v58 = vsel %vm1481_vm3, %v15689_v6, 0.0 }
0x1d41   : > { %v7024_v39 = vsub.f32 %v15634_v13, %v7022_v4  ;;  %6787 = vadd.xlane.f32.xlu1 %v6786_v58  ;;  %v7025_v18 = vmul.f32 1.442695, %v7023_v42 }
0x1d42   : > { %v6426_v31 = vpop.permute.xlu0 %6425 }
0x1d43   : > { %v7027_v27 = vmul.f32 1.442695, %v7024_v39 }
0x1d44   : > { %v6549_v34 = vpop.permute.xlu1 %6548 }
0x1d45   : > { %v15694_v56 = vpop.eup %13237  ;;  %13245 = vpow2.f32 %v7027_v27  ;;  %6671 = vrot.lane.b32.xlu0 %v15505_v40, %s16784_s14 }
0x1d46   : > { %v13240_v9 = vpop.eup %13239  ;;  %v6906_v47 = vsel %vm1481_vm3, %v15694_v56, 0.0 }
0x1d47   : > { %v15700_v33 = vpop.eup %13241  ;;  %6907 = vadd.xlane.f32.xlu1 %v6906_v47  ;;  %v6174_v49 = vmul.f32 %v13240_v9, %v15624_v53 }
0x1d48   : > { %v13244_v21 = vpop.eup %13243  ;;  %v6909_v3 = vsel %vm1481_vm3, %v15700_v33, 0.0 }
0x1d49   : > { %v6175_v13 = vmul.f32 %v13244_v21, %v15628_v50  ;;  %v6779_v50 = vmul.f32 1.442695, %v6777_v19 }
0x1d4b   : > { %6910 = vadd.xlane.f32.xlu1 %v6909_v3  ;;  %v6176_v43 = vpack.c.bf16 %v6175_v13, %v6174_v49  ;;  %13247 = vpow2.f32 %v6779_v50 }
0x1d4c   : > { %13249 = vpow2.f32 %v7025_v18 }
0x1d4d   : > { %12048 = vmatmul.mubr.msk.bf16.vlgmr.msra.gmra.mrb[136].mxu1 %vm1481_vm3, %v6176_v43 }
0x1d4e   : > { %12058 = vmatpush3.bf16.msra.mxu1 %v15644_v32  ;;  %12059 = vmatprep.mubr.msk.bf16.mxu1 %vm13865_vm1, %v13864_v14 }
0x1d4f   : > { %v15711_v16 = vpop.eup %13245  ;;  %12069 = vmatprep.subr.bf16.mxu1 %v13864_v14 }
0x1d50   : > { %v7032_v53 = vsel %vm1481_vm3, %v15711_v16, 0.0 }
0x1d51   : > { %7033 = vadd.xlane.f32.xlu1 %v7032_v53 }
0x1d55   : > { %v15717_v11 = vpop.eup %13247 }
0x1d56   : > { %v6783_v32 = vsel %vm1481_vm3, %v15717_v11, 0.0  ;;  %v15723_v60 = vpop.eup %13249 }
0x1d57   : > { %v7029_v48 = vsel %vm1481_vm3, %v15723_v60, 0.0 }
0x1d62   : > { %6794 = vrot.lane.b32.xlu1 %v15505_v40, %s16801_s18 }
0x1d64   : > { %6784 = vadd.xlane.f32.xlu0 %v6783_v32 }
0x1d68   : > { %7030 = vadd.xlane.f32.xlu0 %v7029_v48 }
0x1d7e   : > { %6917 = vrot.lane.b32.xlu0 %v15505_v40, %s16803_s7 }
0x1d82   : > { %7040 = vrot.lane.b32.xlu0 %v15505_v40, %s16805_s19 }
0x1dac   : > { %v6293_v63 = vpop.xlane.xlu0 %6292 }
0x1dad   : > { %13251 = vrcp.f32 %v6293_v63 }
0x1dae   : > { %v6296_v57 = vpop.xlane.xlu1 %6295 }
0x1daf   : > { %13253 = vrcp.f32 %v6296_v57 }
0x1db4   : > { %v6416_v28 = vpop.xlane.xlu0 %6415 }
0x1db5   : > { %13255 = vrcp.f32 %v6416_v28 }
0x1db6   : > { %v6419_v35 = vpop.xlane.xlu1 %6418 }
0x1db7   : > { %v13252_v61 = vpop.eup %13251  ;;  %13257 = vrcp.f32 %v6419_v35 }
0x1db8   : > { %v6299_v8 = vmul.f32 %v13252_v61, %v15650_v12 }
0x1db9   : > { %v13254_v51 = vpop.eup %13253 }
0x1dba   : > { %v6300_v22 = vmul.f32 %v13254_v51, %v15654_v24 }
0x1dbc   : > { %v6539_v7 = vpop.xlane.xlu0 %6538  ;;  %v6301_v26 = vpack.c.bf16 %v6300_v22, %v6299_v8 }
0x1dbd   : > { %13259 = vrcp.f32 %v6539_v7 }
0x1dbe   : > { %v6542_v40 = vpop.xlane.xlu1 %6541  ;;  %12060 = vmatmul.mubr.msk.bf16.vlgmr.msra.gmra.mrb[140].mxu1 %vm1481_vm3, %v6301_v26 }
0x1dbf   : > { %v13256_v44 = vpop.eup %13255  ;;  %13261 = vrcp.f32 %v6542_v40  ;;  %12070 = vmatpush3.bf16.msra.mxu1 %v6426_v31  ;;  %12071 = vmatprep.mubr.msk.bf16.mxu1 %vm13865_vm1, %v13864_v14 }
0x1dc0   : > { %12081 = vmatprep.subr.bf16.mxu1 %v13864_v14  ;;  %v6422_v41 = vmul.f32 %v13256_v44, %v15660_v30  ;;  %v6672_v62 = vpop.permute.xlu0 %6671 }
0x1dc1   : > { %v13258_v36 = vpop.eup %13257 }
0x1dc2   : > { %v6423_v12 = vmul.f32 %v13258_v36, %v15664_v1 }
0x1dc4   : > { %v6662_v24 = vpop.xlane.xlu1 %6661  ;;  %v6424_v23 = vpack.c.bf16 %v6423_v12, %v6422_v41 }
0x1dc5   : > { %13263 = vrcp.f32 %v6662_v24 }
0x1dc6   : > { %12072 = vmatmul.mubr.msk.bf16.vlgmr.msra.gmra.mrb[144].mxu1 %vm1481_vm3, %v6424_v23 }
0x1dc7   : > { %v13260_v54 = vpop.eup %13259  ;;  %12082 = vmatpush3.bf16.msra.mxu1 %v6549_v34  ;;  %12083 = vmatprep.mubr.msk.bf16.mxu1 %vm13865_vm1, %v13864_v14 }
0x1dc8   : > { %v6665_v59 = vpop.xlane.xlu1 %6664  ;;  %12093 = vmatprep.subr.bf16.mxu1 %v13864_v14  ;;  %v6545_v10 = vmul.f32 %v13260_v54, %v15670_v29 }
0x1dc9   : > { %v13262_v25 = vpop.eup %13261  ;;  %13265 = vrcp.f32 %v6665_v59 }
0x1dca   : > { %v6546_v30 = vmul.f32 %v13262_v25, %v15674_v38 }
0x1dcc   : > { %v6547_v1 = vpack.c.bf16 %v6546_v30, %v6545_v10  ;;  %v12911_v10 = vld [vmem:[#allocation13] sm:$0xff]  }
0x1dcd   : > { %12136 = vmatpush3.bf16.msra.mxu0 %v12911_v10 }
0x1dce   : > { %12084 = vmatmul.mubr.msk.bf16.vlgmr.msra.gmra.mrb[148].mxu1 %vm1481_vm3, %v6547_v1  ;;  %v6788_v45 = vpop.xlane.xlu1 %6787  ;;  %12137 = vmatprep.subr.bf16.mxu0 %v13864_v14 }
0x1dcf   : > { %12094 = vmatpush3.bf16.msra.mxu1 %v6672_v62  ;;  %12095 = vmatprep.mubr.msk.bf16.mxu1 %vm13865_vm1, %v13864_v14  ;;  %v13264_v5 = vpop.eup %13263  ;;  %13267 = vrcp.f32 %v6788_v45  ;;  %v12912_v45 = vld [vmem:[#allocation13 + $0x8] sm:$0xff]  }
0x1dd0   : > { %12105 = vmatprep.subr.bf16.mxu1 %v13864_v14  ;;  %v6668_v58 = vmul.f32 %v13264_v5, %v15679_v46 }
0x1dd1   : > { %12138 = vmatpush3.bf16.msra.mxu0 %v12912_v45 }
0x1dd2   : > { %12139 = vmatprep.subr.bf16.mxu0 %v13864_v14 }
0x1dd3   : > { %v13266_v4 = vpop.eup %13265 }
0x1dd4   : > { %v6669_v39 = vmul.f32 %v13266_v4, %v15683_v2  ;;  %v6908_v29 = vpop.xlane.xlu1 %6907 }
0x1dd6   : > { %v6670_v27 = vpack.c.bf16 %v6669_v39, %v6668_v58  ;;  %v12913_v58 = vld [vmem:[#allocation13 + $0x10] sm:$0xff]  }
0x1dd7   : > { %12140 = vmatpush3.bf16.msra.mxu0 %v12913_v58 }
0x1dd8   : > { %12096 = vmatmul.mubr.msk.bf16.vlgmr.msra.gmra.mrb[152].mxu1 %vm1481_vm3, %v6670_v27  ;;  %v6911_v38 = vpop.xlane.xlu1 %6910  ;;  %12141 = vmatprep.subr.bf16.mxu0 %v13864_v14 }
0x1dd9   : > { %12107 = vmatprep.mubr.msk.bf16.mxu1 %vm13865_vm1, %v13864_v14  ;;  %v13268_v46 = vpop.eup %13267 }
0x1dda   : > { %v6792_v13 = vmul.f32 %v13268_v46, %v15689_v6 }
0x1dde   : > { %v7034_v9 = vpop.xlane.xlu1 %7033 }
0x1de2   : > { %v6795_v47 = vpop.permute.xlu1 %6794 }
0x1de3   : > { %12106 = vmatpush3.bf16.msra.mxu1 %v6795_v47 }
0x1de4   : > { %12117 = vmatprep.subr.bf16.mxu1 %v13864_v14 }
0x1df1   : > { %v6785_v21 = vpop.xlane.xlu0 %6784 }
0x1df2   : > { %13269 = vrcp.f32 %v6785_v21 }
0x1df3   : > { %13271 = vrcp.f32 %v6911_v38  ;;  %v12914_v38 = vld [vmem:[#allocation13 + $0x18] sm:$0xff]  }
0x1df4   : > { %13273 = vrcp.f32 %v6908_v29  ;;  %12142 = vmatpush3.bf16.msra.mxu0 %v12914_v38 }
0x1df5   : > { %v7031_v2 = vpop.xlane.xlu0 %7030 }
0x1df6   : > { %13275 = vrcp.f32 %v7031_v2 }
0x1df7   : > { %13277 = vrcp.f32 %v7034_v9 }
0x1df9   : > { %v6918_v52 = vpop.permute.xlu0 %6917 }
0x1dfc   : > { %v13270_v49 = vpop.eup %13269 }
0x1dfd   : > { %v6791_v3 = vmul.f32 %v13270_v49, %v15717_v11  ;;  %v13272_v19 = vpop.eup %13271  ;;  %v7041_v11 = vpop.permute.xlu0 %7040 }
0x1dfe   : > { %v13274_v53 = vpop.eup %13273  ;;  %v6915_v50 = vmul.f32 %v13272_v19, %v15700_v33 }
0x1dff   : > { %v6793_v43 = vpack.c.bf16 %v6792_v13, %v6791_v3  ;;  %v6914_v6 = vmul.f32 %v13274_v53, %v15694_v56 }
0x1e00   : > { %v13276_v18 = vpop.eup %13275 }
0x1e01   : > { %12108 = vmatmul.mubr.msk.bf16.vlgmr.msra.gmra.mrb[156].mxu1 %vm1481_vm3, %v6793_v43  ;;  %v6916_v42 = vpack.c.bf16 %v6915_v50, %v6914_v6  ;;  %v13278_v32 = vpop.eup %13277  ;;  %v7037_v48 = vmul.f32 %v13276_v18, %v15723_v60 }
0x1e02   : > { %12118 = vmatpush3.bf16.msra.mxu1 %v6918_v52  ;;  %12119 = vmatprep.mubr.msk.bf16.mxu1 %vm13865_vm1, %v13864_v14  ;;  %v7038_v31 = vmul.f32 %v13278_v32, %v15711_v16 }
0x1e03   : > { %12129 = vmatprep.subr.bf16.mxu1 %v13864_v14 }
0x1e04   : > { %v7039_v34 = vpack.c.bf16 %v7038_v31, %v7037_v48 }
0x1e09   : > { %12120 = vmatmul.mubr.msk.bf16.vlgmr.msra.gmra.mrb[160].mxu1 %vm1481_vm3, %v6916_v42 }
0x1e0a   : > { %12130 = vmatpush3.bf16.msra.mxu1 %v7041_v11  ;;  %12131 = vmatprep.mubr.msk.bf16.mxu1 %vm13865_vm1, %v13864_v14 }
0x1e11   : > { %12132 = vmatmul.mubr.msk.bf16.vlgmr.msra.gmra.mrb[164].mxu1 %vm1481_vm3, %v7039_v34 }
0x1e12   : > { %7407 = vmatprep.mubr.bf16.mxu1 %v13863_v0 }
0x1e20   : > { %v15770_v56 = vpop.f32.mrb[136].mxu1 }
0x1e21   : > { %v12049_v33 = vpop.f32.mrb[137].mxu1 }
0x1e22   : > { %v15772_v63 = vpop.f32.mrb[138].mxu1 }
0x1e23   : > { %v12050_v57 = vpop.f32.mrb[139].mxu1 }
0x1e91   : > { %v6342_v28 = vpop.f32.mrb[140].mxu1 }
0x1e92   : > { %v12061_v35 = vpop.f32.mrb[141].mxu1 }
0x1e93   : > { %v6345_v61 = vpop.f32.mrb[142].mxu1 }
0x1e94   : > { %v12694_v51 = vpack.i.bf16 %v6345_v61, %v6342_v28  ;;  %v12062_v8 = vpop.f32.mrb[143].mxu1 }
0x1e96   : > { %12695 = vrot.lane.b32.xlu0 %v12694_v51, %s16805_s19 }
0x1e99   : > { %v6465_v60 = vpop.f32.mrb[144].mxu1 }
0x1e9a   : > { %v12073_v16 = vpop.f32.mrb[145].mxu1 }
0x1e9b   : > { %v6468_v22 = vpop.f32.mrb[146].mxu1 }
0x1e9c   : > { %v12699_v7 = vpack.i.bf16 %v6468_v22, %v6465_v60  ;;  %v12074_v26 = vpop.f32.mrb[147].mxu1 }
0x1e9e   : > { %12700 = vrot.lane.b32.xlu0 %v12699_v7, %s16803_s7 }
0x1ea1   : > { %v6588_v40 = vpop.f32.mrb[148].mxu1 }
0x1ea2   : > { %v12085_v44 = vpop.f32.mrb[149].mxu1 }
0x1ea3   : > { %v6591_v36 = vpop.f32.mrb[150].mxu1 }
0x1ea4   : > { %v12704_v41 = vpack.i.bf16 %v6591_v36, %v6588_v40  ;;  %v12086_v12 = vpop.f32.mrb[151].mxu1 }
0x1ea6   : > { %12705 = vrot.lane.b32.xlu1 %v12704_v41, %s16801_s18 }
0x1eab   : > { %v6711_v24 = vpop.f32.mrb[152].mxu1 }
0x1eac   : > { %v12097_v23 = vpop.f32.mrb[153].mxu1 }
0x1ead   : > { %v6714_v54 = vpop.f32.mrb[154].mxu1 }
0x1eae   : > { %v12709_v59 = vpack.i.bf16 %v6714_v54, %v6711_v24  ;;  %v12098_v25 = vpop.f32.mrb[155].mxu1 }
0x1eb0   : > { %12710 = vrot.lane.b32.xlu0 %v12709_v59, %s16784_s14  ;;  %v11155_v59 = vld [vmem:[#allocation14] ss:$0 sm:$0xff] }
0x1ed4   : > { %v6834_v30 = vpop.f32.mrb[156].mxu1 }
0x1ed5   : > { %v12109_v1 = vpop.f32.mrb[157].mxu1 }
0x1ed6   : > { %v6837_v62 = vpop.f32.mrb[158].mxu1 }
0x1ed7   : > { %v12714_v5 = vpack.i.bf16 %v6837_v62, %v6834_v30  ;;  %v12110_v4 = vpop.f32.mrb[159].mxu1 }
0x1ed9   : > { %12715 = vrot.lane.b32.xlu1 %v12714_v5, %s16785_s28 }
0x1edc   : > { %v6957_v39 = vpop.f32.mrb[160].mxu1 }
0x1edd   : > { %v12121_v29 = vpop.f32.mrb[161].mxu1 }
0x1ede   : > { %v6960_v27 = vpop.f32.mrb[162].mxu1 }
0x1edf   : > { %v12719_v9 = vpack.i.bf16 %v6960_v27, %v6957_v39  ;;  %v12122_v47 = vpop.f32.mrb[163].mxu1 }
0x1ee1   : > { %12720 = vrot.lane.b32.xlu0 %v12719_v9, %s16786_s11 }
0x1ee4   : > { %v7080_v21 = vpop.f32.mrb[164].mxu1 }
0x1ee5   : > { %v12133_v46 = vpop.f32.mrb[165].mxu1 }
0x1ee6   : > { %v7083_v2 = vpop.f32.mrb[166].mxu1 }
0x1ee7   : > { %v12724_v49 = vpack.i.bf16 %v7083_v2, %v7080_v21  ;;  %v12134_v13 = vpop.f32.mrb[167].mxu1 }
0x1ee8   : > { %v12915_v13 = vld [vmem:[%s16815_s24] ss:$8 sps:$4 sm:$0xff]  }
0x1ee9   : > { %12725 = vrot.lane.b32.xlu1 %v12724_v49, %s16787_s12  ;;  %v12917_v49 = vld [vmem:[%s16815_s24 + $0x4] ss:$8 sps:$4 sm:$0xff]  }
0x1eea   : > { %7375 = vmatprep.subr.bf16.mxu1 %v12917_v49  ;;  %v11172_v49 = vld [vmem:[#allocation17] ss:$0 sm:$0xff] }
0x1eeb   : > { %7376 = vmatpush1.bf16.msra.mxu1 %v12915_v13 }
0x1f08   : > { %v12696_v3 = vpop.permute.xlu0 %12695 }
0x1f09   : > { %v12698_v53 = vunpack.i.h.bf16 %v12696_v3  ;;  %v12697_v50 = vunpack.i.l.bf16 %v12696_v3  ;;  %v12920_v3 = vld [vmem:[%s16815_s24 + $0x14] ss:$8 sps:$4 sm:$0xff]  }
0x1f0a   : > { %7377 = vmatprep.subr.bf16.mxu1 %v12920_v3 }
0x1f0b   : > { %v7144_v33 = vsel %vm1431_vm2, %v15772_v63, %v12698_v53  ;;  %v7143_v57 = vsel %vm1431_vm2, %v15770_v56, %v12697_v50  ;;  %v12926_v53 = vld [vmem:[%s16815_s24 + $0x34] ss:$8 sps:$4 sm:$0xff]   ;;  %v12924_v50 = vld [vmem:[%s16815_s24 + $0x30] ss:$8 sps:$4 sm:$0xff]  }
0x1f10   : > { %v12701_v43 = vpop.permute.xlu0 %12700 }
0x1f11   : > { %v12703_v6 = vunpack.i.h.bf16 %v12701_v43  ;;  %v12702_v42 = vunpack.i.l.bf16 %v12701_v43  ;;  %v12918_v43 = vld [vmem:[%s16815_s24 + $0x10] ss:$8 sps:$4 sm:$0xff]  }
0x1f12   : > { %7378 = vmatpush1.bf16.msra.mxu1 %v12918_v43 }
0x1f13   : > { %v7146_v61 = vsel %vm1481_vm3, %v7144_v33, %v12703_v6  ;;  %v7145_v51 = vsel %vm1481_vm3, %v7143_v57, %v12702_v42  ;;  %v12927_v6 = vld [vmem:[%s16816_s8 + $0x40] sm:$0xff]  }
0x1f14   : > { %v12928_v42 = vld [vmem:[%s16816_s8] sm:$0xff]   ;;  %11563 = vmatprep.subr.bf16.mxu0 %v12927_v6 }
0x1f15   : > { %v12935_v33 = vld [vmem:[%s16816_s8 + $0x60] sm:$0xff]  }
0x1f16   : > { %v12936_v57 = vld [vmem:[%s16816_s8 + $0x20] sm:$0xff]  }
0x1f18   : > { %v12706_v19 = vpop.permute.xlu1 %12705 }
0x1f19   : > { %v12708_v11 = vunpack.i.h.bf16 %v12706_v19  ;;  %v12707_v32 = vunpack.i.l.bf16 %v12706_v19  ;;  %v12923_v19 = vld [vmem:[%s16815_s24 + $0x24] ss:$8 sps:$4 sm:$0xff]  }
0x1f1a   : > { %7379 = vmatprep.subr.bf16.mxu1 %v12923_v19 }
0x1f1b   : > { %v7148_v16 = vsel %vm2471_vm4, %v7146_v61, %v12708_v11  ;;  %v7147_v22 = vsel %vm2471_vm4, %v7145_v51, %v12707_v32  ;;  %v12930_v11 = vld [vmem:[%s16816_s8 + $0x8] sm:$0xff]   ;;  %v12931_v32 = vld [vmem:[%s16816_s8 + $0x50] sm:$0xff]  }
0x1f22   : > { %v12711_v52 = vpop.permute.xlu0 %12710 }
0x1f23   : > { %v12713_v31 = vunpack.i.h.bf16 %v12711_v52  ;;  %v12712_v34 = vunpack.i.l.bf16 %v12711_v52  ;;  %v12921_v52 = vld [vmem:[%s16815_s24 + $0x20] ss:$8 sps:$4 sm:$0xff]  }
0x1f24   : > { %7380 = vmatpush1.bf16.msra.mxu1 %v12921_v52 }
0x1f25   : > { %v7150_v7 = vsel %vm2474_vm5, %v7148_v16, %v12713_v31  ;;  %v7149_v26 = vsel %vm2474_vm5, %v7147_v22, %v12712_v34  ;;  %7381 = vmatprep.subr.bf16.mxu1 %v12926_v53  ;;  %v12933_v31 = vld [vmem:[%s16816_s8 + $0x58] sm:$0xff]  }
0x1f26   : > { %v12934_v34 = vld [vmem:[%s16816_s8 + $0x18] sm:$0xff]  }
0x1f28   : > { %7382 = vmatpush1.bf16.msra.mxu1 %v12924_v50 }
0x1f4b   : > { %v12716_v18 = vpop.permute.xlu1 %12715 }
0x1f4c   : > { %v12718_v28 = vunpack.i.h.bf16 %v12716_v18  ;;  %v12717_v35 = vunpack.i.l.bf16 %v12716_v18  ;;  %v12929_v18 = vld [vmem:[%s16816_s8 + $0x48] sm:$0xff]  }
0x1f4e   : > { %v7152_v40 = vsel %vm2477_vm6, %v7150_v7, %v12718_v28  ;;  %v7151_v56 = vsel %vm2477_vm6, %v7149_v26, %v12717_v35  ;;  %v12937_v28 = vld [vmem:[%s16816_s8 + $0x68] sm:$0xff]   ;;  %v11161_v26 = vld [vmem:[%s16817_s20] ss:$0 sm:$0xff] }
0x1f53   : > { %v12721_v48 = vpop.permute.xlu0 %12720 }
0x1f54   : > { %v12723_v8 = vunpack.i.h.bf16 %v12721_v48  ;;  %v12722_v60 = vunpack.i.l.bf16 %v12721_v48  ;;  %v12932_v48 = vld [vmem:[%s16816_s8 + $0x10] sm:$0xff]  }
0x1f56   : > { %v7154_v41 = vsel %vm2480_vm7, %v7152_v40, %v12723_v8  ;;  %v7153_v12 = vsel %vm2480_vm7, %v7151_v56, %v12722_v60 }
0x1f5b   : > { %v12726_v63 = vpop.permute.xlu1 %12725 }
0x1f5c   : > { %v12728_v44 = vunpack.i.h.bf16 %v12726_v63  ;;  %v12727_v36 = vunpack.i.l.bf16 %v12726_v63 }
0x1f5e   : > { %v7156_v24 = vsel %vm2483_vm8, %v7154_v41, %v12728_v44  ;;  %v7155_v23 = vsel %vm2483_vm8, %v7153_v12, %v12727_v36  ;;  %v11162_v44 = vld [vmem:[%s16818_s23] ss:$0 sm:$0xff] }
0x1f5f   : > { %v7157_v54 = vpack.c.bf16 %v7156_v24, %v7155_v23  ;;  %v12938_v23 = vld [vmem:[%s16816_s8 + $0x28] sm:$0xff]  }
0x1f61   : > { %12144 = vmatmul.mubr.msk.bf16.vlgmr.msra.gmra.mrb[136].mxu0 %vm1370_vm0, %v7157_v54  ;;  %v12939_v54 = vld [vmem:[%s16816_s8 + $0x70] sm:$0xff]  }
0x1f62   : > { %11564 = vmatpush3.bf16.msra.mxu0 %v12928_v42 }
0x1f63   : > { %11565 = vmatprep.subr.bf16.mxu0 %v12929_v18 }
0x1f66   : > { %11566 = vmatpush3.bf16.msra.mxu0 %v12930_v11 }
0x1f67   : > { %11567 = vmatprep.subr.bf16.mxu0 %v12931_v32 }
0x1f6a   : > { %11568 = vmatpush3.bf16.msra.mxu0 %v12932_v48 }
0x1f6b   : > { %11569 = vmatprep.subr.bf16.mxu0 %v12933_v31 }
0x1f6e   : > { %11570 = vmatpush3.bf16.msra.mxu0 %v12934_v34 }
0x1f6f   : > { %11571 = vmatprep.subr.bf16.mxu0 %v12935_v33 }
0x1f72   : > { %11572 = vmatpush3.bf16.msra.mxu0 %v12936_v57 }
0x1f73   : > { %11573 = vmatprep.subr.bf16.mxu0 %v12937_v28 }
0x1f76   : > { %11574 = vmatpush3.bf16.msra.mxu0 %v12938_v23 }
0x1f77   : > { %11575 = vmatprep.subr.bf16.mxu0 %v12939_v54  ;;  %v11189_v54 = vld [vmem:[%s16819_s25] ss:$0 sm:$0xff] }
0x2034   : > { %v7225_v25 = vpop.f32.mrb[136].mxu0 }
0x2035   : > { %v7226_v10 = vadd.f32 %v11155_v59, %v7225_v25  ;;  %v12145_v30 = vpop.f32.mrb[137].mxu0  ;;  %v12941_v25 = vld [vmem:[%s16816_s8 + $0x78] sm:$0xff]  }
0x2036   : > { %v7228_v1 = vpop.f32.mrb[138].mxu0  ;;  %v7286_v30 = vld [vmem:[#allocation16] sm:$0x3] }
0x2037   : > { %v7232_v62 = vadd.f32 %v7226_v10, %v15494_v20  ;;  %v7229_v45 = vadd.f32 %v11155_v59, %v7228_v1  ;;  %v12146_v5 = vpop.f32.mrb[139].mxu0  ;;  %v12940_v59 = vld [vmem:[%s16816_s8 + $0x30] sm:$0xff]   ;;  %v12942_v10 = vld [vmem:[%s16816_s8 + $0x38] sm:$0xff]   ;;  %v7325_v1 = vrot.slane %v7286_v30, %v14380_v15 }
0x2038   : > { %11576 = vmatpush3.bf16.msra.mxu0 %v12940_v59 }
0x2039   : > { %v7233_v4 = vadd.f32 %v7229_v45, %v15496_v37  ;;  %v7236_v58 = vsel %vm1370_vm0, %v7232_v62, 0.0  ;;  %11577 = vmatprep.subr.bf16.mxu0 %v12941_v25 }
0x203a   : > { %7237 = vadd.xlane.f32.xlu0 %v7236_v58 }
0x203b   : > { %v7239_v39 = vsel %vm1370_vm0, %v7233_v4, 0.0 }
0x203c   : > { %7240 = vadd.xlane.f32.xlu1 %v7239_v39  ;;  %11578 = vmatpush3.bf16.msra.mxu0 %v12942_v10 }
0x203d   : > { %12159 = vmatprep.subr.bf16.mxu0 %v13864_v14 }
0x20c7   : > { %v7238_v29 = vpop.xlane.xlu0 %7237 }
0x20c8   : > { %v7242_v27 = vmul.f32 0.015625, %v7238_v29 }
0x20c9   : > { %v7241_v38 = vpop.xlane.xlu1 %7240 }
0x20ca   : > { %v7244_v9 = vsub.f32 %v7232_v62, %v7242_v27  ;;  %v7243_v47 = vmul.f32 0.015625, %v7241_v38  ;;  %v7329_v62 = vrot.slane %v7286_v30, %v14383_v17 }
0x20cc   : > { %v7245_v20 = vsub.f32 %v7233_v4, %v7243_v47  ;;  %v7246_v21 = vmul.f32 %v7244_v9, %v7244_v9 }
0x20ce   : > { %v7248_v37 = vsel %vm1370_vm0, %v7246_v21, 0.0  ;;  %v7247_v46 = vmul.f32 %v7245_v20, %v7245_v20 }
0x20cf   : > { %7249 = vadd.xlane.f32.xlu0 %v7248_v37 }
0x20d0   : > { %v7251_v2 = vsel %vm1370_vm0, %v7247_v46, 0.0 }
0x20d3   : > { %7252 = vadd.xlane.f32.xlu0 %v7251_v2 }
0x215c   : > { %v7250_v35 = vpop.xlane.xlu0 %7249 }
0x215d   : > { %v7254_v61 = vmul.f32 0.015625, %v7250_v35 }
0x215f   : > { %v7256_v51 = vadd.f32 1e-05, %v7254_v61 }
0x2160   : > { %v7253_v8 = vpop.xlane.xlu0 %7252 }
0x2161   : > { %13279 = vrsqrt.f32 %v7256_v51  ;;  %v7255_v60 = vmul.f32 0.015625, %v7253_v8  ;;  %v12945_v8 = vld [vmem:[%s16807_s21 + $0x44] ss:$8 sps:$4 sm:$0xff]  }
0x2162   : > { %7679 = vmatprep.subr.bf16.mxu1 %v12945_v8 }
0x2163   : > { %v7257_v16 = vadd.f32 1e-05, %v7255_v60  ;;  %v12943_v60 = vld [vmem:[%s16807_s21 + $0x40] ss:$8 sps:$4 sm:$0xff]  }
0x2165   : > { %13281 = vrsqrt.f32 %v7257_v16  ;;  %v12948_v16 = vld [vmem:[%s16807_s21 + $0x54] ss:$8 sps:$4 sm:$0xff]  }
0x216b   : > { %v13280_v22 = vpop.eup %13279 }
0x216c   : > { %v7260_v7 = vmul.f32 %v13280_v22, %v7244_v9  ;;  %v12946_v22 = vld [vmem:[%s16807_s21 + $0x50] ss:$8 sps:$4 sm:$0xff]  }
0x216e   : > { %v7268_v40 = vmul.f32 %v11161_v26, %v7260_v7  ;;  %v12951_v7 = vld [vmem:[%s16807_s21 + $0x64] ss:$8 sps:$4 sm:$0xff]  }
0x216f   : > { %v13282_v63 = vpop.eup %13281 }
0x2170   : > { %v7261_v56 = vmul.f32 %v13282_v63, %v7245_v20  ;;  %v7276_v41 = vadd.f32 %v11162_v44, %v7268_v40  ;;  %v12954_v63 = vld [vmem:[%s16807_s21 + $0x74] ss:$8 sps:$4 sm:$0xff]   ;;  %v12952_v40 = vld [vmem:[%s16807_s21 + $0x70] ss:$8 sps:$4 sm:$0xff]  }
0x2172   : > { %v7269_v36 = vmul.f32 %v11161_v26, %v7261_v56  ;;  %v12949_v26 = vld [vmem:[%s16807_s21 + $0x60] ss:$8 sps:$4 sm:$0xff]  }
0x2174   : > { %v7277_v12 = vadd.f32 %v11162_v44, %v7269_v36 }
0x2176   : > { %v7320_v24 = vpack.c.bf16 %v7277_v12, %v7276_v41 }
0x2178   : > { %11171 = vmatmul.mubr.msk.bf16.vlgmr.msra.gmra.mrb[168].mxu1 %vm1370_vm0, %v7320_v24 }
0x2179   : > { %7711 = vmatprep.mubr.bf16.mxu1 %v13863_v0  ;;  %7680 = vmatpush1.bf16.msra.mxu1 %v12943_v60 }
0x217a   : > { %7681 = vmatprep.subr.bf16.mxu1 %v12948_v16 }
0x217d   : > { %7682 = vmatpush1.bf16.msra.mxu1 %v12946_v22 }
0x217e   : > { %7683 = vmatprep.subr.bf16.mxu1 %v12951_v7 }
0x2181   : > { %7684 = vmatpush1.bf16.msra.mxu1 %v12949_v26 }
0x2182   : > { %7685 = vmatprep.subr.bf16.mxu1 %v12954_v63 }
0x2185   : > { %7686 = vmatpush1.bf16.msra.mxu1 %v12952_v40 }
0x2186   : > { %12147 = vmatprep.subr.bf16.mxu1 %v13864_v14 }
0x224b   : > { %v7409_v45 = vpop.f32.mrb[168].mxu1 }
0x224c   : > { %v7410_v5 = vadd.f32 %v7409_v45, %v7325_v1  ;;  %v7411_v4 = vpop.f32.mrb[169].mxu1 }
0x224d   : > { %v7412_v58 = vadd.f32 %v7411_v4, %v7329_v62  ;;  %v7413_v39 = vpop.f32.mrb[170].mxu1 }
0x224e   : > { %v7414_v29 = vadd.f32 %v7413_v39, %v7325_v1  ;;  %v7415_v27 = vpop.f32.mrb[171].mxu1  ;;  %v7418_v9 = vmax.f32 %v7410_v5, 0.0  ;;  %v11190_v1 = vld [vmem:[%s16820_s27] ss:$0 sm:$0xff] }
0x224f   : > { %v7416_v38 = vadd.f32 %v7415_v27, %v7329_v62  ;;  %v7419_v20 = vmax.f32 %v7412_v58, 0.0  ;;  %v11199_v58 = vld [vmem:[%s16808_s1 + $0x2] sm:$0x3] }
0x2250   : > { %v7420_v47 = vmax.f32 %v7414_v29, 0.0  ;;  %v7629_v39 = vrot.slane %v11199_v58, %v14380_v15  ;;  %v7633_v27 = vrot.slane %v11199_v58, %v14383_v17 }
0x2251   : > { %v7421_v21 = vmax.f32 %v7416_v38, 0.0 }
0x2252   : > { %v7422_v37 = vpack.c.bf16 %v7420_v47, %v7418_v9 }
0x2253   : > { %v7423_v46 = vpack.c.bf16 %v7421_v21, %v7419_v20 }
0x2255   : > { %7558 = vmatprep.mubr.bf16.mxu0 %v7423_v46 }
0x2256   : > { %7559 = vmatmul.mubr.bf16.vlgmr.msra.gmra.mrb[140].mxu0 %v7422_v37 }
0x2257   : > { %12161 = vmatprep.mubr.msk.bf16.mxu0 %vm13865_vm1, %v13864_v14 }
0x2329   : > { %v11579_v2 = vpop.f32.mrb[140].mxu0 }
0x232a   : > { %v11580_v13 = vpop.f32.mrb[141].mxu0 }
0x232b   : > { %v11581_v3 = vadd.f32 %v11580_v13, %v11579_v2  ;;  %v11582_v43 = vpop.f32.mrb[142].mxu0 }
0x232c   : > { %v11583_v19 = vpop.f32.mrb[143].mxu0 }
0x232d   : > { %v7561_v52 = vadd.f32 %v11581_v3, %v11172_v49  ;;  %v11584_v53 = vadd.f32 %v11583_v19, %v11582_v43 }
0x232f   : > { %v7564_v50 = vadd.f32 %v11584_v53, %v11172_v49  ;;  %v7567_v6 = vadd.f32 %v7561_v52, %v7276_v41 }
0x2331   : > { %v7571_v42 = vsel %vm1370_vm0, %v7567_v6, 0.0  ;;  %v7568_v18 = vadd.f32 %v7564_v50, %v7277_v12 }
0x2332   : > { %7572 = vadd.xlane.f32.xlu1 %v7571_v42 }
0x2333   : > { %v7574_v11 = vsel %vm1370_vm0, %v7568_v18, 0.0 }
0x2334   : > { %7575 = vadd.xlane.f32.xlu0 %v7574_v11 }
0x23bf   : > { %v7573_v32 = vpop.xlane.xlu1 %7572 }
0x23c0   : > { %v7577_v48 = vmul.f32 0.015625, %v7573_v32 }
0x23c1   : > { %v7576_v31 = vpop.xlane.xlu0 %7575 }
0x23c2   : > { %v7579_v34 = vsub.f32 %v7567_v6, %v7577_v48  ;;  %v7578_v33 = vmul.f32 0.015625, %v7576_v31 }
0x23c4   : > { %v7580_v57 = vsub.f32 %v7568_v18, %v7578_v33  ;;  %v7581_v28 = vmul.f32 %v7579_v34, %v7579_v34 }
0x23c6   : > { %v7583_v35 = vsel %vm1370_vm0, %v7581_v28, 0.0  ;;  %v7582_v61 = vmul.f32 %v7580_v57, %v7580_v57 }
0x23c7   : > { %7584 = vadd.xlane.f32.xlu1 %v7583_v35 }
0x23c8   : > { %v7586_v51 = vsel %vm1370_vm0, %v7582_v61, 0.0 }
0x23c9   : > { %7587 = vadd.xlane.f32.xlu0 %v7586_v51 }
0x2454   : > { %v7585_v56 = vpop.xlane.xlu1 %7584 }
0x2455   : > { %v7589_v44 = vmul.f32 0.015625, %v7585_v56 }
0x2456   : > { %v7588_v36 = vpop.xlane.xlu0 %7587 }
0x2457   : > { %v7591_v41 = vadd.f32 1e-05, %v7589_v44  ;;  %v7590_v12 = vmul.f32 0.015625, %v7588_v36  ;;  %v15926_v36 = vld [vmem:[#allocation5] sm:$0xff] }
0x2459   : > { %13283 = vrsqrt.f32 %v7591_v41  ;;  %v7592_v24 = vadd.f32 1e-05, %v7590_v12 }
0x245b   : > { %13285 = vrsqrt.f32 %v7592_v24 }
0x2463   : > { %v13284_v23 = vpop.eup %13283 }
0x2464   : > { %v7595_v59 = vmul.f32 %v13284_v23, %v7579_v34 }
0x2465   : > { %v13286_v25 = vpop.eup %13285 }
0x2466   : > { %v7603_v10 = vmul.f32 %v11189_v54, %v7595_v59  ;;  %v7596_v30 = vmul.f32 %v13286_v25, %v7580_v57  ;;  %v15934_v25 = vld [vmem:[#allocation5 + $0x8] sm:$0xff] }
0x2468   : > { %v7604_v62 = vmul.f32 %v11189_v54, %v7596_v30  ;;  %v15855_v45 = vadd.f32 %v11190_v1, %v7603_v10 }
0x246a   : > { %v15857_v5 = vadd.f32 %v11190_v1, %v7604_v62 }
0x246c   : > { %v7613_v4 = vpack.c.bf16 %v15857_v5, %v15855_v45 }
0x246e   : > { %11208 = vmatmul.mubr.msk.bf16.vlgmr.msra.gmra.mrb[172].mxu1 %vm1370_vm0, %v7613_v4 }
0x246f   : > { %12149 = vmatprep.mubr.msk.bf16.mxu1 %vm13865_vm1, %v13864_v14 }
0x2541   : > { %v7713_v29 = vpop.f32.mrb[172].mxu1 }
0x2542   : > { %v7715_v38 = vpop.f32.mrb[173].mxu1  ;;  %v7714_v47 = vadd.f32 %v7713_v29, %v7629_v39 }
0x2543   : > { %v7717_v9 = vpop.f32.mrb[174].mxu1  ;;  %v7716_v37 = vadd.f32 %v7715_v38, %v7633_v27 }
0x2544   : > { %v7718_v20 = vadd.f32 %v7717_v9, %v7629_v39  ;;  %v7719_v21 = vpop.f32.mrb[175].mxu1 }
0x2545   : > { %v7720_v46 = vadd.f32 %v7719_v21, %v7633_v27 }
0x2546   : > { %v7733_v2 = vpack.c.bf16 %v7718_v20, %v7714_v47 }
0x2547   : > { %v15867_v49 = vpack.c.bf16 %v7720_v46, %v7716_v37 }
0x2548   : > { %7858 = vrot.lane.b32.xlu0 %v7733_v2, %s16787_s12  ;;  %7736 = vrot.lane.b32.xlu1 %v7733_v2, %s16796_s13 }
0x254c   : > { %7982 = vrot.lane.b32.xlu0 %v7733_v2, %s16798_s29  ;;  %7856 = vrot.lane.b32.xlu1 %v7733_v2, %s16797_s17 }
0x2550   : > { %8107 = vrot.lane.b32.xlu0 %v7733_v2, %s16799_s30  ;;  %7984 = vrot.lane.b32.xlu1 %v7733_v2, %s16786_s11 }
0x2554   : > { %8232 = vrot.lane.b32.xlu0 %v7733_v2, %s16800_s2  ;;  %8109 = vrot.lane.b32.xlu1 %v7733_v2, %s16785_s28 }
0x2558   : > { %8357 = vrot.lane.b32.xlu0 %v7733_v2, %s16802_s16  ;;  %8234 = vrot.lane.b32.xlu1 %v7733_v2, %s16784_s14 }
0x255c   : > { %8482 = vrot.lane.b32.xlu0 %v7733_v2, %s16804_s22  ;;  %8359 = vrot.lane.b32.xlu1 %v7733_v2, %s16801_s18 }
0x2560   : > { %8607 = vrot.lane.b32.xlu0 %v7733_v2, %s16806_s15  ;;  %8484 = vrot.lane.b32.xlu1 %v7733_v2, %s16803_s7 }
0x2564   : > { %8609 = vrot.lane.b32.xlu1 %v7733_v2, %s16805_s19 }
0x25ba   : > { %v7859_v13 = vpop.permute.xlu0 %7858  ;;  %v7737_v3 = vpop.permute.xlu1 %7736 }
0x25bb   : > { %v7864_v43 = vsel %vm1431_vm2, %v7859_v13, 0  ;;  %v7742_v19 = vsel %vm1431_vm2, %v7737_v3, 0 }
0x25bc   : > { %12148 = vmatpush3.bf16.xpose.msra.mxu1 %v7742_v19  ;;  %12160 = vmatpush3.bf16.xpose.msra.mxu0 %v7864_v43 }
0x25bd   : > { %12153 = vmatprep.subr.bf16.mxu1 %v13864_v14  ;;  %12171 = vmatprep.subr.bf16.mxu0 %v13864_v14 }
0x25be   : > { %v7857_v52 = vpop.permute.xlu1 %7856  ;;  %v7983_v42 = vpop.permute.xlu0 %7982 }
0x25c2   : > { %v7985_v53 = vpop.permute.xlu1 %7984  ;;  %v8108_v32 = vpop.permute.xlu0 %8107 }
0x25c3   : > { %v7990_v50 = vsel %vm1431_vm2, %v7985_v53, 0  ;;  %12150 = vmatmul.mubr.msk.bf16.vlgmr.msra.gmra.mrb[176].mxu1 %vm1431_vm2, %v7733_v2  ;;  %12162 = vmatmul.mubr.msk.bf16.vlgmr.msra.gmra.mrb[144].mxu0 %vm1431_vm2, %v7857_v52 }
0x25c4   : > { %12154 = vmatpush3.bf16.msra.mxu1 %v15867_v49  ;;  %12172 = vmatpush3.bf16.xpose.msra.mxu0 %v7990_v50 }
0x25c5   : > { %12173 = vmatprep.mubr.msk.bf16.mxu0 %vm13865_vm1, %v13864_v14  ;;  %12183 = vmatprep.subr.bf16.mxu0 %v13864_v14 }
0x25c6   : > { %12155 = vmatprep.mubr.msk.bf16.mxu1 %vm13865_vm1, %v13864_v14  ;;  %12165 = vmatprep.subr.bf16.mxu1 %v13864_v14  ;;  %v8110_v6 = vpop.permute.xlu1 %8109  ;;  %v8233_v34 = vpop.permute.xlu0 %8232 }
0x25c7   : > { %v8115_v18 = vsel %vm1431_vm2, %v8110_v6, 0 }
0x25ca   : > { %v8235_v11 = vpop.permute.xlu1 %8234  ;;  %v8358_v28 = vpop.permute.xlu0 %8357 }
0x25cb   : > { %12174 = vmatmul.mubr.msk.bf16.vlgmr.msra.gmra.mrb[148].mxu0 %vm1431_vm2, %v7983_v42  ;;  %v8240_v48 = vsel %vm1431_vm2, %v8235_v11, 0 }
0x25cc   : > { %12184 = vmatpush3.bf16.xpose.msra.mxu0 %v8115_v18  ;;  %12185 = vmatprep.mubr.msk.bf16.mxu0 %vm13865_vm1, %v13864_v14 }
0x25cd   : > { %12195 = vmatprep.subr.bf16.mxu0 %v13864_v14 }
0x25ce   : > { %v8360_v31 = vpop.permute.xlu1 %8359  ;;  %v8483_v51 = vpop.permute.xlu0 %8482 }
0x25cf   : > { %v8365_v33 = vsel %vm1431_vm2, %v8360_v31, 0 }
0x25d2   : > { %v8485_v57 = vpop.permute.xlu1 %8484  ;;  %v8608_v60 = vpop.permute.xlu0 %8607 }
0x25d3   : > { %12186 = vmatmul.mubr.msk.bf16.vlgmr.msra.gmra.mrb[152].mxu0 %vm1431_vm2, %v8108_v32  ;;  %v8490_v35 = vsel %vm1431_vm2, %v8485_v57, 0 }
0x25d4   : > { %12196 = vmatpush3.bf16.xpose.msra.mxu0 %v8240_v48  ;;  %12197 = vmatprep.mubr.msk.bf16.mxu0 %vm13865_vm1, %v13864_v14 }
0x25d5   : > { %12207 = vmatprep.subr.bf16.mxu0 %v13864_v14 }
0x25d6   : > { %v8610_v61 = vpop.permute.xlu1 %8609 }
0x25d7   : > { %v8615_v8 = vsel %vm1431_vm2, %v8610_v61, 0 }
0x25db   : > { %12198 = vmatmul.mubr.msk.bf16.vlgmr.msra.gmra.mrb[156].mxu0 %vm1431_vm2, %v8233_v34 }
0x25dc   : > { %12208 = vmatpush3.bf16.xpose.msra.mxu0 %v8365_v33  ;;  %12209 = vmatprep.mubr.msk.bf16.mxu0 %vm13865_vm1, %v13864_v14 }
0x25dd   : > { %12219 = vmatprep.subr.bf16.mxu0 %v13864_v14 }
0x25e3   : > { %12210 = vmatmul.mubr.msk.bf16.vlgmr.msra.gmra.mrb[160].mxu0 %vm1431_vm2, %v8358_v28 }
0x25e4   : > { %12220 = vmatpush3.bf16.xpose.msra.mxu0 %v8490_v35  ;;  %12221 = vmatprep.mubr.msk.bf16.mxu0 %vm13865_vm1, %v13864_v14 }
0x25e5   : > { %12231 = vmatprep.subr.bf16.mxu0 %v13864_v14 }
0x25eb   : > { %12222 = vmatmul.mubr.msk.bf16.vlgmr.msra.gmra.mrb[164].mxu0 %vm1431_vm2, %v8483_v51 }
0x25ec   : > { %12232 = vmatpush3.bf16.xpose.msra.mxu0 %v8615_v8  ;;  %12233 = vmatprep.mubr.msk.bf16.mxu0 %vm13865_vm1, %v13864_v14 }
0x25ed   : > { %12243 = vmatprep.subr.bf16.mxu0 %v13864_v14 }
0x25f3   : > { %12234 = vmatmul.mubr.msk.bf16.vlgmr.msra.gmra.mrb[168].mxu0 %vm1431_vm2, %v8608_v60 }
0x25f4   : > { %12251 = vmatprep.mubr.msk.bf16.mxu0 %vm13865_vm1, %v13864_v14 }
0x2696   : > { %v7778_v16 = vpop.f32.mrb[176].mxu1  ;;  %v7900_v22 = vpop.f32.mrb[144].mxu0 }
0x2697   : > { %v7785_v7 = vmul.f32 0.35355338, %v7778_v16  ;;  %v7907_v26 = vmul.f32 0.35355338, %v7900_v22  ;;  %v12151_v63 = vpop.f32.mrb[177].mxu1  ;;  %v12163_v40 = vpop.f32.mrb[145].mxu0 }
0x2698   : > { %v7781_v56 = vpop.f32.mrb[178].mxu1  ;;  %v7903_v44 = vpop.f32.mrb[146].mxu0 }
0x2699   : > { %v15929_v41 = vadd.f32 %v15926_v36, %v7785_v7  ;;  %v15932_v12 = vadd.f32 %v15926_v36, %v7907_v26  ;;  %v7786_v24 = vmul.f32 0.35355338, %v7781_v56  ;;  %v7908_v23 = vmul.f32 0.35355338, %v7903_v44  ;;  %v12152_v54 = vpop.f32.mrb[179].mxu1  ;;  %v12164_v59 = vpop.f32.mrb[147].mxu0 }
0x269b   : > { %v15937_v10 = vadd.f32 %v15934_v25, %v7786_v24  ;;  %v15940_v30 = vadd.f32 %v15934_v25, %v7908_v23  ;;  %v7789_v1 = vsel %vm1481_vm3, %v15929_v41, -inf  ;;  %v7911_v62 = vsel %vm1481_vm3, %v15932_v12, -inf }
0x269c   : > { %7790 = vmax.xlane.f32.xlu1 %v7789_v1  ;;  %7912 = vmax.xlane.f32.xlu0 %v7911_v62 }
0x269d   : > { %v7792_v29 = vsel %vm1481_vm3, %v15937_v10, -inf  ;;  %v7914_v27 = vsel %vm1481_vm3, %v15940_v30, -inf }
0x269e   : > { %v8026_v4 = vpop.f32.mrb[148].mxu0 }
0x269f   : > { %v8033_v58 = vmul.f32 0.35355338, %v8026_v4  ;;  %v12175_v39 = vpop.f32.mrb[149].mxu0 }
0x26a0   : > { %7793 = vmax.xlane.f32.xlu0 %v7792_v29  ;;  %7915 = vmax.xlane.f32.xlu1 %v7914_v27  ;;  %v8029_v38 = vpop.f32.mrb[150].mxu0 }
0x26a1   : > { %v15951_v9 = vadd.f32 %v15926_v36, %v8033_v58  ;;  %v8034_v47 = vmul.f32 0.35355338, %v8029_v38  ;;  %v12176_v20 = vpop.f32.mrb[151].mxu0 }
0x26a3   : > { %v15954_v21 = vadd.f32 %v15934_v25, %v8034_v47  ;;  %v8037_v37 = vsel %vm1481_vm3, %v15951_v9, -inf }
0x26a4   : > { %8038 = vmax.xlane.f32.xlu0 %v8037_v37 }
0x26a5   : > { %v8040_v46 = vsel %vm1481_vm3, %v15954_v21, -inf }
0x26a6   : > { %8041 = vmax.xlane.f32.xlu1 %v8040_v46  ;;  %v8151_v2 = vpop.f32.mrb[152].mxu0 }
0x26a7   : > { %v8158_v13 = vmul.f32 0.35355338, %v8151_v2  ;;  %v12187_v3 = vpop.f32.mrb[153].mxu0 }
0x26a8   : > { %v8154_v43 = vpop.f32.mrb[154].mxu0 }
0x26a9   : > { %v15961_v19 = vadd.f32 %v15926_v36, %v8158_v13  ;;  %v8159_v52 = vmul.f32 0.35355338, %v8154_v43  ;;  %v12188_v53 = vpop.f32.mrb[155].mxu0 }
0x26ab   : > { %v15964_v50 = vadd.f32 %v15934_v25, %v8159_v52  ;;  %v8162_v6 = vsel %vm1481_vm3, %v15961_v19, -inf }
0x26ac   : > { %8163 = vmax.xlane.f32.xlu0 %v8162_v6 }
0x26ad   : > { %v8165_v42 = vsel %vm1481_vm3, %v15964_v50, -inf }
0x26ae   : > { %8166 = vmax.xlane.f32.xlu1 %v8165_v42  ;;  %v8276_v18 = vpop.f32.mrb[156].mxu0 }
0x26af   : > { %v8283_v11 = vmul.f32 0.35355338, %v8276_v18  ;;  %v12199_v32 = vpop.f32.mrb[157].mxu0 }
0x26b0   : > { %v8279_v48 = vpop.f32.mrb[158].mxu0 }
0x26b1   : > { %v15971_v31 = vadd.f32 %v15926_v36, %v8283_v11  ;;  %v8284_v34 = vmul.f32 0.35355338, %v8279_v48  ;;  %v12200_v33 = vpop.f32.mrb[159].mxu0 }
0x26b3   : > { %v15974_v57 = vadd.f32 %v15934_v25, %v8284_v34  ;;  %v8287_v28 = vsel %vm1481_vm3, %v15971_v31, -inf }
0x26b4   : > { %8288 = vmax.xlane.f32.xlu0 %v8287_v28 }
0x26b5   : > { %v8290_v35 = vsel %vm1481_vm3, %v15974_v57, -inf }
0x26b6   : > { %8291 = vmax.xlane.f32.xlu1 %v8290_v35  ;;  %v8401_v61 = vpop.f32.mrb[160].mxu0 }
0x26b7   : > { %v8408_v51 = vmul.f32 0.35355338, %v8401_v61  ;;  %v12211_v8 = vpop.f32.mrb[161].mxu0 }
0x26b8   : > { %v8404_v60 = vpop.f32.mrb[162].mxu0 }
0x26b9   : > { %v15981_v16 = vadd.f32 %v15926_v36, %v8408_v51  ;;  %v8409_v22 = vmul.f32 0.35355338, %v8404_v60  ;;  %v12212_v7 = vpop.f32.mrb[163].mxu0 }
0x26bb   : > { %v15984_v26 = vadd.f32 %v15934_v25, %v8409_v22  ;;  %v8412_v63 = vsel %vm1481_vm3, %v15981_v16, -inf }
0x26bc   : > { %8413 = vmax.xlane.f32.xlu0 %v8412_v63 }
0x26bd   : > { %v8415_v40 = vsel %vm1481_vm3, %v15984_v26, -inf }
0x26be   : > { %8416 = vmax.xlane.f32.xlu1 %v8415_v40  ;;  %v8526_v56 = vpop.f32.mrb[164].mxu0 }
0x26bf   : > { %v12223_v44 = vpop.f32.mrb[165].mxu0  ;;  %v8533_v47 = vmul.f32 0.35355338, %v8526_v56 }
0x26c0   : > { %v8529_v24 = vpop.f32.mrb[166].mxu0 }
0x26c1   : > { %v8534_v23 = vmul.f32 0.35355338, %v8529_v24  ;;  %v12224_v54 = vpop.f32.mrb[167].mxu0  ;;  %v16005_v20 = vadd.f32 %v15926_v36, %v8533_v47 }
0x26c3   : > { %v15991_v59 = vadd.f32 %v15934_v25, %v8534_v23 }
0x26c5   : > { %v8540_v1 = vsel %vm1481_vm3, %v15991_v59, -inf }
0x26c6   : > { %8541 = vmax.xlane.f32.xlu1 %v8540_v1  ;;  %v8651_v62 = vpop.f32.mrb[168].mxu0 }
0x26c7   : > { %v12235_v4 = vpop.f32.mrb[169].mxu0  ;;  %v8658_v37 = vmul.f32 0.35355338, %v8651_v62 }
0x26c8   : > { %v8654_v58 = vpop.f32.mrb[170].mxu0 }
0x26c9   : > { %v8659_v39 = vmul.f32 0.35355338, %v8654_v58  ;;  %v12236_v29 = vpop.f32.mrb[171].mxu0  ;;  %v16008_v46 = vadd.f32 %v15926_v36, %v8658_v37 }
0x26cb   : > { %v15996_v27 = vadd.f32 %v15934_v25, %v8659_v39  ;;  %v8537_v25 = vsel %vm1481_vm3, %v16005_v20, -inf  ;;  %v8662_v2 = vsel %vm1481_vm3, %v16008_v46, -inf }
0x26cd   : > { %v8665_v38 = vsel %vm1481_vm3, %v15996_v27, -inf }
0x26ce   : > { %8666 = vmax.xlane.f32.xlu1 %v8665_v38 }
0x26d2   : > { %7935 = vrot.lane.b32.xlu0 %v15867_v49, %s16797_s17 }
0x26df   : > { %8060 = vrot.lane.b32.xlu1 %v15867_v49, %s16798_s29 }
0x26f1   : > { %8538 = vmax.xlane.f32.xlu0 %v8537_v25 }
0x26f5   : > { %8663 = vmax.xlane.f32.xlu0 %v8662_v2 }
0x2729   : > { %v7913_v13 = vpop.xlane.xlu0 %7912  ;;  %v7791_v3 = vpop.xlane.xlu1 %7790 }
0x272a   : > { %v7917_v43 = vsub.f32 %v15932_v12, %v7913_v13  ;;  %v7795_v52 = vsub.f32 %v15929_v41, %v7791_v3 }
0x272c   : > { %v7797_v53 = vmul.f32 1.442695, %v7795_v52  ;;  %v7919_v6 = vmul.f32 1.442695, %v7917_v43 }
0x272d   : > { %v7794_v42 = vpop.xlane.xlu0 %7793  ;;  %v7916_v18 = vpop.xlane.xlu1 %7915 }
0x272e   : > { %v7796_v36 = vsub.f32 %v15937_v10, %v7794_v42  ;;  %v7918_v11 = vsub.f32 %v15940_v30, %v7916_v18  ;;  %13287 = vpow2.f32 %v7797_v53 }
0x272f   : > { %13289 = vpow2.f32 %v7919_v6 }
0x2730   : > { %v7799_v32 = vmul.f32 1.442695, %v7796_v36  ;;  %v7921_v48 = vmul.f32 1.442695, %v7918_v11 }
0x2731   : > { %v8039_v34 = vpop.xlane.xlu0 %8038 }
0x2732   : > { %13291 = vpow2.f32 %v7799_v32  ;;  %v8043_v33 = vsub.f32 %v15951_v9, %v8039_v34 }
0x2733   : > { %v8042_v28 = vpop.xlane.xlu1 %8041  ;;  %13293 = vpow2.f32 %v7921_v48 }
0x2734   : > { %v8045_v12 = vmul.f32 1.442695, %v8043_v33  ;;  %v8044_v41 = vsub.f32 %v15954_v21, %v8042_v28 }
0x2736   : > { %13295 = vpow2.f32 %v8045_v12  ;;  %v8047_v35 = vmul.f32 1.442695, %v8044_v41 }
0x2738   : > { %13297 = vpow2.f32 %v8047_v35  ;;  %v16020_v61 = vpop.eup %13287 }
0x2739   : > { %v8164_v10 = vpop.xlane.xlu0 %8163  ;;  %v7801_v51 = vsel %vm1481_vm3, %v16020_v61, 0.0  ;;  %v16025_v8 = vpop.eup %13289 }
0x273a   : > { %v8168_v30 = vsub.f32 %v15961_v19, %v8164_v10  ;;  %7802 = vadd.xlane.f32.xlu0 %v7801_v51  ;;  %v7923_v19 = vsel %vm1481_vm3, %v16025_v8, 0.0 }
0x273b   : > { %v8167_v9 = vpop.xlane.xlu1 %8166 }
0x273c   : > { %v16027_v60 = vpop.eup %13291  ;;  %v8170_v22 = vmul.f32 1.442695, %v8168_v30  ;;  %v8169_v21 = vsub.f32 %v15964_v50, %v8167_v9 }
0x273d   : > { %v7804_v7 = vsel %vm1481_vm3, %v16027_v60, 0.0  ;;  %v16032_v63 = vpop.eup %13293 }
0x273e   : > { %13299 = vpow2.f32 %v8170_v22  ;;  %v8172_v40 = vmul.f32 1.442695, %v8169_v21  ;;  %7805 = vadd.xlane.f32.xlu1 %v7804_v7  ;;  %7924 = vadd.xlane.f32.xlu0 %v7923_v19  ;;  %v7926_v50 = vsel %vm1481_vm3, %v16032_v63, 0.0 }
0x2740   : > { %v16036_v56 = vpop.eup %13295  ;;  %13301 = vpow2.f32 %v8172_v40 }
0x2741   : > { %v8049_v44 = vsel %vm1481_vm3, %v16036_v56, 0.0  ;;  %v8289_v1 = vpop.xlane.xlu0 %8288 }
0x2742   : > { %v16042_v24 = vpop.eup %13297  ;;  %7927 = vadd.xlane.f32.xlu1 %v7926_v50  ;;  %8050 = vadd.xlane.f32.xlu0 %v8049_v44  ;;  %v8293_v11 = vsub.f32 %v15971_v31, %v8289_v1 }
0x2743   : > { %v8292_v23 = vpop.xlane.xlu1 %8291  ;;  %v8052_v62 = vsel %vm1481_vm3, %v16042_v24, 0.0 }
0x2744   : > { %v8294_v54 = vsub.f32 %v15974_v57, %v8292_v23  ;;  %v8295_v32 = vmul.f32 1.442695, %v8293_v11 }
0x2746   : > { %v8297_v4 = vmul.f32 1.442695, %v8294_v54  ;;  %8053 = vadd.xlane.f32.xlu1 %v8052_v62 }
0x2748   : > { %v16047_v58 = vpop.eup %13299  ;;  %13303 = vpow2.f32 %v8297_v4 }
0x2749   : > { %v8414_v39 = vpop.xlane.xlu0 %8413  ;;  %v8174_v29 = vsel %vm1481_vm3, %v16047_v58, 0.0 }
0x274a   : > { %v16051_v38 = vpop.eup %13301  ;;  %v8418_v47 = vsub.f32 %v15981_v16, %v8414_v39  ;;  %8175 = vadd.xlane.f32.xlu0 %v8174_v29 }
0x274b   : > { %v8417_v37 = vpop.xlane.xlu1 %8416  ;;  %v8177_v57 = vsel %vm1481_vm3, %v16051_v38, 0.0 }
0x274c   : > { %v8420_v25 = vmul.f32 1.442695, %v8418_v47  ;;  %v8419_v2 = vsub.f32 %v15984_v26, %v8417_v37  ;;  %8178 = vadd.xlane.f32.xlu1 %v8177_v57 }
0x274d   : > { %v7936_v48 = vpop.permute.xlu0 %7935 }
0x274e   : > { %13305 = vpow2.f32 %v8420_v25  ;;  %v8422_v13 = vmul.f32 1.442695, %v8419_v2 }
0x2750   : > { %13307 = vpow2.f32 %v8422_v13 }
0x2752   : > { %v16057_v3 = vpop.eup %13303 }
0x2753   : > { %v8542_v43 = vpop.xlane.xlu1 %8541  ;;  %v8302_v52 = vsel %vm1481_vm3, %v16057_v3, 0.0 }
0x2754   : > { %v8544_v16 = vsub.f32 %v15991_v59, %v8542_v43  ;;  %8303 = vadd.xlane.f32.xlu1 %v8302_v52 }
0x2756   : > { %v8547_v53 = vmul.f32 1.442695, %v8544_v16 }
0x2758   : > { %v16062_v6 = vpop.eup %13305  ;;  %13309 = vpow2.f32 %v8547_v53 }
0x2759   : > { %v8424_v26 = vsel %vm1481_vm3, %v16062_v6, 0.0  ;;  %13311 = vpow2.f32 %v8295_v32 }
0x275a   : > { %v16066_v42 = vpop.eup %13307  ;;  %8425 = vadd.xlane.f32.xlu1 %v8424_v26 }
0x275b   : > { %v8427_v18 = vsel %vm1481_vm3, %v16066_v42, 0.0  ;;  %v8667_v33 = vpop.xlane.xlu1 %8666 }
0x275c   : > { %v8669_v35 = vsub.f32 %v15996_v27, %v8667_v33 }
0x275e   : > { %8428 = vadd.xlane.f32.xlu1 %v8427_v18  ;;  %v8672_v51 = vmul.f32 1.442695, %v8669_v35 }
0x275f   : > { %v8061_v40 = vpop.permute.xlu1 %8060 }
0x2760   : > { %8185 = vrot.lane.b32.xlu0 %v15867_v49, %s16799_s30 }
0x2762   : > { %v16072_v36 = vpop.eup %13309 }
0x2763   : > { %v8552_v59 = vsel %vm1481_vm3, %v16072_v36, 0.0  ;;  %v16077_v34 = vpop.eup %13311 }
0x2764   : > { %8553 = vadd.xlane.f32.xlu1 %v8552_v59  ;;  %v8299_v12 = vsel %vm1481_vm3, %v16077_v34, 0.0 }
0x277e   : > { %v8539_v28 = vpop.xlane.xlu0 %8538 }
0x277f   : > { %v8543_v41 = vsub.f32 %v16005_v20, %v8539_v28  ;;  %8300 = vadd.xlane.f32.xlu0 %v8299_v12 }
0x2781   : > { %v8545_v10 = vmul.f32 1.442695, %v8543_v41 }
0x2782   : > { %v8664_v30 = vpop.xlane.xlu0 %8663 }
0x2783   : > { %13313 = vpow2.f32 %v8545_v10  ;;  %v8668_v31 = vsub.f32 %v16008_v46, %v8664_v30 }
0x2785   : > { %v8670_v9 = vmul.f32 1.442695, %v8668_v31 }
0x2787   : > { %13315 = vpow2.f32 %v8670_v9 }
0x2788   : > { %13317 = vpow2.f32 %v8672_v51 }
0x278d   : > { %v16084_v22 = vpop.eup %13313 }
0x278e   : > { %v8549_v21 = vsel %vm1481_vm3, %v16084_v22, 0.0 }
0x278f   : > { %8550 = vadd.xlane.f32.xlu0 %v8549_v21 }
0x2791   : > { %v16088_v7 = vpop.eup %13315 }
0x2792   : > { %v8674_v27 = vsel %vm1481_vm3, %v16088_v7, 0.0  ;;  %v16092_v20 = vpop.eup %13317 }
0x2793   : > { %8675 = vadd.xlane.f32.xlu1 %v8674_v27  ;;  %v8677_v46 = vsel %vm1481_vm3, %v16092_v20, 0.0 }
0x2797   : > { %8678 = vadd.xlane.f32.xlu1 %v8677_v46 }
0x27a5   : > { %8435 = vrot.lane.b32.xlu0 %v15867_v49, %s16802_s16 }
0x27a8   : > { %8310 = vrot.lane.b32.xlu1 %v15867_v49, %s16800_s2 }
0x27a9   : > { %8560 = vrot.lane.b32.xlu0 %v15867_v49, %s16804_s22 }
0x27ad   : > { %8685 = vrot.lane.b32.xlu0 %v15867_v49, %s16806_s15 }
0x27c7   : > { %v7803_v19 = vpop.xlane.xlu0 %7802 }
0x27c8   : > { %13319 = vrcp.f32 %v7803_v19 }
0x27cb   : > { %v7806_v44 = vpop.xlane.xlu1 %7805  ;;  %v7925_v50 = vpop.xlane.xlu0 %7924 }
0x27cc   : > { %13321 = vrcp.f32 %v7806_v44 }
0x27cf   : > { %v7928_v23 = vpop.xlane.xlu1 %7927  ;;  %v8051_v29 = vpop.xlane.xlu0 %8050 }
0x27d0   : > { %13323 = vrcp.f32 %v7928_v23 }
0x27d1   : > { %13325 = vrcp.f32 %v7925_v50 }
0x27d2   : > { %v13320_v54 = vpop.eup %13319 }
0x27d3   : > { %v8054_v1 = vpop.xlane.xlu1 %8053  ;;  %v7809_v4 = vmul.f32 %v13320_v54, %v16020_v61 }
0x27d4   : > { %13327 = vrcp.f32 %v8054_v1 }
0x27d5   : > { %13329 = vrcp.f32 %v8051_v29 }
0x27d6   : > { %v13322_v62 = vpop.eup %13321 }
0x27d7   : > { %v7810_v39 = vmul.f32 %v13322_v62, %v16027_v60  ;;  %v8176_v60 = vpop.xlane.xlu0 %8175 }
0x27d9   : > { %v7811_v47 = vpack.c.bf16 %v7810_v39, %v7809_v4  ;;  %v8179_v25 = vpop.xlane.xlu1 %8178 }
0x27da   : > { %v13324_v49 = vpop.eup %13323  ;;  %13331 = vrcp.f32 %v8179_v25 }
0x27db   : > { %12156 = vmatmul.mubr.msk.bf16.vlgmr.msra.gmra.mrb[180].mxu1 %vm1481_vm3, %v7811_v47  ;;  %v13326_v37 = vpop.eup %13325  ;;  %v7932_v57 = vmul.f32 %v13324_v49, %v16032_v63  ;;  %13333 = vrcp.f32 %v8176_v60  ;;  %v8186_v53 = vpop.permute.xlu0 %8185 }
0x27dc   : > { %12166 = vmatpush3.bf16.msra.mxu1 %v7936_v48  ;;  %12167 = vmatprep.mubr.msk.bf16.mxu1 %vm13865_vm1, %v13864_v14  ;;  %v7931_v61 = vmul.f32 %v13326_v37, %v16025_v8 }
0x27dd   : > { %12177 = vmatprep.subr.bf16.mxu1 %v13864_v14 }
0x27de   : > { %v7933_v2 = vpack.c.bf16 %v7932_v57, %v7931_v61  ;;  %v13328_v13 = vpop.eup %13327 }
0x27df   : > { %v13330_v43 = vpop.eup %13329  ;;  %v8058_v52 = vmul.f32 %v13328_v13, %v16042_v24 }
0x27e0   : > { %v8057_v63 = vmul.f32 %v13330_v43, %v16036_v56 }
0x27e1   : > { %v8304_v56 = vpop.xlane.xlu1 %8303 }
0x27e2   : > { %v8059_v16 = vpack.c.bf16 %v8058_v52, %v8057_v63 }
0x27e3   : > { %12168 = vmatmul.mubr.msk.bf16.vlgmr.msra.gmra.mrb[184].mxu1 %vm1481_vm3, %v7933_v2 }
0x27e4   : > { %12178 = vmatpush3.bf16.msra.mxu1 %v8061_v40  ;;  %12179 = vmatprep.mubr.msk.bf16.mxu1 %vm13865_vm1, %v13864_v14  ;;  %v13332_v8 = vpop.eup %13331 }
0x27e5   : > { %12189 = vmatprep.subr.bf16.mxu1 %v13864_v14  ;;  %v13334_v26 = vpop.eup %13333  ;;  %v8183_v18 = vmul.f32 %v13332_v8, %v16051_v38 }
0x27e6   : > { %v8182_v24 = vmul.f32 %v13334_v26, %v16047_v58 }
0x27e7   : > { %v8426_v11 = vpop.xlane.xlu1 %8425 }
0x27e8   : > { %v8184_v59 = vpack.c.bf16 %v8183_v18, %v8182_v24  ;;  %v12955_v18 = vld [vmem:[%s16809_s0 + $0x20] sm:$0xff]  }
0x27e9   : > { %12244 = vmatpush3.bf16.msra.mxu0 %v12955_v18 }
0x27ea   : > { %12245 = vmatprep.subr.bf16.mxu0 %v13864_v14 }
0x27eb   : > { %12180 = vmatmul.mubr.msk.bf16.vlgmr.msra.gmra.mrb[188].mxu1 %vm1481_vm3, %v8059_v16  ;;  %v8429_v48 = vpop.xlane.xlu1 %8428 }
0x27ec   : > { %12190 = vmatpush3.bf16.msra.mxu1 %v8186_v53  ;;  %12191 = vmatprep.mubr.msk.bf16.mxu1 %vm13865_vm1, %v13864_v14 }
0x27ed   : > { %12201 = vmatprep.subr.bf16.mxu1 %v13864_v14 }
0x27f1   : > { %v8554_v33 = vpop.xlane.xlu1 %8553 }
0x27f3   : > { %12192 = vmatmul.mubr.msk.bf16.vlgmr.msra.gmra.mrb[192].mxu1 %vm1481_vm3, %v8184_v59 }
0x27f4   : > { %12203 = vmatprep.mubr.msk.bf16.mxu1 %vm13865_vm1, %v13864_v14 }
0x280c   : > { %v8301_v32 = vpop.xlane.xlu0 %8300 }
0x280d   : > { %13335 = vrcp.f32 %v8301_v32  ;;  %v12956_v32 = vld [vmem:[%s16809_s0 + $0x28] sm:$0xff]  }
0x280e   : > { %13337 = vrcp.f32 %v8304_v56  ;;  %12246 = vmatpush3.bf16.msra.mxu0 %v12956_v32 }
0x280f   : > { %13339 = vrcp.f32 %v8429_v48  ;;  %12247 = vmatprep.subr.bf16.mxu0 %v13864_v14 }
0x2810   : > { %13341 = vrcp.f32 %v8426_v11 }
0x2817   : > { %v13336_v38 = vpop.eup %13335 }
0x2818   : > { %v13338_v41 = vpop.eup %13337  ;;  %v8307_v58 = vmul.f32 %v13336_v38, %v16077_v34  ;;  %v12957_v38 = vld [vmem:[%s16809_s0 + $0x30] sm:$0xff]  }
0x2819   : > { %v8308_v10 = vmul.f32 %v13338_v41, %v16057_v3  ;;  %v13340_v51 = vpop.eup %13339  ;;  %12248 = vmatpush3.bf16.msra.mxu0 %v12957_v38 }
0x281a   : > { %v13342_v21 = vpop.eup %13341  ;;  %v8433_v34 = vmul.f32 %v13340_v51, %v16066_v42  ;;  %12249 = vmatprep.subr.bf16.mxu0 %v13864_v14 }
0x281b   : > { %v8309_v31 = vpack.c.bf16 %v8308_v10, %v8307_v58  ;;  %v8432_v3 = vmul.f32 %v13342_v21, %v16062_v6  ;;  %v12958_v58 = vld [vmem:[%s16809_s0 + $0x38] sm:$0xff]  }
0x281c   : > { %v8551_v35 = vpop.xlane.xlu0 %8550 }
0x281d   : > { %13343 = vrcp.f32 %v8551_v35  ;;  %v8434_v27 = vpack.c.bf16 %v8433_v34, %v8432_v3  ;;  %12250 = vmatpush3.bf16.msra.mxu0 %v12958_v58 }
0x281e   : > { %13345 = vrcp.f32 %v8554_v33  ;;  %12267 = vmatprep.subr.bf16.mxu0 %v13864_v14 }
0x2820   : > { %v8676_v28 = vpop.xlane.xlu1 %8675  ;;  %v8436_v9 = vpop.permute.xlu0 %8435 }
0x2824   : > { %v8679_v12 = vpop.xlane.xlu1 %8678  ;;  %v8561_v40 = vpop.permute.xlu0 %8560 }
0x2825   : > { %13347 = vrcp.f32 %v8679_v12 }
0x2826   : > { %13349 = vrcp.f32 %v8676_v28 }
0x2827   : > { %v13344_v46 = vpop.eup %13343 }
0x2828   : > { %v8311_v30 = vpop.permute.xlu1 %8310  ;;  %v13346_v19 = vpop.eup %13345  ;;  %v8557_v44 = vmul.f32 %v13344_v46, %v16084_v22 }
0x2829   : > { %12202 = vmatpush3.bf16.msra.mxu1 %v8311_v30  ;;  %v8558_v42 = vmul.f32 %v13346_v19, %v16072_v36  ;;  %v8686_v23 = vpop.permute.xlu0 %8685 }
0x282a   : > { %12213 = vmatprep.subr.bf16.mxu1 %v13864_v14 }
0x282b   : > { %v8559_v50 = vpack.c.bf16 %v8558_v42, %v8557_v44 }
0x282c   : > { %12204 = vmatmul.mubr.msk.bf16.vlgmr.msra.gmra.mrb[196].mxu1 %vm1481_vm3, %v8309_v31 }
0x282d   : > { %12214 = vmatpush3.bf16.msra.mxu1 %v8436_v9  ;;  %12215 = vmatprep.mubr.msk.bf16.mxu1 %vm13865_vm1, %v13864_v14 }
0x282e   : > { %12225 = vmatprep.subr.bf16.mxu1 %v13864_v14 }
0x282f   : > { %v13348_v6 = vpop.eup %13347 }
0x2830   : > { %v13350_v54 = vpop.eup %13349  ;;  %v8683_v1 = vmul.f32 %v13348_v6, %v16092_v20 }
0x2831   : > { %v8682_v22 = vmul.f32 %v13350_v54, %v16088_v7 }
0x2833   : > { %v8684_v62 = vpack.c.bf16 %v8683_v1, %v8682_v22 }
0x2834   : > { %12216 = vmatmul.mubr.msk.bf16.vlgmr.msra.gmra.mrb[200].mxu1 %vm1481_vm3, %v8434_v27 }
0x2835   : > { %12226 = vmatpush3.bf16.msra.mxu1 %v8561_v40  ;;  %12227 = vmatprep.mubr.msk.bf16.mxu1 %vm13865_vm1, %v13864_v14 }
0x2836   : > { %12237 = vmatprep.subr.bf16.mxu1 %v13864_v14 }
0x283c   : > { %12228 = vmatmul.mubr.msk.bf16.vlgmr.msra.gmra.mrb[204].mxu1 %vm1481_vm3, %v8559_v50 }
0x283d   : > { %12238 = vmatpush3.bf16.msra.mxu1 %v8686_v23  ;;  %12239 = vmatprep.mubr.msk.bf16.mxu1 %vm13865_vm1, %v13864_v14 }
0x283e   : > { %12255 = vmatprep.subr.bf16.mxu1 %v13864_v14 }
0x2844   : > { %12240 = vmatmul.mubr.msk.bf16.vlgmr.msra.gmra.mrb[208].mxu1 %vm1481_vm3, %v8684_v62 }
0x2845   : > { %12263 = vmatprep.mubr.msk.bf16.mxu1 %vm13865_vm1, %v13864_v14 }
0x28ae   : > { %v16151_v36 = vpop.f32.mrb[180].mxu1 }
0x28af   : > { %v12157_v4 = vpop.f32.mrb[181].mxu1 }
0x28b0   : > { %v16153_v39 = vpop.f32.mrb[182].mxu1 }
0x28b1   : > { %v12158_v29 = vpop.f32.mrb[183].mxu1 }
0x28b6   : > { %v7975_v47 = vpop.f32.mrb[184].mxu1 }
0x28b7   : > { %v12169_v49 = vpop.f32.mrb[185].mxu1 }
0x28b8   : > { %v7978_v37 = vpop.f32.mrb[186].mxu1 }
0x28b9   : > { %v12729_v20 = vpack.i.bf16 %v7978_v37, %v7975_v47  ;;  %v12170_v57 = vpop.f32.mrb[187].mxu1 }
0x28bb   : > { %12730 = vrot.lane.b32.xlu0 %v12729_v20, %s16805_s19 }
0x28be   : > { %v8100_v7 = vpop.f32.mrb[188].mxu1 }
0x28bf   : > { %v12181_v25 = vpop.f32.mrb[189].mxu1 }
0x28c0   : > { %v8103_v61 = vpop.f32.mrb[190].mxu1 }
0x28c1   : > { %v12734_v60 = vpack.i.bf16 %v8103_v61, %v8100_v7  ;;  %v12182_v2 = vpop.f32.mrb[191].mxu1 }
0x28c3   : > { %12735 = vrot.lane.b32.xlu1 %v12734_v60, %s16803_s7 }
0x28c6   : > { %v8225_v13 = vpop.f32.mrb[192].mxu1 }
0x28c7   : > { %v12193_v43 = vpop.f32.mrb[193].mxu1 }
0x28c8   : > { %v8228_v52 = vpop.f32.mrb[194].mxu1 }
0x28c9   : > { %v12739_v63 = vpack.i.bf16 %v8228_v52, %v8225_v13  ;;  %v12194_v16 = vpop.f32.mrb[195].mxu1 }
0x28cb   : > { %12740 = vrot.lane.b32.xlu0 %v12739_v63, %s16801_s18 }
0x28ff   : > { %v8350_v8 = vpop.f32.mrb[196].mxu1 }
0x2900   : > { %v12205_v53 = vpop.f32.mrb[197].mxu1 }
0x2901   : > { %v8353_v26 = vpop.f32.mrb[198].mxu1 }
0x2902   : > { %v12744_v24 = vpack.i.bf16 %v8353_v26, %v8350_v8  ;;  %v12206_v59 = vpop.f32.mrb[199].mxu1  ;;  %v12959_v26 = vld [vmem:[#allocation10 + $0x20] sm:$0xff]  }
0x2903   : > { %v12961_v59 = vld [vmem:[#allocation10 + $0x30] sm:$0xff]  }
0x2904   : > { %12745 = vrot.lane.b32.xlu1 %v12744_v24, %s16784_s14  ;;  %v12960_v24 = vld [vmem:[#allocation10 + $0x28] sm:$0xff]  }
0x2907   : > { %v8475_v56 = vpop.f32.mrb[200].mxu1 }
0x2908   : > { %v12217_v11 = vpop.f32.mrb[201].mxu1 }
0x2909   : > { %v8478_v48 = vpop.f32.mrb[202].mxu1  ;;  %v11234_v11 = vld [vmem:[%s16810_s5 + $0x1] ss:$0 sm:$0xff] }
0x290a   : > { %v12749_v33 = vpack.i.bf16 %v8478_v48, %v8475_v56  ;;  %v12218_v28 = vpop.f32.mrb[203].mxu1  ;;  %v12962_v56 = vld [vmem:[#allocation10 + $0x38] sm:$0xff]  }
0x290c   : > { %12750 = vrot.lane.b32.xlu0 %v12749_v33, %s16785_s28 }
0x290f   : > { %v8600_v12 = vpop.f32.mrb[204].mxu1 }
0x2910   : > { %v12229_v41 = vpop.f32.mrb[205].mxu1 }
0x2911   : > { %v8603_v35 = vpop.f32.mrb[206].mxu1 }
0x2912   : > { %v12754_v10 = vpack.i.bf16 %v8603_v35, %v8600_v12  ;;  %v12230_v30 = vpop.f32.mrb[207].mxu1 }
0x2914   : > { %12755 = vrot.lane.b32.xlu1 %v12754_v10, %s16786_s11 }
0x2917   : > { %v8725_v31 = vpop.f32.mrb[208].mxu1 }
0x2918   : > { %v12241_v51 = vpop.f32.mrb[209].mxu1 }
0x2919   : > { %v8728_v9 = vpop.f32.mrb[210].mxu1 }
0x291a   : > { %v12759_v21 = vpack.i.bf16 %v8728_v9, %v8725_v31  ;;  %v12242_v34 = vpop.f32.mrb[211].mxu1 }
0x291c   : > { %12760 = vrot.lane.b32.xlu0 %v12759_v21, %s16787_s12 }
0x292d   : > { %v12731_v3 = vpop.permute.xlu0 %12730 }
0x292e   : > { %v12733_v19 = vunpack.i.h.bf16 %v12731_v3  ;;  %v12732_v44 = vunpack.i.l.bf16 %v12731_v3 }
0x2930   : > { %v8789_v4 = vsel %vm1431_vm2, %v16153_v39, %v12733_v19  ;;  %v8788_v29 = vsel %vm1431_vm2, %v16151_v36, %v12732_v44 }
0x2935   : > { %v12736_v27 = vpop.permute.xlu1 %12735 }
0x2936   : > { %v12738_v42 = vunpack.i.h.bf16 %v12736_v27  ;;  %v12737_v50 = vunpack.i.l.bf16 %v12736_v27 }
0x2938   : > { %v8791_v37 = vsel %vm1481_vm3, %v8789_v4, %v12738_v42  ;;  %v8790_v20 = vsel %vm1481_vm3, %v8788_v29, %v12737_v50 }
0x293d   : > { %v12741_v46 = vpop.permute.xlu0 %12740 }
0x293e   : > { %v12743_v23 = vunpack.i.h.bf16 %v12741_v46  ;;  %v12742_v54 = vunpack.i.l.bf16 %v12741_v46 }
0x2940   : > { %v8792_v25 = vsel %vm2471_vm4, %v8790_v20, %v12742_v54  ;;  %v8793_v61 = vsel %vm2471_vm4, %v8791_v37, %v12743_v23  ;;  %v12963_v23 = vld [vmem:[#allocation7 + $0x20] sm:$0xff]   ;;  %v12964_v54 = vld [vmem:[#allocation7 + $0x28] sm:$0xff]  }
0x2941   : > { %12256 = vmatpush3.bf16.msra.mxu1 %v12963_v23 }
0x2942   : > { %12257 = vmatprep.subr.bf16.mxu1 %v13864_v14 }
0x2945   : > { %12258 = vmatpush3.bf16.msra.mxu1 %v12964_v54 }
0x2946   : > { %12259 = vmatprep.subr.bf16.mxu1 %v13864_v14 }
0x2976   : > { %v12746_v40 = vpop.permute.xlu1 %12745 }
0x2977   : > { %v12748_v22 = vunpack.i.h.bf16 %v12746_v40  ;;  %v12747_v62 = vunpack.i.l.bf16 %v12746_v40 }
0x2979   : > { %v8794_v60 = vsel %vm2474_vm5, %v8792_v25, %v12747_v62  ;;  %v8795_v2 = vsel %vm2474_vm5, %v8793_v61, %v12748_v22  ;;  %v12966_v22 = vld [vmem:[#allocation7 + $0x38] sm:$0xff]   ;;  %v11242_v25 = vld [vmem:[%s16812_s6 + $0x1] ss:$0 sm:$0xff] }
0x297e   : > { %v12751_v6 = vpop.permute.xlu0 %12750 }
0x297f   : > { %v12753_v47 = vunpack.i.h.bf16 %v12751_v6  ;;  %v12752_v49 = vunpack.i.l.bf16 %v12751_v6 }
0x2981   : > { %v8796_v13 = vsel %vm2477_vm6, %v8794_v60, %v12752_v49  ;;  %v8797_v36 = vsel %vm2477_vm6, %v8795_v2, %v12753_v47 }
0x2986   : > { %v12756_v1 = vpop.permute.xlu1 %12755 }
0x2987   : > { %v12758_v57 = vunpack.i.h.bf16 %v12756_v1  ;;  %v12757_v7 = vunpack.i.l.bf16 %v12756_v1  ;;  %v12965_v1 = vld [vmem:[#allocation7 + $0x30] sm:$0xff]  }
0x2988   : > { %12260 = vmatpush3.bf16.msra.mxu1 %v12965_v1 }
0x2989   : > { %v8798_v63 = vsel %vm2480_vm7, %v8796_v13, %v12757_v7  ;;  %v8799_v16 = vsel %vm2480_vm7, %v8797_v36, %v12758_v57  ;;  %12261 = vmatprep.subr.bf16.mxu1 %v13864_v14  ;;  %v11243_v13 = vld [vmem:[%s16814_s9 + $0x1] ss:$0 sm:$0xff] }
0x298c   : > { %12262 = vmatpush3.bf16.msra.mxu1 %v12966_v22 }
0x298d   : > { %12279 = vmatprep.subr.bf16.mxu1 %v13864_v14 }
0x298e   : > { %v12761_v39 = vpop.permute.xlu0 %12760 }
0x298f   : > { %v12763_v43 = vunpack.i.h.bf16 %v12761_v39  ;;  %v12762_v52 = vunpack.i.l.bf16 %v12761_v39 }
0x2991   : > { %v8800_v8 = vsel %vm2483_vm8, %v8798_v63, %v12762_v52  ;;  %v8801_v53 = vsel %vm2483_vm8, %v8799_v16, %v12763_v43 }
0x2992   : > { %v8802_v18 = vpack.c.bf16 %v8801_v53, %v8800_v8  ;;  %v11244_v8 = vld [vmem:[#allocation8 + $0x1] ss:$0 sm:$0xff] }
0x2994   : > { %12252 = vmatmul.mubr.msk.bf16.vlgmr.msra.gmra.mrb[172].mxu0 %vm1370_vm0, %v8802_v18 }
0x2995   : > { %12268 = vmatpush3.bf16.msra.mxu0 %v12959_v26  ;;  %12275 = vmatprep.mubr.msk.bf16.mxu0 %vm13865_vm1, %v13864_v14 }
0x2996   : > { %12269 = vmatprep.subr.bf16.mxu0 %v13864_v14 }
0x2999   : > { %12270 = vmatpush3.bf16.msra.mxu0 %v12960_v24 }
0x299a   : > { %12271 = vmatprep.subr.bf16.mxu0 %v13864_v14 }
0x299d   : > { %12272 = vmatpush3.bf16.msra.mxu0 %v12961_v59 }
0x299e   : > { %12273 = vmatprep.subr.bf16.mxu0 %v13864_v14 }
0x29a1   : > { %12274 = vmatpush3.bf16.msra.mxu0 %v12962_v56 }
0x29a2   : > { %12291 = vmatprep.subr.bf16.mxu0 %v13864_v14 }
0x29a4   : > { %12276 = vmatmul.mubr.msk.bf16.vlgmr.msra.gmra.mrb[176].mxu0 %vm1370_vm0, %v15490_v55  ;;  %v11250_v55 = vld [vmem:[#allocation11 + $0x1] ss:$0 sm:$0xff] }
0x29a5   : > { %12293 = vmatprep.mubr.msk.bf16.mxu0 %vm13865_vm1, %v13864_v14 }
0x2a67   : > { %v8870_v32 = vpop.f32.mrb[172].mxu0 }
0x2a68   : > { %v8871_v48 = vadd.f32 %v11234_v11, %v8870_v32  ;;  %v12253_v33 = vpop.f32.mrb[173].mxu0 }
0x2a69   : > { %v8873_v28 = vpop.f32.mrb[174].mxu0 }
0x2a6a   : > { %v8877_v38 = vadd.f32 %v8871_v48, %v15855_v45  ;;  %v8874_v12 = vadd.f32 %v11234_v11, %v8873_v28  ;;  %v12254_v41 = vpop.f32.mrb[175].mxu0 }
0x2a6c   : > { %v8878_v58 = vadd.f32 %v8874_v12, %v15857_v5  ;;  %v8883_v35 = vsel %vm1370_vm0, %v8877_v38, 0.0 }
0x2a6d   : > { %8884 = vadd.xlane.f32.xlu1 %v8883_v35 }
0x2a6e   : > { %v8886_v10 = vsel %vm1370_vm0, %v8878_v58, 0.0 }
0x2a6f   : > { %8887 = vadd.xlane.f32.xlu0 %v8886_v10 }
0x2a77   : > { %v9086_v30 = vpop.f32.mrb[176].mxu0 }
0x2a78   : > { %v12277_v31 = vpop.f32.mrb[177].mxu0  ;;  %v9087_v9 = vadd.f32 %v11250_v55, %v9086_v30 }
0x2a79   : > { %v9089_v51 = vpop.f32.mrb[178].mxu0 }
0x2a7a   : > { %v9090_v21 = vadd.f32 %v11250_v55, %v9089_v51  ;;  %v12278_v34 = vpop.f32.mrb[179].mxu0 }
0x2a7c   : > { %v16202_v3 = vpack.c.bf16 %v9090_v21, %v9087_v9 }
0x2a7e   : > { %v9110_v16 = vsel %vm1431_vm2, %v16202_v3, 0 }
0x2afa   : > { %v8885_v45 = vpop.xlane.xlu1 %8884 }
0x2afb   : > { %v8889_v27 = vmul.f32 0.015625, %v8885_v45 }
0x2afc   : > { %v8888_v46 = vpop.xlane.xlu0 %8887 }
0x2afd   : > { %v8891_v40 = vsub.f32 %v8877_v38, %v8889_v27  ;;  %v8890_v5 = vmul.f32 0.015625, %v8888_v46 }
0x2aff   : > { %v8892_v19 = vsub.f32 %v8878_v58, %v8890_v5  ;;  %v8893_v44 = vmul.f32 %v8891_v40, %v8891_v40 }
0x2b01   : > { %v8895_v42 = vsel %vm1370_vm0, %v8893_v44, 0.0  ;;  %v8894_v50 = vmul.f32 %v8892_v19, %v8892_v19 }
0x2b02   : > { %8896 = vadd.xlane.f32.xlu0 %v8895_v42 }
0x2b03   : > { %v8898_v6 = vsel %vm1370_vm0, %v8894_v50, 0.0 }
0x2b04   : > { %8899 = vadd.xlane.f32.xlu1 %v8898_v6 }
0x2b18   : > { %9229 = vrot.lane.b32.xlu0 %v16202_v3, %s16797_s17 }
0x2b8f   : > { %v8897_v62 = vpop.xlane.xlu0 %8896 }
0x2b90   : > { %v8901_v4 = vmul.f32 0.015625, %v8897_v62 }
0x2b91   : > { %v8900_v29 = vpop.xlane.xlu1 %8899 }
0x2b92   : > { %v8903_v47 = vadd.f32 1e-05, %v8901_v4  ;;  %v8902_v49 = vmul.f32 0.015625, %v8900_v29 }
0x2b93   : > { %v9230_v37 = vpop.permute.xlu0 %9229 }
0x2b94   : > { %13351 = vrsqrt.f32 %v8903_v47  ;;  %v8904_v20 = vadd.f32 1e-05, %v8902_v49  ;;  %v9235_v57 = vsel %vm1431_vm2, %v9230_v37, 0 }
0x2b95   : > { %12292 = vmatpush3.bf16.xpose.msra.mxu0 %v9235_v57 }
0x2b96   : > { %13353 = vrsqrt.f32 %v8904_v20  ;;  %12303 = vmatprep.subr.bf16.mxu0 %v13864_v14 }
0x2b9e   : > { %v13352_v7 = vpop.eup %13351 }
0x2b9f   : > { %v8907_v61 = vmul.f32 %v13352_v7, %v8891_v40 }
0x2ba0   : > { %v13354_v60 = vpop.eup %13353 }
0x2ba1   : > { %v8915_v2 = vmul.f32 %v11242_v25, %v8907_v61  ;;  %v8908_v39 = vmul.f32 %v13354_v60, %v8892_v19 }
0x2ba3   : > { %v8916_v36 = vmul.f32 %v11242_v25, %v8908_v39  ;;  %v16216_v43 = vadd.f32 %v11243_v13, %v8915_v2 }
0x2ba5   : > { %v16218_v52 = vadd.f32 %v11243_v13, %v8916_v36 }
0x2ba7   : > { %v8925_v63 = vpack.c.bf16 %v16218_v52, %v16216_v43 }
0x2ba9   : > { %12264 = vmatmul.mubr.msk.bf16.vlgmr.msra.gmra.mrb[212].mxu1 %vm1370_vm0, %v8925_v63 }
0x2baa   : > { %12280 = vmatpush3.bf16.xpose.msra.mxu1 %v9110_v16  ;;  %12281 = vmatprep.mubr.msk.bf16.mxu1 %vm13865_vm1, %v13864_v14 }
0x2bab   : > { %12285 = vmatprep.subr.bf16.mxu1 %v13864_v14 }
0x2c7c   : > { %v9004_v53 = vpop.f32.mrb[212].mxu1 }
0x2c7d   : > { %v12265_v26 = vpop.f32.mrb[213].mxu1  ;;  %v9005_v24 = vadd.f32 %v11244_v8, %v9004_v53 }
0x2c7e   : > { %v9007_v18 = vpop.f32.mrb[214].mxu1 }
0x2c7f   : > { %v9008_v59 = vadd.f32 %v11244_v8, %v9007_v18  ;;  %v12266_v56 = vpop.f32.mrb[215].mxu1 }
0x2c81   : > { %v9104_v11 = vpack.c.bf16 %v9008_v59, %v9005_v24 }
0x2c83   : > { %9227 = vrot.lane.b32.xlu1 %v9104_v11, %s16797_s17  ;;  %9350 = vrot.lane.b32.xlu0 %v9104_v11, %s16798_s29  ;;  %s16822_s17 = sld [smem:[#allocation64_spill]] }
0x2c84   : > { %12282 = vmatmul.mubr.msk.bf16.vlgmr.msra.gmra.mrb[216].mxu1 %vm1431_vm2, %v9104_v11 }
0x2c85   : > { %12287 = vmatprep.mubr.msk.bf16.mxu1 %vm13865_vm1, %v13864_v14 }
0x2c87   : > { %9352 = vrot.lane.b32.xlu1 %v16202_v3, %s16798_s29  ;;  %9473 = vrot.lane.b32.xlu0 %v9104_v11, %s16799_s30  ;;  %s11360_s29 = sshll.u32 %s14104_s26, 8  ;;  %s13881_s26 = smov [#allocation19]  }
0x2c8b   : > { %9475 = vrot.lane.b32.xlu1 %v16202_v3, %s16799_s30  ;;  %9596 = vrot.lane.b32.xlu0 %v9104_v11, %s16800_s2  ;;  %s16823_s30 = sshll.u32 %s14331_s10, 4 }
0x2c8f   : > { %9598 = vrot.lane.b32.xlu1 %v16202_v3, %s16800_s2  ;;  %9719 = vrot.lane.b32.xlu0 %v9104_v11, %s16802_s16  ;;  %s13723_s2 = sshll.u32 %s13881_s26, 4  ;;  %s13724_s2 = int_to_ptr.vmem [resolvable:$false] %s13723_s2 }
0x2c93   : > { %9721 = vrot.lane.b32.xlu1 %v16202_v3, %s16802_s16  ;;  %9842 = vrot.lane.b32.xlu0 %v9104_v11, %s16804_s22 }
0x2c97   : > { %9844 = vrot.lane.b32.xlu1 %v16202_v3, %s16804_s22  ;;  %9965 = vrot.lane.b32.xlu0 %v9104_v11, %s16806_s15  ;;  %s10669_s22 = scalar_lea.sflag [#allocation4], %s14331_s10 }
0x2c9b   : > { %9967 = vrot.lane.b32.xlu1 %v16202_v3, %s16806_s15  ;;  %9179 = vrot.lane.b32.xlu0 %v16202_v3, %s16796_s13  ;;  %s16821_s13 = sld [smem:[#allocation63_spill]]  ;;  %s1303_s15 = scalar_lea.vmem [#allocation19], %s16823_s30 }
0x2c9c   : > { %s10682_s16 = sshll.u32 %s1303_s15, 4  ;;  %s16569_s16 = int_to_ptr.vmem [resolvable:$true] %s10682_s16 }
0x2c9d   : > { %p13726_p0 = scmp.lt.s32.totalorder %s16569_s16, %s13724_s2 }
0x2cf5   : > { %v9228_v32 = vpop.permute.xlu1 %9227  ;;  %v9351_v48 = vpop.permute.xlu0 %9350 }
0x2cf6   : > { %12294 = vmatmul.mubr.msk.bf16.vlgmr.msra.gmra.mrb[180].mxu0 %vm1431_vm2, %v9228_v32 }
0x2cf7   : > { %12305 = vmatprep.mubr.msk.bf16.mxu0 %vm13865_vm1, %v13864_v14 }
0x2cf9   : > { %v9353_v33 = vpop.permute.xlu1 %9352  ;;  %v9474_v28 = vpop.permute.xlu0 %9473 }
0x2cfa   : > { %v9358_v38 = vsel %vm1431_vm2, %v9353_v33, 0 }
0x2cfb   : > { %12304 = vmatpush3.bf16.xpose.msra.mxu0 %v9358_v38 }
0x2cfc   : > { %12315 = vmatprep.subr.bf16.mxu0 %v13864_v14 }
0x2cfd   : > { %v9597_v12 = vpop.permute.xlu0 %9596  ;;  %v9476_v41 = vpop.permute.xlu1 %9475 }
0x2cfe   : > { %v9481_v35 = vsel %vm1431_vm2, %v9476_v41, 0 }
0x2d01   : > { %v9720_v58 = vpop.permute.xlu0 %9719  ;;  %v9599_v55 = vpop.permute.xlu1 %9598 }
0x2d02   : > { %12306 = vmatmul.mubr.msk.bf16.vlgmr.msra.gmra.mrb[184].mxu0 %vm1431_vm2, %v9351_v48  ;;  %v9604_v31 = vsel %vm1431_vm2, %v9599_v55, 0 }
0x2d03   : > { %12316 = vmatpush3.bf16.xpose.msra.mxu0 %v9481_v35  ;;  %12317 = vmatprep.mubr.msk.bf16.mxu0 %vm13865_vm1, %v13864_v14 }
0x2d04   : > { %12327 = vmatprep.subr.bf16.mxu0 %v13864_v14 }
0x2d05   : > { %v9843_v10 = vpop.permute.xlu0 %9842  ;;  %v9722_v9 = vpop.permute.xlu1 %9721 }
0x2d06   : > { %v9727_v21 = vsel %vm1431_vm2, %v9722_v9, 0 }
0x2d09   : > { %v9966_v30 = vpop.permute.xlu0 %9965  ;;  %v9845_v34 = vpop.permute.xlu1 %9844 }
0x2d0a   : > { %12318 = vmatmul.mubr.msk.bf16.vlgmr.msra.gmra.mrb[188].mxu0 %vm1431_vm2, %v9474_v28  ;;  %v9850_v45 = vsel %vm1431_vm2, %v9845_v34, 0 }
0x2d0b   : > { %12328 = vmatpush3.bf16.xpose.msra.mxu0 %v9604_v31  ;;  %12329 = vmatprep.mubr.msk.bf16.mxu0 %vm13865_vm1, %v13864_v14 }
0x2d0c   : > { %12339 = vmatprep.subr.bf16.mxu0 %v13864_v14 }
0x2d0d   : > { %v9180_v51 = vpop.permute.xlu0 %9179  ;;  %v9968_v27 = vpop.permute.xlu1 %9967 }
0x2d0e   : > { %12286 = vmatpush3.bf16.msra.mxu1 %v9180_v51  ;;  %v9973_v46 = vsel %vm1431_vm2, %v9968_v27, 0 }
0x2d0f   : > { %12297 = vmatprep.subr.bf16.mxu1 %v13864_v14 }
0x2d12   : > { %12330 = vmatmul.mubr.msk.bf16.vlgmr.msra.gmra.mrb[192].mxu0 %vm1431_vm2, %v9597_v12 }
0x2d13   : > { %12340 = vmatpush3.bf16.xpose.msra.mxu0 %v9727_v21  ;;  %12341 = vmatprep.mubr.msk.bf16.mxu0 %vm13865_vm1, %v13864_v14 }
0x2d14   : > { %12351 = vmatprep.subr.bf16.mxu0 %v13864_v14 }
0x2d1a   : > { %12342 = vmatmul.mubr.msk.bf16.vlgmr.msra.gmra.mrb[196].mxu0 %vm1431_vm2, %v9720_v58 }
0x2d1b   : > { %12352 = vmatpush3.bf16.xpose.msra.mxu0 %v9850_v45  ;;  %12353 = vmatprep.mubr.msk.bf16.mxu0 %vm13865_vm1, %v13864_v14 }
0x2d1c   : > { %12363 = vmatprep.subr.bf16.mxu0 %v13864_v14 }
0x2d22   : > { %12354 = vmatmul.mubr.msk.bf16.vlgmr.msra.gmra.mrb[200].mxu0 %vm1431_vm2, %v9843_v10 }
0x2d23   : > { %12364 = vmatpush3.bf16.xpose.msra.mxu0 %v9973_v46  ;;  %12365 = vmatprep.mubr.msk.bf16.mxu0 %vm13865_vm1, %v13864_v14 }
0x2d24   : > { %12375 = vmatprep.subr.bf16.mxu0 %v13864_v14 }
0x2d2a   : > { %12366 = vmatmul.mubr.msk.bf16.vlgmr.msra.gmra.mrb[204].mxu0 %vm1431_vm2, %v9966_v30 }
0x2d2b   : > { %12383 = vmatprep.mubr.msk.bf16.mxu0 %vm13865_vm1, %v13864_v14 }
0x2d57   : > { %v9146_v40 = vpop.f32.mrb[216].mxu1 }
0x2d58   : > { %v9153_v5 = vmul.f32 0.35355338, %v9146_v40  ;;  %v12283_v19 = vpop.f32.mrb[217].mxu1 }
0x2d59   : > { %v9149_v44 = vpop.f32.mrb[218].mxu1 }
0x2d5a   : > { %v9154_v42 = vmul.f32 0.35355338, %v9149_v44  ;;  %v12284_v50 = vpop.f32.mrb[219].mxu1  ;;  %v9155_v6 = vsel %vm1481_vm3, %v9153_v5, -inf }
0x2d5b   : > { %9156 = vmax.xlane.f32.xlu1 %v9155_v6 }
0x2d5c   : > { %v9158_v23 = vsel %vm1481_vm3, %v9154_v42, -inf }
0x2d5d   : > { %9159 = vmax.xlane.f32.xlu0 %v9158_v23 }
0x2d6c   : > { %9303 = vrot.lane.b32.xlu1 %v16202_v3, %s16787_s12 }
0x2dc9   : > { %v9271_v54 = vpop.f32.mrb[180].mxu0 }
0x2dca   : > { %v16290_v1 = vmul.f32 0.35355338, %v9271_v54  ;;  %v12295_v22 = vpop.f32.mrb[181].mxu0 }
0x2dcb   : > { %v9274_v62 = vpop.f32.mrb[182].mxu0 }
0x2dcc   : > { %v16292_v4 = vmul.f32 0.35355338, %v9274_v62  ;;  %v12296_v29 = vpop.f32.mrb[183].mxu0  ;;  %v9280_v47 = vsel %vm1481_vm3, %v16290_v1, -inf }
0x2dcd   : > { %9281 = vmax.xlane.f32.xlu0 %v9280_v47 }
0x2dce   : > { %v9283_v49 = vsel %vm1481_vm3, %v16292_v4, -inf }
0x2dcf   : > { %9284 = vmax.xlane.f32.xlu1 %v9283_v49 }
0x2dd5   : > { %v9394_v37 = vpop.f32.mrb[184].mxu0 }
0x2dd6   : > { %v16298_v20 = vmul.f32 0.35355338, %v9394_v37  ;;  %v12307_v57 = vpop.f32.mrb[185].mxu0 }
0x2dd7   : > { %v9397_v7 = vpop.f32.mrb[186].mxu0 }
0x2dd8   : > { %v16300_v25 = vmul.f32 0.35355338, %v9397_v7  ;;  %v12308_v61 = vpop.f32.mrb[187].mxu0  ;;  %v9403_v60 = vsel %vm1481_vm3, %v16298_v20, -inf }
0x2dd9   : > { %9404 = vmax.xlane.f32.xlu0 %v9403_v60 }
0x2dda   : > { %v9406_v2 = vsel %vm1481_vm3, %v16300_v25, -inf }
0x2ddb   : > { %9407 = vmax.xlane.f32.xlu1 %v9406_v2 }
0x2ddd   : > { %v9517_v39 = vpop.f32.mrb[188].mxu0 }
0x2dde   : > { %v16306_v13 = vmul.f32 0.35355338, %v9517_v39  ;;  %v12319_v36 = vpop.f32.mrb[189].mxu0 }
0x2ddf   : > { %v9520_v63 = vpop.f32.mrb[190].mxu0 }
0x2de0   : > { %v16308_v16 = vmul.f32 0.35355338, %v9520_v63  ;;  %v12320_v8 = vpop.f32.mrb[191].mxu0  ;;  %v9526_v53 = vsel %vm1481_vm3, %v16306_v13, -inf }
0x2de1   : > { %9527 = vmax.xlane.f32.xlu0 %v9526_v53 }
0x2de2   : > { %v9529_v26 = vsel %vm1481_vm3, %v16308_v16, -inf }
0x2de3   : > { %9530 = vmax.xlane.f32.xlu1 %v9529_v26 }
0x2de5   : > { %v9640_v18 = vpop.f32.mrb[192].mxu0 }
0x2de6   : > { %v16314_v24 = vmul.f32 0.35355338, %v9640_v18  ;;  %v12331_v59 = vpop.f32.mrb[193].mxu0 }
0x2de7   : > { %v9643_v56 = vpop.f32.mrb[194].mxu0 }
0x2de8   : > { %v9157_v11 = vpop.xlane.xlu1 %9156  ;;  %v16316_v32 = vmul.f32 0.35355338, %v9643_v56  ;;  %v12332_v48 = vpop.f32.mrb[195].mxu0  ;;  %v9649_v33 = vsel %vm1481_vm3, %v16314_v24, -inf }
0x2de9   : > { %v9161_v28 = vsub.f32 %v9153_v5, %v9157_v11  ;;  %9650 = vmax.xlane.f32.xlu0 %v9649_v33 }
0x2dea   : > { %v9160_v38 = vpop.xlane.xlu0 %9159  ;;  %v9652_v12 = vsel %vm1481_vm3, %v16316_v32, -inf }
0x2deb   : > { %v9163_v41 = vmul.f32 1.442695, %v9161_v28  ;;  %v9162_v58 = vsub.f32 %v9154_v42, %v9160_v38  ;;  %9653 = vmax.xlane.f32.xlu1 %v9652_v12 }
0x2dec   : > { %v16358_v61 = vpop.permute.xlu1 %9303 }
0x2ded   : > { %v9165_v35 = vmul.f32 1.442695, %v9162_v58  ;;  %v9763_v10 = vpop.f32.mrb[196].mxu0  ;;  %13355 = vpow2.f32 %v9163_v41 }
0x2dee   : > { %v16322_v55 = vmul.f32 0.35355338, %v9763_v10  ;;  %v12343_v30 = vpop.f32.mrb[197].mxu0 }
0x2def   : > { %v9766_v31 = vpop.f32.mrb[198].mxu0  ;;  %13357 = vpow2.f32 %v9165_v35 }
0x2df0   : > { %v16324_v51 = vmul.f32 0.35355338, %v9766_v31  ;;  %v12344_v9 = vpop.f32.mrb[199].mxu0  ;;  %v9772_v21 = vsel %vm1481_vm3, %v16322_v55, -inf }
0x2df1   : > { %9773 = vmax.xlane.f32.xlu0 %v9772_v21 }
0x2df2   : > { %v9775_v34 = vsel %vm1481_vm3, %v16324_v51, -inf }
0x2df3   : > { %9776 = vmax.xlane.f32.xlu1 %v9775_v34 }
0x2df5   : > { %v9886_v45 = vpop.f32.mrb[200].mxu0 }
0x2df6   : > { %v16330_v27 = vmul.f32 0.35355338, %v9886_v45  ;;  %v12355_v46 = vpop.f32.mrb[201].mxu0 }
0x2df7   : > { %v9889_v40 = vpop.f32.mrb[202].mxu0  ;;  %v16336_v42 = vpop.eup %13355 }
0x2df8   : > { %v16332_v5 = vmul.f32 0.35355338, %v9889_v40  ;;  %v12356_v19 = vpop.f32.mrb[203].mxu0  ;;  %v9895_v44 = vsel %vm1481_vm3, %v16330_v27, -inf  ;;  %v9167_v23 = vsel %vm1481_vm3, %v16336_v42, 0.0 }
0x2df9   : > { %9896 = vmax.xlane.f32.xlu0 %v9895_v44  ;;  %v16340_v6 = vpop.eup %13357 }
0x2dfa   : > { %v9898_v50 = vsel %vm1481_vm3, %v16332_v5, -inf  ;;  %v9170_v29 = vsel %vm1481_vm3, %v16340_v6, 0.0 }
0x2dfb   : > { %9899 = vmax.xlane.f32.xlu1 %v9898_v50 }
0x2dfd   : > { %9168 = vadd.xlane.f32.xlu0 %v9167_v23  ;;  %v10009_v54 = vpop.f32.mrb[204].mxu0 }
0x2dfe   : > { %v16344_v22 = vmul.f32 0.35355338, %v10009_v54  ;;  %v12367_v62 = vpop.f32.mrb[205].mxu0 }
0x2dff   : > { %9171 = vadd.xlane.f32.xlu1 %v9170_v29  ;;  %v10012_v47 = vpop.f32.mrb[206].mxu0 }
0x2e00   : > { %v16348_v49 = vmul.f32 0.35355338, %v10012_v47  ;;  %v12368_v37 = vpop.f32.mrb[207].mxu0  ;;  %v10018_v57 = vsel %vm1481_vm3, %v16344_v22, -inf }
0x2e01   : > { %10019 = vmax.xlane.f32.xlu0 %v10018_v57 }
0x2e02   : > { %v10021_v7 = vsel %vm1481_vm3, %v16348_v49, -inf }
0x2e03   : > { %10022 = vmax.xlane.f32.xlu1 %v10021_v7 }
0x2e14   : > { %9549 = vrot.lane.b32.xlu1 %v16202_v3, %s16785_s28 }
0x2e17   : > { %9426 = vrot.lane.b32.xlu0 %v16202_v3, %s16786_s11 }
0x2e5a   : > { %v9282_v60 = vpop.xlane.xlu0 %9281 }
0x2e5b   : > { %v9286_v2 = vsub.f32 %v16290_v1, %v9282_v60 }
0x2e5c   : > { %v9285_v39 = vpop.xlane.xlu1 %9284 }
0x2e5d   : > { %v9288_v36 = vmul.f32 1.442695, %v9286_v2  ;;  %v9287_v63 = vsub.f32 %v16292_v4, %v9285_v39 }
0x2e5f   : > { %13359 = vpow2.f32 %v9288_v36  ;;  %v9290_v8 = vmul.f32 1.442695, %v9287_v63 }
0x2e61   : > { %13361 = vpow2.f32 %v9290_v8 }
0x2e66   : > { %v9405_v53 = vpop.xlane.xlu0 %9404 }
0x2e67   : > { %v9409_v26 = vsub.f32 %v16298_v20, %v9405_v53 }
0x2e68   : > { %v9408_v18 = vpop.xlane.xlu1 %9407 }
0x2e69   : > { %v16363_v59 = vpop.eup %13359  ;;  %v9411_v56 = vmul.f32 1.442695, %v9409_v26  ;;  %v9410_v11 = vsub.f32 %v16300_v25, %v9408_v18 }
0x2e6a   : > { %v9292_v48 = vsel %vm1481_vm3, %v16363_v59, 0.0 }
0x2e6b   : > { %v16368_v1 = vpop.eup %13361  ;;  %13363 = vpow2.f32 %v9411_v56  ;;  %v9413_v33 = vmul.f32 1.442695, %v9410_v11  ;;  %9293 = vadd.xlane.f32.xlu0 %v9292_v48 }
0x2e6c   : > { %v9295_v4 = vsel %vm1481_vm3, %v16368_v1, 0.0 }
0x2e6d   : > { %13365 = vpow2.f32 %v9413_v33  ;;  %9296 = vadd.xlane.f32.xlu1 %v9295_v4 }
0x2e6e   : > { %v9528_v20 = vpop.xlane.xlu0 %9527 }
0x2e6f   : > { %v9532_v28 = vsub.f32 %v16306_v13, %v9528_v20 }
0x2e70   : > { %v9531_v38 = vpop.xlane.xlu1 %9530 }
0x2e71   : > { %v9534_v12 = vmul.f32 1.442695, %v9532_v28  ;;  %v9533_v25 = vsub.f32 %v16308_v16, %v9531_v38 }
0x2e73   : > { %13367 = vpow2.f32 %v9534_v12  ;;  %v9536_v41 = vmul.f32 1.442695, %v9533_v25 }
0x2e75   : > { %v16374_v58 = vpop.eup %13363  ;;  %13369 = vpow2.f32 %v9536_v41 }
0x2e76   : > { %v9651_v35 = vpop.xlane.xlu0 %9650  ;;  %v9415_v10 = vsel %vm1481_vm3, %v16374_v58, 0.0 }
0x2e77   : > { %v16378_v30 = vpop.eup %13365  ;;  %v9655_v31 = vsub.f32 %v16314_v24, %v9651_v35  ;;  %9416 = vadd.xlane.f32.xlu0 %v9415_v10 }
0x2e78   : > { %v9654_v9 = vpop.xlane.xlu1 %9653  ;;  %v9418_v13 = vsel %vm1481_vm3, %v16378_v30, 0.0 }
0x2e79   : > { %v9657_v21 = vmul.f32 1.442695, %v9655_v31  ;;  %v9656_v16 = vsub.f32 %v16316_v32, %v9654_v9  ;;  %9419 = vadd.xlane.f32.xlu1 %v9418_v13 }
0x2e7b   : > { %13371 = vpow2.f32 %v9657_v21  ;;  %v9659_v34 = vmul.f32 1.442695, %v9656_v16 }
0x2e7d   : > { %v16384_v45 = vpop.eup %13367  ;;  %13373 = vpow2.f32 %v9659_v34 }
0x2e7e   : > { %v9538_v46 = vsel %vm1481_vm3, %v16384_v45, 0.0  ;;  %v9774_v32 = vpop.xlane.xlu0 %9773 }
0x2e7f   : > { %v16388_v40 = vpop.eup %13369  ;;  %9539 = vadd.xlane.f32.xlu0 %v9538_v46  ;;  %v9778_v20 = vsub.f32 %v16322_v55, %v9774_v32 }
0x2e80   : > { %v9777_v24 = vpop.xlane.xlu1 %9776  ;;  %v9541_v19 = vsel %vm1481_vm3, %v16388_v40, 0.0 }
0x2e81   : > { %v9779_v44 = vsub.f32 %v16324_v51, %v9777_v24  ;;  %9542 = vadd.xlane.f32.xlu1 %v9541_v19 }
0x2e83   : > { %v9782_v50 = vmul.f32 1.442695, %v9779_v44 }
0x2e85   : > { %v16393_v23 = vpop.eup %13371  ;;  %13375 = vpow2.f32 %v9782_v50 }
0x2e86   : > { %v9897_v54 = vpop.xlane.xlu0 %9896  ;;  %v9661_v62 = vsel %vm1481_vm3, %v16393_v23, 0.0 }
0x2e87   : > { %v16397_v29 = vpop.eup %13373  ;;  %v9901_v47 = vsub.f32 %v16330_v27, %v9897_v54  ;;  %9662 = vadd.xlane.f32.xlu1 %v9661_v62 }
0x2e88   : > { %v9900_v37 = vpop.xlane.xlu1 %9899  ;;  %v9664_v60 = vsel %vm1481_vm3, %v16397_v29, 0.0 }
0x2e89   : > { %v9903_v57 = vmul.f32 1.442695, %v9901_v47  ;;  %v9902_v7 = vsub.f32 %v16332_v5, %v9900_v37 }
0x2e8a   : > { %v9169_v51 = vpop.xlane.xlu0 %9168 }
0x2e8b   : > { %13377 = vpow2.f32 %v9903_v57  ;;  %v9905_v2 = vmul.f32 1.442695, %v9902_v7  ;;  %9665 = vadd.xlane.f32.xlu1 %v9664_v60 }
0x2e8c   : > { %13379 = vrcp.f32 %v9169_v51  ;;  %v9172_v39 = vpop.xlane.xlu1 %9171 }
0x2e8d   : > { %13381 = vpow2.f32 %v9905_v2 }
0x2e8e   : > { %13383 = vrcp.f32 %v9172_v39  ;;  %v10020_v38 = vpop.xlane.xlu0 %10019 }
0x2e8f   : > { %v16403_v36 = vpop.eup %13375  ;;  %v10024_v12 = vsub.f32 %v16344_v22, %v10020_v38 }
0x2e90   : > { %v10023_v63 = vpop.xlane.xlu1 %10022  ;;  %v9787_v27 = vsel %vm1481_vm3, %v16403_v36, 0.0 }
0x2e91   : > { %v10025_v8 = vsub.f32 %v16348_v49, %v10023_v63  ;;  %9788 = vadd.xlane.f32.xlu1 %v9787_v27  ;;  %v10026_v25 = vmul.f32 1.442695, %v10024_v12 }
0x2e92   : > { %v9427_v22 = vpop.permute.xlu0 %9426 }
0x2e93   : > { %v10028_v5 = vmul.f32 1.442695, %v10025_v8 }
0x2e94   : > { %v9550_v10 = vpop.permute.xlu1 %9549 }
0x2e95   : > { %v16408_v53 = vpop.eup %13377  ;;  %13385 = vpow2.f32 %v10028_v5  ;;  %9672 = vrot.lane.b32.xlu0 %v16202_v3, %s16784_s14 }
0x2e96   : > { %v13380_v26 = vpop.eup %13379  ;;  %v9907_v18 = vsel %vm1481_vm3, %v16408_v53, 0.0 }
0x2e97   : > { %v16414_v56 = vpop.eup %13381  ;;  %9908 = vadd.xlane.f32.xlu1 %v9907_v18  ;;  %v9175_v48 = vmul.f32 %v13380_v26, %v16336_v42 }
0x2e98   : > { %v13384_v11 = vpop.eup %13383  ;;  %v9910_v33 = vsel %vm1481_vm3, %v16414_v56, 0.0 }
0x2e99   : > { %v9176_v49 = vmul.f32 %v13384_v11, %v16340_v6  ;;  %v9780_v6 = vmul.f32 1.442695, %v9778_v20 }
0x2e9b   : > { %9911 = vadd.xlane.f32.xlu1 %v9910_v33  ;;  %v9177_v4 = vpack.c.bf16 %v9176_v49, %v9175_v48  ;;  %13387 = vpow2.f32 %v9780_v6 }
0x2e9c   : > { %13389 = vpow2.f32 %v10026_v25 }
0x2e9d   : > { %12288 = vmatmul.mubr.msk.bf16.vlgmr.msra.gmra.mrb[220].mxu1 %vm1481_vm3, %v9177_v4 }
0x2e9e   : > { %12298 = vmatpush3.bf16.msra.mxu1 %v16358_v61  ;;  %12299 = vmatprep.mubr.msk.bf16.mxu1 %vm13865_vm1, %v13864_v14 }
0x2e9f   : > { %v16425_v28 = vpop.eup %13385  ;;  %12309 = vmatprep.subr.bf16.mxu1 %v13864_v14 }
0x2ea0   : > { %v10033_v42 = vsel %vm1481_vm3, %v16425_v28, 0.0 }
0x2ea1   : > { %10034 = vadd.xlane.f32.xlu1 %v10033_v42 }
0x2ea5   : > { %v16431_v55 = vpop.eup %13387 }
0x2ea6   : > { %v9784_v61 = vsel %vm1481_vm3, %v16431_v55, 0.0  ;;  %v16437_v41 = vpop.eup %13389 }
0x2ea7   : > { %v10030_v35 = vsel %vm1481_vm3, %v16437_v41, 0.0 }
0x2eb2   : > { %9795 = vrot.lane.b32.xlu1 %v16202_v3, %s16801_s18 }
0x2eb4   : > { %9785 = vadd.xlane.f32.xlu0 %v9784_v61 }
0x2eb8   : > { %10031 = vadd.xlane.f32.xlu0 %v10030_v35 }
0x2ece   : > { %9918 = vrot.lane.b32.xlu0 %v16202_v3, %s16803_s7 }
0x2ed2   : > { %10041 = vrot.lane.b32.xlu0 %v16202_v3, %s16805_s19 }
0x2ef8   : > { %v9294_v31 = vpop.xlane.xlu0 %9293 }
0x2ef9   : > { %13391 = vrcp.f32 %v9294_v31 }
0x2efa   : > { %v9297_v9 = vpop.xlane.xlu1 %9296 }
0x2efb   : > { %13393 = vrcp.f32 %v9297_v9 }
0x2f03   : > { %v13392_v13 = vpop.eup %13391 }
0x2f04   : > { %v9417_v21 = vpop.xlane.xlu0 %9416  ;;  %v9300_v34 = vmul.f32 %v13392_v13, %v16363_v59 }
0x2f05   : > { %v13394_v16 = vpop.eup %13393  ;;  %13395 = vrcp.f32 %v9417_v21 }
0x2f06   : > { %v9301_v46 = vmul.f32 %v13394_v16, %v16368_v1  ;;  %v9420_v24 = vpop.xlane.xlu1 %9419 }
0x2f07   : > { %13397 = vrcp.f32 %v9420_v24 }
0x2f08   : > { %v9302_v19 = vpack.c.bf16 %v9301_v46, %v9300_v34 }
0x2f0a   : > { %12300 = vmatmul.mubr.msk.bf16.vlgmr.msra.gmra.mrb[224].mxu1 %vm1481_vm3, %v9302_v19 }
0x2f0b   : > { %12310 = vmatpush3.bf16.msra.mxu1 %v9427_v22  ;;  %12311 = vmatprep.mubr.msk.bf16.mxu1 %vm13865_vm1, %v13864_v14 }
0x2f0c   : > { %v9540_v3 = vpop.xlane.xlu0 %9539  ;;  %12321 = vmatprep.subr.bf16.mxu1 %v13864_v14 }
0x2f0d   : > { %13399 = vrcp.f32 %v9540_v3 }
0x2f0e   : > { %v9543_v44 = vpop.xlane.xlu1 %9542 }
0x2f0f   : > { %v13396_v32 = vpop.eup %13395  ;;  %13401 = vrcp.f32 %v9543_v44 }
0x2f10   : > { %v9423_v59 = vmul.f32 %v13396_v32, %v16374_v58  ;;  %v9673_v51 = vpop.permute.xlu0 %9672 }
0x2f11   : > { %v13398_v50 = vpop.eup %13397 }
0x2f12   : > { %v9424_v1 = vmul.f32 %v13398_v50, %v16378_v30 }
0x2f14   : > { %v9663_v54 = vpop.xlane.xlu1 %9662  ;;  %v9425_v62 = vpack.c.bf16 %v9424_v1, %v9423_v59 }
0x2f15   : > { %13403 = vrcp.f32 %v9663_v54 }
0x2f16   : > { %12312 = vmatmul.mubr.msk.bf16.vlgmr.msra.gmra.mrb[228].mxu1 %vm1481_vm3, %v9425_v62 }
0x2f17   : > { %v13400_v47 = vpop.eup %13399  ;;  %12322 = vmatpush3.bf16.msra.mxu1 %v9550_v10  ;;  %12323 = vmatprep.mubr.msk.bf16.mxu1 %vm13865_vm1, %v13864_v14 }
0x2f18   : > { %v9666_v37 = vpop.xlane.xlu1 %9665  ;;  %12333 = vmatprep.subr.bf16.mxu1 %v13864_v14  ;;  %v9546_v7 = vmul.f32 %v13400_v47, %v16384_v45 }
0x2f19   : > { %v13402_v57 = vpop.eup %13401  ;;  %13405 = vrcp.f32 %v9666_v37  ;;  %v12967_v37 = vld [vmem:[#allocation13 + $0x20] sm:$0xff]  }
0x2f1a   : > { %v9547_v58 = vmul.f32 %v13402_v57, %v16388_v40  ;;  %12376 = vmatpush3.bf16.msra.mxu0 %v12967_v37 }
0x2f1b   : > { %12377 = vmatprep.subr.bf16.mxu0 %v13864_v14 }
0x2f1c   : > { %v9548_v30 = vpack.c.bf16 %v9547_v58, %v9546_v7 }
0x2f1e   : > { %12324 = vmatmul.mubr.msk.bf16.vlgmr.msra.gmra.mrb[232].mxu1 %vm1481_vm3, %v9548_v30  ;;  %v9789_v60 = vpop.xlane.xlu1 %9788  ;;  %v12968_v30 = vld [vmem:[#allocation13 + $0x28] sm:$0xff]  }
0x2f1f   : > { %12334 = vmatpush3.bf16.msra.mxu1 %v9673_v51  ;;  %12335 = vmatprep.mubr.msk.bf16.mxu1 %vm13865_vm1, %v13864_v14  ;;  %v13404_v2 = vpop.eup %13403  ;;  %13407 = vrcp.f32 %v9789_v60 }
0x2f20   : > { %12345 = vmatprep.subr.bf16.mxu1 %v13864_v14  ;;  %v9669_v63 = vmul.f32 %v13404_v2, %v16393_v23  ;;  %12378 = vmatpush3.bf16.msra.mxu0 %v12968_v30  ;;  %v12969_v2 = vld [vmem:[#allocation13 + $0x30] sm:$0xff]  }
0x2f21   : > { %12379 = vmatprep.subr.bf16.mxu0 %v13864_v14 }
0x2f23   : > { %v13406_v39 = vpop.eup %13405 }
0x2f24   : > { %v9670_v27 = vmul.f32 %v13406_v39, %v16397_v29  ;;  %v9909_v45 = vpop.xlane.xlu1 %9908  ;;  %12380 = vmatpush3.bf16.msra.mxu0 %v12969_v2 }
0x2f25   : > { %12381 = vmatprep.subr.bf16.mxu0 %v13864_v14 }
0x2f26   : > { %v9671_v8 = vpack.c.bf16 %v9670_v27, %v9669_v63 }
0x2f28   : > { %12336 = vmatmul.mubr.msk.bf16.vlgmr.msra.gmra.mrb[236].mxu1 %vm1481_vm3, %v9671_v8  ;;  %v9912_v40 = vpop.xlane.xlu1 %9911 }
0x2f29   : > { %12347 = vmatprep.mubr.msk.bf16.mxu1 %vm13865_vm1, %v13864_v14  ;;  %v13408_v23 = vpop.eup %13407 }
0x2f2a   : > { %v9793_v48 = vmul.f32 %v13408_v23, %v16403_v36 }
0x2f2e   : > { %v10035_v5 = vpop.xlane.xlu1 %10034 }
0x2f32   : > { %v9796_v26 = vpop.permute.xlu1 %9795 }
0x2f33   : > { %12346 = vmatpush3.bf16.msra.mxu1 %v9796_v26 }
0x2f34   : > { %12357 = vmatprep.subr.bf16.mxu1 %v13864_v14 }
0x2f41   : > { %v9786_v18 = vpop.xlane.xlu0 %9785 }
0x2f42   : > { %13409 = vrcp.f32 %v9786_v18 }
0x2f43   : > { %13411 = vrcp.f32 %v9912_v40 }
0x2f44   : > { %13413 = vrcp.f32 %v9909_v45  ;;  %v12970_v45 = vld [vmem:[#allocation13 + $0x38] sm:$0xff]  }
0x2f45   : > { %v10032_v29 = vpop.xlane.xlu0 %10031  ;;  %12382 = vmatpush3.bf16.msra.mxu0 %v12970_v45 }
0x2f46   : > { %13415 = vrcp.f32 %v10032_v29 }
0x2f47   : > { %13417 = vrcp.f32 %v10035_v5 }
0x2f49   : > { %v9919_v20 = vpop.permute.xlu0 %9918 }
0x2f4c   : > { %v13410_v11 = vpop.eup %13409 }
0x2f4d   : > { %v9792_v49 = vmul.f32 %v13410_v11, %v16431_v55  ;;  %v13412_v4 = vpop.eup %13411  ;;  %v10042_v25 = vpop.permute.xlu0 %10041 }
0x2f4e   : > { %v13414_v38 = vpop.eup %13413  ;;  %v9916_v42 = vmul.f32 %v13412_v4, %v16414_v56 }
0x2f4f   : > { %v9794_v33 = vpack.c.bf16 %v9793_v48, %v9792_v49  ;;  %v9915_v36 = vmul.f32 %v13414_v38, %v16408_v53 }
0x2f50   : > { %v13416_v12 = vpop.eup %13415 }
0x2f51   : > { %12348 = vmatmul.mubr.msk.bf16.vlgmr.msra.gmra.mrb[240].mxu1 %vm1481_vm3, %v9794_v33  ;;  %v9917_v6 = vpack.c.bf16 %v9916_v42, %v9915_v36  ;;  %v13418_v55 = vpop.eup %13417  ;;  %v10038_v61 = vmul.f32 %v13416_v12, %v16437_v41 }
0x2f52   : > { %12358 = vmatpush3.bf16.msra.mxu1 %v9919_v20  ;;  %12359 = vmatprep.mubr.msk.bf16.mxu1 %vm13865_vm1, %v13864_v14  ;;  %v10039_v35 = vmul.f32 %v13418_v55, %v16425_v28 }
0x2f53   : > { %12369 = vmatprep.subr.bf16.mxu1 %v13864_v14 }
0x2f54   : > { %v10040_v22 = vpack.c.bf16 %v10039_v35, %v10038_v61 }
0x2f59   : > { %12360 = vmatmul.mubr.msk.bf16.vlgmr.msra.gmra.mrb[244].mxu1 %vm1481_vm3, %v9917_v6 }
0x2f5a   : > { %12370 = vmatpush3.bf16.msra.mxu1 %v10042_v25  ;;  %12371 = vmatprep.mubr.msk.bf16.mxu1 %vm13865_vm1, %v13864_v14 }
0x2f61   : > { %12372 = vmatmul.mubr.msk.bf16.vlgmr.msra.gmra.mrb[248].mxu1 %vm1481_vm3, %v10040_v22 }
0x2f62   : > { %10414 = vmatprep.mubr.bf16.mxu1 %v13863_v0 }
0x2f70   : > { %v16484_v53 = vpop.f32.mrb[220].mxu1 }
0x2f71   : > { %v12289_v56 = vpop.f32.mrb[221].mxu1 }
0x2f72   : > { %v16486_v10 = vpop.f32.mrb[222].mxu1 }
0x2f73   : > { %v12290_v31 = vpop.f32.mrb[223].mxu1 }
0x2fdd   : > { %v9343_v9 = vpop.f32.mrb[224].mxu1 }
0x2fde   : > { %v12301_v13 = vpop.f32.mrb[225].mxu1 }
0x2fdf   : > { %v9346_v21 = vpop.f32.mrb[226].mxu1 }
0x2fe0   : > { %v12764_v16 = vpack.i.bf16 %v9346_v21, %v9343_v9  ;;  %v12302_v34 = vpop.f32.mrb[227].mxu1 }
0x2fe2   : > { %12765 = vrot.lane.b32.xlu0 %v12764_v16, %s16805_s19 }
0x2fe9   : > { %v9466_v41 = vpop.f32.mrb[228].mxu1 }
0x2fea   : > { %v12313_v28 = vpop.f32.mrb[229].mxu1 }
0x2feb   : > { %v9469_v46 = vpop.f32.mrb[230].mxu1 }
0x2fec   : > { %v12769_v24 = vpack.i.bf16 %v9469_v46, %v9466_v41  ;;  %v12314_v19 = vpop.f32.mrb[231].mxu1 }
0x2fee   : > { %12770 = vrot.lane.b32.xlu0 %v12769_v24, %s16803_s7  ;;  %s13719_s7 = scalar_lea.vmem %s16569_s16, 256 }
0x2fef   : > { %p13720_p1 = scmp.ne.s32.totalorder %s16569_s16, %s13719_s7 }
0x2ff1   : > { %v9589_v0 = vpop.f32.mrb[232].mxu1  ;;  %p13721_p6 = pnand %p13720_p1, %p16824_p3 }
0x2ff2   : > { %v12325_v3 = vpop.f32.mrb[233].mxu1 }
0x2ff3   : > { %v9592_v44 = vpop.f32.mrb[234].mxu1  ;;  %p13722_p11 = pneg %p13721_p6 }
0x2ff4   : > { %v12774_v32 = vpack.i.bf16 %v9592_v44, %v9589_v0  ;;  %v12326_v50 = vpop.f32.mrb[235].mxu1 }
0x2ff6   : > { %12775 = vrot.lane.b32.xlu1 %v12774_v32, %s16801_s18  ;;  %s16566_s18 = scalar_lea.hbm %s16822_s17, %s11360_s29 }
0x2ffb   : > { %v9712_v59 = vpop.f32.mrb[236].mxu1 }
0x2ffc   : > { %v12337_v1 = vpop.f32.mrb[237].mxu1 }
0x2ffd   : > { %v9715_v54 = vpop.f32.mrb[238].mxu1 }
0x2ffe   : > { %v12779_v62 = vpack.i.bf16 %v9715_v54, %v9712_v59  ;;  %v12338_v47 = vpop.f32.mrb[239].mxu1  ;;  %v11272_v59 = vld [vmem:[#allocation14 + $0x1] ss:$0 sm:$0xff] }
0x3000   : > { %12780 = vrot.lane.b32.xlu0 %v12779_v62, %s16784_s14 }
0x3024   : > { %v9835_v57 = vpop.f32.mrb[240].mxu1 }
0x3025   : > { %v12349_v7 = vpop.f32.mrb[241].mxu1 }
0x3026   : > { %v9838_v58 = vpop.f32.mrb[242].mxu1 }
0x3027   : > { %v12784_v51 = vpack.i.bf16 %v9838_v58, %v9835_v57  ;;  %v12350_v60 = vpop.f32.mrb[243].mxu1 }
0x3029   : > { %12785 = vrot.lane.b32.xlu1 %v12784_v51, %s16785_s28 }
0x302c   : > { %v9958_v39 = vpop.f32.mrb[244].mxu1 }
0x302d   : > { %v12361_v63 = vpop.f32.mrb[245].mxu1 }
0x302e   : > { %v9961_v27 = vpop.f32.mrb[246].mxu1 }
0x302f   : > { %v12789_v8 = vpack.i.bf16 %v9961_v27, %v9958_v39  ;;  %v12362_v40 = vpop.f32.mrb[247].mxu1 }
0x3031   : > { %12790 = vrot.lane.b32.xlu0 %v12789_v8, %s16786_s11 }
0x3034   : > { %v10081_v5 = vpop.f32.mrb[248].mxu1 }
0x3035   : > { %v12373_v26 = vpop.f32.mrb[249].mxu1 }
0x3036   : > { %v10084_v18 = vpop.f32.mrb[250].mxu1  ;;  %v12971_v26 = vld [vmem:[%s16815_s24 + $0x40] ss:$8 sps:$4 sm:$0xff]  }
0x3037   : > { %v12794_v23 = vpack.i.bf16 %v10084_v18, %v10081_v5  ;;  %v12374_v29 = vpop.f32.mrb[251].mxu1  ;;  %v12973_v5 = vld [vmem:[%s16815_s24 + $0x44] ss:$8 sps:$4 sm:$0xff]   ;;  %v12976_v18 = vld [vmem:[%s16815_s24 + $0x54] ss:$8 sps:$4 sm:$0xff]  }
0x3038   : > { %10382 = vmatprep.subr.bf16.mxu1 %v12973_v5  ;;  %v12979_v29 = vld [vmem:[%s16815_s24 + $0x64] ss:$8 sps:$4 sm:$0xff]  }
0x3039   : > { %12795 = vrot.lane.b32.xlu1 %v12794_v23, %s16787_s12  ;;  %10383 = vmatpush1.bf16.msra.mxu1 %v12971_v26  ;;  %v12974_v23 = vld [vmem:[%s16815_s24 + $0x50] ss:$8 sps:$4 sm:$0xff]   ;;  %s13725_s12 = scalar_lea.vmem %s13724_s2, 512 }
0x303a   : > { %10384 = vmatprep.subr.bf16.mxu1 %v12976_v18  ;;  %p13727_p2 = scmp.lt.s32.totalorder %s13725_s12, %s13719_s7 }
0x303c   : > { %p13728_p8 = por %p13727_p2, %p13726_p0 }
0x303d   : > { %10385 = vmatpush1.bf16.msra.mxu1 %v12974_v23 }
0x303e   : > { %10386 = vmatprep.subr.bf16.mxu1 %v12979_v29  ;;  %p13729_p4 = pnand %p13728_p8, %p13722_p11 }
0x3054   : > { %v12766_v11 = vpop.permute.xlu0 %12765 }
0x3055   : > { %v12768_v4 = vunpack.i.h.bf16 %v12766_v11  ;;  %v12767_v14 = vunpack.i.l.bf16 %v12766_v11  ;;  %v12977_v11 = vld [vmem:[%s16815_s24 + $0x60] ss:$8 sps:$4 sm:$0xff]  }
0x3056   : > { %10387 = vmatpush1.bf16.msra.mxu1 %v12977_v11 }
0x3057   : > { %v10145_v61 = vsel %vm1431_vm2, %v16486_v10, %v12768_v4  ;;  %v10144_v35 = vsel %vm1431_vm2, %v16484_v53, %v12767_v14  ;;  %v12984_v4 = vld [vmem:[%s16816_s8 + $0x80] sm:$0xff]   ;;  %v12985_v14 = vld [vmem:[%s16816_s8 + $0xc8] sm:$0xff]  }
0x3060   : > { %v12771_v48 = vpop.permute.xlu0 %12770 }
0x3061   : > { %v12773_v20 = vunpack.i.h.bf16 %v12771_v48  ;;  %v12772_v38 = vunpack.i.l.bf16 %v12771_v48  ;;  %v12982_v48 = vld [vmem:[%s16815_s24 + $0x74] ss:$8 sps:$4 sm:$0xff]  }
0x3062   : > { %10388 = vmatprep.subr.bf16.mxu1 %v12982_v48 }
0x3063   : > { %v10147_v31 = vsel %vm1481_vm3, %v10145_v61, %v12773_v20  ;;  %v10146_v9 = vsel %vm1481_vm3, %v10144_v35, %v12772_v38  ;;  %v12986_v20 = vld [vmem:[%s16816_s8 + $0x88] sm:$0xff]   ;;  %v12987_v38 = vld [vmem:[%s16816_s8 + $0xd0] sm:$0xff]  }
0x3068   : > { %v12776_v49 = vpop.permute.xlu1 %12775 }
0x3069   : > { %v12778_v36 = vunpack.i.h.bf16 %v12776_v49  ;;  %v12777_v6 = vunpack.i.l.bf16 %v12776_v49  ;;  %v12980_v49 = vld [vmem:[%s16815_s24 + $0x70] ss:$8 sps:$4 sm:$0xff]  }
0x306a   : > { %10389 = vmatpush1.bf16.msra.mxu1 %v12980_v49 }
0x306b   : > { %v10149_v16 = vsel %vm2471_vm4, %v10147_v31, %v12778_v36  ;;  %v10148_v34 = vsel %vm2471_vm4, %v10146_v9, %v12777_v6  ;;  %v12989_v36 = vld [vmem:[%s16816_s8 + $0xd8] sm:$0xff]  }
0x306c   : > { %v12990_v6 = vld [vmem:[%s16816_s8 + $0x98] sm:$0xff]  }
0x3072   : > { %v12781_v33 = vpop.permute.xlu0 %12780 }
0x3073   : > { %v12783_v25 = vunpack.i.h.bf16 %v12781_v33  ;;  %v12782_v55 = vunpack.i.l.bf16 %v12781_v33  ;;  %v12983_v33 = vld [vmem:[%s16816_s8 + $0xc0] sm:$0xff]  }
0x3074   : > { %11669 = vmatprep.subr.bf16.mxu0 %v12983_v33 }
0x3075   : > { %v10150_v41 = vsel %vm2474_vm5, %v10148_v34, %v12782_v55  ;;  %v10151_v28 = vsel %vm2474_vm5, %v10149_v16, %v12783_v25  ;;  %v12992_v25 = vld [vmem:[%s16816_s8 + $0xa0] sm:$0xff]   ;;  %v12993_v55 = vld [vmem:[%s16816_s8 + $0xe8] sm:$0xff]  }
0x3076   : > { %v11280_v16 = vld [vmem:[%s16817_s20 + $0x1] ss:$0 sm:$0xff] }
0x309b   : > { %v12786_v42 = vpop.permute.xlu1 %12785 }
0x309c   : > { %v12788_v22 = vunpack.i.h.bf16 %v12786_v42  ;;  %v12787_v56 = vunpack.i.l.bf16 %v12786_v42  ;;  %v12988_v42 = vld [vmem:[%s16816_s8 + $0x90] sm:$0xff]  }
0x309e   : > { %v10152_v46 = vsel %vm2477_vm6, %v10150_v41, %v12787_v56  ;;  %v10153_v53 = vsel %vm2477_vm6, %v10151_v28, %v12788_v22 }
0x30a3   : > { %v12791_v12 = vpop.permute.xlu0 %12790 }
0x30a4   : > { %v12793_v13 = vunpack.i.h.bf16 %v12791_v12  ;;  %v12792_v21 = vunpack.i.l.bf16 %v12791_v12  ;;  %v12991_v12 = vld [vmem:[%s16816_s8 + $0xe0] sm:$0xff]  }
0x30a6   : > { %v10154_v0 = vsel %vm2480_vm7, %v10152_v46, %v12792_v21  ;;  %v10155_v3 = vsel %vm2480_vm7, %v10153_v53, %v12793_v13 }
0x30ab   : > { %v12796_v10 = vpop.permute.xlu1 %12795 }
0x30ac   : > { %v12798_v24 = vunpack.i.h.bf16 %v12796_v10  ;;  %v12797_v19 = vunpack.i.l.bf16 %v12796_v10  ;;  %v11281_v10 = vld [vmem:[%s16818_s23 + $0x1] ss:$0 sm:$0xff] }
0x30ae   : > { %v10156_v44 = vsel %vm2483_vm8, %v10154_v0, %v12797_v19  ;;  %v10157_v32 = vsel %vm2483_vm8, %v10155_v3, %v12798_v24  ;;  %v12994_v0 = vld [vmem:[%s16816_s8 + $0xa8] sm:$0xff]   ;;  %v12995_v3 = vld [vmem:[%s16816_s8 + $0xf0] sm:$0xff]  }
0x30af   : > { %v10158_v50 = vpack.c.bf16 %v10157_v32, %v10156_v44  ;;  %v12996_v44 = vld [vmem:[%s16816_s8 + $0xb0] sm:$0xff]   ;;  %v12997_v32 = vld [vmem:[%s16816_s8 + $0xf8] sm:$0xff]  }
0x30b1   : > { %12384 = vmatmul.mubr.msk.bf16.vlgmr.msra.gmra.mrb[208].mxu0 %vm1370_vm0, %v10158_v50  ;;  %v12998_v50 = vld [vmem:[%s16816_s8 + $0xb8] sm:$0xff]  }
0x30b2   : > { %11670 = vmatpush3.bf16.msra.mxu0 %v12984_v4 }
0x30b3   : > { %11671 = vmatprep.subr.bf16.mxu0 %v12985_v14 }
0x30b6   : > { %11672 = vmatpush3.bf16.msra.mxu0 %v12986_v20 }
0x30b7   : > { %11673 = vmatprep.subr.bf16.mxu0 %v12987_v38 }
0x30ba   : > { %11674 = vmatpush3.bf16.msra.mxu0 %v12988_v42 }
0x30bb   : > { %11675 = vmatprep.subr.bf16.mxu0 %v12989_v36 }
0x30be   : > { %11676 = vmatpush3.bf16.msra.mxu0 %v12990_v6 }
0x30bf   : > { %11677 = vmatprep.subr.bf16.mxu0 %v12991_v12 }
0x30c2   : > { %11678 = vmatpush3.bf16.msra.mxu0 %v12992_v25 }
0x30c3   : > { %11679 = vmatprep.subr.bf16.mxu0 %v12993_v55 }
0x30c6   : > { %11680 = vmatpush3.bf16.msra.mxu0 %v12994_v0 }
0x30c7   : > { %11681 = vmatprep.subr.bf16.mxu0 %v12995_v3 }
0x30ca   : > { %11682 = vmatpush3.bf16.msra.mxu0 %v12996_v44 }
0x30cb   : > { %11683 = vmatprep.subr.bf16.mxu0 %v12997_v32 }
0x30ce   : > { %11684 = vmatpush3.bf16.msra.mxu0 %v12998_v50 }
0x3184   : > { %v10226_v1 = vpop.f32.mrb[208].mxu0 }
0x3185   : > { %v10227_v54 = vadd.f32 %v11272_v59, %v10226_v1  ;;  %v12385_v62 = vpop.f32.mrb[209].mxu0 }
0x3186   : > { %v10229_v47 = vpop.f32.mrb[210].mxu0 }
0x3187   : > { %v10233_v37 = vadd.f32 %v10227_v54, %v16216_v43  ;;  %v10230_v57 = vadd.f32 %v11272_v59, %v10229_v47  ;;  %v12386_v7 = vpop.f32.mrb[211].mxu0  ;;  %v10291_v59 = vld [vmem:[#allocation16 + $0x2] sm:$0x3] }
0x3188   : > { %v10332_v1 = vrot.slane %v10291_v59, %v14380_v15  ;;  %v10336_v54 = vrot.slane %v10291_v59, %v14383_v17  ;;  %v11331_v15 = vld [vmem:[#allocation17 + $0x1] ss:$0 sm:$0xff] }
0x3189   : > { %v10234_v58 = vadd.f32 %v10230_v57, %v16218_v52  ;;  %v10239_v30 = vsel %vm1370_vm0, %v10233_v37, 0.0 }
0x318a   : > { %10240 = vadd.xlane.f32.xlu0 %v10239_v30 }
0x318b   : > { %v10242_v51 = vsel %vm1370_vm0, %v10234_v58, 0.0 }
0x318c   : > { %10243 = vadd.xlane.f32.xlu1 %v10242_v51 }
0x3217   : > { %v10241_v60 = vpop.xlane.xlu0 %10240 }
0x3218   : > { %v10245_v2 = vmul.f32 0.015625, %v10241_v60 }
0x3219   : > { %v10244_v39 = vpop.xlane.xlu1 %10243 }
0x321a   : > { %v10247_v63 = vsub.f32 %v10233_v37, %v10245_v2  ;;  %v10246_v27 = vmul.f32 0.015625, %v10244_v39 }
0x321c   : > { %v10248_v43 = vsub.f32 %v10234_v58, %v10246_v27  ;;  %v10249_v45 = vmul.f32 %v10247_v63, %v10247_v63 }
0x321e   : > { %v10251_v52 = vsel %vm1370_vm0, %v10249_v45, 0.0  ;;  %v10250_v8 = vmul.f32 %v10248_v43, %v10248_v43 }
0x321f   : > { %10252 = vadd.xlane.f32.xlu0 %v10251_v52 }
0x3220   : > { %v10254_v40 = vsel %vm1370_vm0, %v10250_v8, 0.0 }
0x3223   : > { %10255 = vadd.xlane.f32.xlu0 %v10254_v40 }
0x32ac   : > { %v10253_v61 = vpop.xlane.xlu0 %10252 }
0x32ad   : > { %v10257_v35 = vmul.f32 0.015625, %v10253_v61 }
0x32af   : > { %v10259_v22 = vadd.f32 1e-05, %v10257_v35 }
0x32b0   : > { %v10256_v56 = vpop.xlane.xlu0 %10255 }
0x32b1   : > { %13419 = vrsqrt.f32 %v10259_v22  ;;  %v10258_v31 = vmul.f32 0.015625, %v10256_v56 }
0x32b3   : > { %v10260_v9 = vadd.f32 1e-05, %v10258_v31 }
0x32b5   : > { %13421 = vrsqrt.f32 %v10260_v9  ;;  %v11350_v9 = vld [vmem:[%s16819_s25 + $0x1] ss:$0 sm:$0xff] }
0x32bb   : > { %v13420_v13 = vpop.eup %13419 }
0x32bc   : > { %v10263_v21 = vmul.f32 %v13420_v13, %v10247_v63 }
0x32be   : > { %v10271_v41 = vmul.f32 %v11280_v16, %v10263_v21 }
0x32bf   : > { %v13422_v34 = vpop.eup %13421 }
0x32c0   : > { %v10264_v28 = vmul.f32 %v13422_v34, %v10248_v43  ;;  %v10279_v53 = vadd.f32 %v11281_v10, %v10271_v41 }
0x32c2   : > { %v10272_v46 = vmul.f32 %v11280_v16, %v10264_v28  ;;  %v11351_v16 = vld [vmem:[%s16820_s27 + $0x1] ss:$0 sm:$0xff] }
0x32c4   : > { %v10280_v24 = vadd.f32 %v11281_v10, %v10272_v46 }
0x32c6   : > { %v10327_v19 = vpack.c.bf16 %v10280_v24, %v10279_v53 }
0x32c8   : > { %11330 = vmatmul.mubr.msk.bf16.vlgmr.msra.gmra.mrb[252].mxu1 %vm1370_vm0, %v10327_v19 }
0x339b   : > { %v10416_v62 = vpop.f32.mrb[252].mxu1 }
0x339c   : > { %v10417_v47 = vadd.f32 %v10416_v62, %v10332_v1  ;;  %v10418_v37 = vpop.f32.mrb[253].mxu1 }
0x339d   : > { %v10419_v57 = vadd.f32 %v10418_v37, %v10336_v54  ;;  %v10420_v7 = vpop.f32.mrb[254].mxu1 }
0x339e   : > { %v10421_v58 = vadd.f32 %v10420_v7, %v10332_v1  ;;  %v10422_v30 = vpop.f32.mrb[255].mxu1  ;;  %v10425_v60 = vmax.f32 %v10417_v47, 0.0 }
0x339f   : > { %v10423_v51 = vadd.f32 %v10422_v30, %v10336_v54  ;;  %v10426_v39 = vmax.f32 %v10419_v57, 0.0 }
0x33a0   : > { %v10427_v2 = vmax.f32 %v10421_v58, 0.0 }
0x33a1   : > { %v10428_v63 = vmax.f32 %v10423_v51, 0.0 }
0x33a2   : > { %v10429_v27 = vpack.c.bf16 %v10427_v2, %v10425_v60  ;;  %v11352_v60 = vld [vmem:[%s14071_s3] ss:$0 sm:$0xff] }
0x33a3   : > { %v10430_v43 = vpack.c.bf16 %v10428_v63, %v10426_v39  ;;  %v11353_v63 = vld [vmem:[%s16821_s13] ss:$0 sm:$0xff] }
0x33a5   : > { %10565 = vmatprep.mubr.bf16.mxu0 %v10430_v43 }
0x33a6   : > { %10566 = vmatmul.mubr.bf16.vlgmr.msra.gmra.mrb[212].mxu0 %v10429_v27 }
0x3479   : > { %v11685_v45 = vpop.f32.mrb[212].mxu0 }
0x347a   : > { %v11686_v52 = vpop.f32.mrb[213].mxu0 }
0x347b   : > { %v11687_v17 = vadd.f32 %v11686_v52, %v11685_v45  ;;  %v11688_v8 = vpop.f32.mrb[214].mxu0 }
0x347c   : > { %v11689_v40 = vpop.f32.mrb[215].mxu0 }
0x347d   : > { %v10568_v5 = vadd.f32 %v11687_v17, %v11331_v15  ;;  %v11690_v26 = vadd.f32 %v11689_v40, %v11688_v8 }
0x347f   : > { %v10571_v18 = vadd.f32 %v11690_v26, %v11331_v15  ;;  %v10574_v23 = vadd.f32 %v10568_v5, %v10279_v53 }
0x3481   : > { %v10580_v29 = vsel %vm1370_vm0, %v10574_v23, 0.0  ;;  %v10575_v11 = vadd.f32 %v10571_v18, %v10280_v24 }
0x3482   : > { %10581 = vadd.xlane.f32.xlu1 %v10580_v29 }
0x3483   : > { %v10583_v48 = vsel %vm1370_vm0, %v10575_v11, 0.0 }
0x3484   : > { %10584 = vadd.xlane.f32.xlu0 %v10583_v48 }
0x350f   : > { %v10582_v49 = vpop.xlane.xlu1 %10581 }
0x3510   : > { %v10586_v33 = vmul.f32 0.015625, %v10582_v49 }
0x3511   : > { %v10585_v4 = vpop.xlane.xlu0 %10584 }
0x3512   : > { %v10588_v14 = vsub.f32 %v10574_v23, %v10586_v33  ;;  %v10587_v20 = vmul.f32 0.015625, %v10585_v4 }
0x3514   : > { %v10589_v38 = vsub.f32 %v10575_v11, %v10587_v20  ;;  %v10590_v42 = vmul.f32 %v10588_v14, %v10588_v14 }
0x3516   : > { %v10592_v36 = vsel %vm1370_vm0, %v10590_v42, 0.0  ;;  %v10591_v6 = vmul.f32 %v10589_v38, %v10589_v38 }
0x3517   : > { %10593 = vadd.xlane.f32.xlu1 %v10592_v36 }
0x3518   : > { %v10595_v12 = vsel %vm1370_vm0, %v10591_v6, 0.0 }
0x3519   : > { %10596 = vadd.xlane.f32.xlu0 %v10595_v12 }
0x35a4   : > { %v10594_v25 = vpop.xlane.xlu1 %10593 }
0x35a5   : > { %v10598_v55 = vmul.f32 0.015625, %v10594_v25 }
0x35a6   : > { %v10597_v61 = vpop.xlane.xlu0 %10596 }
0x35a7   : > { %v10600_v35 = vadd.f32 1e-05, %v10598_v55  ;;  %v10599_v22 = vmul.f32 0.015625, %v10597_v61 }
0x35a9   : > { %13423 = vrsqrt.f32 %v10600_v35  ;;  %v10601_v56 = vadd.f32 1e-05, %v10599_v22 }
0x35ab   : > { %13425 = vrsqrt.f32 %v10601_v56 }
0x35b3   : > { %v13424_v31 = vpop.eup %13423 }
0x35b4   : > { %v10604_v13 = vmul.f32 %v13424_v31, %v10588_v14 }
0x35b5   : > { %v13426_v21 = vpop.eup %13425 }
0x35b6   : > { %v10612_v34 = vmul.f32 %v11350_v9, %v10604_v13  ;;  %v10605_v41 = vmul.f32 %v13426_v21, %v10589_v38 }
0x35b8   : > { %v10620_v28 = vadd.f32 %v11351_v16, %v10612_v34  ;;  %v10613_v10 = vmul.f32 %v11350_v9, %v10605_v41 }
0x35ba   : > { %v10624_v46 = vsel %vm1370_vm0, %v10620_v28, 0.0  ;;  %v10621_v53 = vadd.f32 %v11351_v16, %v10613_v10 }
0x35bb   : > { %10625 = vadd.xlane.f32.xlu1 %v10624_v46 }
0x35bc   : > { %v10627_v24 = vsel %vm1370_vm0, %v10621_v53, 0.0 }
0x35bd   : > { %10628 = vadd.xlane.f32.xlu0 %v10627_v24 }
0x3648   : > { %v10626_v19 = vpop.xlane.xlu1 %10625 }
0x3649   : > { %v10630_v0 = vmul.f32 0.015625, %v10626_v19 }
0x364a   : > { %v10629_v3 = vpop.xlane.xlu0 %10628 }
0x364b   : > { %v10632_v44 = vsub.f32 %v10620_v28, %v10630_v0  ;;  %v10631_v32 = vmul.f32 0.015625, %v10629_v3 }
0x364d   : > { %v10633_v50 = vsub.f32 %v10621_v53, %v10631_v32  ;;  %v10634_v59 = vmul.f32 %v10632_v44, %v10632_v44 }
0x364f   : > { %v10636_v1 = vsel %vm1370_vm0, %v10634_v59, 0.0  ;;  %v10635_v54 = vmul.f32 %v10633_v50, %v10633_v50 }
0x3650   : > { %10637 = vadd.xlane.f32.xlu1 %v10636_v1 }
0x3651   : > { %v10639_v62 = vsel %vm1370_vm0, %v10635_v54, 0.0 }
0x3652   : > { %10640 = vadd.xlane.f32.xlu0 %v10639_v62 }
0x36dd   : > { %v10638_v47 = vpop.xlane.xlu1 %10637 }
0x36de   : > { %v10642_v37 = vmul.f32 0.015625, %v10638_v47 }
0x36df   : > { %v10641_v57 = vpop.xlane.xlu0 %10640 }
0x36e0   : > { %v10644_v7 = vadd.f32 1e-05, %v10642_v37  ;;  %v10643_v58 = vmul.f32 0.015625, %v10641_v57 }
0x36e2   : > { %13427 = vrsqrt.f32 %v10644_v7  ;;  %v10645_v30 = vadd.f32 1e-05, %v10643_v58 }
0x36e4   : > { %13429 = vrsqrt.f32 %v10645_v30 }
0x36ec   : > { %v13428_v51 = vpop.eup %13427 }
0x36ed   : > { %v10648_v2 = vmul.f32 %v13428_v51, %v10632_v44 }
0x36ee   : > { %v13430_v39 = vpop.eup %13429 }
0x36ef   : > { %v10656_v27 = vmul.f32 %v11352_v60, %v10648_v2  ;;  %v10649_v43 = vmul.f32 %v13430_v39, %v10633_v50 }
0x36f1   : > { %v10664_v45 = vadd.f32 %v11353_v63, %v10656_v27  ;;  %v10657_v15 = vmul.f32 %v11352_v60, %v10649_v43 }
0x36f3   : > { %v10665_v52 = vadd.f32 %v11353_v63, %v10657_v15  ;;  %10666 = vst.msk [vmem:[%s1303_s15] sm:$0xff] %vm1370_vm0, %v10664_v45 }
0x36f5   : > { %10667 = vst.msk [vmem:[%s1303_s15 + $0x8] sm:$0xff] %vm1370_vm0, %v10665_v52 }
0x36f6   : > { %13732 = shalt.err (!%p13729_p4)
}
0x36f7   : > { %s13733_s28 = scalar_lea.hbm %s16566_s18, 256  ;;  %s13737_s11 = scalar_lea.hbm %s16822_s17, 512 }
0x36f8   : > { %p13734_p9 = scmp.ne.s32.totalorder %s16566_s18, %s13733_s28  ;;  %p13738_p13 = scmp.lt.u32.totalorder %s16566_s18, %s16822_s17 }
0x36f9   : > { %p13739_p5 = scmp.lt.u32.totalorder %s13737_s11, %s13733_s28  ;;  %p13741_p1 = scmp.lt.u32.totalorder %s13733_s28, %s16566_s18 }
0x36fa   : > { %p13735_p10 = pnand %p13734_p9, %p16824_p3 }
0x36fb   : > { %p13740_p7 = por %p13739_p5, %p13738_p13 }
0x36fc   : > { %p13736_p12 = pneg %p13735_p10 }
0x36fd   : > { %p13742_p6 = por %p13741_p1, %p13740_p7 }
0x36ff   : > { %p13743_p11 = pnand %p13742_p6, %p13736_p12 }
0x3701   : > { %13746 = shalt.err (!%p13743_p11)
}
0x3702   : > { %s13882_s14 = smov 128  }
0x3703   : > { %12425 = dma.vmem_to_hbm [thread:$0]  (%p16824_p3), %s16569_s16, 256, %s16566_s18, %s10669_s22, %s13882_s14, %s13882_s14, %s16805_s19  }
0x3704 PF: > { %s16825_s13 = sld [smem:[#allocation65_spill]]  ;;  %s16826_s29 = sld [smem:[#allocation71_spill]] }
0x3705   : > { %s16827_s30 = sld [smem:[#allocation68_spill]] }
0x370a   : > { %s10697_s15 = sand.u32 1, %s16825_s13   ;;  %p16828_p0 = scmp.ne.s32.totalorder %s16826_s29, 0 }
0x370b   : > { %p16829_p2 = scmp.ge.s32.totalorder %s16827_s30, 2  ;;  %s10698_s7 = scalar_lea.sflag [#allocation4], %s10697_s15 }
0x370d   : > { %p12460_p8 = pnand %p16829_p2, %p16828_p0 }
0x370f   : > { %13788 = dma.done.wait (!%p12460_p8), %s10698_s7, 256  }
0x3710   : > { %13790 = vsyncadd (!%p12460_p8), %s10698_s7, 4294967040  ;;  %s16830_s22 = sld [smem:[#allocation69_spill]]  ;;  %s16831_s15 = sld [smem:[#allocation66_spill]] }
0x3711   : > { %s16832_s16 = sld [smem:[#allocation67_spill]]  ;;  %s16833_s18 = sld [smem:[#allocation70_spill]] }
0x3716   : > { %p95_p4 = scmp.ge.s32.totalorder %s16830_s22, 4  }
0x3718   :  { %97 = sbr.rel (!%p95_p4) target bundleno = 92 (0x5c), region = 323 }
0x371f   :  { %10703 = vsyncpa [#allocation3], 1 }
0x3720   :  { %10705 = vsyncpa [#allocation3 + $0x1], 1 }
0x3721   :  { %10706 = vsyncpa [#allocation6], 1 }
0x3722   :  { %10707 = vsyncpa [#allocation9], 1 }
0x3723   :  { %10708 = vsyncpa [#allocation12], 1 }
0x3724   :  { %10709 = vsyncpa [#allocation15], 1 }
0x3725   :  { %10710 = vsyncpa [#allocation18], 1 }
0x3726   :  { %10711 = vsyncpa [#allocation4], 1 }
0x3727   :  { %10713 = vsyncpa [#allocation4 + $0x1], 1 }

</bundles_post_ra>
